<compile_context>
chip_gen: v7x
topology: tpu7x:2x2x1
jax: 0.10.0
libtpu: 0.0.40
codegen_flags: <defaults>
</compile_context>

<pallas_src>
import functools
import math

import jax
import jax.numpy as jnp
from jax.experimental import pallas as pl
from jax.experimental.pallas import tpu as pltpu


# --------------------------------------------------------------------------- #
# fused kernel
# --------------------------------------------------------------------------- #

def _conv3x3_relu_pool(x2, w_ref, b_ref, H, W, C, Cout):
    """conv3x3(pad=1, stride=1) + ReLU + 2x2/stride-2 maxpool, all in registers.

    x2    : (H, W*C) float32 activation in row-major "(H, W*C)" layout
            (x2[y, x*C + c] == act[y, x, c]).
    w_ref : (3, 3, W*C, W*Cout) ref; tap (ky, kx) holds kron(I_W, w[ky, kx]).
    b_ref : (1, W*Cout) ref; bias tiled W times along the lane axis.
    returns (H//2, (W//2)*Cout) float32 pooled activation.
    """
    WC = W * C
    acc = jnp.zeros((H, W * Cout), jnp.float32)
    for ky, dy in enumerate((-1, 0, 1)):
        # vertical shift with zero halo (sublane axis)
        if dy == -1:
            shifted_v = jnp.concatenate(
                [jnp.zeros((1, WC), jnp.float32), x2[:H - 1, :]], axis=0)
        elif dy == 1:
            shifted_v = jnp.concatenate(
                [x2[1:, :], jnp.zeros((1, WC), jnp.float32)], axis=0)
        else:
            shifted_v = x2
        for kx, dx in enumerate((-1, 0, 1)):
            # horizontal shift with zero halo (lane axis, in steps of C lanes)
            if dx == -1:
                shifted = jnp.concatenate(
                    [jnp.zeros((H, C), jnp.float32), shifted_v[:, :WC - C]], axis=1)
            elif dx == 1:
                shifted = jnp.concatenate(
                    [shifted_v[:, C:], jnp.zeros((H, C), jnp.float32)], axis=1)
            else:
                shifted = shifted_v
            w_tap = w_ref[ky, kx]                         # (W*C, W*Cout) block-diag
            acc = acc + jnp.dot(shifted.astype(w_tap.dtype), w_tap,
                                preferred_element_type=jnp.float32)
    act = jnp.maximum(acc + b_ref[...], 0.0)              # (H, W*Cout), ReLU

    # fused 2x2 / stride-2 max pool (column pairs on the lane axis, then row pairs)
    cols = [jnp.maximum(act[:, (2 * k) * Cout:(2 * k + 1) * Cout],
                        act[:, (2 * k + 1) * Cout:(2 * k + 2) * Cout])
            for k in range(W // 2)]
    cp = cols[0] if W // 2 == 1 else jnp.concatenate(cols, axis=1)    # (H, W//2*Cout)
    rows = [jnp.maximum(cp[2 * i:2 * i + 1, :], cp[2 * i + 1:2 * i + 2, :])
            for i in range(H // 2)]
    return rows[0] if H // 2 == 1 else jnp.concatenate(rows, axis=0)  # (H//2, W//2*Cout)


def fused_cnn_kernel(x_ref,
                     w1_ref, b1_ref, w2_ref, b2_ref,
                     w3_ref, b3_ref, w4_ref, b4_ref,
                     wf1_ref, bf1_ref, wf2_ref, bf2_ref, wf3_ref, bf3_ref,
                     o_ref, *, H, W, channels):
    c1, c2, c3, c4 = channels
    a = x_ref[0].astype(jnp.float32)                                    # (H, W), Cin=1
    a = _conv3x3_relu_pool(a, w1_ref, b1_ref, H, W, 1, c1)              # (H/2,  W/2*c1)
    a = _conv3x3_relu_pool(a, w2_ref, b2_ref, H // 2, W // 2, c1, c2)   # (H/4,  W/4*c2)
    a = _conv3x3_relu_pool(a, w3_ref, b3_ref, H // 4, W // 4, c2, c3)   # (H/8,  W/8*c3)
    a = _conv3x3_relu_pool(a, w4_ref, b4_ref, H // 8, W // 8, c3, c4)   # (H/16, W/16*c4)

    # AdaptiveAvgPool2d(1) + flatten -> (1, c4)
    Hf, Wf = H // 16, W // 16
    s = jnp.sum(a, axis=0, keepdims=True)                               # (1, Wf*c4)
    feats = s[:, :c4]
    for k in range(1, Wf):
        feats = feats + s[:, k * c4:(k + 1) * c4]
    feats = feats * (1.0 / (Hf * Wf))

    # fc1 -> ReLU -> fc2 -> ReLU -> fc3   (bf16 MXU inputs, f32 accumulate)
    h = jnp.dot(feats.astype(wf1_ref.dtype), wf1_ref[...],
                preferred_element_type=jnp.float32) + bf1_ref[...]
    h = jnp.maximum(h, 0.0)
    h = jnp.dot(h.astype(wf2_ref.dtype), wf2_ref[...],
                preferred_element_type=jnp.float32) + bf2_ref[...]
    h = jnp.maximum(h, 0.0)
    out = jnp.dot(h.astype(wf3_ref.dtype), wf3_ref[...],
                  preferred_element_type=jnp.float32) + bf3_ref[...]
    o_ref[0] = out.astype(o_ref.dtype)                                  # (1, n_out)


# --------------------------------------------------------------------------- #
# wrapper
# --------------------------------------------------------------------------- #

def _block_diag_taps(w, width):
    """(3,3,Cin,Cout) -> (3,3,width*Cin,width*Cout): per-tap kron(I_width, w[ky,kx])."""
    cin, cout = w.shape[2], w.shape[3]
    eye = jnp.eye(width, dtype=w.dtype)
    bd = jnp.einsum("xy,abio->abxiyo", eye, w)
    return bd.reshape(3, 3, width * cin, width * cout)


def cnn_forward_pallas(x_nchw, params, *, matmul_dtype=jnp.bfloat16):
    N, Cin, H, W = x_nchw.shape
    assert Cin == 1 and H % 16 == 0 and W % 16 == 0
    x2d = x_nchw[:, 0, :, :].astype(jnp.float32)          # (N, H, W), channel squeezed

    (w1, b1) = params["conv1"]
    (w2, b2) = params["conv2"]
    (w3, b3) = params["conv3"]
    (w4, b4) = params["conv4"]
    (wf1, bf1) = params["fc1"]
    (wf2, bf2) = params["fc2"]
    (wf3, bf3) = params["fc3"]

    widths = (W, W // 2, W // 4, W // 8)                  # spatial width per conv layer
    conv_dtypes = (jnp.float32, matmul_dtype, matmul_dtype, matmul_dtype)
    conv_args = []
    for (wc, bc), width, dt in zip(((w1, b1), (w2, b2), (w3, b3), (w4, b4)),
                                   widths, conv_dtypes):
        conv_args.append(_block_diag_taps(wc, width).astype(dt))
        conv_args.append(jnp.tile(bc, width).reshape(1, -1).astype(jnp.float32))

    fc_args = [wf1.astype(matmul_dtype), bf1.reshape(1, -1).astype(jnp.float32),
               wf2.astype(matmul_dtype), bf2.reshape(1, -1).astype(jnp.float32),
               wf3.astype(matmul_dtype), bf3.reshape(1, -1).astype(jnp.float32)]

    args = [x2d] + conv_args + fc_args
    n_out = wf3.shape[1]

    def full_spec(a):
        nd = a.ndim
        return pl.BlockSpec(a.shape, lambda n, _nd=nd: (0,) * _nd)

    in_specs = [pl.BlockSpec((1, H, W), lambda n: (n, 0, 0))]
    in_specs += [full_spec(a) for a in args[1:]]

    kern = functools.partial(
        fused_cnn_kernel, H=H, W=W,
        channels=(w1.shape[3], w2.shape[3], w3.shape[3], w4.shape[3]))

    out = pl.pallas_call(
        kern,
        out_shape=jax.ShapeDtypeStruct((N, 1, n_out), jnp.float32),
        grid=(N,),
        in_specs=in_specs,
        out_specs=pl.BlockSpec((1, 1, n_out), lambda n: (n, 0, 0)),
        compiler_params=pltpu.CompilerParams(
            dimension_semantics=("parallel",),
            vmem_limit_bytes=32 * 1024 * 1024,
        ),
    )(*args)
    return out[:, 0, :]                                   # (N, 600)


# --------------------------------------------------------------------------- #
# model glue
# --------------------------------------------------------------------------- #

def _uniform(key, shape, fan_in):
    bound = 1.0 / math.sqrt(fan_in)
    return jax.random.uniform(key, shape, jnp.float32, -bound, bound)


def init_params(key):
    params = {}
    keys = jax.random.split(key, 14)
    ki = 0
    for idx, (cin, cout) in enumerate([(1, 32), (32, 64), (64, 128), (128, 256)], 1):
        params[f"conv{idx}"] = (_uniform(keys[ki], (3, 3, cin, cout), cin * 9),
                                _uniform(keys[ki + 1], (cout,), cin * 9))
        ki += 2
    for idx, (din, dout) in enumerate([(256, 512), (512, 256), (256, 600)], 1):
        params[f"fc{idx}"] = (_uniform(keys[ki], (din, dout), din),
                              _uniform(keys[ki + 1], (dout,), din))
        ki += 2
    return params


@jax.jit
def cnn_forward(x_nchw, params):
    # Accepts NCHW (PyTorch convention); runs the whole network in one Pallas call.
    return cnn_forward_pallas(x_nchw, params)


if __name__ == "__main__":
    key = jax.random.PRNGKey(0)
    pkey, xkey = jax.random.split(key)
    params = init_params(pkey)
    # MNIST-like input consistent with in_channels=1: (batch=2, C=1, 16, 16).
    x = jax.random.normal(xkey, (2, 1, 16, 16), jnp.float32)
    out = cnn_forward(x, params)
    out = jax.block_until_ready(out)
    assert out.shape == (2, 600) and out.dtype == jnp.float32
    assert bool(jnp.all(jnp.isfinite(out)))
    print("KERNEL_OK")
</pallas_src>

<mosaic_0001>
module attributes {stable_mosaic.version = 11 : i64} {
  func.func @fused_cnn_kernel(%arg0: i32, %arg1: memref<1x16x16xf32, #tpu.memory_space<vmem>>, %arg2: memref<3x3x16x512xf32, #tpu.memory_space<vmem>>, %arg3: memref<1x512xf32, #tpu.memory_space<vmem>>, %arg4: memref<3x3x256x512xbf16, #tpu.memory_space<vmem>>, %arg5: memref<1x512xf32, #tpu.memory_space<vmem>>, %arg6: memref<3x3x256x512xbf16, #tpu.memory_space<vmem>>, %arg7: memref<1x512xf32, #tpu.memory_space<vmem>>, %arg8: memref<3x3x256x512xbf16, #tpu.memory_space<vmem>>, %arg9: memref<1x512xf32, #tpu.memory_space<vmem>>, %arg10: memref<256x512xbf16, #tpu.memory_space<vmem>>, %arg11: memref<1x512xf32, #tpu.memory_space<vmem>>, %arg12: memref<512x256xbf16, #tpu.memory_space<vmem>>, %arg13: memref<1x256xf32, #tpu.memory_space<vmem>>, %arg14: memref<256x600xbf16, #tpu.memory_space<vmem>>, %arg15: memref<1x600xf32, #tpu.memory_space<vmem>>, %arg16: memref<1x1x600xf32, #tpu.memory_space<vmem>>) attributes {dimension_semantics = [#tpu.dimension_semantics<parallel>], iteration_bounds = array<i64: 2>, scalar_prefetch = 0 : i64, scratch_operands = 0 : i64, tpu.core_type = #tpu.core_type<tc>, window_params = [{transform_indices = @transform_0, window_bounds = array<i64: 1, 16, 16>}, {pipeline_mode = #tpu.pipeline_mode<synchronous>, transform_indices = @transform_1, window_bounds = array<i64: 3, 3, 16, 512>}, {pipeline_mode = #tpu.pipeline_mode<synchronous>, transform_indices = @transform_2, window_bounds = array<i64: 1, 512>}, {pipeline_mode = #tpu.pipeline_mode<synchronous>, transform_indices = @transform_3, window_bounds = array<i64: 3, 3, 256, 512>}, {pipeline_mode = #tpu.pipeline_mode<synchronous>, transform_indices = @transform_4, window_bounds = array<i64: 1, 512>}, {pipeline_mode = #tpu.pipeline_mode<synchronous>, transform_indices = @transform_5, window_bounds = array<i64: 3, 3, 256, 512>}, {pipeline_mode = #tpu.pipeline_mode<synchronous>, transform_indices = @transform_6, window_bounds = array<i64: 1, 512>}, {pipeline_mode = #tpu.pipeline_mode<synchronous>, transform_indices = @transform_7, window_bounds = array<i64: 3, 3, 256, 512>}, {pipeline_mode = #tpu.pipeline_mode<synchronous>, transform_indices = @transform_8, window_bounds = array<i64: 1, 512>}, {pipeline_mode = #tpu.pipeline_mode<synchronous>, transform_indices = @transform_9, window_bounds = array<i64: 256, 512>}, {pipeline_mode = #tpu.pipeline_mode<synchronous>, transform_indices = @transform_10, window_bounds = array<i64: 1, 512>}, {pipeline_mode = #tpu.pipeline_mode<synchronous>, transform_indices = @transform_11, window_bounds = array<i64: 512, 256>}, {pipeline_mode = #tpu.pipeline_mode<synchronous>, transform_indices = @transform_12, window_bounds = array<i64: 1, 256>}, {pipeline_mode = #tpu.pipeline_mode<synchronous>, transform_indices = @transform_13, window_bounds = array<i64: 256, 600>}, {pipeline_mode = #tpu.pipeline_mode<synchronous>, transform_indices = @transform_14, window_bounds = array<i64: 1, 600>}, {transform_indices = @transform_15, window_bounds = array<i64: 1, 1, 600>}]} {
    %c0 = arith.constant 0 : index
    %c0_0 = arith.constant 0 : index
    %c0_1 = arith.constant 0 : index
    %0 = vector.load %arg1[%c0, %c0_0, %c0_1] : memref<1x16x16xf32, #tpu.memory_space<vmem>>, vector<1x16x16xf32>
    %1 = vector.shape_cast %0 : vector<1x16x16xf32> to vector<16x16xf32>
    %cst = arith.constant 0.000000e+00 : f32
    %2 = vector.broadcast %cst : f32 to vector<16x512xf32>
    %cst_2 = arith.constant 0.000000e+00 : f32
    %3 = vector.broadcast %cst_2 : f32 to vector<1x16xf32>
    %4 = vector.extract_strided_slice %1 {offsets = [0, 0], sizes = [15, 16], strides = [1, 1]} : vector<16x16xf32> to vector<15x16xf32>
    %5 = tpu.concatenate %3, %4 in 0 : vector<1x16xf32>, vector<15x16xf32> -> vector<16x16xf32>
    %cst_3 = arith.constant 0.000000e+00 : f32
    %6 = vector.broadcast %cst_3 : f32 to vector<16x1xf32>
    %7 = vector.extract_strided_slice %5 {offsets = [0, 0], sizes = [16, 15], strides = [1, 1]} : vector<16x16xf32> to vector<16x15xf32>
    %8 = tpu.concatenate %6, %7 in 1 : vector<16x1xf32>, vector<16x15xf32> -> vector<16x16xf32>
    %c0_4 = arith.constant 0 : index
    %c0_5 = arith.constant 0 : index
    %c0_6 = arith.constant 0 : index
    %c0_7 = arith.constant 0 : index
    %9 = vector.load %arg2[%c0_4, %c0_5, %c0_6, %c0_7] : memref<3x3x16x512xf32, #tpu.memory_space<vmem>>, vector<1x1x16x512xf32>
    %10 = vector.shape_cast %9 : vector<1x1x16x512xf32> to vector<16x512xf32>
    %cst_8 = arith.constant dense<0.000000e+00> : vector<16x512xf32>
    %11 = tpu.matmul %8, %10, %cst_8 {dimension_numbers = #tpu.dot_dimension_numbers<[1], [0], [0], [1], [0, 0, 1, 1], [], []>} : vector<16x16xf32>, vector<16x512xf32>, vector<16x512xf32> -> vector<16x512xf32>
    %12 = arith.addf %2, %11 : vector<16x512xf32>
    %c0_9 = arith.constant 0 : index
    %c1 = arith.constant 1 : index
    %c0_10 = arith.constant 0 : index
    %c0_11 = arith.constant 0 : index
    %13 = vector.load %arg2[%c0_9, %c1, %c0_10, %c0_11] : memref<3x3x16x512xf32, #tpu.memory_space<vmem>>, vector<1x1x16x512xf32>
    %14 = vector.shape_cast %13 : vector<1x1x16x512xf32> to vector<16x512xf32>
    %cst_12 = arith.constant dense<0.000000e+00> : vector<16x512xf32>
    %15 = tpu.matmul %5, %14, %cst_12 {dimension_numbers = #tpu.dot_dimension_numbers<[1], [0], [0], [1], [0, 0, 1, 1], [], []>} : vector<16x16xf32>, vector<16x512xf32>, vector<16x512xf32> -> vector<16x512xf32>
    %16 = arith.addf %12, %15 : vector<16x512xf32>
    %17 = vector.extract_strided_slice %5 {offsets = [0, 1], sizes = [16, 15], strides = [1, 1]} : vector<16x16xf32> to vector<16x15xf32>
    %cst_13 = arith.constant 0.000000e+00 : f32
    %18 = vector.broadcast %cst_13 : f32 to vector<16x1xf32>
    %19 = tpu.concatenate %17, %18 in 1 : vector<16x15xf32>, vector<16x1xf32> -> vector<16x16xf32>
    %c0_14 = arith.constant 0 : index
    %c2 = arith.constant 2 : index
    %c0_15 = arith.constant 0 : index
    %c0_16 = arith.constant 0 : index
    %20 = vector.load %arg2[%c0_14, %c2, %c0_15, %c0_16] : memref<3x3x16x512xf32, #tpu.memory_space<vmem>>, vector<1x1x16x512xf32>
    %21 = vector.shape_cast %20 : vector<1x1x16x512xf32> to vector<16x512xf32>
    %cst_17 = arith.constant dense<0.000000e+00> : vector<16x512xf32>
    %22 = tpu.matmul %19, %21, %cst_17 {dimension_numbers = #tpu.dot_dimension_numbers<[1], [0], [0], [1], [0, 0, 1, 1], [], []>} : vector<16x16xf32>, vector<16x512xf32>, vector<16x512xf32> -> vector<16x512xf32>
    %23 = arith.addf %16, %22 : vector<16x512xf32>
    %cst_18 = arith.constant 0.000000e+00 : f32
    %24 = vector.broadcast %cst_18 : f32 to vector<16x1xf32>
    %25 = vector.extract_strided_slice %1 {offsets = [0, 0], sizes = [16, 15], strides = [1, 1]} : vector<16x16xf32> to vector<16x15xf32>
    %26 = tpu.concatenate %24, %25 in 1 : vector<16x1xf32>, vector<16x15xf32> -> vector<16x16xf32>
    %c1_19 = arith.constant 1 : index
    %c0_20 = arith.constant 0 : index
    %c0_21 = arith.constant 0 : index
    %c0_22 = arith.constant 0 : index
    %27 = vector.load %arg2[%c1_19, %c0_20, %c0_21, %c0_22] : memref<3x3x16x512xf32, #tpu.memory_space<vmem>>, vector<1x1x16x512xf32>
    %28 = vector.shape_cast %27 : vector<1x1x16x512xf32> to vector<16x512xf32>
    %cst_23 = arith.constant dense<0.000000e+00> : vector<16x512xf32>
    %29 = tpu.matmul %26, %28, %cst_23 {dimension_numbers = #tpu.dot_dimension_numbers<[1], [0], [0], [1], [0, 0, 1, 1], [], []>} : vector<16x16xf32>, vector<16x512xf32>, vector<16x512xf32> -> vector<16x512xf32>
    %30 = arith.addf %23, %29 : vector<16x512xf32>
    %c1_24 = arith.constant 1 : index
    %c1_25 = arith.constant 1 : index
    %c0_26 = arith.constant 0 : index
    %c0_27 = arith.constant 0 : index
    %31 = vector.load %arg2[%c1_24, %c1_25, %c0_26, %c0_27] : memref<3x3x16x512xf32, #tpu.memory_space<vmem>>, vector<1x1x16x512xf32>
    %32 = vector.shape_cast %31 : vector<1x1x16x512xf32> to vector<16x512xf32>
    %cst_28 = arith.constant dense<0.000000e+00> : vector<16x512xf32>
    %33 = tpu.matmul %1, %32, %cst_28 {dimension_numbers = #tpu.dot_dimension_numbers<[1], [0], [0], [1], [0, 0, 1, 1], [], []>} : vector<16x16xf32>, vector<16x512xf32>, vector<16x512xf32> -> vector<16x512xf32>
    %34 = arith.addf %30, %33 : vector<16x512xf32>
    %35 = vector.extract_strided_slice %1 {offsets = [0, 1], sizes = [16, 15], strides = [1, 1]} : vector<16x16xf32> to vector<16x15xf32>
    %cst_29 = arith.constant 0.000000e+00 : f32
    %36 = vector.broadcast %cst_29 : f32 to vector<16x1xf32>
    %37 = tpu.concatenate %35, %36 in 1 : vector<16x15xf32>, vector<16x1xf32> -> vector<16x16xf32>
    %c1_30 = arith.constant 1 : index
    %c2_31 = arith.constant 2 : index
    %c0_32 = arith.constant 0 : index
    %c0_33 = arith.constant 0 : index
    %38 = vector.load %arg2[%c1_30, %c2_31, %c0_32, %c0_33] : memref<3x3x16x512xf32, #tpu.memory_space<vmem>>, vector<1x1x16x512xf32>
    %39 = vector.shape_cast %38 : vector<1x1x16x512xf32> to vector<16x512xf32>
    %cst_34 = arith.constant dense<0.000000e+00> : vector<16x512xf32>
    %40 = tpu.matmul %37, %39, %cst_34 {dimension_numbers = #tpu.dot_dimension_numbers<[1], [0], [0], [1], [0, 0, 1, 1], [], []>} : vector<16x16xf32>, vector<16x512xf32>, vector<16x512xf32> -> vector<16x512xf32>
    %41 = arith.addf %34, %40 : vector<16x512xf32>
    %42 = vector.extract_strided_slice %1 {offsets = [1, 0], sizes = [15, 16], strides = [1, 1]} : vector<16x16xf32> to vector<15x16xf32>
    %cst_35 = arith.constant 0.000000e+00 : f32
    %43 = vector.broadcast %cst_35 : f32 to vector<1x16xf32>
    %44 = tpu.concatenate %42, %43 in 0 : vector<15x16xf32>, vector<1x16xf32> -> vector<16x16xf32>
    %cst_36 = arith.constant 0.000000e+00 : f32
    %45 = vector.broadcast %cst_36 : f32 to vector<16x1xf32>
    %46 = vector.extract_strided_slice %44 {offsets = [0, 0], sizes = [16, 15], strides = [1, 1]} : vector<16x16xf32> to vector<16x15xf32>
    %47 = tpu.concatenate %45, %46 in 1 : vector<16x1xf32>, vector<16x15xf32> -> vector<16x16xf32>
    %c2_37 = arith.constant 2 : index
    %c0_38 = arith.constant 0 : index
    %c0_39 = arith.constant 0 : index
    %c0_40 = arith.constant 0 : index
    %48 = vector.load %arg2[%c2_37, %c0_38, %c0_39, %c0_40] : memref<3x3x16x512xf32, #tpu.memory_space<vmem>>, vector<1x1x16x512xf32>
    %49 = vector.shape_cast %48 : vector<1x1x16x512xf32> to vector<16x512xf32>
    %cst_41 = arith.constant dense<0.000000e+00> : vector<16x512xf32>
    %50 = tpu.matmul %47, %49, %cst_41 {dimension_numbers = #tpu.dot_dimension_numbers<[1], [0], [0], [1], [0, 0, 1, 1], [], []>} : vector<16x16xf32>, vector<16x512xf32>, vector<16x512xf32> -> vector<16x512xf32>
    %51 = arith.addf %41, %50 : vector<16x512xf32>
    %c2_42 = arith.constant 2 : index
    %c1_43 = arith.constant 1 : index
    %c0_44 = arith.constant 0 : index
    %c0_45 = arith.constant 0 : index
    %52 = vector.load %arg2[%c2_42, %c1_43, %c0_44, %c0_45] : memref<3x3x16x512xf32, #tpu.memory_space<vmem>>, vector<1x1x16x512xf32>
    %53 = vector.shape_cast %52 : vector<1x1x16x512xf32> to vector<16x512xf32>
    %cst_46 = arith.constant dense<0.000000e+00> : vector<16x512xf32>
    %54 = tpu.matmul %44, %53, %cst_46 {dimension_numbers = #tpu.dot_dimension_numbers<[1], [0], [0], [1], [0, 0, 1, 1], [], []>} : vector<16x16xf32>, vector<16x512xf32>, vector<16x512xf32> -> vector<16x512xf32>
    %55 = arith.addf %51, %54 : vector<16x512xf32>
    %56 = vector.extract_strided_slice %44 {offsets = [0, 1], sizes = [16, 15], strides = [1, 1]} : vector<16x16xf32> to vector<16x15xf32>
    %cst_47 = arith.constant 0.000000e+00 : f32
    %57 = vector.broadcast %cst_47 : f32 to vector<16x1xf32>
    %58 = tpu.concatenate %56, %57 in 1 : vector<16x15xf32>, vector<16x1xf32> -> vector<16x16xf32>
    %c2_48 = arith.constant 2 : index
    %c2_49 = arith.constant 2 : index
    %c0_50 = arith.constant 0 : index
    %c0_51 = arith.constant 0 : index
    %59 = vector.load %arg2[%c2_48, %c2_49, %c0_50, %c0_51] : memref<3x3x16x512xf32, #tpu.memory_space<vmem>>, vector<1x1x16x512xf32>
    %60 = vector.shape_cast %59 : vector<1x1x16x512xf32> to vector<16x512xf32>
    %cst_52 = arith.constant dense<0.000000e+00> : vector<16x512xf32>
    %61 = tpu.matmul %58, %60, %cst_52 {dimension_numbers = #tpu.dot_dimension_numbers<[1], [0], [0], [1], [0, 0, 1, 1], [], []>} : vector<16x16xf32>, vector<16x512xf32>, vector<16x512xf32> -> vector<16x512xf32>
    %62 = arith.addf %55, %61 : vector<16x512xf32>
    %c0_53 = arith.constant 0 : index
    %c0_54 = arith.constant 0 : index
    %63 = vector.load %arg3[%c0_53, %c0_54] : memref<1x512xf32, #tpu.memory_space<vmem>>, vector<1x512xf32>
    %64 = vector.broadcast %63 : vector<1x512xf32> to vector<16x512xf32>
    %65 = arith.addf %62, %64 : vector<16x512xf32>
    %cst_55 = arith.constant 0.000000e+00 : f32
    %66 = vector.broadcast %cst_55 : f32 to vector<16x512xf32>
    %67 = arith.maximumf %65, %66 : vector<16x512xf32>
    %68 = vector.extract_strided_slice %67 {offsets = [0, 0], sizes = [16, 32], strides = [1, 1]} : vector<16x512xf32> to vector<16x32xf32>
    %69 = vector.extract_strided_slice %67 {offsets = [0, 32], sizes = [16, 32], strides = [1, 1]} : vector<16x512xf32> to vector<16x32xf32>
    %70 = arith.maximumf %68, %69 : vector<16x32xf32>
    %71 = vector.extract_strided_slice %67 {offsets = [0, 64], sizes = [16, 32], strides = [1, 1]} : vector<16x512xf32> to vector<16x32xf32>
    %72 = vector.extract_strided_slice %67 {offsets = [0, 96], sizes = [16, 32], strides = [1, 1]} : vector<16x512xf32> to vector<16x32xf32>
    %73 = arith.maximumf %71, %72 : vector<16x32xf32>
    %74 = vector.extract_strided_slice %67 {offsets = [0, 128], sizes = [16, 32], strides = [1, 1]} : vector<16x512xf32> to vector<16x32xf32>
    %75 = vector.extract_strided_slice %67 {offsets = [0, 160], sizes = [16, 32], strides = [1, 1]} : vector<16x512xf32> to vector<16x32xf32>
    %76 = arith.maximumf %74, %75 : vector<16x32xf32>
    %77 = vector.extract_strided_slice %67 {offsets = [0, 192], sizes = [16, 32], strides = [1, 1]} : vector<16x512xf32> to vector<16x32xf32>
    %78 = vector.extract_strided_slice %67 {offsets = [0, 224], sizes = [16, 32], strides = [1, 1]} : vector<16x512xf32> to vector<16x32xf32>
    %79 = arith.maximumf %77, %78 : vector<16x32xf32>
    %80 = vector.extract_strided_slice %67 {offsets = [0, 256], sizes = [16, 32], strides = [1, 1]} : vector<16x512xf32> to vector<16x32xf32>
    %81 = vector.extract_strided_slice %67 {offsets = [0, 288], sizes = [16, 32], strides = [1, 1]} : vector<16x512xf32> to vector<16x32xf32>
    %82 = arith.maximumf %80, %81 : vector<16x32xf32>
    %83 = vector.extract_strided_slice %67 {offsets = [0, 320], sizes = [16, 32], strides = [1, 1]} : vector<16x512xf32> to vector<16x32xf32>
    %84 = vector.extract_strided_slice %67 {offsets = [0, 352], sizes = [16, 32], strides = [1, 1]} : vector<16x512xf32> to vector<16x32xf32>
    %85 = arith.maximumf %83, %84 : vector<16x32xf32>
    %86 = vector.extract_strided_slice %67 {offsets = [0, 384], sizes = [16, 32], strides = [1, 1]} : vector<16x512xf32> to vector<16x32xf32>
    %87 = vector.extract_strided_slice %67 {offsets = [0, 416], sizes = [16, 32], strides = [1, 1]} : vector<16x512xf32> to vector<16x32xf32>
    %88 = arith.maximumf %86, %87 : vector<16x32xf32>
    %89 = vector.extract_strided_slice %67 {offsets = [0, 448], sizes = [16, 32], strides = [1, 1]} : vector<16x512xf32> to vector<16x32xf32>
    %90 = vector.extract_strided_slice %67 {offsets = [0, 480], sizes = [16, 32], strides = [1, 1]} : vector<16x512xf32> to vector<16x32xf32>
    %91 = arith.maximumf %89, %90 : vector<16x32xf32>
    %92 = tpu.concatenate %70, %73, %76, %79, %82, %85, %88, %91 in 1 : vector<16x32xf32>, vector<16x32xf32>, vector<16x32xf32>, vector<16x32xf32>, vector<16x32xf32>, vector<16x32xf32>, vector<16x32xf32>, vector<16x32xf32> -> vector<16x256xf32>
    %93 = vector.extract_strided_slice %92 {offsets = [0, 0], sizes = [1, 256], strides = [1, 1]} : vector<16x256xf32> to vector<1x256xf32>
    %94 = vector.extract_strided_slice %92 {offsets = [1, 0], sizes = [1, 256], strides = [1, 1]} : vector<16x256xf32> to vector<1x256xf32>
    %95 = arith.maximumf %93, %94 : vector<1x256xf32>
    %96 = vector.extract_strided_slice %92 {offsets = [2, 0], sizes = [1, 256], strides = [1, 1]} : vector<16x256xf32> to vector<1x256xf32>
    %97 = vector.extract_strided_slice %92 {offsets = [3, 0], sizes = [1, 256], strides = [1, 1]} : vector<16x256xf32> to vector<1x256xf32>
    %98 = arith.maximumf %96, %97 : vector<1x256xf32>
    %99 = vector.extract_strided_slice %92 {offsets = [4, 0], sizes = [1, 256], strides = [1, 1]} : vector<16x256xf32> to vector<1x256xf32>
    %100 = vector.extract_strided_slice %92 {offsets = [5, 0], sizes = [1, 256], strides = [1, 1]} : vector<16x256xf32> to vector<1x256xf32>
    %101 = arith.maximumf %99, %100 : vector<1x256xf32>
    %102 = vector.extract_strided_slice %92 {offsets = [6, 0], sizes = [1, 256], strides = [1, 1]} : vector<16x256xf32> to vector<1x256xf32>
    %103 = vector.extract_strided_slice %92 {offsets = [7, 0], sizes = [1, 256], strides = [1, 1]} : vector<16x256xf32> to vector<1x256xf32>
    %104 = arith.maximumf %102, %103 : vector<1x256xf32>
    %105 = vector.extract_strided_slice %92 {offsets = [8, 0], sizes = [1, 256], strides = [1, 1]} : vector<16x256xf32> to vector<1x256xf32>
    %106 = vector.extract_strided_slice %92 {offsets = [9, 0], sizes = [1, 256], strides = [1, 1]} : vector<16x256xf32> to vector<1x256xf32>
    %107 = arith.maximumf %105, %106 : vector<1x256xf32>
    %108 = vector.extract_strided_slice %92 {offsets = [10, 0], sizes = [1, 256], strides = [1, 1]} : vector<16x256xf32> to vector<1x256xf32>
    %109 = vector.extract_strided_slice %92 {offsets = [11, 0], sizes = [1, 256], strides = [1, 1]} : vector<16x256xf32> to vector<1x256xf32>
    %110 = arith.maximumf %108, %109 : vector<1x256xf32>
    %111 = vector.extract_strided_slice %92 {offsets = [12, 0], sizes = [1, 256], strides = [1, 1]} : vector<16x256xf32> to vector<1x256xf32>
    %112 = vector.extract_strided_slice %92 {offsets = [13, 0], sizes = [1, 256], strides = [1, 1]} : vector<16x256xf32> to vector<1x256xf32>
    %113 = arith.maximumf %111, %112 : vector<1x256xf32>
    %114 = vector.extract_strided_slice %92 {offsets = [14, 0], sizes = [1, 256], strides = [1, 1]} : vector<16x256xf32> to vector<1x256xf32>
    %115 = vector.extract_strided_slice %92 {offsets = [15, 0], sizes = [1, 256], strides = [1, 1]} : vector<16x256xf32> to vector<1x256xf32>
    %116 = arith.maximumf %114, %115 : vector<1x256xf32>
    %117 = tpu.concatenate %95, %98, %101, %104, %107, %110, %113, %116 in 0 : vector<1x256xf32>, vector<1x256xf32>, vector<1x256xf32>, vector<1x256xf32>, vector<1x256xf32>, vector<1x256xf32>, vector<1x256xf32>, vector<1x256xf32> -> vector<8x256xf32>
    %cst_56 = arith.constant 0.000000e+00 : f32
    %118 = vector.broadcast %cst_56 : f32 to vector<8x512xf32>
    %cst_57 = arith.constant 0.000000e+00 : f32
    %119 = vector.broadcast %cst_57 : f32 to vector<1x256xf32>
    %120 = vector.extract_strided_slice %117 {offsets = [0, 0], sizes = [7, 256], strides = [1, 1]} : vector<8x256xf32> to vector<7x256xf32>
    %121 = tpu.concatenate %119, %120 in 0 : vector<1x256xf32>, vector<7x256xf32> -> vector<8x256xf32>
    %cst_58 = arith.constant 0.000000e+00 : f32
    %122 = vector.broadcast %cst_58 : f32 to vector<8x32xf32>
    %123 = vector.extract_strided_slice %121 {offsets = [0, 0], sizes = [8, 224], strides = [1, 1]} : vector<8x256xf32> to vector<8x224xf32>
    %124 = tpu.concatenate %122, %123 in 1 : vector<8x32xf32>, vector<8x224xf32> -> vector<8x256xf32>
    %c0_59 = arith.constant 0 : index
    %c0_60 = arith.constant 0 : index
    %c0_61 = arith.constant 0 : index
    %c0_62 = arith.constant 0 : index
    %125 = vector.load %arg4[%c0_59, %c0_60, %c0_61, %c0_62] : memref<3x3x256x512xbf16, #tpu.memory_space<vmem>>, vector<1x1x256x512xbf16>
    %126 = vector.shape_cast %125 : vector<1x1x256x512xbf16> to vector<256x512xbf16>
    %127 = arith.truncf %124 : vector<8x256xf32> to vector<8x256xbf16>
    %cst_63 = arith.constant dense<0.000000e+00> : vector<8x512xf32>
    %128 = tpu.matmul %127, %126, %cst_63 {dimension_numbers = #tpu.dot_dimension_numbers<[1], [0], [0], [1], [0, 0, 1, 1], [], []>} : vector<8x256xbf16>, vector<256x512xbf16>, vector<8x512xf32> -> vector<8x512xf32>
    %129 = arith.addf %118, %128 : vector<8x512xf32>
    %c0_64 = arith.constant 0 : index
    %c1_65 = arith.constant 1 : index
    %c0_66 = arith.constant 0 : index
    %c0_67 = arith.constant 0 : index
    %130 = vector.load %arg4[%c0_64, %c1_65, %c0_66, %c0_67] : memref<3x3x256x512xbf16, #tpu.memory_space<vmem>>, vector<1x1x256x512xbf16>
    %131 = vector.shape_cast %130 : vector<1x1x256x512xbf16> to vector<256x512xbf16>
    %132 = arith.truncf %121 : vector<8x256xf32> to vector<8x256xbf16>
    %cst_68 = arith.constant dense<0.000000e+00> : vector<8x512xf32>
    %133 = tpu.matmul %132, %131, %cst_68 {dimension_numbers = #tpu.dot_dimension_numbers<[1], [0], [0], [1], [0, 0, 1, 1], [], []>} : vector<8x256xbf16>, vector<256x512xbf16>, vector<8x512xf32> -> vector<8x512xf32>
    %134 = arith.addf %129, %133 : vector<8x512xf32>
    %135 = vector.extract_strided_slice %121 {offsets = [0, 32], sizes = [8, 224], strides = [1, 1]} : vector<8x256xf32> to vector<8x224xf32>
    %cst_69 = arith.constant 0.000000e+00 : f32
    %136 = vector.broadcast %cst_69 : f32 to vector<8x32xf32>
    %137 = tpu.concatenate %135, %136 in 1 : vector<8x224xf32>, vector<8x32xf32> -> vector<8x256xf32>
    %c0_70 = arith.constant 0 : index
    %c2_71 = arith.constant 2 : index
    %c0_72 = arith.constant 0 : index
    %c0_73 = arith.constant 0 : index
    %138 = vector.load %arg4[%c0_70, %c2_71, %c0_72, %c0_73] : memref<3x3x256x512xbf16, #tpu.memory_space<vmem>>, vector<1x1x256x512xbf16>
    %139 = vector.shape_cast %138 : vector<1x1x256x512xbf16> to vector<256x512xbf16>
    %140 = arith.truncf %137 : vector<8x256xf32> to vector<8x256xbf16>
    %cst_74 = arith.constant dense<0.000000e+00> : vector<8x512xf32>
    %141 = tpu.matmul %140, %139, %cst_74 {dimension_numbers = #tpu.dot_dimension_numbers<[1], [0], [0], [1], [0, 0, 1, 1], [], []>} : vector<8x256xbf16>, vector<256x512xbf16>, vector<8x512xf32> -> vector<8x512xf32>
    %142 = arith.addf %134, %141 : vector<8x512xf32>
    %cst_75 = arith.constant 0.000000e+00 : f32
    %143 = vector.broadcast %cst_75 : f32 to vector<8x32xf32>
    %144 = vector.extract_strided_slice %117 {offsets = [0, 0], sizes = [8, 224], strides = [1, 1]} : vector<8x256xf32> to vector<8x224xf32>
    %145 = tpu.concatenate %143, %144 in 1 : vector<8x32xf32>, vector<8x224xf32> -> vector<8x256xf32>
    %c1_76 = arith.constant 1 : index
    %c0_77 = arith.constant 0 : index
    %c0_78 = arith.constant 0 : index
    %c0_79 = arith.constant 0 : index
    %146 = vector.load %arg4[%c1_76, %c0_77, %c0_78, %c0_79] : memref<3x3x256x512xbf16, #tpu.memory_space<vmem>>, vector<1x1x256x512xbf16>
    %147 = vector.shape_cast %146 : vector<1x1x256x512xbf16> to vector<256x512xbf16>
    %148 = arith.truncf %145 : vector<8x256xf32> to vector<8x256xbf16>
    %cst_80 = arith.constant dense<0.000000e+00> : vector<8x512xf32>
    %149 = tpu.matmul %148, %147, %cst_80 {dimension_numbers = #tpu.dot_dimension_numbers<[1], [0], [0], [1], [0, 0, 1, 1], [], []>} : vector<8x256xbf16>, vector<256x512xbf16>, vector<8x512xf32> -> vector<8x512xf32>
    %150 = arith.addf %142, %149 : vector<8x512xf32>
    %c1_81 = arith.constant 1 : index
    %c1_82 = arith.constant 1 : index
    %c0_83 = arith.constant 0 : index
    %c0_84 = arith.constant 0 : index
    %151 = vector.load %arg4[%c1_81, %c1_82, %c0_83, %c0_84] : memref<3x3x256x512xbf16, #tpu.memory_space<vmem>>, vector<1x1x256x512xbf16>
    %152 = vector.shape_cast %151 : vector<1x1x256x512xbf16> to vector<256x512xbf16>
    %153 = arith.truncf %117 : vector<8x256xf32> to vector<8x256xbf16>
    %cst_85 = arith.constant dense<0.000000e+00> : vector<8x512xf32>
    %154 = tpu.matmul %153, %152, %cst_85 {dimension_numbers = #tpu.dot_dimension_numbers<[1], [0], [0], [1], [0, 0, 1, 1], [], []>} : vector<8x256xbf16>, vector<256x512xbf16>, vector<8x512xf32> -> vector<8x512xf32>
    %155 = arith.addf %150, %154 : vector<8x512xf32>
    %156 = vector.extract_strided_slice %117 {offsets = [0, 32], sizes = [8, 224], strides = [1, 1]} : vector<8x256xf32> to vector<8x224xf32>
    %cst_86 = arith.constant 0.000000e+00 : f32
    %157 = vector.broadcast %cst_86 : f32 to vector<8x32xf32>
    %158 = tpu.concatenate %156, %157 in 1 : vector<8x224xf32>, vector<8x32xf32> -> vector<8x256xf32>
    %c1_87 = arith.constant 1 : index
    %c2_88 = arith.constant 2 : index
    %c0_89 = arith.constant 0 : index
    %c0_90 = arith.constant 0 : index
    %159 = vector.load %arg4[%c1_87, %c2_88, %c0_89, %c0_90] : memref<3x3x256x512xbf16, #tpu.memory_space<vmem>>, vector<1x1x256x512xbf16>
    %160 = vector.shape_cast %159 : vector<1x1x256x512xbf16> to vector<256x512xbf16>
    %161 = arith.truncf %158 : vector<8x256xf32> to vector<8x256xbf16>
    %cst_91 = arith.constant dense<0.000000e+00> : vector<8x512xf32>
    %162 = tpu.matmul %161, %160, %cst_91 {dimension_numbers = #tpu.dot_dimension_numbers<[1], [0], [0], [1], [0, 0, 1, 1], [], []>} : vector<8x256xbf16>, vector<256x512xbf16>, vector<8x512xf32> -> vector<8x512xf32>
    %163 = arith.addf %155, %162 : vector<8x512xf32>
    %164 = vector.extract_strided_slice %117 {offsets = [1, 0], sizes = [7, 256], strides = [1, 1]} : vector<8x256xf32> to vector<7x256xf32>
    %cst_92 = arith.constant 0.000000e+00 : f32
    %165 = vector.broadcast %cst_92 : f32 to vector<1x256xf32>
    %166 = tpu.concatenate %164, %165 in 0 : vector<7x256xf32>, vector<1x256xf32> -> vector<8x256xf32>
    %cst_93 = arith.constant 0.000000e+00 : f32
    %167 = vector.broadcast %cst_93 : f32 to vector<8x32xf32>
    %168 = vector.extract_strided_slice %166 {offsets = [0, 0], sizes = [8, 224], strides = [1, 1]} : vector<8x256xf32> to vector<8x224xf32>
    %169 = tpu.concatenate %167, %168 in 1 : vector<8x32xf32>, vector<8x224xf32> -> vector<8x256xf32>
    %c2_94 = arith.constant 2 : index
    %c0_95 = arith.constant 0 : index
    %c0_96 = arith.constant 0 : index
    %c0_97 = arith.constant 0 : index
    %170 = vector.load %arg4[%c2_94, %c0_95, %c0_96, %c0_97] : memref<3x3x256x512xbf16, #tpu.memory_space<vmem>>, vector<1x1x256x512xbf16>
    %171 = vector.shape_cast %170 : vector<1x1x256x512xbf16> to vector<256x512xbf16>
    %172 = arith.truncf %169 : vector<8x256xf32> to vector<8x256xbf16>
    %cst_98 = arith.constant dense<0.000000e+00> : vector<8x512xf32>
    %173 = tpu.matmul %172, %171, %cst_98 {dimension_numbers = #tpu.dot_dimension_numbers<[1], [0], [0], [1], [0, 0, 1, 1], [], []>} : vector<8x256xbf16>, vector<256x512xbf16>, vector<8x512xf32> -> vector<8x512xf32>
    %174 = arith.addf %163, %173 : vector<8x512xf32>
    %c2_99 = arith.constant 2 : index
    %c1_100 = arith.constant 1 : index
    %c0_101 = arith.constant 0 : index
    %c0_102 = arith.constant 0 : index
    %175 = vector.load %arg4[%c2_99, %c1_100, %c0_101, %c0_102] : memref<3x3x256x512xbf16, #tpu.memory_space<vmem>>, vector<1x1x256x512xbf16>
    %176 = vector.shape_cast %175 : vector<1x1x256x512xbf16> to vector<256x512xbf16>
    %177 = arith.truncf %166 : vector<8x256xf32> to vector<8x256xbf16>
    %cst_103 = arith.constant dense<0.000000e+00> : vector<8x512xf32>
    %178 = tpu.matmul %177, %176, %cst_103 {dimension_numbers = #tpu.dot_dimension_numbers<[1], [0], [0], [1], [0, 0, 1, 1], [], []>} : vector<8x256xbf16>, vector<256x512xbf16>, vector<8x512xf32> -> vector<8x512xf32>
    %179 = arith.addf %174, %178 : vector<8x512xf32>
    %180 = vector.extract_strided_slice %166 {offsets = [0, 32], sizes = [8, 224], strides = [1, 1]} : vector<8x256xf32> to vector<8x224xf32>
    %cst_104 = arith.constant 0.000000e+00 : f32
    %181 = vector.broadcast %cst_104 : f32 to vector<8x32xf32>
    %182 = tpu.concatenate %180, %181 in 1 : vector<8x224xf32>, vector<8x32xf32> -> vector<8x256xf32>
    %c2_105 = arith.constant 2 : index
    %c2_106 = arith.constant 2 : index
    %c0_107 = arith.constant 0 : index
    %c0_108 = arith.constant 0 : index
    %183 = vector.load %arg4[%c2_105, %c2_106, %c0_107, %c0_108] : memref<3x3x256x512xbf16, #tpu.memory_space<vmem>>, vector<1x1x256x512xbf16>
    %184 = vector.shape_cast %183 : vector<1x1x256x512xbf16> to vector<256x512xbf16>
    %185 = arith.truncf %182 : vector<8x256xf32> to vector<8x256xbf16>
    %cst_109 = arith.constant dense<0.000000e+00> : vector<8x512xf32>
    %186 = tpu.matmul %185, %184, %cst_109 {dimension_numbers = #tpu.dot_dimension_numbers<[1], [0], [0], [1], [0, 0, 1, 1], [], []>} : vector<8x256xbf16>, vector<256x512xbf16>, vector<8x512xf32> -> vector<8x512xf32>
    %187 = arith.addf %179, %186 : vector<8x512xf32>
    %c0_110 = arith.constant 0 : index
    %c0_111 = arith.constant 0 : index
    %188 = vector.load %arg5[%c0_110, %c0_111] : memref<1x512xf32, #tpu.memory_space<vmem>>, vector<1x512xf32>
    %189 = vector.broadcast %188 : vector<1x512xf32> to vector<8x512xf32>
    %190 = arith.addf %187, %189 : vector<8x512xf32>
    %cst_112 = arith.constant 0.000000e+00 : f32
    %191 = vector.broadcast %cst_112 : f32 to vector<8x512xf32>
    %192 = arith.maximumf %190, %191 : vector<8x512xf32>
    %193 = vector.extract_strided_slice %192 {offsets = [0, 0], sizes = [8, 64], strides = [1, 1]} : vector<8x512xf32> to vector<8x64xf32>
    %194 = vector.extract_strided_slice %192 {offsets = [0, 64], sizes = [8, 64], strides = [1, 1]} : vector<8x512xf32> to vector<8x64xf32>
    %195 = arith.maximumf %193, %194 : vector<8x64xf32>
    %196 = vector.extract_strided_slice %192 {offsets = [0, 128], sizes = [8, 64], strides = [1, 1]} : vector<8x512xf32> to vector<8x64xf32>
    %197 = vector.extract_strided_slice %192 {offsets = [0, 192], sizes = [8, 64], strides = [1, 1]} : vector<8x512xf32> to vector<8x64xf32>
    %198 = arith.maximumf %196, %197 : vector<8x64xf32>
    %199 = vector.extract_strided_slice %192 {offsets = [0, 256], sizes = [8, 64], strides = [1, 1]} : vector<8x512xf32> to vector<8x64xf32>
    %200 = vector.extract_strided_slice %192 {offsets = [0, 320], sizes = [8, 64], strides = [1, 1]} : vector<8x512xf32> to vector<8x64xf32>
    %201 = arith.maximumf %199, %200 : vector<8x64xf32>
    %202 = vector.extract_strided_slice %192 {offsets = [0, 384], sizes = [8, 64], strides = [1, 1]} : vector<8x512xf32> to vector<8x64xf32>
    %203 = vector.extract_strided_slice %192 {offsets = [0, 448], sizes = [8, 64], strides = [1, 1]} : vector<8x512xf32> to vector<8x64xf32>
    %204 = arith.maximumf %202, %203 : vector<8x64xf32>
    %205 = tpu.concatenate %195, %198, %201, %204 in 1 : vector<8x64xf32>, vector<8x64xf32>, vector<8x64xf32>, vector<8x64xf32> -> vector<8x256xf32>
    %206 = vector.extract_strided_slice %205 {offsets = [0, 0], sizes = [1, 256], strides = [1, 1]} : vector<8x256xf32> to vector<1x256xf32>
    %207 = vector.extract_strided_slice %205 {offsets = [1, 0], sizes = [1, 256], strides = [1, 1]} : vector<8x256xf32> to vector<1x256xf32>
    %208 = arith.maximumf %206, %207 : vector<1x256xf32>
    %209 = vector.extract_strided_slice %205 {offsets = [2, 0], sizes = [1, 256], strides = [1, 1]} : vector<8x256xf32> to vector<1x256xf32>
    %210 = vector.extract_strided_slice %205 {offsets = [3, 0], sizes = [1, 256], strides = [1, 1]} : vector<8x256xf32> to vector<1x256xf32>
    %211 = arith.maximumf %209, %210 : vector<1x256xf32>
    %212 = vector.extract_strided_slice %205 {offsets = [4, 0], sizes = [1, 256], strides = [1, 1]} : vector<8x256xf32> to vector<1x256xf32>
    %213 = vector.extract_strided_slice %205 {offsets = [5, 0], sizes = [1, 256], strides = [1, 1]} : vector<8x256xf32> to vector<1x256xf32>
    %214 = arith.maximumf %212, %213 : vector<1x256xf32>
    %215 = vector.extract_strided_slice %205 {offsets = [6, 0], sizes = [1, 256], strides = [1, 1]} : vector<8x256xf32> to vector<1x256xf32>
    %216 = vector.extract_strided_slice %205 {offsets = [7, 0], sizes = [1, 256], strides = [1, 1]} : vector<8x256xf32> to vector<1x256xf32>
    %217 = arith.maximumf %215, %216 : vector<1x256xf32>
    %218 = tpu.concatenate %208, %211, %214, %217 in 0 : vector<1x256xf32>, vector<1x256xf32>, vector<1x256xf32>, vector<1x256xf32> -> vector<4x256xf32>
    %cst_113 = arith.constant 0.000000e+00 : f32
    %219 = vector.broadcast %cst_113 : f32 to vector<4x512xf32>
    %cst_114 = arith.constant 0.000000e+00 : f32
    %220 = vector.broadcast %cst_114 : f32 to vector<1x256xf32>
    %221 = vector.extract_strided_slice %218 {offsets = [0, 0], sizes = [3, 256], strides = [1, 1]} : vector<4x256xf32> to vector<3x256xf32>
    %222 = tpu.concatenate %220, %221 in 0 : vector<1x256xf32>, vector<3x256xf32> -> vector<4x256xf32>
    %cst_115 = arith.constant 0.000000e+00 : f32
    %223 = vector.broadcast %cst_115 : f32 to vector<4x64xf32>
    %224 = vector.extract_strided_slice %222 {offsets = [0, 0], sizes = [4, 192], strides = [1, 1]} : vector<4x256xf32> to vector<4x192xf32>
    %225 = tpu.concatenate %223, %224 in 1 : vector<4x64xf32>, vector<4x192xf32> -> vector<4x256xf32>
    %c0_116 = arith.constant 0 : index
    %c0_117 = arith.constant 0 : index
    %c0_118 = arith.constant 0 : index
    %c0_119 = arith.constant 0 : index
    %226 = vector.load %arg6[%c0_116, %c0_117, %c0_118, %c0_119] : memref<3x3x256x512xbf16, #tpu.memory_space<vmem>>, vector<1x1x256x512xbf16>
    %227 = vector.shape_cast %226 : vector<1x1x256x512xbf16> to vector<256x512xbf16>
    %228 = arith.truncf %225 : vector<4x256xf32> to vector<4x256xbf16>
    %cst_120 = arith.constant dense<0.000000e+00> : vector<4x512xf32>
    %229 = tpu.matmul %228, %227, %cst_120 {dimension_numbers = #tpu.dot_dimension_numbers<[1], [0], [0], [1], [0, 0, 1, 1], [], []>} : vector<4x256xbf16>, vector<256x512xbf16>, vector<4x512xf32> -> vector<4x512xf32>
    %230 = arith.addf %219, %229 : vector<4x512xf32>
    %c0_121 = arith.constant 0 : index
    %c1_122 = arith.constant 1 : index
    %c0_123 = arith.constant 0 : index
    %c0_124 = arith.constant 0 : index
    %231 = vector.load %arg6[%c0_121, %c1_122, %c0_123, %c0_124] : memref<3x3x256x512xbf16, #tpu.memory_space<vmem>>, vector<1x1x256x512xbf16>
    %232 = vector.shape_cast %231 : vector<1x1x256x512xbf16> to vector<256x512xbf16>
    %233 = arith.truncf %222 : vector<4x256xf32> to vector<4x256xbf16>
    %cst_125 = arith.constant dense<0.000000e+00> : vector<4x512xf32>
    %234 = tpu.matmul %233, %232, %cst_125 {dimension_numbers = #tpu.dot_dimension_numbers<[1], [0], [0], [1], [0, 0, 1, 1], [], []>} : vector<4x256xbf16>, vector<256x512xbf16>, vector<4x512xf32> -> vector<4x512xf32>
    %235 = arith.addf %230, %234 : vector<4x512xf32>
    %236 = vector.extract_strided_slice %222 {offsets = [0, 64], sizes = [4, 192], strides = [1, 1]} : vector<4x256xf32> to vector<4x192xf32>
    %cst_126 = arith.constant 0.000000e+00 : f32
    %237 = vector.broadcast %cst_126 : f32 to vector<4x64xf32>
    %238 = tpu.concatenate %236, %237 in 1 : vector<4x192xf32>, vector<4x64xf32> -> vector<4x256xf32>
    %c0_127 = arith.constant 0 : index
    %c2_128 = arith.constant 2 : index
    %c0_129 = arith.constant 0 : index
    %c0_130 = arith.constant 0 : index
    %239 = vector.load %arg6[%c0_127, %c2_128, %c0_129, %c0_130] : memref<3x3x256x512xbf16, #tpu.memory_space<vmem>>, vector<1x1x256x512xbf16>
    %240 = vector.shape_cast %239 : vector<1x1x256x512xbf16> to vector<256x512xbf16>
    %241 = arith.truncf %238 : vector<4x256xf32> to vector<4x256xbf16>
    %cst_131 = arith.constant dense<0.000000e+00> : vector<4x512xf32>
    %242 = tpu.matmul %241, %240, %cst_131 {dimension_numbers = #tpu.dot_dimension_numbers<[1], [0], [0], [1], [0, 0, 1, 1], [], []>} : vector<4x256xbf16>, vector<256x512xbf16>, vector<4x512xf32> -> vector<4x512xf32>
    %243 = arith.addf %235, %242 : vector<4x512xf32>
    %cst_132 = arith.constant 0.000000e+00 : f32
    %244 = vector.broadcast %cst_132 : f32 to vector<4x64xf32>
    %245 = vector.extract_strided_slice %218 {offsets = [0, 0], sizes = [4, 192], strides = [1, 1]} : vector<4x256xf32> to vector<4x192xf32>
    %246 = tpu.concatenate %244, %245 in 1 : vector<4x64xf32>, vector<4x192xf32> -> vector<4x256xf32>
    %c1_133 = arith.constant 1 : index
    %c0_134 = arith.constant 0 : index
    %c0_135 = arith.constant 0 : index
    %c0_136 = arith.constant 0 : index
    %247 = vector.load %arg6[%c1_133, %c0_134, %c0_135, %c0_136] : memref<3x3x256x512xbf16, #tpu.memory_space<vmem>>, vector<1x1x256x512xbf16>
    %248 = vector.shape_cast %247 : vector<1x1x256x512xbf16> to vector<256x512xbf16>
    %249 = arith.truncf %246 : vector<4x256xf32> to vector<4x256xbf16>
    %cst_137 = arith.constant dense<0.000000e+00> : vector<4x512xf32>
    %250 = tpu.matmul %249, %248, %cst_137 {dimension_numbers = #tpu.dot_dimension_numbers<[1], [0], [0], [1], [0, 0, 1, 1], [], []>} : vector<4x256xbf16>, vector<256x512xbf16>, vector<4x512xf32> -> vector<4x512xf32>
    %251 = arith.addf %243, %250 : vector<4x512xf32>
    %c1_138 = arith.constant 1 : index
    %c1_139 = arith.constant 1 : index
    %c0_140 = arith.constant 0 : index
    %c0_141 = arith.constant 0 : index
    %252 = vector.load %arg6[%c1_138, %c1_139, %c0_140, %c0_141] : memref<3x3x256x512xbf16, #tpu.memory_space<vmem>>, vector<1x1x256x512xbf16>
    %253 = vector.shape_cast %252 : vector<1x1x256x512xbf16> to vector<256x512xbf16>
    %254 = arith.truncf %218 : vector<4x256xf32> to vector<4x256xbf16>
    %cst_142 = arith.constant dense<0.000000e+00> : vector<4x512xf32>
    %255 = tpu.matmul %254, %253, %cst_142 {dimension_numbers = #tpu.dot_dimension_numbers<[1], [0], [0], [1], [0, 0, 1, 1], [], []>} : vector<4x256xbf16>, vector<256x512xbf16>, vector<4x512xf32> -> vector<4x512xf32>
    %256 = arith.addf %251, %255 : vector<4x512xf32>
    %257 = vector.extract_strided_slice %218 {offsets = [0, 64], sizes = [4, 192], strides = [1, 1]} : vector<4x256xf32> to vector<4x192xf32>
    %cst_143 = arith.constant 0.000000e+00 : f32
    %258 = vector.broadcast %cst_143 : f32 to vector<4x64xf32>
    %259 = tpu.concatenate %257, %258 in 1 : vector<4x192xf32>, vector<4x64xf32> -> vector<4x256xf32>
    %c1_144 = arith.constant 1 : index
    %c2_145 = arith.constant 2 : index
    %c0_146 = arith.constant 0 : index
    %c0_147 = arith.constant 0 : index
    %260 = vector.load %arg6[%c1_144, %c2_145, %c0_146, %c0_147] : memref<3x3x256x512xbf16, #tpu.memory_space<vmem>>, vector<1x1x256x512xbf16>
    %261 = vector.shape_cast %260 : vector<1x1x256x512xbf16> to vector<256x512xbf16>
    %262 = arith.truncf %259 : vector<4x256xf32> to vector<4x256xbf16>
    %cst_148 = arith.constant dense<0.000000e+00> : vector<4x512xf32>
    %263 = tpu.matmul %262, %261, %cst_148 {dimension_numbers = #tpu.dot_dimension_numbers<[1], [0], [0], [1], [0, 0, 1, 1], [], []>} : vector<4x256xbf16>, vector<256x512xbf16>, vector<4x512xf32> -> vector<4x512xf32>
    %264 = arith.addf %256, %263 : vector<4x512xf32>
    %265 = vector.extract_strided_slice %218 {offsets = [1, 0], sizes = [3, 256], strides = [1, 1]} : vector<4x256xf32> to vector<3x256xf32>
    %cst_149 = arith.constant 0.000000e+00 : f32
    %266 = vector.broadcast %cst_149 : f32 to vector<1x256xf32>
    %267 = tpu.concatenate %265, %266 in 0 : vector<3x256xf32>, vector<1x256xf32> -> vector<4x256xf32>
    %cst_150 = arith.constant 0.000000e+00 : f32
    %268 = vector.broadcast %cst_150 : f32 to vector<4x64xf32>
    %269 = vector.extract_strided_slice %267 {offsets = [0, 0], sizes = [4, 192], strides = [1, 1]} : vector<4x256xf32> to vector<4x192xf32>
    %270 = tpu.concatenate %268, %269 in 1 : vector<4x64xf32>, vector<4x192xf32> -> vector<4x256xf32>
    %c2_151 = arith.constant 2 : index
    %c0_152 = arith.constant 0 : index
    %c0_153 = arith.constant 0 : index
    %c0_154 = arith.constant 0 : index
    %271 = vector.load %arg6[%c2_151, %c0_152, %c0_153, %c0_154] : memref<3x3x256x512xbf16, #tpu.memory_space<vmem>>, vector<1x1x256x512xbf16>
    %272 = vector.shape_cast %271 : vector<1x1x256x512xbf16> to vector<256x512xbf16>
    %273 = arith.truncf %270 : vector<4x256xf32> to vector<4x256xbf16>
    %cst_155 = arith.constant dense<0.000000e+00> : vector<4x512xf32>
    %274 = tpu.matmul %273, %272, %cst_155 {dimension_numbers = #tpu.dot_dimension_numbers<[1], [0], [0], [1], [0, 0, 1, 1], [], []>} : vector<4x256xbf16>, vector<256x512xbf16>, vector<4x512xf32> -> vector<4x512xf32>
    %275 = arith.addf %264, %274 : vector<4x512xf32>
    %c2_156 = arith.constant 2 : index
    %c1_157 = arith.constant 1 : index
    %c0_158 = arith.constant 0 : index
    %c0_159 = arith.constant 0 : index
    %276 = vector.load %arg6[%c2_156, %c1_157, %c0_158, %c0_159] : memref<3x3x256x512xbf16, #tpu.memory_space<vmem>>, vector<1x1x256x512xbf16>
    %277 = vector.shape_cast %276 : vector<1x1x256x512xbf16> to vector<256x512xbf16>
    %278 = arith.truncf %267 : vector<4x256xf32> to vector<4x256xbf16>
    %cst_160 = arith.constant dense<0.000000e+00> : vector<4x512xf32>
    %279 = tpu.matmul %278, %277, %cst_160 {dimension_numbers = #tpu.dot_dimension_numbers<[1], [0], [0], [1], [0, 0, 1, 1], [], []>} : vector<4x256xbf16>, vector<256x512xbf16>, vector<4x512xf32> -> vector<4x512xf32>
    %280 = arith.addf %275, %279 : vector<4x512xf32>
    %281 = vector.extract_strided_slice %267 {offsets = [0, 64], sizes = [4, 192], strides = [1, 1]} : vector<4x256xf32> to vector<4x192xf32>
    %cst_161 = arith.constant 0.000000e+00 : f32
    %282 = vector.broadcast %cst_161 : f32 to vector<4x64xf32>
    %283 = tpu.concatenate %281, %282 in 1 : vector<4x192xf32>, vector<4x64xf32> -> vector<4x256xf32>
    %c2_162 = arith.constant 2 : index
    %c2_163 = arith.constant 2 : index
    %c0_164 = arith.constant 0 : index
    %c0_165 = arith.constant 0 : index
    %284 = vector.load %arg6[%c2_162, %c2_163, %c0_164, %c0_165] : memref<3x3x256x512xbf16, #tpu.memory_space<vmem>>, vector<1x1x256x512xbf16>
    %285 = vector.shape_cast %284 : vector<1x1x256x512xbf16> to vector<256x512xbf16>
    %286 = arith.truncf %283 : vector<4x256xf32> to vector<4x256xbf16>
    %cst_166 = arith.constant dense<0.000000e+00> : vector<4x512xf32>
    %287 = tpu.matmul %286, %285, %cst_166 {dimension_numbers = #tpu.dot_dimension_numbers<[1], [0], [0], [1], [0, 0, 1, 1], [], []>} : vector<4x256xbf16>, vector<256x512xbf16>, vector<4x512xf32> -> vector<4x512xf32>
    %288 = arith.addf %280, %287 : vector<4x512xf32>
    %c0_167 = arith.constant 0 : index
    %c0_168 = arith.constant 0 : index
    %289 = vector.load %arg7[%c0_167, %c0_168] : memref<1x512xf32, #tpu.memory_space<vmem>>, vector<1x512xf32>
    %290 = vector.broadcast %289 : vector<1x512xf32> to vector<4x512xf32>
    %291 = arith.addf %288, %290 : vector<4x512xf32>
    %cst_169 = arith.constant 0.000000e+00 : f32
    %292 = vector.broadcast %cst_169 : f32 to vector<4x512xf32>
    %293 = arith.maximumf %291, %292 : vector<4x512xf32>
    %294 = vector.extract_strided_slice %293 {offsets = [0, 0], sizes = [4, 128], strides = [1, 1]} : vector<4x512xf32> to vector<4x128xf32>
    %295 = vector.extract_strided_slice %293 {offsets = [0, 128], sizes = [4, 128], strides = [1, 1]} : vector<4x512xf32> to vector<4x128xf32>
    %296 = arith.maximumf %294, %295 : vector<4x128xf32>
    %297 = vector.extract_strided_slice %293 {offsets = [0, 256], sizes = [4, 128], strides = [1, 1]} : vector<4x512xf32> to vector<4x128xf32>
    %298 = vector.extract_strided_slice %293 {offsets = [0, 384], sizes = [4, 128], strides = [1, 1]} : vector<4x512xf32> to vector<4x128xf32>
    %299 = arith.maximumf %297, %298 : vector<4x128xf32>
    %300 = tpu.concatenate %296, %299 in 1 : vector<4x128xf32>, vector<4x128xf32> -> vector<4x256xf32>
    %301 = vector.extract_strided_slice %300 {offsets = [0, 0], sizes = [1, 256], strides = [1, 1]} : vector<4x256xf32> to vector<1x256xf32>
    %302 = vector.extract_strided_slice %300 {offsets = [1, 0], sizes = [1, 256], strides = [1, 1]} : vector<4x256xf32> to vector<1x256xf32>
    %303 = arith.maximumf %301, %302 : vector<1x256xf32>
    %304 = vector.extract_strided_slice %300 {offsets = [2, 0], sizes = [1, 256], strides = [1, 1]} : vector<4x256xf32> to vector<1x256xf32>
    %305 = vector.extract_strided_slice %300 {offsets = [3, 0], sizes = [1, 256], strides = [1, 1]} : vector<4x256xf32> to vector<1x256xf32>
    %306 = arith.maximumf %304, %305 : vector<1x256xf32>
    %307 = tpu.concatenate %303, %306 in 0 : vector<1x256xf32>, vector<1x256xf32> -> vector<2x256xf32>
    %cst_170 = arith.constant 0.000000e+00 : f32
    %308 = vector.broadcast %cst_170 : f32 to vector<2x512xf32>
    %cst_171 = arith.constant 0.000000e+00 : f32
    %309 = vector.broadcast %cst_171 : f32 to vector<1x256xf32>
    %310 = vector.extract_strided_slice %307 {offsets = [0, 0], sizes = [1, 256], strides = [1, 1]} : vector<2x256xf32> to vector<1x256xf32>
    %311 = tpu.concatenate %309, %310 in 0 : vector<1x256xf32>, vector<1x256xf32> -> vector<2x256xf32>
    %cst_172 = arith.constant 0.000000e+00 : f32
    %312 = vector.broadcast %cst_172 : f32 to vector<2x128xf32>
    %313 = vector.extract_strided_slice %311 {offsets = [0, 0], sizes = [2, 128], strides = [1, 1]} : vector<2x256xf32> to vector<2x128xf32>
    %314 = tpu.concatenate %312, %313 in 1 : vector<2x128xf32>, vector<2x128xf32> -> vector<2x256xf32>
    %c0_173 = arith.constant 0 : index
    %c0_174 = arith.constant 0 : index
    %c0_175 = arith.constant 0 : index
    %c0_176 = arith.constant 0 : index
    %315 = vector.load %arg8[%c0_173, %c0_174, %c0_175, %c0_176] : memref<3x3x256x512xbf16, #tpu.memory_space<vmem>>, vector<1x1x256x512xbf16>
    %316 = vector.shape_cast %315 : vector<1x1x256x512xbf16> to vector<256x512xbf16>
    %317 = arith.truncf %314 : vector<2x256xf32> to vector<2x256xbf16>
    %cst_177 = arith.constant dense<0.000000e+00> : vector<2x512xf32>
    %318 = tpu.matmul %317, %316, %cst_177 {dimension_numbers = #tpu.dot_dimension_numbers<[1], [0], [0], [1], [0, 0, 1, 1], [], []>} : vector<2x256xbf16>, vector<256x512xbf16>, vector<2x512xf32> -> vector<2x512xf32>
    %319 = arith.addf %308, %318 : vector<2x512xf32>
    %c0_178 = arith.constant 0 : index
    %c1_179 = arith.constant 1 : index
    %c0_180 = arith.constant 0 : index
    %c0_181 = arith.constant 0 : index
    %320 = vector.load %arg8[%c0_178, %c1_179, %c0_180, %c0_181] : memref<3x3x256x512xbf16, #tpu.memory_space<vmem>>, vector<1x1x256x512xbf16>
    %321 = vector.shape_cast %320 : vector<1x1x256x512xbf16> to vector<256x512xbf16>
    %322 = arith.truncf %311 : vector<2x256xf32> to vector<2x256xbf16>
    %cst_182 = arith.constant dense<0.000000e+00> : vector<2x512xf32>
    %323 = tpu.matmul %322, %321, %cst_182 {dimension_numbers = #tpu.dot_dimension_numbers<[1], [0], [0], [1], [0, 0, 1, 1], [], []>} : vector<2x256xbf16>, vector<256x512xbf16>, vector<2x512xf32> -> vector<2x512xf32>
    %324 = arith.addf %319, %323 : vector<2x512xf32>
    %325 = vector.extract_strided_slice %311 {offsets = [0, 128], sizes = [2, 128], strides = [1, 1]} : vector<2x256xf32> to vector<2x128xf32>
    %cst_183 = arith.constant 0.000000e+00 : f32
    %326 = vector.broadcast %cst_183 : f32 to vector<2x128xf32>
    %327 = tpu.concatenate %325, %326 in 1 : vector<2x128xf32>, vector<2x128xf32> -> vector<2x256xf32>
    %c0_184 = arith.constant 0 : index
    %c2_185 = arith.constant 2 : index
    %c0_186 = arith.constant 0 : index
    %c0_187 = arith.constant 0 : index
    %328 = vector.load %arg8[%c0_184, %c2_185, %c0_186, %c0_187] : memref<3x3x256x512xbf16, #tpu.memory_space<vmem>>, vector<1x1x256x512xbf16>
    %329 = vector.shape_cast %328 : vector<1x1x256x512xbf16> to vector<256x512xbf16>
    %330 = arith.truncf %327 : vector<2x256xf32> to vector<2x256xbf16>
    %cst_188 = arith.constant dense<0.000000e+00> : vector<2x512xf32>
    %331 = tpu.matmul %330, %329, %cst_188 {dimension_numbers = #tpu.dot_dimension_numbers<[1], [0], [0], [1], [0, 0, 1, 1], [], []>} : vector<2x256xbf16>, vector<256x512xbf16>, vector<2x512xf32> -> vector<2x512xf32>
    %332 = arith.addf %324, %331 : vector<2x512xf32>
    %cst_189 = arith.constant 0.000000e+00 : f32
    %333 = vector.broadcast %cst_189 : f32 to vector<2x128xf32>
    %334 = vector.extract_strided_slice %307 {offsets = [0, 0], sizes = [2, 128], strides = [1, 1]} : vector<2x256xf32> to vector<2x128xf32>
    %335 = tpu.concatenate %333, %334 in 1 : vector<2x128xf32>, vector<2x128xf32> -> vector<2x256xf32>
    %c1_190 = arith.constant 1 : index
    %c0_191 = arith.constant 0 : index
    %c0_192 = arith.constant 0 : index
    %c0_193 = arith.constant 0 : index
    %336 = vector.load %arg8[%c1_190, %c0_191, %c0_192, %c0_193] : memref<3x3x256x512xbf16, #tpu.memory_space<vmem>>, vector<1x1x256x512xbf16>
    %337 = vector.shape_cast %336 : vector<1x1x256x512xbf16> to vector<256x512xbf16>
    %338 = arith.truncf %335 : vector<2x256xf32> to vector<2x256xbf16>
    %cst_194 = arith.constant dense<0.000000e+00> : vector<2x512xf32>
    %339 = tpu.matmul %338, %337, %cst_194 {dimension_numbers = #tpu.dot_dimension_numbers<[1], [0], [0], [1], [0, 0, 1, 1], [], []>} : vector<2x256xbf16>, vector<256x512xbf16>, vector<2x512xf32> -> vector<2x512xf32>
    %340 = arith.addf %332, %339 : vector<2x512xf32>
    %c1_195 = arith.constant 1 : index
    %c1_196 = arith.constant 1 : index
    %c0_197 = arith.constant 0 : index
    %c0_198 = arith.constant 0 : index
    %341 = vector.load %arg8[%c1_195, %c1_196, %c0_197, %c0_198] : memref<3x3x256x512xbf16, #tpu.memory_space<vmem>>, vector<1x1x256x512xbf16>
    %342 = vector.shape_cast %341 : vector<1x1x256x512xbf16> to vector<256x512xbf16>
    %343 = arith.truncf %307 : vector<2x256xf32> to vector<2x256xbf16>
    %cst_199 = arith.constant dense<0.000000e+00> : vector<2x512xf32>
    %344 = tpu.matmul %343, %342, %cst_199 {dimension_numbers = #tpu.dot_dimension_numbers<[1], [0], [0], [1], [0, 0, 1, 1], [], []>} : vector<2x256xbf16>, vector<256x512xbf16>, vector<2x512xf32> -> vector<2x512xf32>
    %345 = arith.addf %340, %344 : vector<2x512xf32>
    %346 = vector.extract_strided_slice %307 {offsets = [0, 128], sizes = [2, 128], strides = [1, 1]} : vector<2x256xf32> to vector<2x128xf32>
    %cst_200 = arith.constant 0.000000e+00 : f32
    %347 = vector.broadcast %cst_200 : f32 to vector<2x128xf32>
    %348 = tpu.concatenate %346, %347 in 1 : vector<2x128xf32>, vector<2x128xf32> -> vector<2x256xf32>
    %c1_201 = arith.constant 1 : index
    %c2_202 = arith.constant 2 : index
    %c0_203 = arith.constant 0 : index
    %c0_204 = arith.constant 0 : index
    %349 = vector.load %arg8[%c1_201, %c2_202, %c0_203, %c0_204] : memref<3x3x256x512xbf16, #tpu.memory_space<vmem>>, vector<1x1x256x512xbf16>
    %350 = vector.shape_cast %349 : vector<1x1x256x512xbf16> to vector<256x512xbf16>
    %351 = arith.truncf %348 : vector<2x256xf32> to vector<2x256xbf16>
    %cst_205 = arith.constant dense<0.000000e+00> : vector<2x512xf32>
    %352 = tpu.matmul %351, %350, %cst_205 {dimension_numbers = #tpu.dot_dimension_numbers<[1], [0], [0], [1], [0, 0, 1, 1], [], []>} : vector<2x256xbf16>, vector<256x512xbf16>, vector<2x512xf32> -> vector<2x512xf32>
    %353 = arith.addf %345, %352 : vector<2x512xf32>
    %354 = vector.extract_strided_slice %307 {offsets = [1, 0], sizes = [1, 256], strides = [1, 1]} : vector<2x256xf32> to vector<1x256xf32>
    %cst_206 = arith.constant 0.000000e+00 : f32
    %355 = vector.broadcast %cst_206 : f32 to vector<1x256xf32>
    %356 = tpu.concatenate %354, %355 in 0 : vector<1x256xf32>, vector<1x256xf32> -> vector<2x256xf32>
    %cst_207 = arith.constant 0.000000e+00 : f32
    %357 = vector.broadcast %cst_207 : f32 to vector<2x128xf32>
    %358 = vector.extract_strided_slice %356 {offsets = [0, 0], sizes = [2, 128], strides = [1, 1]} : vector<2x256xf32> to vector<2x128xf32>
    %359 = tpu.concatenate %357, %358 in 1 : vector<2x128xf32>, vector<2x128xf32> -> vector<2x256xf32>
    %c2_208 = arith.constant 2 : index
    %c0_209 = arith.constant 0 : index
    %c0_210 = arith.constant 0 : index
    %c0_211 = arith.constant 0 : index
    %360 = vector.load %arg8[%c2_208, %c0_209, %c0_210, %c0_211] : memref<3x3x256x512xbf16, #tpu.memory_space<vmem>>, vector<1x1x256x512xbf16>
    %361 = vector.shape_cast %360 : vector<1x1x256x512xbf16> to vector<256x512xbf16>
    %362 = arith.truncf %359 : vector<2x256xf32> to vector<2x256xbf16>
    %cst_212 = arith.constant dense<0.000000e+00> : vector<2x512xf32>
    %363 = tpu.matmul %362, %361, %cst_212 {dimension_numbers = #tpu.dot_dimension_numbers<[1], [0], [0], [1], [0, 0, 1, 1], [], []>} : vector<2x256xbf16>, vector<256x512xbf16>, vector<2x512xf32> -> vector<2x512xf32>
    %364 = arith.addf %353, %363 : vector<2x512xf32>
    %c2_213 = arith.constant 2 : index
    %c1_214 = arith.constant 1 : index
    %c0_215 = arith.constant 0 : index
    %c0_216 = arith.constant 0 : index
    %365 = vector.load %arg8[%c2_213, %c1_214, %c0_215, %c0_216] : memref<3x3x256x512xbf16, #tpu.memory_space<vmem>>, vector<1x1x256x512xbf16>
    %366 = vector.shape_cast %365 : vector<1x1x256x512xbf16> to vector<256x512xbf16>
    %367 = arith.truncf %356 : vector<2x256xf32> to vector<2x256xbf16>
    %cst_217 = arith.constant dense<0.000000e+00> : vector<2x512xf32>
    %368 = tpu.matmul %367, %366, %cst_217 {dimension_numbers = #tpu.dot_dimension_numbers<[1], [0], [0], [1], [0, 0, 1, 1], [], []>} : vector<2x256xbf16>, vector<256x512xbf16>, vector<2x512xf32> -> vector<2x512xf32>
    %369 = arith.addf %364, %368 : vector<2x512xf32>
    %370 = vector.extract_strided_slice %356 {offsets = [0, 128], sizes = [2, 128], strides = [1, 1]} : vector<2x256xf32> to vector<2x128xf32>
    %cst_218 = arith.constant 0.000000e+00 : f32
    %371 = vector.broadcast %cst_218 : f32 to vector<2x128xf32>
    %372 = tpu.concatenate %370, %371 in 1 : vector<2x128xf32>, vector<2x128xf32> -> vector<2x256xf32>
    %c2_219 = arith.constant 2 : index
    %c2_220 = arith.constant 2 : index
    %c0_221 = arith.constant 0 : index
    %c0_222 = arith.constant 0 : index
    %373 = vector.load %arg8[%c2_219, %c2_220, %c0_221, %c0_222] : memref<3x3x256x512xbf16, #tpu.memory_space<vmem>>, vector<1x1x256x512xbf16>
    %374 = vector.shape_cast %373 : vector<1x1x256x512xbf16> to vector<256x512xbf16>
    %375 = arith.truncf %372 : vector<2x256xf32> to vector<2x256xbf16>
    %cst_223 = arith.constant dense<0.000000e+00> : vector<2x512xf32>
    %376 = tpu.matmul %375, %374, %cst_223 {dimension_numbers = #tpu.dot_dimension_numbers<[1], [0], [0], [1], [0, 0, 1, 1], [], []>} : vector<2x256xbf16>, vector<256x512xbf16>, vector<2x512xf32> -> vector<2x512xf32>
    %377 = arith.addf %369, %376 : vector<2x512xf32>
    %c0_224 = arith.constant 0 : index
    %c0_225 = arith.constant 0 : index
    %378 = vector.load %arg9[%c0_224, %c0_225] : memref<1x512xf32, #tpu.memory_space<vmem>>, vector<1x512xf32>
    %379 = vector.broadcast %378 : vector<1x512xf32> to vector<2x512xf32>
    %380 = arith.addf %377, %379 : vector<2x512xf32>
    %cst_226 = arith.constant 0.000000e+00 : f32
    %381 = vector.broadcast %cst_226 : f32 to vector<2x512xf32>
    %382 = arith.maximumf %380, %381 : vector<2x512xf32>
    %383 = vector.extract_strided_slice %382 {offsets = [0, 0], sizes = [2, 256], strides = [1, 1]} : vector<2x512xf32> to vector<2x256xf32>
    %384 = vector.extract_strided_slice %382 {offsets = [0, 256], sizes = [2, 256], strides = [1, 1]} : vector<2x512xf32> to vector<2x256xf32>
    %385 = arith.maximumf %383, %384 : vector<2x256xf32>
    %386 = vector.extract_strided_slice %385 {offsets = [0, 0], sizes = [1, 256], strides = [1, 1]} : vector<2x256xf32> to vector<1x256xf32>
    %387 = vector.extract_strided_slice %385 {offsets = [1, 0], sizes = [1, 256], strides = [1, 1]} : vector<2x256xf32> to vector<1x256xf32>
    %388 = arith.maximumf %386, %387 : vector<1x256xf32>
    %cst_227 = arith.constant dense<0.000000e+00> : vector<256xf32>
    %389 = vector.multi_reduction <add>, %388, %cst_227 [0] : vector<1x256xf32> to vector<256xf32>
    %390 = vector.shape_cast %389 : vector<256xf32> to vector<1x256xf32>
    %cst_228 = arith.constant 1.000000e+00 : f32
    %391 = vector.broadcast %cst_228 : f32 to vector<1x256xf32>
    %392 = arith.mulf %390, %391 : vector<1x256xf32>
    %393 = arith.truncf %392 : vector<1x256xf32> to vector<1x256xbf16>
    %c0_229 = arith.constant 0 : index
    %c0_230 = arith.constant 0 : index
    %394 = vector.load %arg10[%c0_229, %c0_230] : memref<256x512xbf16, #tpu.memory_space<vmem>>, vector<256x512xbf16>
    %cst_231 = arith.constant dense<0.000000e+00> : vector<1x512xf32>
    %395 = tpu.matmul %393, %394, %cst_231 {dimension_numbers = #tpu.dot_dimension_numbers<[1], [0], [0], [1], [0, 0, 1, 1], [], []>} : vector<1x256xbf16>, vector<256x512xbf16>, vector<1x512xf32> -> vector<1x512xf32>
    %c0_232 = arith.constant 0 : index
    %c0_233 = arith.constant 0 : index
    %396 = vector.load %arg11[%c0_232, %c0_233] : memref<1x512xf32, #tpu.memory_space<vmem>>, vector<1x512xf32>
    %397 = arith.addf %395, %396 : vector<1x512xf32>
    %cst_234 = arith.constant 0.000000e+00 : f32
    %398 = vector.broadcast %cst_234 : f32 to vector<1x512xf32>
    %399 = arith.maximumf %397, %398 : vector<1x512xf32>
    %400 = arith.truncf %399 : vector<1x512xf32> to vector<1x512xbf16>
    %c0_235 = arith.constant 0 : index
    %c0_236 = arith.constant 0 : index
    %401 = vector.load %arg12[%c0_235, %c0_236] : memref<512x256xbf16, #tpu.memory_space<vmem>>, vector<512x256xbf16>
    %cst_237 = arith.constant dense<0.000000e+00> : vector<1x256xf32>
    %402 = tpu.matmul %400, %401, %cst_237 {dimension_numbers = #tpu.dot_dimension_numbers<[1], [0], [0], [1], [0, 0, 1, 1], [], []>} : vector<1x512xbf16>, vector<512x256xbf16>, vector<1x256xf32> -> vector<1x256xf32>
    %c0_238 = arith.constant 0 : index
    %c0_239 = arith.constant 0 : index
    %403 = vector.load %arg13[%c0_238, %c0_239] : memref<1x256xf32, #tpu.memory_space<vmem>>, vector<1x256xf32>
    %404 = arith.addf %402, %403 : vector<1x256xf32>
    %cst_240 = arith.constant 0.000000e+00 : f32
    %405 = vector.broadcast %cst_240 : f32 to vector<1x256xf32>
    %406 = arith.maximumf %404, %405 : vector<1x256xf32>
    %407 = arith.truncf %406 : vector<1x256xf32> to vector<1x256xbf16>
    %c0_241 = arith.constant 0 : index
    %c0_242 = arith.constant 0 : index
    %408 = vector.load %arg14[%c0_241, %c0_242] : memref<256x600xbf16, #tpu.memory_space<vmem>>, vector<256x600xbf16>
    %cst_243 = arith.constant dense<0.000000e+00> : vector<1x600xf32>
    %409 = tpu.matmul %407, %408, %cst_243 {dimension_numbers = #tpu.dot_dimension_numbers<[1], [0], [0], [1], [0, 0, 1, 1], [], []>} : vector<1x256xbf16>, vector<256x600xbf16>, vector<1x600xf32> -> vector<1x600xf32>
    %c0_244 = arith.constant 0 : index
    %c0_245 = arith.constant 0 : index
    %410 = vector.load %arg15[%c0_244, %c0_245] : memref<1x600xf32, #tpu.memory_space<vmem>>, vector<1x600xf32>
    %411 = arith.addf %409, %410 : vector<1x600xf32>
    %c0_246 = arith.constant 0 : index
    %c0_247 = arith.constant 0 : index
    %c0_248 = arith.constant 0 : index
    %412 = vector.load %arg16[%c0_246, %c0_247, %c0_248] : memref<1x1x600xf32, #tpu.memory_space<vmem>>, vector<1x1x600xf32>
    %413 = vector.shape_cast %412 : vector<1x1x600xf32> to vector<1x600xf32>
    %414 = vector.shape_cast %411 : vector<1x600xf32> to vector<1x1x600xf32>
    tpu.vector_store %arg16[%c0_246, %c0_247, %c0_248], %414 {strides = array<i32>} : memref<1x1x600xf32, #tpu.memory_space<vmem>>, vector<1x1x600xf32>,
    return
  }
  func.func @transform_0(%arg0: i32) -> (i32, i32, i32) {
    %c0_i32 = arith.constant 0 : i32
    %c0_i32_0 = arith.constant 0 : i32
    %c0_i32_1 = arith.constant 0 : i32
    return %arg0, %c0_i32, %c0_i32_0 : i32, i32, i32
  }
  func.func @transform_1(%arg0: i32) -> (i32, i32, i32, i32) {
    %c0_i32 = arith.constant 0 : i32
    %c0_i32_0 = arith.constant 0 : i32
    %c0_i32_1 = arith.constant 0 : i32
    %c0_i32_2 = arith.constant 0 : i32
    %c0_i32_3 = arith.constant 0 : i32
    return %c0_i32, %c0_i32_0, %c0_i32_1, %c0_i32_2 : i32, i32, i32, i32
  }
  func.func @transform_2(%arg0: i32) -> (i32, i32) {
    %c0_i32 = arith.constant 0 : i32
    %c0_i32_0 = arith.constant 0 : i32
    %c0_i32_1 = arith.constant 0 : i32
    return %c0_i32, %c0_i32_0 : i32, i32
  }
  func.func @transform_3(%arg0: i32) -> (i32, i32, i32, i32) {
    %c0_i32 = arith.constant 0 : i32
    %c0_i32_0 = arith.constant 0 : i32
    %c0_i32_1 = arith.constant 0 : i32
    %c0_i32_2 = arith.constant 0 : i32
    %c0_i32_3 = arith.constant 0 : i32
    return %c0_i32, %c0_i32_0, %c0_i32_1, %c0_i32_2 : i32, i32, i32, i32
  }
  func.func @transform_4(%arg0: i32) -> (i32, i32) {
    %c0_i32 = arith.constant 0 : i32
    %c0_i32_0 = arith.constant 0 : i32
    %c0_i32_1 = arith.constant 0 : i32
    return %c0_i32, %c0_i32_0 : i32, i32
  }
  func.func @transform_5(%arg0: i32) -> (i32, i32, i32, i32) {
    %c0_i32 = arith.constant 0 : i32
    %c0_i32_0 = arith.constant 0 : i32
    %c0_i32_1 = arith.constant 0 : i32
    %c0_i32_2 = arith.constant 0 : i32
    %c0_i32_3 = arith.constant 0 : i32
    return %c0_i32, %c0_i32_0, %c0_i32_1, %c0_i32_2 : i32, i32, i32, i32
  }
  func.func @transform_6(%arg0: i32) -> (i32, i32) {
    %c0_i32 = arith.constant 0 : i32
    %c0_i32_0 = arith.constant 0 : i32
    %c0_i32_1 = arith.constant 0 : i32
    return %c0_i32, %c0_i32_0 : i32, i32
  }
  func.func @transform_7(%arg0: i32) -> (i32, i32, i32, i32) {
    %c0_i32 = arith.constant 0 : i32
    %c0_i32_0 = arith.constant 0 : i32
    %c0_i32_1 = arith.constant 0 : i32
    %c0_i32_2 = arith.constant 0 : i32
    %c0_i32_3 = arith.constant 0 : i32
    return %c0_i32, %c0_i32_0, %c0_i32_1, %c0_i32_2 : i32, i32, i32, i32
  }
  func.func @transform_8(%arg0: i32) -> (i32, i32) {
    %c0_i32 = arith.constant 0 : i32
    %c0_i32_0 = arith.constant 0 : i32
    %c0_i32_1 = arith.constant 0 : i32
    return %c0_i32, %c0_i32_0 : i32, i32
  }
  func.func @transform_9(%arg0: i32) -> (i32, i32) {
    %c0_i32 = arith.constant 0 : i32
    %c0_i32_0 = arith.constant 0 : i32
    %c0_i32_1 = arith.constant 0 : i32
    return %c0_i32, %c0_i32_0 : i32, i32
  }
  func.func @transform_10(%arg0: i32) -> (i32, i32) {
    %c0_i32 = arith.constant 0 : i32
    %c0_i32_0 = arith.constant 0 : i32
    %c0_i32_1 = arith.constant 0 : i32
    return %c0_i32, %c0_i32_0 : i32, i32
  }
  func.func @transform_11(%arg0: i32) -> (i32, i32) {
    %c0_i32 = arith.constant 0 : i32
    %c0_i32_0 = arith.constant 0 : i32
    %c0_i32_1 = arith.constant 0 : i32
    return %c0_i32, %c0_i32_0 : i32, i32
  }
  func.func @transform_12(%arg0: i32) -> (i32, i32) {
    %c0_i32 = arith.constant 0 : i32
    %c0_i32_0 = arith.constant 0 : i32
    %c0_i32_1 = arith.constant 0 : i32
    return %c0_i32, %c0_i32_0 : i32, i32
  }
  func.func @transform_13(%arg0: i32) -> (i32, i32) {
    %c0_i32 = arith.constant 0 : i32
    %c0_i32_0 = arith.constant 0 : i32
    %c0_i32_1 = arith.constant 0 : i32
    return %c0_i32, %c0_i32_0 : i32, i32
  }
  func.func @transform_14(%arg0: i32) -> (i32, i32) {
    %c0_i32 = arith.constant 0 : i32
    %c0_i32_0 = arith.constant 0 : i32
    %c0_i32_1 = arith.constant 0 : i32
    return %c0_i32, %c0_i32_0 : i32, i32
  }
  func.func @transform_15(%arg0: i32) -> (i32, i32, i32) {
    %c0_i32 = arith.constant 0 : i32
    %c0_i32_0 = arith.constant 0 : i32
    %c0_i32_1 = arith.constant 0 : i32
    return %arg0, %c0_i32, %c0_i32_0 : i32, i32, i32
  }
}

</mosaic_0001>

<bundles_post_ra>
// kernel: tile.23
= control target key start
LH: loop header
LB: loop body
LE: loop exit
PB: predicated region body
PF: predicated region fallthrough
CT: control target
= control target key end

     0   :  { %s28_s0 = inlined_call_operand.vmem [shape: f32[32], index: 0, kind: input, shape index: {}]   ;;  %s29_s1 = inlined_call_operand.vmem [shape: f32[16,32], index: 1, kind: output, shape index: {}]  }
   0x1   :  { %v4_v0 = vld [vmem:[%s28_s0] ss:$0 sm:$0xff] }
   0x2   :  { %5 = vst [vmem:[%s29_s1] sm:$0xff] %v4_v0  ;;  %8 = vst [vmem:[%s29_s1 + $0x8] sm:$0xff] %v4_v0 }

// kernel: tile.24
= control target key start
LH: loop header
LB: loop body
LE: loop exit
PB: predicated region body
PF: predicated region fallthrough
CT: control target
= control target key end

     0   :  { %s57_s8 = smov 96   ;;  %vm3_vm0 = vcmask 261120   ;;  %s59_s15 = smov 64   ;;  %vm9_vm1 = vcmask 1048320   ;;  %vm15_vm2 = vcmask 785920   ;;  %vm21_vm3 = vcmask 523520   ;;  %s94_s0 = inlined_call_operand.vmem [shape: f32[16,32], index: 0, kind: input, shape index: {}]   ;;  %s95_s1 = inlined_call_operand.vmem [shape: f32[1,512], index: 1, kind: output, shape index: {}]  }
   0x1   :  { %v48_v0 = vld [vmem:[%s94_s0 + $0x3] ss:$4 sm:$0xf]   ;;  %v49_v1 = vld [vmem:[%s94_s0 + $0x2] ss:$4 sm:$0xf]  }
   0x2   :  { %7 = vrot.lane.b32.xlu0 %v48_v0, %s57_s8  ;;  %v50_v2 = vld [vmem:[%s94_s0 + $0x1] ss:$4 sm:$0xf]   ;;  %v2_v3 = vld [vmem:[%s94_s0] ss:$4 sm:$0xf]  }
   0x3   :  { %s58_s0 = smov 32   ;;  %4 = vst.msk [vmem:[#allocation0] ss:$8 sm:$0xf] %vm3_vm0, %v2_v3  }
   0x4   :  { %19 = vrot.lane.b32.xlu1 %v50_v2, %s58_s0 }
   0x6   :  { %13 = vrot.lane.b32.xlu0 %v49_v1, %s59_s15 }
  0x74   :  { %v8_v4 = vpop.permute.xlu0 %7  }
  0x75   :  { %10 = vst.msk [vmem:[#allocation0] ss:$8 sm:$0xf] %vm9_vm1, %v8_v4  }
  0x76   :  { %v20_v5 = vpop.permute.xlu1 %19  }
  0x78   :  { %v14_v6 = vpop.permute.xlu0 %13  }
  0x79   :  { %16 = vst.msk [vmem:[#allocation0] ss:$8 sm:$0xf] %vm15_vm2, %v14_v6  }
  0x7a   :  { %22 = vst.msk [vmem:[#allocation0] ss:$8 sm:$0xf] %vm21_vm3, %v20_v5  }
  0x81   :  { %v26_v7 = vld [vmem:[#allocation0] sm:$0x1]  ;;  %v30_v8 = vld [vmem:[#allocation0 + $0x8] sm:$0x1]  ;;  %v35_v9 = vld [vmem:[#allocation0 + $0x10] sm:$0x1] }
  0x82   :  { %28 = vst [vmem:[%s95_s1] sm:$0x1] %v26_v7  ;;  %51 = vst [vmem:[%s95_s1 + $0x1] sm:$0x1] %v30_v8  ;;  %v41_v10 = vld [vmem:[#allocation0 + $0x18] sm:$0x1] }
  0x83   :  { %52 = vst [vmem:[%s95_s1 + $0x2] sm:$0x1] %v35_v9  ;;  %53 = vst [vmem:[%s95_s1 + $0x3] sm:$0x1] %v41_v10 }

// kernel: tile.28
= control target key start
LH: loop header
LB: loop body
LE: loop exit
PB: predicated region body
PF: predicated region fallthrough
CT: control target
= control target key end

     0   :  { %s22_s0 = inlined_call_operand.vmem [shape: f32[64], index: 0, kind: input, shape index: {}]   ;;  %s23_s1 = inlined_call_operand.vmem [shape: f32[8,64], index: 1, kind: output, shape index: {}]  }
   0x1   :  { %v4_v0 = vld [vmem:[%s22_s0] ss:$0 sm:$0xff] }
   0x2   :  { %5 = vst [vmem:[%s23_s1] sm:$0xff] %v4_v0 }

// kernel: tile.29
= control target key start
LH: loop header
LB: loop body
LE: loop exit
PB: predicated region body
PF: predicated region fallthrough
CT: control target
= control target key end

     0   :  { %vm3_vm0 = vcmask 523264   ;;  %s41_s8 = smov 64   ;;  %vm9_vm1 = vcmask 1048064   ;;  %s70_s0 = inlined_call_operand.vmem [shape: f32[8,64], index: 0, kind: input, shape index: {}]   ;;  %s71_s1 = inlined_call_operand.vmem [shape: f32[1,512], index: 1, kind: output, shape index: {}]  }
   0x1   :  { %v36_v0 = vld [vmem:[%s70_s0 + $0x1] ss:$2 sm:$0xf]   ;;  %v2_v1 = vld [vmem:[%s70_s0] ss:$2 sm:$0xf]  }
   0x2   :  { %7 = vrot.lane.b32.xlu0 %v36_v0, %s41_s8  ;;  %4 = vst.msk [vmem:[#allocation0] ss:$8 sm:$0xf] %vm3_vm0, %v2_v1  }
  0x74   :  { %v8_v2 = vpop.permute.xlu0 %7  }
  0x75   :  { %10 = vst.msk [vmem:[#allocation0] ss:$8 sm:$0xf] %vm9_vm1, %v8_v2  }
  0x7c   :  { %v14_v3 = vld [vmem:[#allocation0] sm:$0x1]  ;;  %v18_v4 = vld [vmem:[#allocation0 + $0x8] sm:$0x1]  ;;  %v23_v5 = vld [vmem:[#allocation0 + $0x10] sm:$0x1] }
  0x7d   :  { %16 = vst [vmem:[%s71_s1] sm:$0x1] %v14_v3  ;;  %37 = vst [vmem:[%s71_s1 + $0x1] sm:$0x1] %v18_v4  ;;  %v29_v6 = vld [vmem:[#allocation0 + $0x18] sm:$0x1] }
  0x7e   :  { %38 = vst [vmem:[%s71_s1 + $0x2] sm:$0x1] %v23_v5  ;;  %39 = vst [vmem:[%s71_s1 + $0x3] sm:$0x1] %v29_v6 }

// kernel: tile.33
= control target key start
LH: loop header
LB: loop body
LE: loop exit
PB: predicated region body
PF: predicated region fallthrough
CT: control target
= control target key end

     0   :  { %s22_s0 = inlined_call_operand.vmem [shape: f32[128], index: 0, kind: input, shape index: {}]   ;;  %s23_s1 = inlined_call_operand.vmem [shape: f32[4,128], index: 1, kind: output, shape index: {}]  }
   0x1   :  { %v4_v0 = vld [vmem:[%s22_s0] ss:$0 sm:$0xff] }
   0x2   :  { %5 = vst [vmem:[%s23_s1] sm:$0xf] %v4_v0 }

// kernel: cnn_forward.1
= control target key start
LH: loop header
LB: loop body
LE: loop exit
PB: predicated region body
PF: predicated region fallthrough
CT: control target
= control target key end

     0   :  { %s24208_s18 = smov 0   ;;  %s31175_s0 = inlined_call_operand.vmem [shape: f32[2,16,16], index: 0, kind: input, shape index: {}]   ;;  %s31176_s1 = inlined_call_operand.vmem [shape: f32[3,3,16,512], index: 1, kind: input, shape index: {}]   ;;  %s31177_s2 = inlined_call_operand.vmem [shape: f32[1,512], index: 2, kind: input, shape index: {}]   ;;  %s31178_s3 = inlined_call_operand.vmem [shape: bf16[3,3,256,512], index: 3, kind: input, shape index: {}]   ;;  %s31179_s4 = inlined_call_operand.vmem [shape: f32[1,512], index: 4, kind: input, shape index: {}]   ;;  %s31180_s5 = inlined_call_operand.vmem [shape: bf16[3,3,256,512], index: 5, kind: input, shape index: {}]   ;;  %s31181_s6 = inlined_call_operand.vmem [shape: f32[1,512], index: 6, kind: input, shape index: {}]   ;;  %s31182_s7 = inlined_call_operand.vmem [shape: bf16[3,3,256,512], index: 7, kind: input, shape index: {}]   ;;  %s31183_s8 = inlined_call_operand.vmem [shape: f32[1,512], index: 8, kind: input, shape index: {}]   ;;  %s31184_s9 = inlined_call_operand.vmem [shape: bf16[256,512], index: 9, kind: input, shape index: {}]   ;;  %s31185_s10 = inlined_call_operand.vmem [shape: f32[1,512], index: 10, kind: input, shape index: {}]   ;;  %s31186_s11 = inlined_call_operand.vmem [shape: bf16[512,256], index: 11, kind: input, shape index: {}]   ;;  %s31187_s12 = inlined_call_operand.vmem [shape: f32[1,256], index: 12, kind: input, shape index: {}]   ;;  %s31188_s13 = inlined_call_operand.vmem [shape: bf16[256,600], index: 13, kind: input, shape index: {}]   ;;  %s31189_s14 = inlined_call_operand.vmem [shape: f32[1,600], index: 14, kind: input, shape index: {}]   ;;  %s31190_s15 = inlined_call_operand.vmem [shape: f32[2,1,600], index: 15, kind: output, shape index: {}]  }
   0x1 LB: > { %s17117_s19 = sadd.s32 4294967295, %s24118_s18   ;;  %p17121_p0 = scmp.ge.s32.totalorder %s24118_s18, 1  ;;  %s24118_s18 = sphi %s24208_s18, %s25_s18  }
   0x2   : > { %p437_p1 = scmp.lt.s32.totalorder %s24118_s18, 3 }
   0x4   : > { %p438_p2 = pnand %p17121_p0, %p437_p1 }
   0x5   : > { %p484_p3 = scmp.lt.s32.totalorder (!%p438_p2), %s17117_s19, 1  ;;  %v17125_v0 = vld [vmem:[%s31176_s1 + $0x48] sm:$0xff] (!%p438_p2)  ;;  %v17124_v3 = vld [vmem:[%s31176_s1 + $0x40] sm:$0xff] (!%p438_p2)  ;;  %v17127_v5 = vld [vmem:[%s31176_s1 + $0x58] sm:$0xff] (!%p438_p2)  ;;  %v24120_v7 = vmov (!%p438_p2), 0.0   ;;  %vm498_vm0 = vcmask (!%p438_p2), 1040384  }
   0x6   : > { %441 = sbr.rel (%p438_p2) target bundleno = 4066 (0xfe2), region = 80  ;;  %v17129_v1 = vld [vmem:[%s31176_s1 + $0x68] sm:$0xff] (!%p438_p2)  ;;  %v17128_v4 = vld [vmem:[%s31176_s1 + $0x60] sm:$0xff] (!%p438_p2)  ;;  %600 = vmatprep.mubr.f32.mxu1 (!%p438_p2), %v24120_v7  ;;  %v17131_v8 = vld [vmem:[%s31176_s1 + $0x78] sm:$0xff] (!%p438_p2)  ;;  %938 = vmatprep.mubr.f32.mxu0 (!%p438_p2), %v24120_v7  ;;  %vm531_vm1 = vcmask (!%p438_p2), 130048   ;;  %s24121_s16 = smov (!%p438_p2), 127  }
   0x7   : > { %v20945_v2 = vpack.c.bf16 (!%p438_p2), %v17129_v1, %v17125_v0  ;;  %v20947_v6 = vpack.c.bf16 (!%p438_p2), %v17128_v4, %v17124_v3  ;;  %v20949_v9 = vpack.c.bf16 (!%p438_p2), %v17131_v8, %v17127_v5  ;;  %v17126_v10 = vld [vmem:[%s31176_s1 + $0x50] sm:$0xff] (!%p438_p2)  ;;  %v17141_v12 = vld [vmem:[%s31176_s1 + $0x88] sm:$0xff] (!%p438_p2)  ;;  %v17140_v16 = vld [vmem:[%s31176_s1 + $0x80] sm:$0xff] (!%p438_p2)  ;;  %s24122_s17 = smov (!%p438_p2), 1   ;;  %vm1581_vm2 = vcmask (!%p438_p2), 1046528   ;;  %s24123_s26 = smov (!%p438_p2), 96  }
   0x8   : > { %v17130_v11 = vld [vmem:[%s31176_s1 + $0x70] sm:$0xff] (!%p438_p2)  ;;  %v17145_v13 = vld [vmem:[%s31176_s1 + $0xa8] sm:$0xff] (!%p438_p2)  ;;  %v17144_v17 = vld [vmem:[%s31176_s1 + $0xa0] sm:$0xff] (!%p438_p2)  ;;  %vm856_vm3 = vcmask (!%p438_p2), 121856   ;;  %vm511_vm4 = vcmask (!%p438_p2), 7168   ;;  %s24124_s24 = smov (!%p438_p2), 64  }
   0x9   : > { %20946 = vmatprep.subr.bf16.mxu1 (!%p438_p2), %v20945_v2  ;;  %v515_v14 = vld [vmem:[%s31176_s1 + $0x8] sm:$0xff] (!%p438_p2)  ;;  %v20961_v15 = vpack.c.bf16 (!%p438_p2), %v17145_v13, %v17141_v12  ;;  %v20963_v21 = vpack.c.bf16 (!%p438_p2), %v17144_v17, %v17140_v16  ;;  %v20951_v24 = vpack.c.bf16 (!%p438_p2), %v17130_v11, %v17126_v10  ;;  %v514_v31 = vld [vmem:[%s31176_s1] sm:$0xff] (!%p438_p2)  ;;  %v517_v33 = vld [vmem:[%s31176_s1 + $0x18] sm:$0xff] (!%p438_p2)  ;;  %s24125_s20 = smov (!%p438_p2), 32   ;;  %vm2255_vm5 = vcmask (!%p438_p2), 261120  }
   0xa   : > { %20948 = vmatpush1.bf16.msra.mxu1 (!%p438_p2), %v20947_v6  ;;  %v519_v20 = vld [vmem:[%s31176_s1 + $0x28] sm:$0xff] (!%p438_p2)  ;;  %v518_v32 = vld [vmem:[%s31176_s1 + $0x20] sm:$0xff] (!%p438_p2)  ;;  %v521_v34 = vld [vmem:[%s31176_s1 + $0x38] sm:$0xff] (!%p438_p2)  ;;  %vm2258_vm6 = vcmask (!%p438_p2), 523264   ;;  %vm2261_vm7 = vcmask (!%p438_p2), 785408   ;;  %vm2320_vm8 = vcmask (!%p438_p2), 1041408  }
   0xb   : > { %20950 = vmatprep.subr.bf16.mxu1 (!%p438_p2), %v20949_v9  ;;  %20962 = vmatprep.subr.bf16.mxu0 (!%p438_p2), %v20961_v15  ;;  %v17153_v25 = vld [vmem:[%s31176_s1 + $0xc8] sm:$0xff] (!%p438_p2)  ;;  %v20953_v28 = vpack.c.bf16 (!%p438_p2), %v519_v20, %v515_v14  ;;  %v20955_v35 = vpack.c.bf16 (!%p438_p2), %v518_v32, %v514_v31  ;;  %v20957_v36 = vpack.c.bf16 (!%p438_p2), %v521_v34, %v517_v33  ;;  %v516_v41 = vld [vmem:[%s31176_s1 + $0x10] sm:$0xff] (!%p438_p2)  ;;  %v17152_v43 = vld [vmem:[%s31176_s1 + $0xc0] sm:$0xff] (!%p438_p2)  ;;  %vm2323_vm9 = vcmask (!%p438_p2), 1042432  }
   0xc   : > { %20964 = vmatpush1.bf16.msra.mxu0 (!%p438_p2), %v20963_v21  ;;  %v17157_v26 = vld [vmem:[%s31176_s1 + $0xe8] sm:$0xff] (!%p438_p2)  ;;  %v520_v42 = vld [vmem:[%s31176_s1 + $0x30] sm:$0xff] (!%p438_p2)  ;;  %v17156_v44 = vld [vmem:[%s31176_s1 + $0xe0] sm:$0xff] (!%p438_p2)  ;;  %vm2326_vm10 = vcmask (!%p438_p2), 1043456   ;;  %vm2329_vm11 = vcmask (!%p438_p2), 1044480   ;;  %vm2332_vm12 = vcmask (!%p438_p2), 1045504  }
   0xd   : > { %s31208_s19 = smov (!%p484_p3, %s17117_s19), 1  ;;  %v20969_v29 = vpack.c.bf16 %v17157_v26, %v17153_v25  ;;  %v17143_v45 = vld [vmem:[%s31176_s1 + $0x98] sm:$0xff]  ;;  %v17165_v47 = vld [vmem:[%s31176_s1 + $0x108] sm:$0xff]  ;;  %v20959_v49 = vpack.c.bf16 %v520_v42, %v516_v41  ;;  %v20971_v52 = vpack.c.bf16 %v17156_v44, %v17152_v43  ;;  %v17142_v57 = vld [vmem:[%s31176_s1 + $0x90] sm:$0xff] }
   0xe   : > { %s20922_s21 = sshll.u32 %s31208_s19, 4  ;;  %v17147_v46 = vld [vmem:[%s31176_s1 + $0xb8] sm:$0xff]  ;;  %v17169_v48 = vld [vmem:[%s31176_s1 + $0x128] sm:$0xff]  ;;  %v17146_v58 = vld [vmem:[%s31176_s1 + $0xb0] sm:$0xff] }
   0xf   : > { %s24254_s30 = scalar_lea.vmem %s31175_s0, %s20922_s21  ;;  %20970 = vmatprep.subr.bf16.mxu0 %v20969_v29  ;;  %v20965_v55 = vpack.c.bf16 %v17147_v46, %v17143_v45  ;;  %v20977_v56 = vpack.c.bf16 %v17169_v48, %v17165_v47  ;;  %v17164_v59 = vld [vmem:[%s31176_s1 + $0x100] sm:$0xff]  ;;  %v17155_v63 = vld [vmem:[%s31176_s1 + $0xd8] sm:$0xff]  ;;  %v17177_v1 = vld [vmem:[%s31176_s1 + $0x148] sm:$0xff]  ;;  %v20967_v5 = vpack.c.bf16 %v17146_v58, %v17142_v57 }
  0x10   : > { %v24266_v18 = vld [vmem:[%s24254_s30] sm:$0xff]  ;;  %v24269_v19 = vld [vmem:[%s24254_s30 + $0x8] sm:$0xff]  ;;  %v17159_v0 = vld [vmem:[%s31176_s1 + $0xf8] sm:$0xff] }
  0x11   : > { %v499_v22 = vrot.slane %v24266_v18, 7  ;;  %v500_v23 = vrot.slane %v24269_v19, 7  ;;  %v1582_v37 = vrot.slane %v24266_v18, 1  ;;  %v1583_v38 = vrot.slane %v24269_v19, 1  ;;  %v17168_v60 = vld [vmem:[%s31176_s1 + $0x120] sm:$0xff]  ;;  %v17181_v2 = vld [vmem:[%s31176_s1 + $0x168] sm:$0xff]  ;;  %vm17352_vm13 = vmneg %vm498_vm0 }
  0x12   : > { %v20979_v9 = vpack.c.bf16 %v17168_v60, %v17164_v59  ;;  %v20973_v11 = vpack.c.bf16 %v17159_v0, %v17155_v63  ;;  %v20985_v12 = vpack.c.bf16 %v17181_v2, %v17177_v1  ;;  %v17154_v13 = vld [vmem:[%s31176_s1 + $0xd0] sm:$0xff]  ;;  %v17176_v16 = vld [vmem:[%s31176_s1 + $0x140] sm:$0xff]  ;;  %v17167_v20 = vld [vmem:[%s31176_s1 + $0x118] sm:$0xff] }
  0x13   : > { %v503_v27 = vsel %vm498_vm0, 0.0, %v499_v22  ;;  %v501_v30 = vsel %vm498_vm0, %v499_v22, %v500_v23  ;;  %v24317_v39 = vsel %vm1581_vm2, %v1582_v37, %v1583_v38  ;;  %v24320_v40 = vsel %vm1581_vm2, %v1583_v38, 0.0  ;;  %v17158_v14 = vld [vmem:[%s31176_s1 + $0xf0] sm:$0xff]  ;;  %v17180_v17 = vld [vmem:[%s31176_s1 + $0x160] sm:$0xff]  ;;  %v17171_v21 = vld [vmem:[%s31176_s1 + $0x138] sm:$0xff] }
  0x14   : > { %850 = vrot.lane.b32.xlu1 %v503_v27, %s24121_s16  ;;  %505 = vrot.lane.b32.xlu0 %v503_v27, %s24122_s17  ;;  %v17189_v22 = vld [vmem:[%s31176_s1 + $0x188] sm:$0xff]  ;;  %v20987_v25 = vpack.c.bf16 %v17180_v17, %v17176_v16  ;;  %v20981_v26 = vpack.c.bf16 %v17171_v21, %v17167_v20  ;;  %v17170_v29 = vld [vmem:[%s31176_s1 + $0x130] sm:$0xff]  ;;  %vm24903_vm14 = vmpackc.low %vm17352_vm13, %vm17352_vm13 }
  0x15   : > { %17132 = vmatmul.mubr.msk.f32.vlgmr.msra.gmra.mrb[0].mxu1 %vm531_vm1, %v503_v27  ;;  %v17193_v23 = vld [vmem:[%s31176_s1 + $0x1a8] sm:$0xff]  ;;  %v17192_v31 = vld [vmem:[%s31176_s1 + $0x1a0] sm:$0xff]  ;;  %v17179_v32 = vld [vmem:[%s31176_s1 + $0x158] sm:$0xff] }
  0x16   : > { %20952 = vmatpush1.bf16.msra.mxu1 %v20951_v24  ;;  %606 = vmatprep.mubr.f32.mxu1 %v24120_v7  ;;  %v20975_v24 = vpack.c.bf16 %v17158_v14, %v17154_v13  ;;  %v17183_v33 = vld [vmem:[%s31176_s1 + $0x178] sm:$0xff]  ;;  %v17201_v34 = vld [vmem:[%s31176_s1 + $0x1c8] sm:$0xff]  ;;  %v17178_v44 = vld [vmem:[%s31176_s1 + $0x150] sm:$0xff] }
  0x17   : > { %20954 = vmatprep.subr.bf16.mxu1 %v20953_v28  ;;  %v17166_v28 = vld [vmem:[%s31176_s1 + $0x110] sm:$0xff]  ;;  %v20989_v42 = vpack.c.bf16 %v17183_v33, %v17179_v32  ;;  %v17200_v46 = vld [vmem:[%s31176_s1 + $0x1c0] sm:$0xff]  ;;  %v17203_v1 = vld [vmem:[%s31176_s1 + $0x1d8] sm:$0xff] }
  0x18   : > { %852 = vrot.lane.b32.xlu1 %v501_v30, %s24121_s16  ;;  %507 = vrot.lane.b32.xlu0 %v501_v30, %s24122_s17  ;;  %v20983_v37 = vpack.c.bf16 %v17170_v29, %v17166_v28  ;;  %v17204_v47 = vld [vmem:[%s31176_s1 + $0x1e0] sm:$0xff]  ;;  %v17190_v60 = vld [vmem:[%s31176_s1 + $0x190] sm:$0xff]  ;;  %vm17436_vm15 = vmneg %vm2255_vm5 }
  0x19   : > { %17133 = vmatmul.mubr.msk.f32.gmra.mrb[2].mxu1 %vm531_vm1, %v501_v30  ;;  %v24110_v59 = vld [vmem:[%s24254_s30] sm:$0xff]  ;;  %v17207_v2 = vld [vmem:[%s31176_s1 + $0x1f8] sm:$0xff]  ;;  %v17214_v17 = vld [vmem:[%s31176_s1 + $0x210] sm:$0xff] }
  0x1a   : > { %677 = vmatprep.mubr.f32.mxu1 %v24120_v7  ;;  %v17212_v63 = vld [vmem:[%s31176_s1 + $0x200] sm:$0xff]  ;;  %v17218_v20 = vld [vmem:[%s31176_s1 + $0x230] sm:$0xff] }
  0x1b   : > { %v17216_v0 = vld [vmem:[%s31176_s1 + $0x220] sm:$0xff] }
  0x1c   : > { %1036 = vrot.lane.b32.xlu0 %v24266_v18, %s24122_s17  ;;  %1038 = vrot.lane.b32.xlu1 %v24269_v19, %s24122_s17 }
  0x1d   : > { %17134 = vmatmul.mubr.msk.f32.vlgmr.msra.gmra.mrb[4].mxu1 %vm531_vm1, %v503_v27  ;;  %v20993_v27 = vpack.c.bf16 %v17193_v23, %v17189_v22  ;;  %v21015_v22 = vpack.c.bf16 %v17218_v20, %v17214_v17  ;;  %v21237_v17 = vld [vmem:[%s31178_s3 + $0x26c] ss:$16 sps:$4 sm:$0xff]   ;;  %v21232_v20 = vld [vmem:[%s31178_s3 + $0x260] ss:$16 sps:$4 sm:$0xff]  }
  0x1e   : > { %20956 = vmatpush1.bf16.msra.mxu1 %v20955_v35  ;;  %683 = vmatprep.mubr.f32.mxu1 %v24120_v7  ;;  %v17205_v35 = vld [vmem:[%s31176_s1 + $0x1e8] sm:$0xff] }
  0x1f   : > { %20958 = vmatprep.subr.bf16.mxu1 %v20957_v36  ;;  %v21001_v43 = vpack.c.bf16 %v17205_v35, %v17201_v34 }
  0x20   : > { %1396 = vrot.lane.b32.xlu0 %v24266_v18, %s24121_s16  ;;  %1398 = vrot.lane.b32.xlu1 %v24269_v19, %s24121_s16 }
  0x21   : > { %17135 = vmatmul.mubr.msk.f32.gmra.mrb[6].mxu1 %vm531_vm1, %v501_v30  ;;  %v17188_v30 = vld [vmem:[%s31176_s1 + $0x180] sm:$0xff] }
  0x22   : > { %760 = vmatprep.mubr.f32.mxu1 %v24120_v7  ;;  %v20995_v41 = vpack.c.bf16 %v17192_v31, %v17188_v30 }
  0x24   : > { %1588 = vrot.lane.b32.xlu0 %v24317_v39, %s24122_s17  ;;  %1590 = vrot.lane.b32.xlu1 %v24320_v40, %s24122_s17 }
  0x28   : > { %1948 = vrot.lane.b32.xlu0 %v24317_v39, %s24121_s16  ;;  %1950 = vrot.lane.b32.xlu1 %v24320_v40, %s24121_s16 }
  0x86   : > { %v851_v50 = vpop.permute.xlu1 %850  ;;  %v506_v51 = vpop.permute.xlu0 %505 }
  0x87   : > { %v857_v53 = vsel %vm856_vm3, %v851_v50, 0.0  ;;  %v512_v54 = vsel %vm511_vm4, 0.0, %v506_v51  ;;  %v17195_v50 = vld [vmem:[%s31176_s1 + $0x1b8] sm:$0xff]  ;;  %v17213_v51 = vld [vmem:[%s31176_s1 + $0x208] sm:$0xff] }
  0x88   : > { %17136 = vmatmul.mubr.msk.f32.vlgmr.msra.gmra.mrb[0].mxu1 %vm531_vm1, %v512_v54  ;;  %17148 = vmatmul.mubr.msk.f32.vlgmr.msra.gmra.mrb[0].mxu0 %vm531_vm1, %v857_v53 }
  0x89   : > { %20960 = vmatpush1.bf16.msra.mxu1 %v20959_v49  ;;  %766 = vmatprep.mubr.f32.mxu1 %v24120_v7  ;;  %v17191_v49 = vld [vmem:[%s31176_s1 + $0x198] sm:$0xff] }
  0x8a   : > { %v853_v61 = vpop.permute.xlu1 %852  ;;  %v508_v62 = vpop.permute.xlu0 %507  ;;  %944 = vmatprep.mubr.f32.mxu0 %v24120_v7  ;;  %20972 = vmatpush1.bf16.msra.mxu0 %v20971_v52  ;;  %v17217_v52 = vld [vmem:[%s31176_s1 + $0x228] sm:$0xff]  ;;  %v20997_v57 = vpack.c.bf16 %v17195_v50, %v17191_v49 }
  0x8b   : > { %v858_v3 = vsel %vm856_vm3, %v853_v61, 0.0  ;;  %v513_v4 = vsel %vm511_vm4, 0.0, %v508_v62  ;;  %20966 = vmatprep.subr.bf16.mxu1 %v20965_v55  ;;  %20978 = vmatprep.subr.bf16.mxu0 %v20977_v56  ;;  %v21003_v56 = vpack.c.bf16 %v17204_v47, %v17200_v46  ;;  %v21009_v58 = vpack.c.bf16 %v17217_v52, %v17213_v51  ;;  %v17194_v61 = vld [vmem:[%s31176_s1 + $0x1b0] sm:$0xff] }
  0x8c   : > { %17137 = vmatmul.mubr.msk.f32.gmra.mrb[2].mxu1 %vm531_vm1, %v513_v4  ;;  %17149 = vmatmul.mubr.msk.f32.gmra.mrb[2].mxu0 %vm531_vm1, %v858_v3 }
  0x8d   : > { %837 = vmatprep.mubr.f32.mxu1 %v24120_v7  ;;  %1123 = vmatprep.mubr.f32.mxu0 %v24120_v7 }
  0x8e   : > { %v1037_v6 = vpop.permute.xlu0 %1036  ;;  %v1039_v8 = vpop.permute.xlu1 %1038 }
  0x8f   : > { %v1042_v10 = vsel %vm511_vm4, 0.0, %v1037_v6  ;;  %v24402_v15 = vsel %vm511_vm4, 0.0, %v1039_v8  ;;  %v21005_v6 = vpack.c.bf16 %v17207_v2, %v17203_v1  ;;  %v17202_v8 = vld [vmem:[%s31176_s1 + $0x1d0] sm:$0xff] }
  0x90   : > { %17138 = vmatmul.mubr.msk.f32.vlgmr.msra.gmra.mrb[4].mxu1 %vm531_vm1, %v512_v54  ;;  %17160 = vmatmul.mubr.msk.f32.vlgmr.msra.gmra.mrb[0].mxu0 %vm531_vm1, %v1042_v10  ;;  %v21214_v2 = vld [vmem:[%s31178_s3 + $0x200] ss:$16 sps:$4 sm:$0xff]  }
  0x91   : > { %20968 = vmatpush1.bf16.msra.mxu1 %v20967_v5  ;;  %843 = vmatprep.mubr.f32.mxu1 %v24120_v7  ;;  %v21011_v5 = vpack.c.bf16 %v17216_v0, %v17212_v63 }
  0x92   : > { %1129 = vmatprep.mubr.f32.mxu0 %v24120_v7  ;;  %20980 = vmatpush1.bf16.msra.mxu0 %v20979_v9  ;;  %v1399_v38 = vpop.permute.xlu1 %1398  ;;  %v17206_v9 = vld [vmem:[%s31176_s1 + $0x1f0] sm:$0xff] }
  0x93   : > { %20974 = vmatprep.subr.bf16.mxu1 %v20973_v11  ;;  %20986 = vmatprep.subr.bf16.mxu0 %v20985_v12  ;;  %v1403_v45 = vsel %vm856_vm3, %v1399_v38, 0.0  ;;  %v17219_v11 = vld [vmem:[%s31176_s1 + $0x238] sm:$0xff]  ;;  %v21007_v14 = vpack.c.bf16 %v17206_v9, %v17202_v8  ;;  %v21222_v8 = vld [vmem:[%s31178_s3 + $0x224] ss:$16 sps:$4 sm:$0xff]  }
  0x94   : > { %17139 = vmatmul.mubr.msk.f32.gmra.mrb[6].mxu1 %vm531_vm1, %v513_v4  ;;  %17161 = vmatmul.mubr.msk.f32.gmra.mrb[2].mxu0 %vm531_vm1, %v24402_v15  ;;  %v20999_v4 = vpack.c.bf16 %v17194_v61, %v17190_v60  ;;  %v21225_v9 = vld [vmem:[%s31178_s3 + $0x22c] ss:$16 sps:$4 sm:$0xff]  }
  0x95   : > { %1015 = vmatprep.mubr.f32.mxu1 %v24120_v7  ;;  %1298 = vmatprep.mubr.f32.mxu0 %v24120_v7 }
  0x96   : > { %v1591_v55 = vpop.permute.xlu1 %1590 }
  0x97   : > { %v1595_v62 = vsel %vm511_vm4, 0.0, %v1591_v55 }
  0x98   : > { %17150 = vmatmul.mubr.msk.f32.vlgmr.msra.gmra.mrb[4].mxu1 %vm531_vm1, %v857_v53  ;;  %17172 = vmatmul.mubr.msk.f32.vlgmr.msra.gmra.mrb[0].mxu0 %vm531_vm1, %v24266_v18  ;;  %v1397_v18 = vpop.permute.xlu0 %1396 }
  0x99   : > { %20976 = vmatpush1.bf16.msra.mxu1 %v20975_v24  ;;  %1021 = vmatprep.mubr.f32.mxu1 %v24120_v7  ;;  %v1402_v36 = vsel %vm856_vm3, %v1397_v18, 0.0 }
  0x9a   : > { %1304 = vmatprep.mubr.f32.mxu0 %v24120_v7  ;;  %20988 = vmatpush1.bf16.msra.mxu0 %v20987_v25 }
  0x9b   : > { %20982 = vmatprep.subr.bf16.mxu1 %v20981_v26  ;;  %20994 = vmatprep.subr.bf16.mxu0 %v20993_v27  ;;  %v2135_v27 = vlaneseq }
  0x9c   : > { %17151 = vmatmul.mubr.msk.f32.gmra.mrb[6].mxu1 %vm531_vm1, %v858_v3  ;;  %17173 = vmatmul.mubr.msk.f32.gmra.mrb[2].mxu0 %vm531_vm1, %v24269_v19  ;;  %v17182_v19 = vld [vmem:[%s31176_s1 + $0x170] sm:$0xff]  ;;  %v1589_v48 = vpop.permute.xlu0 %1588  ;;  %v24111_v3 = vld [vmem:[%s24254_s30 + $0x8] sm:$0xff] }
  0x9d   : > { %1200 = vmatprep.mubr.f32.mxu1 %v24120_v7  ;;  %1483 = vmatprep.mubr.f32.mxu0 %v24120_v7  ;;  %v1594_v53 = vsel %vm511_vm4, 0.0, %v1589_v48  ;;  %v20991_v54 = vpack.c.bf16 %v17182_v19, %v17178_v44  ;;  %v24575_v31 = vshrl.u32 %v2135_v27, 7  ;;  %vm26191_vm4 = vmpackc.low %vm1581_vm2, %vm1581_vm2 }
  0x9f   : > { %v24581_v34 = vsub.s32 0, %v24575_v31  ;;  %v24584_v35 = vsub.s32 1, %v24575_v31 }
  0xa0   : > { %17162 = vmatmul.mubr.msk.f32.vlgmr.msra.gmra.mrb[4].mxu1 %vm531_vm1, %v1042_v10  ;;  %17184 = vmatmul.mubr.msk.f32.vlgmr.msra.gmra.mrb[0].mxu0 %vm531_vm1, %v1402_v36  ;;  %v17215_v10 = vld [vmem:[%s31176_s1 + $0x218] sm:$0xff]  ;;  %v1949_v12 = vpop.permute.xlu0 %1948 }
  0xa1   : > { %20984 = vmatpush1.bf16.msra.mxu1 %v20983_v37  ;;  %1206 = vmatprep.mubr.f32.mxu1 %v24120_v7  ;;  %v1954_v13 = vsel %vm856_vm3, %v1949_v12, 0.0  ;;  %v21013_v16 = vpack.c.bf16 %v17219_v11, %v17215_v10  ;;  %v24590_v37 = vsub.s32 3, %v24575_v31  ;;  %v21220_v10 = vld [vmem:[%s31178_s3 + $0x220] ss:$16 sps:$4 sm:$0xff]   ;;  %v21223_v11 = vld [vmem:[%s31178_s3 + $0x228] ss:$16 sps:$4 sm:$0xff]  }
  0xa2   : > { %1489 = vmatprep.mubr.f32.mxu0 %v24120_v7  ;;  %20996 = vmatpush1.bf16.msra.mxu0 %v20995_v41  ;;  %v21228_v12 = vld [vmem:[%s31178_s3 + $0x244] ss:$16 sps:$4 sm:$0xff]  }
  0xa3   : > { %20990 = vmatprep.subr.bf16.mxu1 %v20989_v42  ;;  %21002 = vmatprep.subr.bf16.mxu0 %v21001_v43 }
  0xa4   : > { %17163 = vmatmul.mubr.msk.f32.gmra.mrb[6].mxu1 %vm531_vm1, %v24402_v15  ;;  %17185 = vmatmul.mubr.msk.f32.gmra.mrb[2].mxu0 %vm531_vm1, %v1403_v45  ;;  %v1951_v15 = vpop.permute.xlu1 %1950 }
  0xa5   : > { %1375 = vmatprep.mubr.f32.mxu1 %v24120_v7  ;;  %1675 = vmatprep.mubr.f32.mxu0 %v24120_v7  ;;  %v1955_v21 = vsel %vm856_vm3, %v1951_v15, 0.0  ;;  %v21229_v15 = vld [vmem:[%s31178_s3 + $0x248] ss:$16 sps:$4 sm:$0xff]   ;;  %vm25146_vm3 = vmpackc.low %vm2261_vm7, %vm2261_vm7 }
  0xa8   : > { %17174 = vmatmul.mubr.msk.f32.vlgmr.msra.gmra.mrb[4].mxu1 %vm531_vm1, %v24110_v59  ;;  %17196 = vmatmul.mubr.msk.f32.vlgmr.msra.gmra.mrb[0].mxu0 %vm531_vm1, %v1594_v53 }
  0xa9   : > { %20992 = vmatpush1.bf16.msra.mxu1 %v20991_v54  ;;  %1381 = vmatprep.mubr.f32.mxu1 %v24120_v7 }
  0xaa   : > { %1681 = vmatprep.mubr.f32.mxu0 %v24120_v7  ;;  %21004 = vmatpush1.bf16.msra.mxu0 %v21003_v56 }
  0xab   : > { %20998 = vmatprep.subr.bf16.mxu1 %v20997_v57  ;;  %21010 = vmatprep.subr.bf16.mxu0 %v21009_v58 }
  0xac   : > { %17175 = vmatmul.mubr.msk.f32.gmra.mrb[6].mxu1 %vm531_vm1, %v24111_v3  ;;  %17197 = vmatmul.mubr.msk.f32.gmra.mrb[2].mxu0 %vm531_vm1, %v1595_v62  ;;  %v21216_v3 = vld [vmem:[%s31178_s3 + $0x204] ss:$16 sps:$4 sm:$0xff]  }
  0xad   : > { %1560 = vmatprep.mubr.f32.mxu1 %v24120_v7  ;;  %1850 = vmatprep.mubr.f32.mxu0 %v24120_v7 }
  0xb0   : > { %17186 = vmatmul.mubr.msk.f32.vlgmr.msra.gmra.mrb[4].mxu1 %vm531_vm1, %v1402_v36  ;;  %17208 = vmatmul.mubr.msk.f32.vlgmr.msra.gmra.mrb[0].mxu0 %vm531_vm1, %v24317_v39  ;;  %v24587_v36 = vsub.s32 2, %v24575_v31 }
  0xb1   : > { %21000 = vmatpush1.bf16.msra.mxu1 %v20999_v4  ;;  %1566 = vmatprep.mubr.f32.mxu1 %v24120_v7  ;;  %v21217_v4 = vld [vmem:[%s31178_s3 + $0x208] ss:$16 sps:$4 sm:$0xff]  }
  0xb2   : > { %1856 = vmatprep.mubr.f32.mxu0 %v24120_v7  ;;  %21012 = vmatpush1.bf16.msra.mxu0 %v21011_v5 }
  0xb3   : > { %21006 = vmatprep.subr.bf16.mxu1 %v21005_v6  ;;  %v21219_v6 = vld [vmem:[%s31178_s3 + $0x20c] ss:$16 sps:$4 sm:$0xff]   ;;  %2808 = vmatprep.subr.bf16.mxu0 %v21216_v3  ;;  %v21274_v3 = vld [vmem:[%s31178_s3 + $0x340] ss:$16 sps:$4 sm:$0xff]  }
  0xb4   : > { %17187 = vmatmul.mubr.msk.f32.gmra.mrb[6].mxu1 %vm531_vm1, %v1403_v45  ;;  %17209 = vmatmul.mubr.msk.f32.gmra.mrb[2].mxu0 %vm531_vm1, %v24320_v40 }
  0xb5   : > { %1752 = vmatprep.mubr.f32.mxu1 %v24120_v7  ;;  %2035 = vmatprep.mubr.f32.mxu0 %v24120_v7 }
  0xb8   : > { %17198 = vmatmul.mubr.msk.f32.vlgmr.msra.gmra.mrb[4].mxu1 %vm531_vm1, %v1594_v53  ;;  %17220 = vmatmul.mubr.msk.f32.vlgmr.msra.gmra.mrb[0].mxu0 %vm531_vm1, %v1954_v13 }
  0xb9   : > { %21008 = vmatpush1.bf16.msra.mxu1 %v21007_v14  ;;  %1758 = vmatprep.mubr.f32.mxu1 %v24120_v7  ;;  %v21226_v14 = vld [vmem:[%s31178_s3 + $0x240] ss:$16 sps:$4 sm:$0xff]  }
  0xba   : > { %2041 = vmatprep.mubr.f32.mxu0 %v24120_v7  ;;  %21014 = vmatprep.subr.bf16.mxu1 %v21013_v16  ;;  %v21234_v16 = vld [vmem:[%s31178_s3 + $0x264] ss:$16 sps:$4 sm:$0xff]  }
  0xbb   : > { %2809 = vmatpush1.bf16.msra.mxu0 %v21214_v2  ;;  %v21279_v2 = vld [vmem:[%s31178_s3 + $0x34c] ss:$16 sps:$4 sm:$0xff]  }
  0xbc   : > { %17199 = vmatmul.mubr.msk.f32.gmra.mrb[6].mxu1 %vm531_vm1, %v1595_v62  ;;  %17221 = vmatmul.mubr.msk.f32.gmra.mrb[2].mxu0 %vm531_vm1, %v1955_v21 }
  0xbd   : > { %1927 = vmatprep.mubr.f32.mxu1 %v24120_v7  ;;  %2810 = vmatprep.subr.bf16.mxu0 %v21222_v8  ;;  %v21285_v8 = vld [vmem:[%s31178_s3 + $0x36c] ss:$16 sps:$4 sm:$0xff]  }
  0xbf   : > { %2811 = vmatpush1.bf16.msra.mxu0 %v21220_v10 }
  0xc0   : > { %17210 = vmatmul.mubr.msk.f32.vlgmr.msra.gmra.mrb[4].mxu1 %vm531_vm1, %v24317_v39  ;;  %2812 = vmatprep.subr.bf16.mxu0 %v21228_v12  ;;  %v21280_v12 = vld [vmem:[%s31178_s3 + $0x360] ss:$16 sps:$4 sm:$0xff]  }
  0xc1   : > { %21016 = vmatpush1.bf16.msra.mxu1 %v21015_v22  ;;  %1933 = vmatprep.mubr.f32.mxu1 %v24120_v7  ;;  %v21240_v22 = vld [vmem:[%s31178_s3 + $0x284] ss:$16 sps:$4 sm:$0xff]  }
  0xc2   : > { %2849 = vmatprep.subr.bf16.mxu1 %v21219_v6  ;;  %v21282_v6 = vld [vmem:[%s31178_s3 + $0x364] ss:$16 sps:$4 sm:$0xff]  }
  0xc3   : > { %2813 = vmatpush1.bf16.msra.mxu0 %v21226_v14 }
  0xc4   : > { %17211 = vmatmul.mubr.msk.f32.gmra.mrb[6].mxu1 %vm531_vm1, %v24320_v40  ;;  %2814 = vmatprep.subr.bf16.mxu0 %v21234_v16 }
  0xc5   : > { %2112 = vmatprep.mubr.f32.mxu1 %v24120_v7 }
  0xc7   : > { %2815 = vmatpush1.bf16.msra.mxu0 %v21232_v20 }
  0xc8   : > { %17222 = vmatmul.mubr.msk.f32.vlgmr.msra.gmra.mrb[4].mxu1 %vm531_vm1, %v1954_v13  ;;  %v21231_v13 = vld [vmem:[%s31178_s3 + $0x24c] ss:$16 sps:$4 sm:$0xff]   ;;  %2816 = vmatprep.subr.bf16.mxu0 %v21240_v22 }
  0xc9   : > { %2118 = vmatprep.mubr.f32.mxu1 %v24120_v7  ;;  %v2133_v7 = vld [vmem:[%s31177_s2] sm:$0xf]  ;;  %2850 = vmatpush1.bf16.msra.mxu1 %v21217_v4  ;;  %v21277_v4 = vld [vmem:[%s31178_s3 + $0x348] ss:$16 sps:$4 sm:$0xff]  }
  0xca   : > { %v2138_v38 = vrot.slane %v2133_v7, %v24581_v34  ;;  %v2142_v41 = vrot.slane %v2133_v7, %v24584_v35  ;;  %v2146_v42 = vrot.slane %v2133_v7, %v24587_v36  ;;  %v2150_v43 = vrot.slane %v2133_v7, %v24590_v37  ;;  %2851 = vmatprep.subr.bf16.mxu1 %v21225_v9  ;;  %v21258_v7 = vld [vmem:[%s31178_s3 + $0x2e4] ss:$16 sps:$4 sm:$0xff]  }
  0xcc   : > { %17223 = vmatmul.mubr.msk.f32.gmra.mrb[6].mxu1 %vm531_vm1, %v1955_v21  ;;  %v21235_v21 = vld [vmem:[%s31178_s3 + $0x268] ss:$16 sps:$4 sm:$0xff]   ;;  %vm25140_vm1 = vmpackc.low %vm17436_vm15, %vm17436_vm15 }
  0xcd   : > { %2852 = vmatpush1.bf16.msra.mxu1 %v21223_v11 }
  0xce   : > { %2853 = vmatprep.subr.bf16.mxu1 %v21231_v13  ;;  %v21283_v13 = vld [vmem:[%s31178_s3 + $0x368] ss:$16 sps:$4 sm:$0xff]  }
  0xd1   : > { %2854 = vmatpush1.bf16.msra.mxu1 %v21229_v15 }
  0xd2   : > { %2855 = vmatprep.subr.bf16.mxu1 %v21237_v17 }
  0xd5   : > { %2856 = vmatpush1.bf16.msra.mxu1 %v21235_v21 }
 0x15b   : > { %v762_v23 = vpop.f32.mrb[0].mxu1 }
 0x15c   : > { %v764_v24 = vpop.f32.mrb[1].mxu1 }
 0x15f   : > { %v768_v25 = vpop.f32.mrb[2].mxu1 }
 0x160   : > { %v770_v26 = vpop.f32.mrb[3].mxu1 }
 0x18b   : > { %v2037_v39 = vpop.f32.mrb[0].mxu0 }
 0x18c   : > { %v21017_v28 = vadd.f32 %v2037_v39, %v762_v23  ;;  %v2039_v29 = vpop.f32.mrb[1].mxu0  ;;  %v21243_v23 = vld [vmem:[%s31178_s3 + $0x28c] ss:$16 sps:$4 sm:$0xff]  }
 0x18d   : > { %v21018_v30 = vadd.f32 %v2039_v29, %v764_v24  ;;  %v21238_v24 = vld [vmem:[%s31178_s3 + $0x280] ss:$16 sps:$4 sm:$0xff]   ;;  %v21249_v39 = vld [vmem:[%s31178_s3 + $0x2ac] ss:$16 sps:$4 sm:$0xff]   ;;  %2857 = vmatprep.subr.bf16.mxu1 %v21243_v23  ;;  %v21247_v29 = vld [vmem:[%s31178_s3 + $0x2a8] ss:$16 sps:$4 sm:$0xff]  }
 0x18e   : > { %v24596_v44 = vadd.f32 %v21017_v28, %v2138_v38  ;;  %v21244_v28 = vld [vmem:[%s31178_s3 + $0x2a0] ss:$16 sps:$4 sm:$0xff]   ;;  %2817 = vmatpush1.bf16.msra.mxu0 %v21238_v24 }
 0x18f   : > { %v2043_v40 = vpop.f32.mrb[2].mxu0  ;;  %v24598_v19 = vadd.f32 %v21018_v30, %v2142_v41  ;;  %v21252_v30 = vld [vmem:[%s31178_s3 + $0x2c4] ss:$16 sps:$4 sm:$0xff]  }
 0x190   : > { %v21019_v18 = vadd.f32 %v2043_v40, %v768_v25  ;;  %v2045_v32 = vpop.f32.mrb[3].mxu0  ;;  %v2163_v49 = vmax.f32 %v24596_v44, 0.0  ;;  %v21241_v25 = vld [vmem:[%s31178_s3 + $0x288] ss:$16 sps:$4 sm:$0xff]   ;;  %v21255_v40 = vld [vmem:[%s31178_s3 + $0x2cc] ss:$16 sps:$4 sm:$0xff]  }
 0x191   : > { %v21020_v33 = vadd.f32 %v2045_v32, %v770_v26  ;;  %v2164_v52 = vmax.f32 %v24598_v19, 0.0  ;;  %v21246_v26 = vld [vmem:[%s31178_s3 + $0x2a4] ss:$16 sps:$4 sm:$0xff]   ;;  %2858 = vmatpush1.bf16.msra.mxu1 %v21241_v25  ;;  %v21253_v32 = vld [vmem:[%s31178_s3 + $0x2c8] ss:$16 sps:$4 sm:$0xff]  }
 0x192   : > { %v24605_v50 = vadd.f32 %v21019_v18, %v2138_v38  ;;  %2818 = vmatprep.subr.bf16.mxu0 %v21246_v26  ;;  %2859 = vmatprep.subr.bf16.mxu1 %v21249_v39  ;;  %v21250_v18 = vld [vmem:[%s31178_s3 + $0x2c0] ss:$16 sps:$4 sm:$0xff]  }
 0x193   : > { %v24609_v53 = vadd.f32 %v21020_v33, %v2142_v41  ;;  %v21261_v33 = vld [vmem:[%s31178_s3 + $0x2ec] ss:$16 sps:$4 sm:$0xff]   ;;  %2819 = vmatpush1.bf16.msra.mxu0 %v21244_v28  ;;  %v21256_v38 = vld [vmem:[%s31178_s3 + $0x2e0] ss:$16 sps:$4 sm:$0xff]   ;;  %v21259_v41 = vld [vmem:[%s31178_s3 + $0x2e8] ss:$16 sps:$4 sm:$0xff]  }
 0x194   : > { %v2167_v61 = vmax.f32 %v24605_v50, 0.0  ;;  %2820 = vmatprep.subr.bf16.mxu0 %v21252_v30  ;;  %v21298_v30 = vld [vmem:[%s31178_s3 + $0x3c0] ss:$16 sps:$4 sm:$0xff]  }
 0x195   : > { %v2168_v63 = vmax.f32 %v24609_v53, 0.0  ;;  %2860 = vmatpush1.bf16.msra.mxu1 %v21247_v29  ;;  %v21295_v53 = vld [vmem:[%s31178_s3 + $0x3a8] ss:$16 sps:$4 sm:$0xff]  }
 0x196   : > { %2861 = vmatprep.subr.bf16.mxu1 %v21255_v40  ;;  %v21301_v40 = vld [vmem:[%s31178_s3 + $0x3c8] ss:$16 sps:$4 sm:$0xff]  }
 0x197   : > { %2821 = vmatpush1.bf16.msra.mxu0 %v21250_v18  ;;  %v21304_v18 = vld [vmem:[%s31178_s3 + $0x3e0] ss:$16 sps:$4 sm:$0xff]  }
 0x198   : > { %2822 = vmatprep.subr.bf16.mxu0 %v21258_v7  ;;  %v21307_v7 = vld [vmem:[%s31178_s3 + $0x3e8] ss:$16 sps:$4 sm:$0xff]  }
 0x199   : > { %2862 = vmatpush1.bf16.msra.mxu1 %v21253_v32  ;;  %v21306_v32 = vld [vmem:[%s31178_s3 + $0x3e4] ss:$16 sps:$4 sm:$0xff]  }
 0x19a   : > { %2863 = vmatprep.subr.bf16.mxu1 %v21261_v33  ;;  %v21309_v33 = vld [vmem:[%s31178_s3 + $0x3ec] ss:$16 sps:$4 sm:$0xff]  }
 0x19b   : > { %v2114_v45 = vpop.f32.mrb[4].mxu1  ;;  %2823 = vmatpush1.bf16.msra.mxu0 %v21256_v38  ;;  %v21312_v38 = vld [vmem:[%s31178_s3 + $0x4] ss:$16 sps:$4 sm:$0xff]  }
 0x19c   : > { %v24600_v46 = vadd.f32 %v2146_v42, %v2114_v45  ;;  %v2116_v47 = vpop.f32.mrb[5].mxu1  ;;  %v21262_v45 = vld [vmem:[%s31178_s3 + $0x300] ss:$16 sps:$4 sm:$0xff]  }
 0x19d   : > { %v24602_v48 = vadd.f32 %v2150_v43, %v2116_v47  ;;  %v21265_v47 = vld [vmem:[%s31178_s3 + $0x308] ss:$16 sps:$4 sm:$0xff]   ;;  %2864 = vmatpush1.bf16.msra.mxu1 %v21259_v41  ;;  %v21315_v41 = vld [vmem:[%s31178_s3 + $0xc] ss:$16 sps:$4 sm:$0xff]  }
 0x19e   : > { %v2165_v51 = vmax.f32 %v24600_v46, 0.0  ;;  %v21288_v46 = vld [vmem:[%s31178_s3 + $0x384] ss:$16 sps:$4 sm:$0xff]  }
 0x19f   : > { %v2166_v54 = vmax.f32 %v24602_v48, 0.0  ;;  %v2120_v55 = vpop.f32.mrb[6].mxu1  ;;  %v21286_v48 = vld [vmem:[%s31178_s3 + $0x380] ss:$16 sps:$4 sm:$0xff]  }
 0x1a0   : > { %v21104_v56 = vpack.i.bf16 %v2163_v49, %v2165_v51  ;;  %v24616_v57 = vadd.f32 %v2146_v42, %v2120_v55  ;;  %v2122_v58 = vpop.f32.mrb[7].mxu1  ;;  %v21264_v42 = vld [vmem:[%s31178_s3 + $0x304] ss:$16 sps:$4 sm:$0xff]  }
 0x1a1   : > { %v21109_v59 = vpack.i.bf16 %v2164_v52, %v2166_v54  ;;  %v24622_v60 = vadd.f32 %v2150_v43, %v2122_v58  ;;  %v21267_v43 = vld [vmem:[%s31178_s3 + $0x30c] ss:$16 sps:$4 sm:$0xff]   ;;  %v21270_v55 = vld [vmem:[%s31178_s3 + $0x324] ss:$16 sps:$4 sm:$0xff]   ;;  %2824 = vmatprep.subr.bf16.mxu0 %v21264_v42  ;;  %v21268_v58 = vld [vmem:[%s31178_s3 + $0x320] ss:$16 sps:$4 sm:$0xff]  }
 0x1a2   : > { %v2169_v62 = vmax.f32 %v24616_v57, 0.0  ;;  %21105 = vrot.lane.b32.xlu0 %v21104_v56, %s24123_s26  ;;  %v21273_v56 = vld [vmem:[%s31178_s3 + $0x32c] ss:$16 sps:$4 sm:$0xff]   ;;  %2865 = vmatprep.subr.bf16.mxu1 %v21267_v43  ;;  %v21294_v57 = vld [vmem:[%s31178_s3 + $0x3a4] ss:$16 sps:$4 sm:$0xff]  }
 0x1a3   : > { %v2170_v0 = vmax.f32 %v24622_v60, 0.0  ;;  %21110 = vrot.lane.b32.xlu1 %v21109_v59, %s24123_s26  ;;  %v21271_v59 = vld [vmem:[%s31178_s3 + $0x328] ss:$16 sps:$4 sm:$0xff]   ;;  %2825 = vmatpush1.bf16.msra.mxu0 %v21262_v45  ;;  %v21297_v60 = vld [vmem:[%s31178_s3 + $0x3ac] ss:$16 sps:$4 sm:$0xff]  }
 0x1a4   : > { %v21114_v1 = vpack.i.bf16 %v2167_v61, %v2169_v62  ;;  %2866 = vmatpush1.bf16.msra.mxu1 %v21265_v47  ;;  %2826 = vmatprep.subr.bf16.mxu0 %v21270_v55 }
 0x1a5   : > { %v21119_v5 = vpack.i.bf16 %v2168_v63, %v2170_v0  ;;  %2867 = vmatprep.subr.bf16.mxu1 %v21273_v56 }
 0x1a6   : > { %21115 = vrot.lane.b32.xlu0 %v21114_v1, %s24123_s26  ;;  %v21276_v1 = vld [vmem:[%s31178_s3 + $0x344] ss:$16 sps:$4 sm:$0xff]  }
 0x1a7   : > { %21120 = vrot.lane.b32.xlu1 %v21119_v5, %s24123_s26  ;;  %2827 = vmatpush1.bf16.msra.mxu0 %v21268_v58 }
 0x1a8   : > { %2868 = vmatpush1.bf16.msra.mxu1 %v21271_v59  ;;  %2828 = vmatprep.subr.bf16.mxu0 %v21276_v1 }
 0x1a9   : > { %2869 = vmatprep.subr.bf16.mxu1 %v21279_v2 }
 0x1ab   : > { %2829 = vmatpush1.bf16.msra.mxu0 %v21274_v3 }
 0x1ac   : > { %2870 = vmatpush1.bf16.msra.mxu1 %v21277_v4  ;;  %2830 = vmatprep.subr.bf16.mxu0 %v21282_v6 }
 0x1ad   : > { %2871 = vmatprep.subr.bf16.mxu1 %v21285_v8 }
 0x1af   : > { %2831 = vmatpush1.bf16.msra.mxu0 %v21280_v12 }
 0x1b0   : > { %2872 = vmatpush1.bf16.msra.mxu1 %v21283_v13  ;;  %2832 = vmatprep.subr.bf16.mxu0 %v21288_v46 }
 0x1b3   : > { %2833 = vmatpush1.bf16.msra.mxu0 %v21286_v48 }
 0x1b4   : > { %2834 = vmatprep.subr.bf16.mxu0 %v21294_v57 }
 0x214   : > { %v21106_v5 = vpop.permute.xlu0 %21105 }
 0x215   : > { %v21108_v9 = vunpack.i.h.bf16 %v21106_v5  ;;  %v21107_v10 = vunpack.i.l.bf16 %v21106_v5  ;;  %v21111_v11 = vpop.permute.xlu1 %21110 }
 0x216   : > { %v21113_v14 = vunpack.i.h.bf16 %v21111_v11  ;;  %v21112_v15 = vunpack.i.l.bf16 %v21111_v11 }
 0x217   : > { %v24786_v16 = vmax.f32 %v2163_v49, %v21108_v9  ;;  %v24790_v17 = vmax.f32 %v2165_v51, %v21107_v10  ;;  %v21291_v49 = vld [vmem:[%s31178_s3 + $0x38c] ss:$16 sps:$4 sm:$0xff]  }
 0x218   : > { %v2189_v20 = vmax.f32 %v2164_v52, %v21113_v14  ;;  %v2209_v21 = vmax.f32 %v2166_v54, %v21112_v15  ;;  %v21116_v22 = vpop.permute.xlu0 %21115  ;;  %v21289_v54 = vld [vmem:[%s31178_s3 + $0x388] ss:$16 sps:$4 sm:$0xff]   ;;  %2873 = vmatprep.subr.bf16.mxu1 %v21291_v49 }
 0x219   : > { %v21118_v23 = vunpack.i.h.bf16 %v21116_v22  ;;  %v21117_v24 = vunpack.i.l.bf16 %v21116_v22  ;;  %v21121_v25 = vpop.permute.xlu1 %21120  ;;  %v21124_v44 = vpack.i.bf16 %v24786_v16, %v24790_v17  ;;  %2874 = vmatpush1.bf16.msra.mxu1 %v21289_v54 }
 0x21a   : > { %v21123_v19 = vunpack.i.h.bf16 %v21121_v25  ;;  %v21122_v51 = vunpack.i.l.bf16 %v21121_v25  ;;  %v21129_v52 = vpack.i.bf16 %v2189_v20, %v2209_v21  ;;  %2875 = vmatprep.subr.bf16.mxu1 %v21297_v60 }
 0x21b   : > { %v24812_v26 = vmax.f32 %v2167_v61, %v21118_v23  ;;  %v24816_v39 = vmax.f32 %v2169_v62, %v21117_v24  ;;  %21125 = vrot.lane.b32.xlu0 %v21124_v44, %s24123_s26  ;;  %v21292_v61 = vld [vmem:[%s31178_s3 + $0x3a0] ss:$16 sps:$4 sm:$0xff]  }
 0x21c   : > { %21130 = vrot.lane.b32.xlu1 %v21129_v52, %s24124_s24  ;;  %v2190_v28 = vmax.f32 %v2168_v63, %v21123_v19  ;;  %v2210_v29 = vmax.f32 %v2170_v0, %v21122_v51  ;;  %2835 = vmatpush1.bf16.msra.mxu0 %v21292_v61  ;;  %v21300_v63 = vld [vmem:[%s31178_s3 + $0x3c4] ss:$16 sps:$4 sm:$0xff]   ;;  %v21303_v0 = vld [vmem:[%s31178_s3 + $0x3cc] ss:$16 sps:$4 sm:$0xff]  }
 0x21d   : > { %v21139_v50 = vpack.i.bf16 %v24812_v26, %v24816_v39  ;;  %2876 = vmatpush1.bf16.msra.mxu1 %v21295_v53  ;;  %2836 = vmatprep.subr.bf16.mxu0 %v21300_v63 }
 0x21e   : > { %v21144_v62 = vpack.i.bf16 %v2190_v28, %v2210_v29  ;;  %2877 = vmatprep.subr.bf16.mxu1 %v21303_v0 }
 0x21f   : > { %21135 = vrot.lane.b32.xlu0 %v21129_v52, %s24125_s20 }
 0x220   : > { %21140 = vrot.lane.b32.xlu1 %v21139_v50, %s24123_s26  ;;  %2837 = vmatpush1.bf16.msra.mxu0 %v21298_v30 }
 0x221   : > { %2878 = vmatpush1.bf16.msra.mxu1 %v21301_v40  ;;  %2838 = vmatprep.subr.bf16.mxu0 %v21306_v32 }
 0x222   : > { %2879 = vmatprep.subr.bf16.mxu1 %v21309_v33 }
 0x223   : > { %21145 = vrot.lane.b32.xlu0 %v21144_v62, %s24124_s24 }
 0x224   : > { %21150 = vrot.lane.b32.xlu1 %v21144_v62, %s24125_s20  ;;  %2839 = vmatpush1.bf16.msra.mxu0 %v21304_v18 }
 0x225   : > { %2880 = vmatpush1.bf16.msra.mxu1 %v21307_v7  ;;  %3210 = vmatprep.subr.bf16.mxu0 %v21312_v38 }
 0x226   : > { %3251 = vmatprep.subr.bf16.mxu1 %v21315_v41 }
 0x28d   : > { %v21126_v42 = vpop.permute.xlu0 %21125 }
 0x28e   : > { %v21128_v43 = vunpack.i.h.bf16 %v21126_v42  ;;  %v21127_v45 = vunpack.i.l.bf16 %v21126_v42  ;;  %v21131_v47 = vpop.permute.xlu1 %21130 }
 0x28f   : > { %v21133_v55 = vunpack.i.h.bf16 %v21131_v47  ;;  %v21132_v56 = vunpack.i.l.bf16 %v21131_v47 }
 0x290   : > { %v2256_v58 = vsel %vm2255_vm5, %v24786_v16, %v21128_v43  ;;  %v2264_v59 = vsel %vm2255_vm5, %v24790_v17, %v21127_v45 }
 0x291   : > { %v21136_v1 = vpop.permute.xlu0 %21135  ;;  %v2259_v5 = vsel %vm2258_vm6, %v2256_v58, %v21133_v55  ;;  %v2266_v6 = vsel %vm2258_vm6, %v2264_v59, %v21132_v56 }
 0x292   : > { %v21138_v2 = vunpack.i.h.bf16 %v21136_v1  ;;  %v21137_v3 = vunpack.i.l.bf16 %v21136_v1  ;;  %v21141_v4 = vpop.permute.xlu1 %21140 }
 0x293   : > { %v21143_v8 = vunpack.i.h.bf16 %v21141_v4  ;;  %v21142_v9 = vunpack.i.l.bf16 %v21141_v4 }
 0x294   : > { %v2262_v10 = vsel %vm2261_vm7, %v2259_v5, %v21138_v2  ;;  %v2268_v11 = vsel %vm2261_vm7, %v2266_v6, %v21137_v3  ;;  %v23247_v3 = vld [vmem:[%s31182_s7 + $0x64c] ss:$16 sps:$4 sm:$0xff]  }
 0x295   : > { %v2272_v12 = vrot.slane %v2262_v10, 1  ;;  %v2273_v13 = vrot.slane %v2268_v11, 1  ;;  %v21146_v14 = vpop.permute.xlu0 %21145  ;;  %v2257_v15 = vsel %vm2255_vm5, %v24812_v26, %v21143_v8  ;;  %v2265_v16 = vsel %vm2255_vm5, %v24816_v39, %v21142_v9  ;;  %v21310_v9 = vld [vmem:[%s31178_s3] ss:$16 sps:$4 sm:$0xff]  }
 0x296   : > { %v21148_v17 = vunpack.i.h.bf16 %v21146_v14  ;;  %v21147_v20 = vunpack.i.l.bf16 %v21146_v14  ;;  %v21151_v21 = vpop.permute.xlu1 %21150 }
 0x297   : > { %v2276_v22 = vmax.f32 %v2262_v10, %v2272_v12  ;;  %v2277_v23 = vmax.f32 %v2268_v11, %v2273_v13  ;;  %v21153_v24 = vunpack.i.h.bf16 %v21151_v21  ;;  %v21152_v25 = vunpack.i.l.bf16 %v21151_v21  ;;  %v21313_v10 = vld [vmem:[%s31178_s3 + $0x8] ss:$16 sps:$4 sm:$0xff]   ;;  %v21318_v12 = vld [vmem:[%s31178_s3 + $0x24] ss:$16 sps:$4 sm:$0xff]   ;;  %v21321_v13 = vld [vmem:[%s31178_s3 + $0x2c] ss:$16 sps:$4 sm:$0xff]  }
 0x298   : > { %v2260_v44 = vsel %vm2258_vm6, %v2257_v15, %v21148_v17  ;;  %v2267_v46 = vsel %vm2258_vm6, %v2265_v16, %v21147_v20  ;;  %v21316_v16 = vld [vmem:[%s31178_s3 + $0x20] ss:$16 sps:$4 sm:$0xff]   ;;  %v21319_v17 = vld [vmem:[%s31178_s3 + $0x28] ss:$16 sps:$4 sm:$0xff]   ;;  %v21324_v21 = vld [vmem:[%s31178_s3 + $0x44] ss:$16 sps:$4 sm:$0xff]  }
 0x299   : > { %v2288_v49 = vrot.slane %v2276_v22, 1  ;;  %v2289_v19 = vrot.slane %v2277_v23, 1  ;;  %v2292_v51 = vrot.slane %v2276_v22, 2  ;;  %v2293_v52 = vrot.slane %v2277_v23, 2 }
 0x29a   : > { %v2263_v48 = vsel %vm2261_vm7, %v2260_v44, %v21153_v24  ;;  %v2269_v54 = vsel %vm2261_vm7, %v2267_v46, %v21152_v25  ;;  %v2296_v60 = vrot.slane %v2276_v22, 3  ;;  %v2297_v62 = vrot.slane %v2277_v23, 3  ;;  %v21322_v25 = vld [vmem:[%s31178_s3 + $0x40] ss:$16 sps:$4 sm:$0xff]   ;;  %v21325_v44 = vld [vmem:[%s31178_s3 + $0x48] ss:$16 sps:$4 sm:$0xff]  }
 0x29b   : > { %v2318_v26 = vsel %vm498_vm0, %v2276_v22, %v2288_v49  ;;  %v2319_v39 = vsel %vm498_vm0, %v2277_v23, %v2289_v19  ;;  %v2280_v28 = vrot.slane %v2263_v48, 1  ;;  %v2281_v29 = vrot.slane %v2269_v54, 1  ;;  %v21327_v22 = vld [vmem:[%s31178_s3 + $0x4c] ss:$16 sps:$4 sm:$0xff]   ;;  %v21330_v49 = vld [vmem:[%s31178_s3 + $0x64] ss:$16 sps:$4 sm:$0xff]  }
 0x29c   : > { %v2321_v50 = vsel %vm2320_vm8, %v2318_v26, %v2292_v51  ;;  %v2322_v57 = vsel %vm2320_vm8, %v2319_v39, %v2293_v52  ;;  %v21333_v19 = vld [vmem:[%s31178_s3 + $0x6c] ss:$16 sps:$4 sm:$0xff]   ;;  %v21328_v51 = vld [vmem:[%s31178_s3 + $0x60] ss:$16 sps:$4 sm:$0xff]   ;;  %v21331_v52 = vld [vmem:[%s31178_s3 + $0x68] ss:$16 sps:$4 sm:$0xff]  }
 0x29d   : > { %v2284_v61 = vmax.f32 %v2263_v48, %v2280_v28  ;;  %v2285_v53 = vmax.f32 %v2269_v54, %v2281_v29  ;;  %v2324_v18 = vsel %vm2323_vm9, %v2321_v50, %v2296_v60  ;;  %v2325_v32 = vsel %vm2323_vm9, %v2322_v57, %v2297_v62  ;;  %v21336_v48 = vld [vmem:[%s31178_s3 + $0x84] ss:$16 sps:$4 sm:$0xff]   ;;  %v21339_v54 = vld [vmem:[%s31178_s3 + $0x8c] ss:$16 sps:$4 sm:$0xff]   ;;  %v21334_v26 = vld [vmem:[%s31178_s3 + $0x80] ss:$16 sps:$4 sm:$0xff]  }
 0x29e   : > { %v21337_v39 = vld [vmem:[%s31178_s3 + $0x88] ss:$16 sps:$4 sm:$0xff]   ;;  %v21342_v28 = vld [vmem:[%s31178_s3 + $0xa4] ss:$16 sps:$4 sm:$0xff]   ;;  %v21345_v29 = vld [vmem:[%s31178_s3 + $0xac] ss:$16 sps:$4 sm:$0xff]  }
 0x29f   : > { %v2302_v63 = vrot.slane %v2284_v61, 4  ;;  %v2303_v0 = vrot.slane %v2285_v53, 4  ;;  %v2306_v30 = vrot.slane %v2284_v61, 5  ;;  %v2307_v40 = vrot.slane %v2285_v53, 5  ;;  %v21340_v50 = vld [vmem:[%s31178_s3 + $0xa0] ss:$16 sps:$4 sm:$0xff]  }
 0x2a0   : > { %v2310_v7 = vrot.slane %v2284_v61, 6  ;;  %v2311_v33 = vrot.slane %v2285_v53, 6  ;;  %v2314_v42 = vrot.slane %v2284_v61, 7  ;;  %v2315_v43 = vrot.slane %v2285_v53, 7  ;;  %v21343_v57 = vld [vmem:[%s31178_s3 + $0xa8] ss:$16 sps:$4 sm:$0xff]  }
 0x2a1   : > { %v2327_v38 = vsel %vm2326_vm10, %v2324_v18, %v2302_v63  ;;  %v2328_v41 = vsel %vm2326_vm10, %v2325_v32, %v2303_v0  ;;  %v21348_v61 = vld [vmem:[%s31178_s3 + $0xc4] ss:$16 sps:$4 sm:$0xff]   ;;  %v21351_v53 = vld [vmem:[%s31178_s3 + $0xcc] ss:$16 sps:$4 sm:$0xff]   ;;  %v21346_v60 = vld [vmem:[%s31178_s3 + $0xc0] ss:$16 sps:$4 sm:$0xff]  }
 0x2a2   : > { %v2330_v45 = vsel %vm2329_vm11, %v2327_v38, %v2306_v30  ;;  %v2331_v47 = vsel %vm2329_vm11, %v2328_v41, %v2307_v40  ;;  %v21349_v62 = vld [vmem:[%s31178_s3 + $0xc8] ss:$16 sps:$4 sm:$0xff]   ;;  %v21354_v63 = vld [vmem:[%s31178_s3 + $0xe4] ss:$16 sps:$4 sm:$0xff]   ;;  %v21357_v0 = vld [vmem:[%s31178_s3 + $0xec] ss:$16 sps:$4 sm:$0xff]  }
 0x2a3   : > { %v2333_v55 = vsel %vm2332_vm12, %v2330_v45, %v2310_v7  ;;  %v2334_v56 = vsel %vm2332_vm12, %v2331_v47, %v2311_v33  ;;  %v21352_v30 = vld [vmem:[%s31178_s3 + $0xe0] ss:$16 sps:$4 sm:$0xff]   ;;  %v21355_v40 = vld [vmem:[%s31178_s3 + $0xe8] ss:$16 sps:$4 sm:$0xff]   ;;  %v21360_v18 = vld [vmem:[%s31178_s3 + $0x104] ss:$16 sps:$4 sm:$0xff]  }
 0x2a4   : > { %v24896_v58 = vsel %vm1581_vm2, %v2333_v55, %v2314_v42  ;;  %v24899_v59 = vsel %vm1581_vm2, %v2334_v56, %v2315_v43  ;;  %v21363_v32 = vld [vmem:[%s31178_s3 + $0x10c] ss:$16 sps:$4 sm:$0xff]   ;;  %v21358_v7 = vld [vmem:[%s31178_s3 + $0x100] ss:$16 sps:$4 sm:$0xff]   ;;  %v21361_v33 = vld [vmem:[%s31178_s3 + $0x108] ss:$16 sps:$4 sm:$0xff]  }
 0x2a5   : > { %v2340_v1 = vrot.slane %v24899_v59, 7  ;;  %v2339_v2 = vrot.slane %v24896_v58, 7  ;;  %v24930_v14 = vrot.slane %v24896_v58, 1  ;;  %v24933_v15 = vrot.slane %v24899_v59, 1  ;;  %v21366_v38 = vld [vmem:[%s31178_s3 + $0x124] ss:$16 sps:$4 sm:$0xff]  }
 0x2a6   : > { %v21169_v20 = vpack.i.bf16 %v24899_v59, %v24896_v58  ;;  %v21369_v41 = vld [vmem:[%s31178_s3 + $0x12c] ss:$16 sps:$4 sm:$0xff]   ;;  %v21364_v42 = vld [vmem:[%s31178_s3 + $0x120] ss:$16 sps:$4 sm:$0xff]   ;;  %v21367_v43 = vld [vmem:[%s31178_s3 + $0x128] ss:$16 sps:$4 sm:$0xff]  }
 0x2a7   : > { %v17355_v4 = vpack.c.bf16 %v2340_v1, %v2340_v1  ;;  %v17360_v5 = vpack.c.bf16 %v2339_v2, %v2339_v2  ;;  %v2343_v6 = vsel %vm498_vm0, 0.0, %v2339_v2  ;;  %v2344_v8 = vsel %vm498_vm0, 0.0, %v2340_v1  ;;  %v21372_v45 = vld [vmem:[%s31178_s3 + $0x144] ss:$16 sps:$4 sm:$0xff]   ;;  %v21375_v47 = vld [vmem:[%s31178_s3 + $0x14c] ss:$16 sps:$4 sm:$0xff]  }
 0x2a8   : > { %v21159_v11 = vpack.i.bf16 %v2344_v8, %v2343_v6  ;;  %v5212_v23 = vsel %vm1581_vm2, %v24930_v14, 0.0  ;;  %v5213_v24 = vsel %vm1581_vm2, %v24933_v15, 0.0  ;;  %v21370_v55 = vld [vmem:[%s31178_s3 + $0x140] ss:$16 sps:$4 sm:$0xff]   ;;  %v21373_v56 = vld [vmem:[%s31178_s3 + $0x148] ss:$16 sps:$4 sm:$0xff]   ;;  %vm18604_vm2 = vmneg %vm2258_vm6 }
 0x2a9   : > { %17356 = vmatprep.mubr.msk.bf16.mxu0 %vm24903_vm14, %v17355_v4  ;;  %17366 = vmatprep.mubr.msk.bf16.mxu1 %vm24903_vm14, %v17355_v4  ;;  %v21179_v46 = vpack.i.bf16 %v5213_v24, %v5212_v23  ;;  %v21378_v1 = vld [vmem:[%s31178_s3 + $0x164] ss:$16 sps:$4 sm:$0xff]   ;;  %v21381_v2 = vld [vmem:[%s31178_s3 + $0x16c] ss:$16 sps:$4 sm:$0xff]   ;;  %v21376_v4 = vld [vmem:[%s31178_s3 + $0x160] ss:$16 sps:$4 sm:$0xff]  }
 0x2aa   : > { %17361 = vmatmul.mubr.msk.bf16.vlgmr.msra.gmra.mrb[4].mxu0 %vm24903_vm14, %v17360_v5  ;;  %17371 = vmatmul.mubr.msk.bf16.vlgmr.msra.gmra.mrb[8].mxu1 %vm24903_vm14, %v17360_v5  ;;  %v21379_v5 = vld [vmem:[%s31178_s3 + $0x168] ss:$16 sps:$4 sm:$0xff]   ;;  %v21384_v6 = vld [vmem:[%s31178_s3 + $0x184] ss:$16 sps:$4 sm:$0xff]   ;;  %v21387_v8 = vld [vmem:[%s31178_s3 + $0x18c] ss:$16 sps:$4 sm:$0xff]  }
 0x2ab   : > { %21160 = vrot.lane.b32.xlu1 %v21159_v11, %s24123_s26  ;;  %21155 = vrot.lane.b32.xlu0 %v21159_v11, %s24125_s20  ;;  %v21390_v11 = vld [vmem:[%s31178_s3 + $0x1a4] ss:$16 sps:$4 sm:$0xff]   ;;  %v21405_v24 = vld [vmem:[%s31178_s3 + $0x1ec] ss:$16 sps:$4 sm:$0xff]  }
 0x2ac   : > { %3211 = vmatpush1.bf16.msra.mxu0 %v21310_v9  ;;  %3252 = vmatpush1.bf16.msra.mxu1 %v21313_v10  ;;  %v21382_v9 = vld [vmem:[%s31178_s3 + $0x180] ss:$16 sps:$4 sm:$0xff]   ;;  %v21385_v10 = vld [vmem:[%s31178_s3 + $0x188] ss:$16 sps:$4 sm:$0xff]   ;;  %v21402_v23 = vld [vmem:[%s31178_s3 + $0x1e4] ss:$16 sps:$4 sm:$0xff]  }
 0x2ad   : > { %3212 = vmatprep.subr.bf16.mxu0 %v21318_v12  ;;  %3253 = vmatprep.subr.bf16.mxu1 %v21321_v13  ;;  %v21393_v12 = vld [vmem:[%s31178_s3 + $0x1ac] ss:$16 sps:$4 sm:$0xff]   ;;  %v21388_v13 = vld [vmem:[%s31178_s3 + $0x1a0] ss:$16 sps:$4 sm:$0xff]  }
 0x2af   : > { %21170 = vrot.lane.b32.xlu1 %v21169_v20, %s24123_s26  ;;  %21165 = vrot.lane.b32.xlu0 %v21169_v20, %s24125_s20  ;;  %v21399_v20 = vld [vmem:[%s31178_s3 + $0x1cc] ss:$16 sps:$4 sm:$0xff]  }
 0x2b0   : > { %3213 = vmatpush1.bf16.msra.mxu0 %v21316_v16  ;;  %3254 = vmatpush1.bf16.msra.mxu1 %v21319_v17  ;;  %v21391_v16 = vld [vmem:[%s31178_s3 + $0x1a8] ss:$16 sps:$4 sm:$0xff]   ;;  %v21396_v17 = vld [vmem:[%s31178_s3 + $0x1c4] ss:$16 sps:$4 sm:$0xff]  }
 0x2b1   : > { %3214 = vmatprep.subr.bf16.mxu0 %v21324_v21  ;;  %3255 = vmatprep.subr.bf16.mxu1 %v21327_v22  ;;  %v21394_v21 = vld [vmem:[%s31178_s3 + $0x1c0] ss:$16 sps:$4 sm:$0xff]   ;;  %v21397_v22 = vld [vmem:[%s31178_s3 + $0x1c8] ss:$16 sps:$4 sm:$0xff]  }
 0x2b3   : > { %21180 = vrot.lane.b32.xlu1 %v21179_v46, %s24123_s26  ;;  %21175 = vrot.lane.b32.xlu0 %v21179_v46, %s24125_s20  ;;  %v21408_v46 = vld [vmem:[%s31178_s3 + $0x404] ss:$16 sps:$4 sm:$0xff]  }
 0x2b4   : > { %3215 = vmatpush1.bf16.msra.mxu0 %v21322_v25  ;;  %3256 = vmatpush1.bf16.msra.mxu1 %v21325_v44  ;;  %v21400_v25 = vld [vmem:[%s31178_s3 + $0x1e0] ss:$16 sps:$4 sm:$0xff]   ;;  %v21403_v44 = vld [vmem:[%s31178_s3 + $0x1e8] ss:$16 sps:$4 sm:$0xff]  }
 0x2b5   : > { %3216 = vmatprep.subr.bf16.mxu0 %v21330_v49  ;;  %3257 = vmatprep.subr.bf16.mxu1 %v21333_v19  ;;  %v21411_v49 = vld [vmem:[%s31178_s3 + $0x40c] ss:$16 sps:$4 sm:$0xff]  }
 0x2b8   : > { %3217 = vmatpush1.bf16.msra.mxu0 %v21328_v51  ;;  %3258 = vmatpush1.bf16.msra.mxu1 %v21331_v52 }
 0x2b9   : > { %3218 = vmatprep.subr.bf16.mxu0 %v21336_v48  ;;  %3259 = vmatprep.subr.bf16.mxu1 %v21339_v54 }
 0x2bc   : > { %3219 = vmatpush1.bf16.msra.mxu0 %v21334_v26  ;;  %3260 = vmatpush1.bf16.msra.mxu1 %v21337_v39 }
 0x2bd   : > { %3220 = vmatprep.subr.bf16.mxu0 %v21342_v28  ;;  %3261 = vmatprep.subr.bf16.mxu1 %v21345_v29  ;;  %v21406_v28 = vld [vmem:[%s31178_s3 + $0x400] ss:$16 sps:$4 sm:$0xff]   ;;  %v21409_v29 = vld [vmem:[%s31178_s3 + $0x408] ss:$16 sps:$4 sm:$0xff]  }
 0x2c0   : > { %3221 = vmatpush1.bf16.msra.mxu0 %v21340_v50  ;;  %3262 = vmatpush1.bf16.msra.mxu1 %v21343_v57  ;;  %v21903_v50 = vld [vmem:[%s31178_s3 + $0xe4c] ss:$16 sps:$4 sm:$0xff]  }
 0x2c1   : > { %3222 = vmatprep.subr.bf16.mxu0 %v21348_v61  ;;  %3263 = vmatprep.subr.bf16.mxu1 %v21351_v53  ;;  %v21414_v53 = vld [vmem:[%s31178_s3 + $0x424] ss:$16 sps:$4 sm:$0xff]  }
 0x2c2   : > { %v22002_v61 = vld [vmem:[%s31178_s3 + $0x1064] ss:$16 sps:$4 sm:$0xff]  }
 0x2c4   : > { %3223 = vmatpush1.bf16.msra.mxu0 %v21346_v60  ;;  %3264 = vmatpush1.bf16.msra.mxu1 %v21349_v62  ;;  %v21417_v60 = vld [vmem:[%s31178_s3 + $0x42c] ss:$16 sps:$4 sm:$0xff]  }
 0x2c5   : > { %3224 = vmatprep.subr.bf16.mxu0 %v21354_v63  ;;  %3265 = vmatprep.subr.bf16.mxu1 %v21357_v0  ;;  %v21412_v63 = vld [vmem:[%s31178_s3 + $0x420] ss:$16 sps:$4 sm:$0xff]   ;;  %v21415_v0 = vld [vmem:[%s31178_s3 + $0x428] ss:$16 sps:$4 sm:$0xff]  }
 0x2c8   : > { %3225 = vmatpush1.bf16.msra.mxu0 %v21352_v30  ;;  %3266 = vmatpush1.bf16.msra.mxu1 %v21355_v40  ;;  %v21420_v30 = vld [vmem:[%s31178_s3 + $0x444] ss:$16 sps:$4 sm:$0xff]   ;;  %v21423_v40 = vld [vmem:[%s31178_s3 + $0x44c] ss:$16 sps:$4 sm:$0xff]  }
 0x2c9   : > { %3226 = vmatprep.subr.bf16.mxu0 %v21360_v18  ;;  %3267 = vmatprep.subr.bf16.mxu1 %v21363_v32  ;;  %v21418_v18 = vld [vmem:[%s31178_s3 + $0x440] ss:$16 sps:$4 sm:$0xff]   ;;  %v21421_v32 = vld [vmem:[%s31178_s3 + $0x448] ss:$16 sps:$4 sm:$0xff]  }
 0x2cc   : > { %3227 = vmatpush1.bf16.msra.mxu0 %v21358_v7  ;;  %3268 = vmatpush1.bf16.msra.mxu1 %v21361_v33  ;;  %v21426_v7 = vld [vmem:[%s31178_s3 + $0x464] ss:$16 sps:$4 sm:$0xff]   ;;  %v21429_v33 = vld [vmem:[%s31178_s3 + $0x46c] ss:$16 sps:$4 sm:$0xff]  }
 0x2cd   : > { %3228 = vmatprep.subr.bf16.mxu0 %v21366_v38  ;;  %3269 = vmatprep.subr.bf16.mxu1 %v21369_v41  ;;  %v21424_v38 = vld [vmem:[%s31178_s3 + $0x460] ss:$16 sps:$4 sm:$0xff]   ;;  %v21427_v41 = vld [vmem:[%s31178_s3 + $0x468] ss:$16 sps:$4 sm:$0xff]  }
 0x2d0   : > { %3229 = vmatpush1.bf16.msra.mxu0 %v21364_v42  ;;  %3270 = vmatpush1.bf16.msra.mxu1 %v21367_v43  ;;  %v21432_v42 = vld [vmem:[%s31178_s3 + $0x484] ss:$16 sps:$4 sm:$0xff]   ;;  %v21435_v43 = vld [vmem:[%s31178_s3 + $0x48c] ss:$16 sps:$4 sm:$0xff]  }
 0x2d1   : > { %3230 = vmatprep.subr.bf16.mxu0 %v21372_v45  ;;  %3271 = vmatprep.subr.bf16.mxu1 %v21375_v47  ;;  %v21430_v45 = vld [vmem:[%s31178_s3 + $0x480] ss:$16 sps:$4 sm:$0xff]   ;;  %v21433_v47 = vld [vmem:[%s31178_s3 + $0x488] ss:$16 sps:$4 sm:$0xff]  }
 0x2d4   : > { %3231 = vmatpush1.bf16.msra.mxu0 %v21370_v55  ;;  %3272 = vmatpush1.bf16.msra.mxu1 %v21373_v56  ;;  %v21438_v55 = vld [vmem:[%s31178_s3 + $0x4a4] ss:$16 sps:$4 sm:$0xff]   ;;  %v21441_v56 = vld [vmem:[%s31178_s3 + $0x4ac] ss:$16 sps:$4 sm:$0xff]  }
 0x2d5   : > { %3232 = vmatprep.subr.bf16.mxu0 %v21378_v1  ;;  %3273 = vmatprep.subr.bf16.mxu1 %v21381_v2  ;;  %v21436_v1 = vld [vmem:[%s31178_s3 + $0x4a0] ss:$16 sps:$4 sm:$0xff]   ;;  %v21439_v2 = vld [vmem:[%s31178_s3 + $0x4a8] ss:$16 sps:$4 sm:$0xff]  }
 0x2d8   : > { %3233 = vmatpush1.bf16.msra.mxu0 %v21376_v4  ;;  %3274 = vmatpush1.bf16.msra.mxu1 %v21379_v5  ;;  %v21444_v4 = vld [vmem:[%s31178_s3 + $0x4c4] ss:$16 sps:$4 sm:$0xff]   ;;  %v21447_v5 = vld [vmem:[%s31178_s3 + $0x4cc] ss:$16 sps:$4 sm:$0xff]  }
 0x2d9   : > { %3234 = vmatprep.subr.bf16.mxu0 %v21384_v6  ;;  %3275 = vmatprep.subr.bf16.mxu1 %v21387_v8  ;;  %v21442_v6 = vld [vmem:[%s31178_s3 + $0x4c0] ss:$16 sps:$4 sm:$0xff]   ;;  %v21445_v8 = vld [vmem:[%s31178_s3 + $0x4c8] ss:$16 sps:$4 sm:$0xff]  }
 0x2dc   : > { %3235 = vmatpush1.bf16.msra.mxu0 %v21382_v9  ;;  %3276 = vmatpush1.bf16.msra.mxu1 %v21385_v10  ;;  %v21450_v9 = vld [vmem:[%s31178_s3 + $0x4e4] ss:$16 sps:$4 sm:$0xff]   ;;  %v21453_v10 = vld [vmem:[%s31178_s3 + $0x4ec] ss:$16 sps:$4 sm:$0xff]  }
 0x2dd   : > { %3236 = vmatprep.subr.bf16.mxu0 %v21390_v11  ;;  %3277 = vmatprep.subr.bf16.mxu1 %v21393_v12  ;;  %v21448_v11 = vld [vmem:[%s31178_s3 + $0x4e0] ss:$16 sps:$4 sm:$0xff]   ;;  %v21451_v12 = vld [vmem:[%s31178_s3 + $0x4e8] ss:$16 sps:$4 sm:$0xff]  }
 0x2e0   : > { %3237 = vmatpush1.bf16.msra.mxu0 %v21388_v13  ;;  %3278 = vmatpush1.bf16.msra.mxu1 %v21391_v16  ;;  %v21456_v13 = vld [vmem:[%s31178_s3 + $0x504] ss:$16 sps:$4 sm:$0xff]   ;;  %v21459_v16 = vld [vmem:[%s31178_s3 + $0x50c] ss:$16 sps:$4 sm:$0xff]  }
 0x2e1   : > { %3238 = vmatprep.subr.bf16.mxu0 %v21396_v17  ;;  %3279 = vmatprep.subr.bf16.mxu1 %v21399_v20  ;;  %v21454_v17 = vld [vmem:[%s31178_s3 + $0x500] ss:$16 sps:$4 sm:$0xff]   ;;  %v21457_v20 = vld [vmem:[%s31178_s3 + $0x508] ss:$16 sps:$4 sm:$0xff]  }
 0x2e4   : > { %3239 = vmatpush1.bf16.msra.mxu0 %v21394_v21  ;;  %3280 = vmatpush1.bf16.msra.mxu1 %v21397_v22  ;;  %v21462_v21 = vld [vmem:[%s31178_s3 + $0x524] ss:$16 sps:$4 sm:$0xff]   ;;  %v21465_v22 = vld [vmem:[%s31178_s3 + $0x52c] ss:$16 sps:$4 sm:$0xff]  }
 0x2e5   : > { %3240 = vmatprep.subr.bf16.mxu0 %v21402_v23  ;;  %3281 = vmatprep.subr.bf16.mxu1 %v21405_v24  ;;  %v21460_v23 = vld [vmem:[%s31178_s3 + $0x520] ss:$16 sps:$4 sm:$0xff]   ;;  %v21463_v24 = vld [vmem:[%s31178_s3 + $0x528] ss:$16 sps:$4 sm:$0xff]  }
 0x2e8   : > { %3241 = vmatpush1.bf16.msra.mxu0 %v21400_v25  ;;  %3282 = vmatpush1.bf16.msra.mxu1 %v21403_v44  ;;  %v21468_v25 = vld [vmem:[%s31178_s3 + $0x544] ss:$16 sps:$4 sm:$0xff]   ;;  %v21471_v44 = vld [vmem:[%s31178_s3 + $0x54c] ss:$16 sps:$4 sm:$0xff]  }
 0x2e9   : > { %3687 = vmatprep.subr.bf16.mxu0 %v21408_v46  ;;  %3728 = vmatprep.subr.bf16.mxu1 %v21411_v49  ;;  %v21466_v46 = vld [vmem:[%s31178_s3 + $0x540] ss:$16 sps:$4 sm:$0xff]   ;;  %v21469_v49 = vld [vmem:[%s31178_s3 + $0x548] ss:$16 sps:$4 sm:$0xff]  }
 0x31d   : > { %v25127_v19 = vpop.permute.xlu1 %21160  ;;  %v21156_v51 = vpop.permute.xlu0 %21155 }
 0x31e   : > { %v21158_v52 = vunpack.i.h.bf16 %v21156_v51  ;;  %v21157_v48 = vunpack.i.l.bf16 %v21156_v51  ;;  %v25131_v54 = vunpack.i.h.bf16 %v25127_v19  ;;  %v21474_v51 = vld [vmem:[%s31178_s3 + $0x564] ss:$16 sps:$4 sm:$0xff]  }
 0x320   : > { %v2351_v26 = vsel %vm2255_vm5, %v21157_v48, %v21158_v52  ;;  %v17439_v57 = vpack.c.bf16 %v21157_v48, %v21157_v48  ;;  %v17575_v62 = vpack.c.bf16 %v25131_v54, %v25131_v54  ;;  %v21477_v52 = vld [vmem:[%s31178_s3 + $0x56c] ss:$16 sps:$4 sm:$0xff]   ;;  %v21472_v48 = vld [vmem:[%s31178_s3 + $0x560] ss:$16 sps:$4 sm:$0xff]  }
 0x321   : > { %v2420_v39 = vpack.c.bf16 %v2351_v26, %v2351_v26  ;;  %v21475_v26 = vld [vmem:[%s31178_s3 + $0x568] ss:$16 sps:$4 sm:$0xff]  }
 0x323   : > { %3242 = vmatprep.mubr.bf16.mxu0 %v2420_v39  ;;  %3283 = vmatprep.mubr.bf16.mxu1 %v2420_v39  ;;  %v21480_v39 = vld [vmem:[%s31178_s3 + $0x584] ss:$16 sps:$4 sm:$0xff]  }
 0x324   : > { %17440 = vmatmul.mubr.msk.bf16.vlgmr.msra.gmra.mrb[8].mxu0 %vm25140_vm1, %v17439_v57  ;;  %17445 = vmatmul.mubr.msk.bf16.vlgmr.msra.gmra.mrb[12].mxu1 %vm25140_vm1, %v17439_v57  ;;  %v21481_v57 = vld [vmem:[%s31178_s3 + $0x588] ss:$16 sps:$4 sm:$0xff]  }
 0x325   : > { %3688 = vmatpush1.bf16.msra.mxu0 %v21406_v28  ;;  %3729 = vmatpush1.bf16.msra.mxu1 %v21409_v29  ;;  %v21483_v28 = vld [vmem:[%s31178_s3 + $0x58c] ss:$16 sps:$4 sm:$0xff]   ;;  %v21478_v29 = vld [vmem:[%s31178_s3 + $0x580] ss:$16 sps:$4 sm:$0xff]  }
 0x326   : > { %17576 = vmatprep.mubr.msk.bf16.mxu0 %vm25146_vm3, %v17575_v62  ;;  %17579 = vmatprep.mubr.msk.bf16.mxu1 %vm25146_vm3, %v17575_v62  ;;  %v21484_v62 = vld [vmem:[%s31178_s3 + $0x5a0] ss:$16 sps:$4 sm:$0xff]  }
 0x327   : > { %3689 = vmatprep.subr.bf16.mxu0 %v21414_v53  ;;  %3730 = vmatprep.subr.bf16.mxu1 %v21417_v60  ;;  %v21486_v53 = vld [vmem:[%s31178_s3 + $0x5a4] ss:$16 sps:$4 sm:$0xff]   ;;  %v21489_v60 = vld [vmem:[%s31178_s3 + $0x5ac] ss:$16 sps:$4 sm:$0xff]  }
 0x329   : > { %3690 = vmatpush1.bf16.msra.mxu0 %v21412_v63  ;;  %3731 = vmatpush1.bf16.msra.mxu1 %v21415_v0  ;;  %v21487_v63 = vld [vmem:[%s31178_s3 + $0x5a8] ss:$16 sps:$4 sm:$0xff]   ;;  %v21492_v0 = vld [vmem:[%s31178_s3 + $0x5c4] ss:$16 sps:$4 sm:$0xff]  }
 0x32a   : > { %3691 = vmatprep.subr.bf16.mxu0 %v21420_v30  ;;  %3732 = vmatprep.subr.bf16.mxu1 %v21423_v40  ;;  %v21495_v30 = vld [vmem:[%s31178_s3 + $0x5cc] ss:$16 sps:$4 sm:$0xff]   ;;  %v21166_v40 = vpop.permute.xlu0 %21165 }
 0x32d   : > { %3692 = vmatpush1.bf16.msra.mxu0 %v21418_v18  ;;  %3733 = vmatpush1.bf16.msra.mxu1 %v21421_v32  ;;  %v21490_v18 = vld [vmem:[%s31178_s3 + $0x5c0] ss:$16 sps:$4 sm:$0xff]   ;;  %v21493_v32 = vld [vmem:[%s31178_s3 + $0x5c8] ss:$16 sps:$4 sm:$0xff]  }
 0x32e   : > { %3693 = vmatprep.subr.bf16.mxu0 %v21426_v7  ;;  %3734 = vmatprep.subr.bf16.mxu1 %v21429_v33  ;;  %v21498_v7 = vld [vmem:[%s31178_s3 + $0x5e4] ss:$16 sps:$4 sm:$0xff]   ;;  %v21501_v33 = vld [vmem:[%s31178_s3 + $0x5ec] ss:$16 sps:$4 sm:$0xff]  }
 0x331   : > { %3694 = vmatpush1.bf16.msra.mxu0 %v21424_v38  ;;  %3735 = vmatpush1.bf16.msra.mxu1 %v21427_v41  ;;  %v21162_v38 = vunpack.i.l.bf16 %v25127_v19  ;;  %v21168_v41 = vunpack.i.h.bf16 %v21166_v40  ;;  %v21507_v19 = vld [vmem:[%s31178_s3 + $0x60c] ss:$16 sps:$4 sm:$0xff]  }
 0x332   : > { %3695 = vmatprep.subr.bf16.mxu0 %v21432_v42  ;;  %3736 = vmatprep.subr.bf16.mxu1 %v21435_v43  ;;  %v25335_v42 = vunpack.i.l.bf16 %v21166_v40  ;;  %v21496_v43 = vld [vmem:[%s31178_s3 + $0x5e0] ss:$16 sps:$4 sm:$0xff]  }
 0x335   : > { %3696 = vmatpush1.bf16.msra.mxu0 %v21430_v45  ;;  %3737 = vmatpush1.bf16.msra.mxu1 %v21433_v47  ;;  %v21499_v45 = vld [vmem:[%s31178_s3 + $0x5e8] ss:$16 sps:$4 sm:$0xff]   ;;  %v21504_v47 = vld [vmem:[%s31178_s3 + $0x604] ss:$16 sps:$4 sm:$0xff]  }
 0x336   : > { %3697 = vmatprep.subr.bf16.mxu0 %v21438_v55  ;;  %3738 = vmatprep.subr.bf16.mxu1 %v21441_v56  ;;  %v3296_v55 = vsel %vm2261_vm7, %v21162_v38, %v25131_v54  ;;  %v3777_v56 = vsel %vm2255_vm5, %v25335_v42, %v21168_v41  ;;  %v21510_v54 = vld [vmem:[%s31178_s3 + $0x624] ss:$16 sps:$4 sm:$0xff]   ;;  %v21550_v38 = vld [vmem:[%s31178_s3 + $0x700] ss:$16 sps:$4 sm:$0xff]   ;;  %v21553_v41 = vld [vmem:[%s31178_s3 + $0x708] ss:$16 sps:$4 sm:$0xff]  }
 0x339   : > { %3698 = vmatpush1.bf16.msra.mxu0 %v21436_v1  ;;  %3739 = vmatpush1.bf16.msra.mxu1 %v21439_v2  ;;  %v21502_v1 = vld [vmem:[%s31178_s3 + $0x600] ss:$16 sps:$4 sm:$0xff]   ;;  %v3365_v2 = vpack.c.bf16 %v3296_v55, %v3296_v55  ;;  %v21564_v55 = vld [vmem:[%s31178_s3 + $0x744] ss:$16 sps:$4 sm:$0xff]  }
 0x33a   : > { %3699 = vmatprep.subr.bf16.mxu0 %v21444_v4  ;;  %3740 = vmatprep.subr.bf16.mxu1 %v21447_v5  ;;  %v21505_v4 = vld [vmem:[%s31178_s3 + $0x608] ss:$16 sps:$4 sm:$0xff]   ;;  %v3847_v5 = vpack.c.bf16 %v3777_v56, %v3777_v56  ;;  %v21567_v56 = vld [vmem:[%s31178_s3 + $0x74c] ss:$16 sps:$4 sm:$0xff]  }
 0x33d   : > { %3700 = vmatpush1.bf16.msra.mxu0 %v21442_v6  ;;  %3741 = vmatpush1.bf16.msra.mxu1 %v21445_v8  ;;  %v21513_v6 = vld [vmem:[%s31178_s3 + $0x62c] ss:$16 sps:$4 sm:$0xff]   ;;  %v21508_v8 = vld [vmem:[%s31178_s3 + $0x620] ss:$16 sps:$4 sm:$0xff]  }
 0x33e   : > { %3701 = vmatprep.subr.bf16.mxu0 %v21450_v9  ;;  %3742 = vmatprep.subr.bf16.mxu1 %v21453_v10  ;;  %v21511_v9 = vld [vmem:[%s31178_s3 + $0x628] ss:$16 sps:$4 sm:$0xff]   ;;  %v21516_v10 = vld [vmem:[%s31178_s3 + $0x644] ss:$16 sps:$4 sm:$0xff]  }
 0x341   : > { %3702 = vmatpush1.bf16.msra.mxu0 %v21448_v11  ;;  %3743 = vmatpush1.bf16.msra.mxu1 %v21451_v12  ;;  %v21519_v11 = vld [vmem:[%s31178_s3 + $0x64c] ss:$16 sps:$4 sm:$0xff]   ;;  %v21514_v12 = vld [vmem:[%s31178_s3 + $0x640] ss:$16 sps:$4 sm:$0xff]  }
 0x342   : > { %3703 = vmatprep.subr.bf16.mxu0 %v21456_v13  ;;  %3744 = vmatprep.subr.bf16.mxu1 %v21459_v16  ;;  %v21517_v13 = vld [vmem:[%s31178_s3 + $0x648] ss:$16 sps:$4 sm:$0xff]   ;;  %v21522_v16 = vld [vmem:[%s31178_s3 + $0x664] ss:$16 sps:$4 sm:$0xff]  }
 0x345   : > { %3704 = vmatpush1.bf16.msra.mxu0 %v21454_v17  ;;  %3745 = vmatpush1.bf16.msra.mxu1 %v21457_v20  ;;  %v21525_v17 = vld [vmem:[%s31178_s3 + $0x66c] ss:$16 sps:$4 sm:$0xff]   ;;  %v21520_v20 = vld [vmem:[%s31178_s3 + $0x660] ss:$16 sps:$4 sm:$0xff]  }
 0x346   : > { %3705 = vmatprep.subr.bf16.mxu0 %v21462_v21  ;;  %3746 = vmatprep.subr.bf16.mxu1 %v21465_v22  ;;  %v21523_v21 = vld [vmem:[%s31178_s3 + $0x668] ss:$16 sps:$4 sm:$0xff]   ;;  %v21528_v22 = vld [vmem:[%s31178_s3 + $0x684] ss:$16 sps:$4 sm:$0xff]  }
 0x349   : > { %3706 = vmatpush1.bf16.msra.mxu0 %v21460_v23  ;;  %3747 = vmatpush1.bf16.msra.mxu1 %v21463_v24  ;;  %v21531_v23 = vld [vmem:[%s31178_s3 + $0x68c] ss:$16 sps:$4 sm:$0xff]   ;;  %v21526_v24 = vld [vmem:[%s31178_s3 + $0x680] ss:$16 sps:$4 sm:$0xff]  }
 0x34a   : > { %3707 = vmatprep.subr.bf16.mxu0 %v21468_v25  ;;  %3748 = vmatprep.subr.bf16.mxu1 %v21471_v44  ;;  %v21529_v25 = vld [vmem:[%s31178_s3 + $0x688] ss:$16 sps:$4 sm:$0xff]   ;;  %v21534_v44 = vld [vmem:[%s31178_s3 + $0x6a4] ss:$16 sps:$4 sm:$0xff]  }
 0x34d   : > { %3708 = vmatpush1.bf16.msra.mxu0 %v21466_v46  ;;  %3749 = vmatpush1.bf16.msra.mxu1 %v21469_v49  ;;  %v21537_v46 = vld [vmem:[%s31178_s3 + $0x6ac] ss:$16 sps:$4 sm:$0xff]   ;;  %v21532_v49 = vld [vmem:[%s31178_s3 + $0x6a0] ss:$16 sps:$4 sm:$0xff]  }
 0x34e   : > { %3709 = vmatprep.subr.bf16.mxu0 %v21474_v51  ;;  %3750 = vmatprep.subr.bf16.mxu1 %v21477_v52  ;;  %v21535_v51 = vld [vmem:[%s31178_s3 + $0x6a8] ss:$16 sps:$4 sm:$0xff]   ;;  %v21540_v52 = vld [vmem:[%s31178_s3 + $0x6c4] ss:$16 sps:$4 sm:$0xff]  }
 0x351   : > { %3710 = vmatpush1.bf16.msra.mxu0 %v21472_v48  ;;  %3751 = vmatpush1.bf16.msra.mxu1 %v21475_v26  ;;  %v21543_v48 = vld [vmem:[%s31178_s3 + $0x6cc] ss:$16 sps:$4 sm:$0xff]   ;;  %v21538_v26 = vld [vmem:[%s31178_s3 + $0x6c0] ss:$16 sps:$4 sm:$0xff]  }
 0x352   : > { %3711 = vmatprep.subr.bf16.mxu0 %v21480_v39  ;;  %3752 = vmatprep.subr.bf16.mxu1 %v21483_v28  ;;  %v21541_v39 = vld [vmem:[%s31178_s3 + $0x6c8] ss:$16 sps:$4 sm:$0xff]   ;;  %v21546_v28 = vld [vmem:[%s31178_s3 + $0x6e4] ss:$16 sps:$4 sm:$0xff]  }
 0x355   : > { %3712 = vmatpush1.bf16.msra.mxu0 %v21478_v29  ;;  %3753 = vmatpush1.bf16.msra.mxu1 %v21481_v57  ;;  %v21549_v29 = vld [vmem:[%s31178_s3 + $0x6ec] ss:$16 sps:$4 sm:$0xff]  }
 0x356   : > { %3713 = vmatprep.subr.bf16.mxu0 %v21486_v53  ;;  %3754 = vmatprep.subr.bf16.mxu1 %v21489_v60  ;;  %v21544_v60 = vld [vmem:[%s31178_s3 + $0x6e0] ss:$16 sps:$4 sm:$0xff]  }
 0x359   : > { %3714 = vmatpush1.bf16.msra.mxu0 %v21484_v62  ;;  %3755 = vmatpush1.bf16.msra.mxu1 %v21487_v63 }
 0x35a   : > { %3715 = vmatprep.subr.bf16.mxu0 %v21492_v0  ;;  %3756 = vmatprep.subr.bf16.mxu1 %v21495_v30  ;;  %v21547_v0 = vld [vmem:[%s31178_s3 + $0x6e8] ss:$16 sps:$4 sm:$0xff]   ;;  %v21552_v30 = vld [vmem:[%s31178_s3 + $0x704] ss:$16 sps:$4 sm:$0xff]  }
 0x35d   : > { %3716 = vmatpush1.bf16.msra.mxu0 %v21490_v18  ;;  %3757 = vmatpush1.bf16.msra.mxu1 %v21493_v32  ;;  %v21555_v32 = vld [vmem:[%s31178_s3 + $0x70c] ss:$16 sps:$4 sm:$0xff]  }
 0x35e   : > { %3717 = vmatprep.subr.bf16.mxu0 %v21498_v7  ;;  %3758 = vmatprep.subr.bf16.mxu1 %v21501_v33 }
 0x361   : > { %3718 = vmatpush1.bf16.msra.mxu0 %v21496_v43  ;;  %3759 = vmatpush1.bf16.msra.mxu1 %v21499_v45  ;;  %v21558_v43 = vld [vmem:[%s31178_s3 + $0x724] ss:$16 sps:$4 sm:$0xff]   ;;  %v21561_v45 = vld [vmem:[%s31178_s3 + $0x72c] ss:$16 sps:$4 sm:$0xff]  }
 0x362   : > { %4168 = vmatprep.subr.bf16.mxu0 %v21504_v47  ;;  %4209 = vmatprep.subr.bf16.mxu1 %v21507_v19  ;;  %v21556_v47 = vld [vmem:[%s31178_s3 + $0x720] ss:$16 sps:$4 sm:$0xff]   ;;  %v21559_v19 = vld [vmem:[%s31178_s3 + $0x728] ss:$16 sps:$4 sm:$0xff]  }
 0x364   : > { %3720 = vmatmul.mubr.bf16.vlgmr.msra.gmra.mrb[12].mxu0 %v3365_v2  ;;  %3761 = vmatmul.mubr.bf16.vlgmr.msra.gmra.mrb[16].mxu1 %v3365_v2  ;;  %v21565_v2 = vld [vmem:[%s31178_s3 + $0x748] ss:$16 sps:$4 sm:$0xff]  }
 0x365   : > { %4169 = vmatpush1.bf16.msra.mxu0 %v21502_v1  ;;  %4200 = vmatprep.mubr.bf16.mxu0 %v3847_v5  ;;  %v21562_v1 = vld [vmem:[%s31178_s3 + $0x740] ss:$16 sps:$4 sm:$0xff]  }
 0x366   : > { %4210 = vmatpush1.bf16.msra.mxu1 %v21505_v4  ;;  %4241 = vmatprep.mubr.bf16.mxu1 %v3847_v5  ;;  %v21570_v4 = vld [vmem:[%s31178_s3 + $0x764] ss:$16 sps:$4 sm:$0xff]   ;;  %v21573_v5 = vld [vmem:[%s31178_s3 + $0x76c] ss:$16 sps:$4 sm:$0xff]  }
 0x367   : > { %4170 = vmatprep.subr.bf16.mxu0 %v21510_v54  ;;  %4211 = vmatprep.subr.bf16.mxu1 %v21513_v6  ;;  %v21568_v54 = vld [vmem:[%s31178_s3 + $0x760] ss:$16 sps:$4 sm:$0xff]   ;;  %v21571_v6 = vld [vmem:[%s31178_s3 + $0x768] ss:$16 sps:$4 sm:$0xff]  }
 0x369   : > { %4171 = vmatpush1.bf16.msra.mxu0 %v21508_v8  ;;  %v21576_v8 = vld [vmem:[%s31178_s3 + $0x784] ss:$16 sps:$4 sm:$0xff]  }
 0x36a   : > { %4212 = vmatpush1.bf16.msra.mxu1 %v21511_v9  ;;  %4172 = vmatprep.subr.bf16.mxu0 %v21516_v10  ;;  %v21579_v9 = vld [vmem:[%s31178_s3 + $0x78c] ss:$16 sps:$4 sm:$0xff]   ;;  %v21574_v10 = vld [vmem:[%s31178_s3 + $0x780] ss:$16 sps:$4 sm:$0xff]  }
 0x36b   : > { %4213 = vmatprep.subr.bf16.mxu1 %v21519_v11  ;;  %v21577_v11 = vld [vmem:[%s31178_s3 + $0x788] ss:$16 sps:$4 sm:$0xff]  }
 0x36d   : > { %4173 = vmatpush1.bf16.msra.mxu0 %v21514_v12  ;;  %v21582_v12 = vld [vmem:[%s31178_s3 + $0x7a4] ss:$16 sps:$4 sm:$0xff]  }
 0x36e   : > { %4214 = vmatpush1.bf16.msra.mxu1 %v21517_v13  ;;  %4174 = vmatprep.subr.bf16.mxu0 %v21522_v16  ;;  %v21585_v13 = vld [vmem:[%s31178_s3 + $0x7ac] ss:$16 sps:$4 sm:$0xff]   ;;  %v21580_v16 = vld [vmem:[%s31178_s3 + $0x7a0] ss:$16 sps:$4 sm:$0xff]  }
 0x36f   : > { %4215 = vmatprep.subr.bf16.mxu1 %v21525_v17  ;;  %v21583_v17 = vld [vmem:[%s31178_s3 + $0x7a8] ss:$16 sps:$4 sm:$0xff]  }
 0x371   : > { %4175 = vmatpush1.bf16.msra.mxu0 %v21520_v20  ;;  %v21588_v20 = vld [vmem:[%s31178_s3 + $0x7c4] ss:$16 sps:$4 sm:$0xff]  }
 0x372   : > { %4216 = vmatpush1.bf16.msra.mxu1 %v21523_v21  ;;  %4176 = vmatprep.subr.bf16.mxu0 %v21528_v22  ;;  %v21591_v21 = vld [vmem:[%s31178_s3 + $0x7cc] ss:$16 sps:$4 sm:$0xff]   ;;  %v21586_v22 = vld [vmem:[%s31178_s3 + $0x7c0] ss:$16 sps:$4 sm:$0xff]  }
 0x373   : > { %4217 = vmatprep.subr.bf16.mxu1 %v21531_v23  ;;  %v21589_v23 = vld [vmem:[%s31178_s3 + $0x7c8] ss:$16 sps:$4 sm:$0xff]  }
 0x375   : > { %4177 = vmatpush1.bf16.msra.mxu0 %v21526_v24  ;;  %v21594_v24 = vld [vmem:[%s31178_s3 + $0x7e4] ss:$16 sps:$4 sm:$0xff]  }
 0x376   : > { %4218 = vmatpush1.bf16.msra.mxu1 %v21529_v25  ;;  %4178 = vmatprep.subr.bf16.mxu0 %v21534_v44  ;;  %v21597_v25 = vld [vmem:[%s31178_s3 + $0x7ec] ss:$16 sps:$4 sm:$0xff]   ;;  %v21592_v44 = vld [vmem:[%s31178_s3 + $0x7e0] ss:$16 sps:$4 sm:$0xff]  }
 0x377   : > { %4219 = vmatprep.subr.bf16.mxu1 %v21537_v46  ;;  %v21595_v46 = vld [vmem:[%s31178_s3 + $0x7e8] ss:$16 sps:$4 sm:$0xff]  }
 0x379   : > { %4179 = vmatpush1.bf16.msra.mxu0 %v21532_v49  ;;  %v21600_v49 = vld [vmem:[%s31178_s3 + $0x804] ss:$16 sps:$4 sm:$0xff]  }
 0x37a   : > { %4220 = vmatpush1.bf16.msra.mxu1 %v21535_v51  ;;  %4180 = vmatprep.subr.bf16.mxu0 %v21540_v52  ;;  %v21603_v51 = vld [vmem:[%s31178_s3 + $0x80c] ss:$16 sps:$4 sm:$0xff]   ;;  %v21598_v52 = vld [vmem:[%s31178_s3 + $0x800] ss:$16 sps:$4 sm:$0xff]  }
 0x37b   : > { %4221 = vmatprep.subr.bf16.mxu1 %v21543_v48  ;;  %v17711_v48 = vpack.c.bf16 %v25335_v42, %v25335_v42  ;;  %v21609_v42 = vld [vmem:[%s31178_s3 + $0x82c] ss:$16 sps:$4 sm:$0xff]  }
 0x37d   : > { %4181 = vmatpush1.bf16.msra.mxu0 %v21538_v26  ;;  %v25437_v57 = vpop.f32.mrb[4].mxu0  ;;  %v25439_v53 = vpop.f32.mrb[8].mxu1  ;;  %v21601_v26 = vld [vmem:[%s31178_s3 + $0x808] ss:$16 sps:$4 sm:$0xff]  }
 0x37e   : > { %4222 = vmatpush1.bf16.msra.mxu1 %v21541_v39  ;;  %v25444_v62 = vpop.f32.mrb[5].mxu0  ;;  %v25446_v63 = vpop.f32.mrb[9].mxu1  ;;  %4182 = vmatprep.subr.bf16.mxu0 %v21546_v28  ;;  %v21606_v39 = vld [vmem:[%s31178_s3 + $0x824] ss:$16 sps:$4 sm:$0xff]   ;;  %v4320_v28 = vpack.c.bf16 %v24899_v59, %v24899_v59 }
 0x37f   : > { %4223 = vmatprep.subr.bf16.mxu1 %v21549_v29  ;;  %v2846_v40 = vpop.f32.mrb[6].mxu0  ;;  %v2887_v18 = vpop.f32.mrb[10].mxu1  ;;  %v21604_v29 = vld [vmem:[%s31178_s3 + $0x820] ss:$16 sps:$4 sm:$0xff]   ;;  %v21612_v59 = vld [vmem:[%s31178_s3 + $0x844] ss:$16 sps:$4 sm:$0xff]  }
 0x380   : > { %v2847_v7 = vpop.f32.mrb[7].mxu0  ;;  %v2888_v33 = vpop.f32.mrb[11].mxu1  ;;  %v21613_v40 = vld [vmem:[%s31178_s3 + $0x848] ss:$16 sps:$4 sm:$0xff]   ;;  %v21618_v18 = vld [vmem:[%s31178_s3 + $0x864] ss:$16 sps:$4 sm:$0xff]  }
 0x381   : > { %4183 = vmatpush1.bf16.msra.mxu0 %v21544_v60  ;;  %v21607_v60 = vld [vmem:[%s31178_s3 + $0x828] ss:$16 sps:$4 sm:$0xff]   ;;  %v21616_v7 = vld [vmem:[%s31178_s3 + $0x860] ss:$16 sps:$4 sm:$0xff]  }
 0x382   : > { %4224 = vmatpush1.bf16.msra.mxu1 %v21547_v0  ;;  %4184 = vmatprep.subr.bf16.mxu0 %v21552_v30  ;;  %v21615_v0 = vld [vmem:[%s31178_s3 + $0x84c] ss:$16 sps:$4 sm:$0xff]   ;;  %v21610_v30 = vld [vmem:[%s31178_s3 + $0x840] ss:$16 sps:$4 sm:$0xff]   ;;  %v21619_v33 = vld [vmem:[%s31178_s3 + $0x868] ss:$16 sps:$4 sm:$0xff]  }
 0x383   : > { %4225 = vmatprep.subr.bf16.mxu1 %v21555_v32  ;;  %v21621_v32 = vld [vmem:[%s31178_s3 + $0x86c] ss:$16 sps:$4 sm:$0xff]  }
 0x385   : > { %4185 = vmatpush1.bf16.msra.mxu0 %v21550_v38  ;;  %v21624_v38 = vld [vmem:[%s31178_s3 + $0x884] ss:$16 sps:$4 sm:$0xff]  }
 0x386   : > { %4226 = vmatpush1.bf16.msra.mxu1 %v21553_v41  ;;  %4186 = vmatprep.subr.bf16.mxu0 %v21558_v43  ;;  %v21627_v41 = vld [vmem:[%s31178_s3 + $0x88c] ss:$16 sps:$4 sm:$0xff]   ;;  %v21622_v43 = vld [vmem:[%s31178_s3 + $0x880] ss:$16 sps:$4 sm:$0xff]  }
 0x387   : > { %4227 = vmatprep.subr.bf16.mxu1 %v21561_v45  ;;  %v21625_v45 = vld [vmem:[%s31178_s3 + $0x888] ss:$16 sps:$4 sm:$0xff]  }
 0x389   : > { %4187 = vmatpush1.bf16.msra.mxu0 %v21556_v47  ;;  %v21630_v47 = vld [vmem:[%s31178_s3 + $0x8a4] ss:$16 sps:$4 sm:$0xff]  }
 0x38a   : > { %4228 = vmatpush1.bf16.msra.mxu1 %v21559_v19  ;;  %4188 = vmatprep.subr.bf16.mxu0 %v21564_v55  ;;  %v21633_v19 = vld [vmem:[%s31178_s3 + $0x8ac] ss:$16 sps:$4 sm:$0xff]   ;;  %v21628_v55 = vld [vmem:[%s31178_s3 + $0x8a0] ss:$16 sps:$4 sm:$0xff]  }
 0x38b   : > { %4229 = vmatprep.subr.bf16.mxu1 %v21567_v56  ;;  %v21631_v56 = vld [vmem:[%s31178_s3 + $0x8a8] ss:$16 sps:$4 sm:$0xff]  }
 0x38d   : > { %4189 = vmatpush1.bf16.msra.mxu0 %v21562_v1  ;;  %v21636_v1 = vld [vmem:[%s31178_s3 + $0x8c4] ss:$16 sps:$4 sm:$0xff]  }
 0x38e   : > { %4230 = vmatpush1.bf16.msra.mxu1 %v21565_v2  ;;  %4190 = vmatprep.subr.bf16.mxu0 %v21570_v4  ;;  %v21639_v2 = vld [vmem:[%s31178_s3 + $0x8cc] ss:$16 sps:$4 sm:$0xff]   ;;  %v21634_v4 = vld [vmem:[%s31178_s3 + $0x8c0] ss:$16 sps:$4 sm:$0xff]  }
 0x38f   : > { %4231 = vmatprep.subr.bf16.mxu1 %v21573_v5  ;;  %v21637_v5 = vld [vmem:[%s31178_s3 + $0x8c8] ss:$16 sps:$4 sm:$0xff]  }
 0x391   : > { %4191 = vmatpush1.bf16.msra.mxu0 %v21568_v54  ;;  %v21642_v54 = vld [vmem:[%s31178_s3 + $0x8e4] ss:$16 sps:$4 sm:$0xff]  }
 0x392   : > { %4232 = vmatpush1.bf16.msra.mxu1 %v21571_v6  ;;  %4192 = vmatprep.subr.bf16.mxu0 %v21576_v8  ;;  %v21645_v6 = vld [vmem:[%s31178_s3 + $0x8ec] ss:$16 sps:$4 sm:$0xff]   ;;  %v21640_v8 = vld [vmem:[%s31178_s3 + $0x8e0] ss:$16 sps:$4 sm:$0xff]  }
 0x393   : > { %4233 = vmatprep.subr.bf16.mxu1 %v21579_v9  ;;  %v21643_v9 = vld [vmem:[%s31178_s3 + $0x8e8] ss:$16 sps:$4 sm:$0xff]  }
 0x395   : > { %4193 = vmatpush1.bf16.msra.mxu0 %v21574_v10  ;;  %v21648_v10 = vld [vmem:[%s31178_s3 + $0x904] ss:$16 sps:$4 sm:$0xff]  }
 0x396   : > { %4234 = vmatpush1.bf16.msra.mxu1 %v21577_v11  ;;  %4194 = vmatprep.subr.bf16.mxu0 %v21582_v12  ;;  %v21651_v11 = vld [vmem:[%s31178_s3 + $0x90c] ss:$16 sps:$4 sm:$0xff]   ;;  %v21646_v12 = vld [vmem:[%s31178_s3 + $0x900] ss:$16 sps:$4 sm:$0xff]  }
 0x397   : > { %4235 = vmatprep.subr.bf16.mxu1 %v21585_v13  ;;  %v21649_v13 = vld [vmem:[%s31178_s3 + $0x908] ss:$16 sps:$4 sm:$0xff]  }
 0x399   : > { %4195 = vmatpush1.bf16.msra.mxu0 %v21580_v16  ;;  %v21654_v16 = vld [vmem:[%s31178_s3 + $0x924] ss:$16 sps:$4 sm:$0xff]  }
 0x39a   : > { %4236 = vmatpush1.bf16.msra.mxu1 %v21583_v17  ;;  %4196 = vmatprep.subr.bf16.mxu0 %v21588_v20  ;;  %v21657_v17 = vld [vmem:[%s31178_s3 + $0x92c] ss:$16 sps:$4 sm:$0xff]   ;;  %v21652_v20 = vld [vmem:[%s31178_s3 + $0x920] ss:$16 sps:$4 sm:$0xff]  }
 0x39b   : > { %4237 = vmatprep.subr.bf16.mxu1 %v21591_v21  ;;  %v21655_v21 = vld [vmem:[%s31178_s3 + $0x928] ss:$16 sps:$4 sm:$0xff]  }
 0x39d   : > { %4197 = vmatpush1.bf16.msra.mxu0 %v21586_v22  ;;  %v21660_v22 = vld [vmem:[%s31178_s3 + $0x944] ss:$16 sps:$4 sm:$0xff]  }
 0x39e   : > { %4238 = vmatpush1.bf16.msra.mxu1 %v21589_v23  ;;  %4198 = vmatprep.subr.bf16.mxu0 %v21594_v24  ;;  %v21663_v23 = vld [vmem:[%s31178_s3 + $0x94c] ss:$16 sps:$4 sm:$0xff]   ;;  %v21658_v24 = vld [vmem:[%s31178_s3 + $0x940] ss:$16 sps:$4 sm:$0xff]  }
 0x39f   : > { %4239 = vmatprep.subr.bf16.mxu1 %v21597_v25  ;;  %v21661_v25 = vld [vmem:[%s31178_s3 + $0x948] ss:$16 sps:$4 sm:$0xff]  }
 0x3a1   : > { %4199 = vmatpush1.bf16.msra.mxu0 %v21592_v44  ;;  %v21666_v44 = vld [vmem:[%s31178_s3 + $0x964] ss:$16 sps:$4 sm:$0xff]  }
 0x3a2   : > { %4240 = vmatpush1.bf16.msra.mxu1 %v21595_v46  ;;  %4641 = vmatprep.subr.bf16.mxu0 %v21600_v49  ;;  %v21669_v46 = vld [vmem:[%s31178_s3 + $0x96c] ss:$16 sps:$4 sm:$0xff]   ;;  %v21664_v49 = vld [vmem:[%s31178_s3 + $0x960] ss:$16 sps:$4 sm:$0xff]  }
 0x3a3   : > { %4682 = vmatprep.subr.bf16.mxu1 %v21603_v51  ;;  %v21667_v51 = vld [vmem:[%s31178_s3 + $0x968] ss:$16 sps:$4 sm:$0xff]  }
 0x3a4   : > { %17712 = vmatmul.mubr.msk.bf16.vlgmr.msra.gmra.mrb[16].mxu0 %vm25140_vm1, %v17711_v48 }
 0x3a5   : > { %17717 = vmatmul.mubr.msk.bf16.vlgmr.msra.gmra.mrb[20].mxu1 %vm25140_vm1, %v17711_v48  ;;  %4642 = vmatpush1.bf16.msra.mxu0 %v21598_v52  ;;  %v21672_v52 = vld [vmem:[%s31178_s3 + $0x984] ss:$16 sps:$4 sm:$0xff]   ;;  %v21675_v48 = vld [vmem:[%s31178_s3 + $0x98c] ss:$16 sps:$4 sm:$0xff]  }
 0x3a6   : > { %4673 = vmatprep.mubr.bf16.mxu0 %v4320_v28  ;;  %4683 = vmatpush1.bf16.msra.mxu1 %v21601_v26  ;;  %v21670_v26 = vld [vmem:[%s31178_s3 + $0x980] ss:$16 sps:$4 sm:$0xff]  }
 0x3a7   : > { %4714 = vmatprep.mubr.bf16.mxu1 %v4320_v28  ;;  %4643 = vmatprep.subr.bf16.mxu0 %v21606_v39  ;;  %v21673_v39 = vld [vmem:[%s31178_s3 + $0x988] ss:$16 sps:$4 sm:$0xff]   ;;  %v21678_v28 = vld [vmem:[%s31178_s3 + $0x9a4] ss:$16 sps:$4 sm:$0xff]  }
 0x3a8   : > { %4684 = vmatprep.subr.bf16.mxu1 %v21609_v42  ;;  %v21681_v42 = vld [vmem:[%s31178_s3 + $0x9ac] ss:$16 sps:$4 sm:$0xff]  }
 0x3a9   : > { %4644 = vmatpush1.bf16.msra.mxu0 %v21604_v29  ;;  %v21676_v29 = vld [vmem:[%s31178_s3 + $0x9a0] ss:$16 sps:$4 sm:$0xff]  }
 0x3aa   : > { %4685 = vmatpush1.bf16.msra.mxu1 %v21607_v60  ;;  %4645 = vmatprep.subr.bf16.mxu0 %v21612_v59  ;;  %v21679_v60 = vld [vmem:[%s31178_s3 + $0x9a8] ss:$16 sps:$4 sm:$0xff]   ;;  %v21684_v59 = vld [vmem:[%s31178_s3 + $0x9c4] ss:$16 sps:$4 sm:$0xff]  }
 0x3ab   : > { %4686 = vmatprep.subr.bf16.mxu1 %v21615_v0  ;;  %v21687_v0 = vld [vmem:[%s31178_s3 + $0x9cc] ss:$16 sps:$4 sm:$0xff]  }
 0x3ad   : > { %4646 = vmatpush1.bf16.msra.mxu0 %v21610_v30  ;;  %v21682_v30 = vld [vmem:[%s31178_s3 + $0x9c0] ss:$16 sps:$4 sm:$0xff]  }
 0x3ae   : > { %4687 = vmatpush1.bf16.msra.mxu1 %v21613_v40  ;;  %4647 = vmatprep.subr.bf16.mxu0 %v21618_v18  ;;  %v21685_v40 = vld [vmem:[%s31178_s3 + $0x9c8] ss:$16 sps:$4 sm:$0xff]   ;;  %v21690_v18 = vld [vmem:[%s31178_s3 + $0x9e4] ss:$16 sps:$4 sm:$0xff]  }
 0x3af   : > { %4688 = vmatprep.subr.bf16.mxu1 %v21621_v32  ;;  %v21693_v32 = vld [vmem:[%s31178_s3 + $0x9ec] ss:$16 sps:$4 sm:$0xff]  }
 0x3b1   : > { %4648 = vmatpush1.bf16.msra.mxu0 %v21616_v7  ;;  %v25741_v7 = vpop.permute.xlu1 %21170 }
 0x3b2   : > { %4689 = vmatpush1.bf16.msra.mxu1 %v21619_v33  ;;  %4649 = vmatprep.subr.bf16.mxu0 %v21624_v38  ;;  %v21688_v33 = vld [vmem:[%s31178_s3 + $0x9e0] ss:$16 sps:$4 sm:$0xff]   ;;  %v21691_v38 = vld [vmem:[%s31178_s3 + $0x9e8] ss:$16 sps:$4 sm:$0xff]  }
 0x3b3   : > { %4690 = vmatprep.subr.bf16.mxu1 %v21627_v41  ;;  %v21696_v41 = vld [vmem:[%s31178_s3 + $0xa04] ss:$16 sps:$4 sm:$0xff]  }
 0x3b5   : > { %4650 = vmatpush1.bf16.msra.mxu0 %v21622_v43  ;;  %v21699_v43 = vld [vmem:[%s31178_s3 + $0xa0c] ss:$16 sps:$4 sm:$0xff]  }
 0x3b6   : > { %4691 = vmatpush1.bf16.msra.mxu1 %v21625_v45  ;;  %4651 = vmatprep.subr.bf16.mxu0 %v21630_v47  ;;  %v25756_v45 = vunpack.i.h.bf16 %v25741_v7  ;;  %v21694_v47 = vld [vmem:[%s31178_s3 + $0xa00] ss:$16 sps:$4 sm:$0xff]  }
 0x3b7   : > { %4692 = vmatprep.subr.bf16.mxu1 %v21633_v19  ;;  %v4319_v19 = vpack.c.bf16 %v24896_v58, %v24896_v58  ;;  %v21700_v58 = vld [vmem:[%s31178_s3 + $0xa20] ss:$16 sps:$4 sm:$0xff]  }
 0x3b9   : > { %4652 = vmatpush1.bf16.msra.mxu0 %v21628_v55  ;;  %v21697_v55 = vld [vmem:[%s31178_s3 + $0xa08] ss:$16 sps:$4 sm:$0xff]  }
 0x3ba   : > { %4693 = vmatpush1.bf16.msra.mxu1 %v21631_v56  ;;  %4653 = vmatprep.subr.bf16.mxu0 %v21636_v1  ;;  %v21702_v56 = vld [vmem:[%s31178_s3 + $0xa24] ss:$16 sps:$4 sm:$0xff]   ;;  %v17975_v1 = vpack.c.bf16 %v25756_v45, %v25756_v45 }
 0x3bb   : > { %4694 = vmatprep.subr.bf16.mxu1 %v21639_v2  ;;  %v21705_v2 = vld [vmem:[%s31178_s3 + $0xa2c] ss:$16 sps:$4 sm:$0xff]  }
 0x3bd   : > { %4654 = vmatpush1.bf16.msra.mxu0 %v21634_v4  ;;  %v21703_v4 = vld [vmem:[%s31178_s3 + $0xa28] ss:$16 sps:$4 sm:$0xff]  }
 0x3be   : > { %4695 = vmatpush1.bf16.msra.mxu1 %v21637_v5  ;;  %4655 = vmatprep.subr.bf16.mxu0 %v21642_v54  ;;  %v21708_v5 = vld [vmem:[%s31178_s3 + $0xa44] ss:$16 sps:$4 sm:$0xff]   ;;  %v21711_v54 = vld [vmem:[%s31178_s3 + $0xa4c] ss:$16 sps:$4 sm:$0xff]  }
 0x3bf   : > { %4696 = vmatprep.subr.bf16.mxu1 %v21645_v6  ;;  %v21706_v6 = vld [vmem:[%s31178_s3 + $0xa40] ss:$16 sps:$4 sm:$0xff]  }
 0x3c1   : > { %4656 = vmatpush1.bf16.msra.mxu0 %v21640_v8  ;;  %v21709_v8 = vld [vmem:[%s31178_s3 + $0xa48] ss:$16 sps:$4 sm:$0xff]  }
 0x3c2   : > { %4697 = vmatpush1.bf16.msra.mxu1 %v21643_v9  ;;  %4657 = vmatprep.subr.bf16.mxu0 %v21648_v10  ;;  %v21714_v9 = vld [vmem:[%s31178_s3 + $0xa64] ss:$16 sps:$4 sm:$0xff]   ;;  %v21717_v10 = vld [vmem:[%s31178_s3 + $0xa6c] ss:$16 sps:$4 sm:$0xff]  }
 0x3c3   : > { %4698 = vmatprep.subr.bf16.mxu1 %v21651_v11  ;;  %v21712_v11 = vld [vmem:[%s31178_s3 + $0xa60] ss:$16 sps:$4 sm:$0xff]  }
 0x3c5   : > { %4658 = vmatpush1.bf16.msra.mxu0 %v21646_v12  ;;  %v21715_v12 = vld [vmem:[%s31178_s3 + $0xa68] ss:$16 sps:$4 sm:$0xff]  }
 0x3c6   : > { %4699 = vmatpush1.bf16.msra.mxu1 %v21649_v13  ;;  %4659 = vmatprep.subr.bf16.mxu0 %v21654_v16  ;;  %v21720_v13 = vld [vmem:[%s31178_s3 + $0xa84] ss:$16 sps:$4 sm:$0xff]   ;;  %v21723_v16 = vld [vmem:[%s31178_s3 + $0xa8c] ss:$16 sps:$4 sm:$0xff]  }
 0x3c7   : > { %4700 = vmatprep.subr.bf16.mxu1 %v21657_v17  ;;  %v21718_v17 = vld [vmem:[%s31178_s3 + $0xa80] ss:$16 sps:$4 sm:$0xff]  }
 0x3c9   : > { %4660 = vmatpush1.bf16.msra.mxu0 %v21652_v20  ;;  %v21721_v20 = vld [vmem:[%s31178_s3 + $0xa88] ss:$16 sps:$4 sm:$0xff]  }
 0x3ca   : > { %4701 = vmatpush1.bf16.msra.mxu1 %v21655_v21  ;;  %4661 = vmatprep.subr.bf16.mxu0 %v21660_v22  ;;  %v21726_v21 = vld [vmem:[%s31178_s3 + $0xaa4] ss:$16 sps:$4 sm:$0xff]   ;;  %v21729_v22 = vld [vmem:[%s31178_s3 + $0xaac] ss:$16 sps:$4 sm:$0xff]  }
 0x3cb   : > { %4702 = vmatprep.subr.bf16.mxu1 %v21663_v23  ;;  %v21724_v23 = vld [vmem:[%s31178_s3 + $0xaa0] ss:$16 sps:$4 sm:$0xff]  }
 0x3cd   : > { %4662 = vmatpush1.bf16.msra.mxu0 %v21658_v24  ;;  %v21727_v24 = vld [vmem:[%s31178_s3 + $0xaa8] ss:$16 sps:$4 sm:$0xff]  }
 0x3ce   : > { %4703 = vmatpush1.bf16.msra.mxu1 %v21661_v25  ;;  %4663 = vmatprep.subr.bf16.mxu0 %v21666_v44  ;;  %v21732_v25 = vld [vmem:[%s31178_s3 + $0xac4] ss:$16 sps:$4 sm:$0xff]  }
 0x3cf   : > { %4704 = vmatprep.subr.bf16.mxu1 %v21669_v46 }
 0x3d1   : > { %4664 = vmatpush1.bf16.msra.mxu0 %v21664_v49  ;;  %v21735_v49 = vld [vmem:[%s31178_s3 + $0xacc] ss:$16 sps:$4 sm:$0xff]  }
 0x3d2   : > { %4705 = vmatpush1.bf16.msra.mxu1 %v21667_v51  ;;  %4665 = vmatprep.subr.bf16.mxu0 %v21672_v52 }
 0x3d3   : > { %4706 = vmatprep.subr.bf16.mxu1 %v21675_v48 }
 0x3d5   : > { %4666 = vmatpush1.bf16.msra.mxu0 %v21670_v26 }
 0x3d6   : > { %4707 = vmatpush1.bf16.msra.mxu1 %v21673_v39  ;;  %4667 = vmatprep.subr.bf16.mxu0 %v21678_v28 }
 0x3d7   : > { %4708 = vmatprep.subr.bf16.mxu1 %v21681_v42 }
 0x3d9   : > { %4668 = vmatpush1.bf16.msra.mxu0 %v21676_v29 }
 0x3da   : > { %4709 = vmatpush1.bf16.msra.mxu1 %v21679_v60  ;;  %4669 = vmatprep.subr.bf16.mxu0 %v21684_v59  ;;  %v21730_v60 = vld [vmem:[%s31178_s3 + $0xac0] ss:$16 sps:$4 sm:$0xff]  }
 0x3db   : > { %4710 = vmatprep.subr.bf16.mxu1 %v21687_v0  ;;  %v21736_v0 = vld [vmem:[%s31178_s3 + $0xae0] ss:$16 sps:$4 sm:$0xff]  }
 0x3dd   : > { %4670 = vmatpush1.bf16.msra.mxu0 %v21682_v30  ;;  %v21739_v30 = vld [vmem:[%s31178_s3 + $0xae8] ss:$16 sps:$4 sm:$0xff]  }
 0x3de   : > { %4711 = vmatpush1.bf16.msra.mxu1 %v21685_v40  ;;  %4671 = vmatprep.subr.bf16.mxu0 %v21690_v18  ;;  %v21744_v40 = vld [vmem:[%s31178_s3 + $0xb04] ss:$16 sps:$4 sm:$0xff]   ;;  %v21747_v18 = vld [vmem:[%s31178_s3 + $0xb0c] ss:$16 sps:$4 sm:$0xff]  }
 0x3df   : > { %4712 = vmatprep.subr.bf16.mxu1 %v21693_v32  ;;  %v21742_v32 = vld [vmem:[%s31178_s3 + $0xb00] ss:$16 sps:$4 sm:$0xff]  }
 0x3e1   : > { %4672 = vmatpush1.bf16.msra.mxu0 %v21688_v33  ;;  %v21745_v33 = vld [vmem:[%s31178_s3 + $0xb08] ss:$16 sps:$4 sm:$0xff]  }
 0x3e2   : > { %4713 = vmatpush1.bf16.msra.mxu1 %v21691_v38  ;;  %5122 = vmatprep.subr.bf16.mxu0 %v21696_v41  ;;  %v21750_v38 = vld [vmem:[%s31178_s3 + $0xb24] ss:$16 sps:$4 sm:$0xff]   ;;  %v21753_v41 = vld [vmem:[%s31178_s3 + $0xb2c] ss:$16 sps:$4 sm:$0xff]  }
 0x3e3   : > { %5163 = vmatprep.subr.bf16.mxu1 %v21699_v43  ;;  %v21748_v43 = vld [vmem:[%s31178_s3 + $0xb20] ss:$16 sps:$4 sm:$0xff]  }
 0x3e4   : > { %4674 = vmatmul.mubr.bf16.vlgmr.msra.gmra.mrb[20].mxu0 %v4319_v19 }
 0x3e5   : > { %4715 = vmatmul.mubr.bf16.vlgmr.msra.gmra.mrb[24].mxu1 %v4319_v19  ;;  %5123 = vmatpush1.bf16.msra.mxu0 %v21694_v47  ;;  %v21751_v47 = vld [vmem:[%s31178_s3 + $0xb28] ss:$16 sps:$4 sm:$0xff]   ;;  %v21756_v19 = vld [vmem:[%s31178_s3 + $0xb44] ss:$16 sps:$4 sm:$0xff]  }
 0x3e6   : > { %17976 = vmatprep.mubr.msk.bf16.mxu0 %vm25146_vm3, %v17975_v1  ;;  %5164 = vmatpush1.bf16.msra.mxu1 %v21697_v55  ;;  %v21759_v55 = vld [vmem:[%s31178_s3 + $0xb4c] ss:$16 sps:$4 sm:$0xff]  }
 0x3e7   : > { %17979 = vmatprep.mubr.msk.bf16.mxu1 %vm25146_vm3, %v17975_v1  ;;  %5124 = vmatprep.subr.bf16.mxu0 %v21702_v56  ;;  %v21754_v56 = vld [vmem:[%s31178_s3 + $0xb40] ss:$16 sps:$4 sm:$0xff]   ;;  %v21757_v1 = vld [vmem:[%s31178_s3 + $0xb48] ss:$16 sps:$4 sm:$0xff]  }
 0x3e8   : > { %5165 = vmatprep.subr.bf16.mxu1 %v21705_v2  ;;  %v21762_v2 = vld [vmem:[%s31178_s3 + $0xb64] ss:$16 sps:$4 sm:$0xff]  }
 0x3e9   : > { %5125 = vmatpush1.bf16.msra.mxu0 %v21700_v58  ;;  %v21765_v58 = vld [vmem:[%s31178_s3 + $0xb6c] ss:$16 sps:$4 sm:$0xff]  }
 0x3ea   : > { %5166 = vmatpush1.bf16.msra.mxu1 %v21703_v4  ;;  %5126 = vmatprep.subr.bf16.mxu0 %v21708_v5  ;;  %v21760_v4 = vld [vmem:[%s31178_s3 + $0xb60] ss:$16 sps:$4 sm:$0xff]   ;;  %v21763_v5 = vld [vmem:[%s31178_s3 + $0xb68] ss:$16 sps:$4 sm:$0xff]  }
 0x3eb   : > { %5167 = vmatprep.subr.bf16.mxu1 %v21711_v54  ;;  %v21768_v54 = vld [vmem:[%s31178_s3 + $0xb84] ss:$16 sps:$4 sm:$0xff]  }
 0x3ed   : > { %5127 = vmatpush1.bf16.msra.mxu0 %v21706_v6  ;;  %v21771_v6 = vld [vmem:[%s31178_s3 + $0xb8c] ss:$16 sps:$4 sm:$0xff]  }
 0x3ee   : > { %5168 = vmatpush1.bf16.msra.mxu1 %v21709_v8  ;;  %5128 = vmatprep.subr.bf16.mxu0 %v21714_v9  ;;  %v21766_v8 = vld [vmem:[%s31178_s3 + $0xb80] ss:$16 sps:$4 sm:$0xff]   ;;  %v21769_v9 = vld [vmem:[%s31178_s3 + $0xb88] ss:$16 sps:$4 sm:$0xff]  }
 0x3ef   : > { %5169 = vmatprep.subr.bf16.mxu1 %v21717_v10  ;;  %v21774_v10 = vld [vmem:[%s31178_s3 + $0xba4] ss:$16 sps:$4 sm:$0xff]  }
 0x3f1   : > { %5129 = vmatpush1.bf16.msra.mxu0 %v21712_v11  ;;  %v21777_v11 = vld [vmem:[%s31178_s3 + $0xbac] ss:$16 sps:$4 sm:$0xff]  }
 0x3f2   : > { %5170 = vmatpush1.bf16.msra.mxu1 %v21715_v12  ;;  %5130 = vmatprep.subr.bf16.mxu0 %v21720_v13  ;;  %v21772_v12 = vld [vmem:[%s31178_s3 + $0xba0] ss:$16 sps:$4 sm:$0xff]   ;;  %v21775_v13 = vld [vmem:[%s31178_s3 + $0xba8] ss:$16 sps:$4 sm:$0xff]  }
 0x3f3   : > { %5171 = vmatprep.subr.bf16.mxu1 %v21723_v16  ;;  %v21780_v16 = vld [vmem:[%s31178_s3 + $0xbc4] ss:$16 sps:$4 sm:$0xff]  }
 0x3f5   : > { %5131 = vmatpush1.bf16.msra.mxu0 %v21718_v17  ;;  %v21783_v17 = vld [vmem:[%s31178_s3 + $0xbcc] ss:$16 sps:$4 sm:$0xff]  }
 0x3f6   : > { %5172 = vmatpush1.bf16.msra.mxu1 %v21721_v20  ;;  %5132 = vmatprep.subr.bf16.mxu0 %v21726_v21  ;;  %v21778_v20 = vld [vmem:[%s31178_s3 + $0xbc0] ss:$16 sps:$4 sm:$0xff]   ;;  %v21176_v21 = vpop.permute.xlu0 %21175 }
 0x3f7   : > { %v3244_v44 = vpop.f32.mrb[8].mxu0  ;;  %v3285_v46 = vpop.f32.mrb[12].mxu1  ;;  %5173 = vmatprep.subr.bf16.mxu1 %v21729_v22  ;;  %v21781_v22 = vld [vmem:[%s31178_s3 + $0xbc8] ss:$16 sps:$4 sm:$0xff]  }
 0x3f8   : > { %v25839_v51 = vadd.f32 %v3244_v44, %v25437_v57  ;;  %v25842_v52 = vadd.f32 %v3285_v46, %v25439_v53  ;;  %v3246_v48 = vpop.f32.mrb[9].mxu0  ;;  %v3287_v26 = vpop.f32.mrb[13].mxu1  ;;  %v21733_v53 = vld [vmem:[%s31178_s3 + $0xac8] ss:$16 sps:$4 sm:$0xff]   ;;  %v21178_v44 = vunpack.i.h.bf16 %v21176_v21  ;;  %v25959_v46 = vunpack.i.l.bf16 %v21176_v21  ;;  %v21826_v21 = vld [vmem:[%s31178_s3 + $0xcc0] ss:$16 sps:$4 sm:$0xff]  }
 0x3f9   : > { %v25845_v39 = vadd.f32 %v3246_v48, %v25444_v62  ;;  %v25848_v28 = vadd.f32 %v3287_v26, %v25446_v63  ;;  %5133 = vmatpush1.bf16.msra.mxu0 %v21724_v23  ;;  %v3248_v42 = vpop.f32.mrb[10].mxu0  ;;  %v3289_v29 = vpop.f32.mrb[14].mxu1  ;;  %v21738_v62 = vld [vmem:[%s31178_s3 + $0xae4] ss:$16 sps:$4 sm:$0xff]   ;;  %v21741_v63 = vld [vmem:[%s31178_s3 + $0xaec] ss:$16 sps:$4 sm:$0xff]  }
 0x3fa   : > { %5174 = vmatpush1.bf16.msra.mxu1 %v21727_v24  ;;  %v3249_v57 = vpop.f32.mrb[11].mxu0  ;;  %v3290_v59 = vpop.f32.mrb[15].mxu1  ;;  %5134 = vmatprep.subr.bf16.mxu0 %v21732_v25  ;;  %v21786_v23 = vld [vmem:[%s31178_s3 + $0xbe4] ss:$16 sps:$4 sm:$0xff]   ;;  %v21172_v24 = vunpack.i.l.bf16 %v25741_v7  ;;  %v21789_v25 = vld [vmem:[%s31178_s3 + $0xbec] ss:$16 sps:$4 sm:$0xff]  }
 0x3fb   : > { %5175 = vmatprep.subr.bf16.mxu1 %v21735_v49  ;;  %v21784_v49 = vld [vmem:[%s31178_s3 + $0xbe0] ss:$16 sps:$4 sm:$0xff]   ;;  %v21787_v48 = vld [vmem:[%s31178_s3 + $0xbe8] ss:$16 sps:$4 sm:$0xff]   ;;  %v21792_v7 = vld [vmem:[%s31178_s3 + $0xc04] ss:$16 sps:$4 sm:$0xff]  }
 0x3fc   : > { %v4731_v26 = vsel %vm2261_vm7, %v21172_v24, %v25756_v45  ;;  %v21795_v42 = vld [vmem:[%s31178_s3 + $0xc0c] ss:$16 sps:$4 sm:$0xff]   ;;  %v21790_v29 = vld [vmem:[%s31178_s3 + $0xc00] ss:$16 sps:$4 sm:$0xff]   ;;  %v21793_v45 = vld [vmem:[%s31178_s3 + $0xc08] ss:$16 sps:$4 sm:$0xff]  }
 0x3fd   : > { %5135 = vmatpush1.bf16.msra.mxu0 %v21730_v60  ;;  %v5220_v60 = vsel %vm2255_vm5, %v25959_v46, %v21178_v44  ;;  %v4800_v57 = vpack.c.bf16 %v4731_v26, %v4731_v26  ;;  %v21798_v59 = vld [vmem:[%s31178_s3 + $0xc24] ss:$16 sps:$4 sm:$0xff]   ;;  %v21835_v24 = vld [vmem:[%s31178_s3 + $0xce8] ss:$16 sps:$4 sm:$0xff]   ;;  %v21843_v44 = vld [vmem:[%s31178_s3 + $0xd0c] ss:$16 sps:$4 sm:$0xff]  }
 0x3fe   : > { %5176 = vmatpush1.bf16.msra.mxu1 %v21733_v53  ;;  %5136 = vmatprep.subr.bf16.mxu0 %v21738_v62  ;;  %v5290_v53 = vpack.c.bf16 %v5220_v60, %v5220_v60  ;;  %v21801_v62 = vld [vmem:[%s31178_s3 + $0xc2c] ss:$16 sps:$4 sm:$0xff]   ;;  %v21852_v60 = vld [vmem:[%s31178_s3 + $0xd44] ss:$16 sps:$4 sm:$0xff]   ;;  %vm27102_vm5 = vmpackc.low %vm18604_vm2, %vm18604_vm2 }
 0x3ff   : > { %5177 = vmatprep.subr.bf16.mxu1 %v21741_v63  ;;  %v21796_v63 = vld [vmem:[%s31178_s3 + $0xc20] ss:$16 sps:$4 sm:$0xff]   ;;  %v21849_v26 = vld [vmem:[%s31178_s3 + $0xd2c] ss:$16 sps:$4 sm:$0xff]  }
 0x401   : > { %5137 = vmatpush1.bf16.msra.mxu0 %v21736_v0  ;;  %v21799_v0 = vld [vmem:[%s31178_s3 + $0xc28] ss:$16 sps:$4 sm:$0xff]  }
 0x402   : > { %5178 = vmatpush1.bf16.msra.mxu1 %v21739_v30  ;;  %5138 = vmatprep.subr.bf16.mxu0 %v21744_v40  ;;  %v21804_v30 = vld [vmem:[%s31178_s3 + $0xc44] ss:$16 sps:$4 sm:$0xff]   ;;  %v21807_v40 = vld [vmem:[%s31178_s3 + $0xc4c] ss:$16 sps:$4 sm:$0xff]  }
 0x403   : > { %5179 = vmatprep.subr.bf16.mxu1 %v21747_v18  ;;  %v21802_v18 = vld [vmem:[%s31178_s3 + $0xc40] ss:$16 sps:$4 sm:$0xff]  }
 0x405   : > { %5139 = vmatpush1.bf16.msra.mxu0 %v21742_v32  ;;  %v21805_v32 = vld [vmem:[%s31178_s3 + $0xc48] ss:$16 sps:$4 sm:$0xff]  }
 0x406   : > { %5180 = vmatpush1.bf16.msra.mxu1 %v21745_v33  ;;  %5140 = vmatprep.subr.bf16.mxu0 %v21750_v38  ;;  %v21810_v33 = vld [vmem:[%s31178_s3 + $0xc64] ss:$16 sps:$4 sm:$0xff]   ;;  %v21813_v38 = vld [vmem:[%s31178_s3 + $0xc6c] ss:$16 sps:$4 sm:$0xff]  }
 0x407   : > { %5181 = vmatprep.subr.bf16.mxu1 %v21753_v41  ;;  %v21808_v41 = vld [vmem:[%s31178_s3 + $0xc60] ss:$16 sps:$4 sm:$0xff]  }
 0x409   : > { %5141 = vmatpush1.bf16.msra.mxu0 %v21748_v43  ;;  %v21811_v43 = vld [vmem:[%s31178_s3 + $0xc68] ss:$16 sps:$4 sm:$0xff]  }
 0x40a   : > { %5182 = vmatpush1.bf16.msra.mxu1 %v21751_v47  ;;  %5142 = vmatprep.subr.bf16.mxu0 %v21756_v19  ;;  %v21816_v47 = vld [vmem:[%s31178_s3 + $0xc84] ss:$16 sps:$4 sm:$0xff]   ;;  %v21819_v19 = vld [vmem:[%s31178_s3 + $0xc8c] ss:$16 sps:$4 sm:$0xff]  }
 0x40b   : > { %5183 = vmatprep.subr.bf16.mxu1 %v21759_v55  ;;  %v21814_v55 = vld [vmem:[%s31178_s3 + $0xc80] ss:$16 sps:$4 sm:$0xff]  }
 0x40d   : > { %5143 = vmatpush1.bf16.msra.mxu0 %v21754_v56  ;;  %v21817_v56 = vld [vmem:[%s31178_s3 + $0xc88] ss:$16 sps:$4 sm:$0xff]  }
 0x40e   : > { %5184 = vmatpush1.bf16.msra.mxu1 %v21757_v1  ;;  %5144 = vmatprep.subr.bf16.mxu0 %v21762_v2  ;;  %v21822_v1 = vld [vmem:[%s31178_s3 + $0xca4] ss:$16 sps:$4 sm:$0xff]   ;;  %v21825_v2 = vld [vmem:[%s31178_s3 + $0xcac] ss:$16 sps:$4 sm:$0xff]  }
 0x40f   : > { %5185 = vmatprep.subr.bf16.mxu1 %v21765_v58  ;;  %v21820_v58 = vld [vmem:[%s31178_s3 + $0xca0] ss:$16 sps:$4 sm:$0xff]  }
 0x411   : > { %5145 = vmatpush1.bf16.msra.mxu0 %v21760_v4  ;;  %v21823_v4 = vld [vmem:[%s31178_s3 + $0xca8] ss:$16 sps:$4 sm:$0xff]  }
 0x412   : > { %5186 = vmatpush1.bf16.msra.mxu1 %v21763_v5  ;;  %5146 = vmatprep.subr.bf16.mxu0 %v21768_v54  ;;  %v21828_v5 = vld [vmem:[%s31178_s3 + $0xcc4] ss:$16 sps:$4 sm:$0xff]  }
 0x413   : > { %5187 = vmatprep.subr.bf16.mxu1 %v21771_v6 }
 0x415   : > { %5147 = vmatpush1.bf16.msra.mxu0 %v21766_v8  ;;  %v21831_v8 = vld [vmem:[%s31178_s3 + $0xccc] ss:$16 sps:$4 sm:$0xff]  }
 0x416   : > { %5188 = vmatpush1.bf16.msra.mxu1 %v21769_v9  ;;  %5148 = vmatprep.subr.bf16.mxu0 %v21774_v10 }
 0x417   : > { %5189 = vmatprep.subr.bf16.mxu1 %v21777_v11 }
 0x419   : > { %5149 = vmatpush1.bf16.msra.mxu0 %v21772_v12 }
 0x41a   : > { %5190 = vmatpush1.bf16.msra.mxu1 %v21775_v13  ;;  %5150 = vmatprep.subr.bf16.mxu0 %v21780_v16 }
 0x41b   : > { %5191 = vmatprep.subr.bf16.mxu1 %v21783_v17 }
 0x41d   : > { %5151 = vmatpush1.bf16.msra.mxu0 %v21778_v20 }
 0x41e   : > { %5192 = vmatpush1.bf16.msra.mxu1 %v21781_v22  ;;  %5152 = vmatprep.subr.bf16.mxu0 %v21786_v23  ;;  %v21832_v23 = vld [vmem:[%s31178_s3 + $0xce0] ss:$16 sps:$4 sm:$0xff]  }
 0x41f   : > { %5193 = vmatprep.subr.bf16.mxu1 %v21789_v25  ;;  %v21840_v25 = vld [vmem:[%s31178_s3 + $0xd04] ss:$16 sps:$4 sm:$0xff]  }
 0x421   : > { %5153 = vmatpush1.bf16.msra.mxu0 %v21784_v49  ;;  %v21838_v49 = vld [vmem:[%s31178_s3 + $0xd00] ss:$16 sps:$4 sm:$0xff]  }
 0x422   : > { %5194 = vmatpush1.bf16.msra.mxu1 %v21787_v48  ;;  %5611 = vmatprep.subr.bf16.mxu0 %v21792_v7  ;;  %v21841_v48 = vld [vmem:[%s31178_s3 + $0xd08] ss:$16 sps:$4 sm:$0xff]   ;;  %v21846_v7 = vld [vmem:[%s31178_s3 + $0xd24] ss:$16 sps:$4 sm:$0xff]  }
 0x423   : > { %5652 = vmatprep.subr.bf16.mxu1 %v21795_v42  ;;  %v21844_v42 = vld [vmem:[%s31178_s3 + $0xd20] ss:$16 sps:$4 sm:$0xff]  }
 0x424   : > { %5155 = vmatmul.mubr.bf16.vlgmr.msra.gmra.mrb[24].mxu0 %v4800_v57 }
 0x425   : > { %5196 = vmatmul.mubr.bf16.vlgmr.msra.gmra.mrb[28].mxu1 %v4800_v57  ;;  %5612 = vmatpush1.bf16.msra.mxu0 %v21790_v29  ;;  %v21847_v29 = vld [vmem:[%s31178_s3 + $0xd28] ss:$16 sps:$4 sm:$0xff]   ;;  %v21855_v57 = vld [vmem:[%s31178_s3 + $0xd4c] ss:$16 sps:$4 sm:$0xff]  }
 0x426   : > { %5643 = vmatprep.mubr.bf16.mxu0 %v5290_v53  ;;  %5653 = vmatpush1.bf16.msra.mxu1 %v21793_v45  ;;  %v21850_v45 = vld [vmem:[%s31178_s3 + $0xd40] ss:$16 sps:$4 sm:$0xff]  }
 0x427   : > { %5684 = vmatprep.mubr.bf16.mxu1 %v5290_v53  ;;  %5613 = vmatprep.subr.bf16.mxu0 %v21798_v59  ;;  %v21853_v59 = vld [vmem:[%s31178_s3 + $0xd48] ss:$16 sps:$4 sm:$0xff]   ;;  %v21858_v53 = vld [vmem:[%s31178_s3 + $0xd64] ss:$16 sps:$4 sm:$0xff]  }
 0x428   : > { %5654 = vmatprep.subr.bf16.mxu1 %v21801_v62  ;;  %v21861_v62 = vld [vmem:[%s31178_s3 + $0xd6c] ss:$16 sps:$4 sm:$0xff]  }
 0x429   : > { %5614 = vmatpush1.bf16.msra.mxu0 %v21796_v63  ;;  %v21856_v63 = vld [vmem:[%s31178_s3 + $0xd60] ss:$16 sps:$4 sm:$0xff]  }
 0x42a   : > { %5655 = vmatpush1.bf16.msra.mxu1 %v21799_v0  ;;  %5615 = vmatprep.subr.bf16.mxu0 %v21804_v30  ;;  %v21859_v0 = vld [vmem:[%s31178_s3 + $0xd68] ss:$16 sps:$4 sm:$0xff]   ;;  %v21864_v30 = vld [vmem:[%s31178_s3 + $0xd84] ss:$16 sps:$4 sm:$0xff]  }
 0x42b   : > { %5656 = vmatprep.subr.bf16.mxu1 %v21807_v40  ;;  %v21867_v40 = vld [vmem:[%s31178_s3 + $0xd8c] ss:$16 sps:$4 sm:$0xff]  }
 0x42d   : > { %5616 = vmatpush1.bf16.msra.mxu0 %v21802_v18  ;;  %v21862_v18 = vld [vmem:[%s31178_s3 + $0xd80] ss:$16 sps:$4 sm:$0xff]  }
 0x42e   : > { %5657 = vmatpush1.bf16.msra.mxu1 %v21805_v32  ;;  %5617 = vmatprep.subr.bf16.mxu0 %v21810_v33  ;;  %v21865_v32 = vld [vmem:[%s31178_s3 + $0xd88] ss:$16 sps:$4 sm:$0xff]   ;;  %v21870_v33 = vld [vmem:[%s31178_s3 + $0xda4] ss:$16 sps:$4 sm:$0xff]  }
 0x42f   : > { %5658 = vmatprep.subr.bf16.mxu1 %v21813_v38  ;;  %v21873_v38 = vld [vmem:[%s31178_s3 + $0xdac] ss:$16 sps:$4 sm:$0xff]  }
 0x431   : > { %5618 = vmatpush1.bf16.msra.mxu0 %v21808_v41  ;;  %v21868_v41 = vld [vmem:[%s31178_s3 + $0xda0] ss:$16 sps:$4 sm:$0xff]  }
 0x432   : > { %5659 = vmatpush1.bf16.msra.mxu1 %v21811_v43  ;;  %5619 = vmatprep.subr.bf16.mxu0 %v21816_v47  ;;  %v21871_v43 = vld [vmem:[%s31178_s3 + $0xda8] ss:$16 sps:$4 sm:$0xff]   ;;  %v21876_v47 = vld [vmem:[%s31178_s3 + $0xdc4] ss:$16 sps:$4 sm:$0xff]  }
 0x433   : > { %5660 = vmatprep.subr.bf16.mxu1 %v21819_v19  ;;  %v21879_v19 = vld [vmem:[%s31178_s3 + $0xdcc] ss:$16 sps:$4 sm:$0xff]  }
 0x435   : > { %5620 = vmatpush1.bf16.msra.mxu0 %v21814_v55  ;;  %v21874_v55 = vld [vmem:[%s31178_s3 + $0xdc0] ss:$16 sps:$4 sm:$0xff]  }
 0x436   : > { %5661 = vmatpush1.bf16.msra.mxu1 %v21817_v56  ;;  %5621 = vmatprep.subr.bf16.mxu0 %v21822_v1  ;;  %v21877_v56 = vld [vmem:[%s31178_s3 + $0xdc8] ss:$16 sps:$4 sm:$0xff]   ;;  %v21882_v1 = vld [vmem:[%s31178_s3 + $0xde4] ss:$16 sps:$4 sm:$0xff]  }
 0x437   : > { %v3721_v54 = vpop.f32.mrb[12].mxu0  ;;  %v3762_v6 = vpop.f32.mrb[16].mxu1  ;;  %5662 = vmatprep.subr.bf16.mxu1 %v21825_v2  ;;  %v21885_v2 = vld [vmem:[%s31178_s3 + $0xdec] ss:$16 sps:$4 sm:$0xff]  }
 0x438   : > { %v26050_v9 = vadd.f32 %v3721_v54, %v25839_v51  ;;  %v26053_v10 = vadd.f32 %v3762_v6, %v25842_v52  ;;  %v3723_v11 = vpop.f32.mrb[13].mxu0  ;;  %v3764_v12 = vpop.f32.mrb[17].mxu1  ;;  %v21829_v52 = vld [vmem:[%s31178_s3 + $0xcc8] ss:$16 sps:$4 sm:$0xff]   ;;  %v21891_v54 = vld [vmem:[%s31178_s3 + $0xe0c] ss:$16 sps:$4 sm:$0xff]  }
 0x439   : > { %v26056_v13 = vadd.f32 %v3723_v11, %v25845_v39  ;;  %v26059_v16 = vadd.f32 %v3764_v12, %v25848_v28  ;;  %v3725_v17 = vpop.f32.mrb[14].mxu0  ;;  %v3766_v20 = vpop.f32.mrb[18].mxu1  ;;  %5622 = vmatpush1.bf16.msra.mxu0 %v21820_v58  ;;  %v21834_v39 = vld [vmem:[%s31178_s3 + $0xce4] ss:$16 sps:$4 sm:$0xff]   ;;  %v21837_v28 = vld [vmem:[%s31178_s3 + $0xcec] ss:$16 sps:$4 sm:$0xff]  }
 0x43a   : > { %5663 = vmatpush1.bf16.msra.mxu1 %v21823_v4  ;;  %v3726_v51 = vpop.f32.mrb[15].mxu0  ;;  %v3767_v22 = vpop.f32.mrb[19].mxu1  ;;  %5623 = vmatprep.subr.bf16.mxu0 %v21828_v5  ;;  %v21880_v58 = vld [vmem:[%s31178_s3 + $0xde0] ss:$16 sps:$4 sm:$0xff]   ;;  %v21883_v4 = vld [vmem:[%s31178_s3 + $0xde8] ss:$16 sps:$4 sm:$0xff]  }
 0x43b   : > { %5664 = vmatprep.subr.bf16.mxu1 %v21831_v8  ;;  %v21888_v5 = vld [vmem:[%s31178_s3 + $0xe04] ss:$16 sps:$4 sm:$0xff]   ;;  %v21886_v6 = vld [vmem:[%s31178_s3 + $0xe00] ss:$16 sps:$4 sm:$0xff]   ;;  %v18111_v8 = vpack.c.bf16 %v25959_v46, %v25959_v46  ;;  %v21889_v11 = vld [vmem:[%s31178_s3 + $0xe08] ss:$16 sps:$4 sm:$0xff]   ;;  %v18247_v46 = vpack.c.bf16 %v24933_v15, %v24933_v15 }
 0x43c   : > { %v21894_v17 = vld [vmem:[%s31178_s3 + $0xe24] ss:$16 sps:$4 sm:$0xff]   ;;  %v21897_v20 = vld [vmem:[%s31178_s3 + $0xe2c] ss:$16 sps:$4 sm:$0xff]   ;;  %v21895_v15 = vld [vmem:[%s31178_s3 + $0xe28] ss:$16 sps:$4 sm:$0xff]  }
 0x43d   : > { %5624 = vmatpush1.bf16.msra.mxu0 %v21826_v21  ;;  %v21892_v21 = vld [vmem:[%s31178_s3 + $0xe20] ss:$16 sps:$4 sm:$0xff]   ;;  %v21900_v51 = vld [vmem:[%s31178_s3 + $0xe44] ss:$16 sps:$4 sm:$0xff]   ;;  %v21999_v12 = vld [vmem:[%s31178_s3 + $0x104c] ss:$16 sps:$4 sm:$0xff]  }
 0x43e   : > { %5665 = vmatpush1.bf16.msra.mxu1 %v21829_v52  ;;  %5625 = vmatprep.subr.bf16.mxu0 %v21834_v39  ;;  %v21898_v22 = vld [vmem:[%s31178_s3 + $0xe40] ss:$16 sps:$4 sm:$0xff]   ;;  %v21901_v52 = vld [vmem:[%s31178_s3 + $0xe48] ss:$16 sps:$4 sm:$0xff]   ;;  %v21906_v39 = vld [vmem:[%s31178_s3 + $0xe64] ss:$16 sps:$4 sm:$0xff]  }
 0x43f   : > { %5666 = vmatprep.subr.bf16.mxu1 %v21837_v28  ;;  %v21909_v28 = vld [vmem:[%s31178_s3 + $0xe6c] ss:$16 sps:$4 sm:$0xff]  }
 0x441   : > { %5626 = vmatpush1.bf16.msra.mxu0 %v21832_v23  ;;  %v21904_v23 = vld [vmem:[%s31178_s3 + $0xe60] ss:$16 sps:$4 sm:$0xff]  }
 0x442   : > { %5667 = vmatpush1.bf16.msra.mxu1 %v21835_v24  ;;  %5627 = vmatprep.subr.bf16.mxu0 %v21840_v25  ;;  %v21907_v24 = vld [vmem:[%s31178_s3 + $0xe68] ss:$16 sps:$4 sm:$0xff]   ;;  %v21912_v25 = vld [vmem:[%s31178_s3 + $0xe84] ss:$16 sps:$4 sm:$0xff]  }
 0x443   : > { %5668 = vmatprep.subr.bf16.mxu1 %v21843_v44  ;;  %v21915_v44 = vld [vmem:[%s31178_s3 + $0xe8c] ss:$16 sps:$4 sm:$0xff]  }
 0x445   : > { %5628 = vmatpush1.bf16.msra.mxu0 %v21838_v49  ;;  %v21910_v49 = vld [vmem:[%s31178_s3 + $0xe80] ss:$16 sps:$4 sm:$0xff]  }
 0x446   : > { %5669 = vmatpush1.bf16.msra.mxu1 %v21841_v48  ;;  %5629 = vmatprep.subr.bf16.mxu0 %v21846_v7  ;;  %v21913_v48 = vld [vmem:[%s31178_s3 + $0xe88] ss:$16 sps:$4 sm:$0xff]   ;;  %v21918_v7 = vld [vmem:[%s31178_s3 + $0xea4] ss:$16 sps:$4 sm:$0xff]  }
 0x447   : > { %5670 = vmatprep.subr.bf16.mxu1 %v21849_v26  ;;  %v21921_v26 = vld [vmem:[%s31178_s3 + $0xeac] ss:$16 sps:$4 sm:$0xff]  }
 0x449   : > { %5630 = vmatpush1.bf16.msra.mxu0 %v21844_v42  ;;  %v21916_v42 = vld [vmem:[%s31178_s3 + $0xea0] ss:$16 sps:$4 sm:$0xff]  }
 0x44a   : > { %5671 = vmatpush1.bf16.msra.mxu1 %v21847_v29  ;;  %5631 = vmatprep.subr.bf16.mxu0 %v21852_v60  ;;  %v21919_v29 = vld [vmem:[%s31178_s3 + $0xea8] ss:$16 sps:$4 sm:$0xff]   ;;  %v21924_v60 = vld [vmem:[%s31178_s3 + $0xec4] ss:$16 sps:$4 sm:$0xff]  }
 0x44b   : > { %5672 = vmatprep.subr.bf16.mxu1 %v21855_v57 }
 0x44d   : > { %5632 = vmatpush1.bf16.msra.mxu0 %v21850_v45  ;;  %v21927_v45 = vld [vmem:[%s31178_s3 + $0xecc] ss:$16 sps:$4 sm:$0xff]  }
 0x44e   : > { %5673 = vmatpush1.bf16.msra.mxu1 %v21853_v59  ;;  %5633 = vmatprep.subr.bf16.mxu0 %v21858_v53 }
 0x44f   : > { %5674 = vmatprep.subr.bf16.mxu1 %v21861_v62 }
 0x451   : > { %5634 = vmatpush1.bf16.msra.mxu0 %v21856_v63 }
 0x452   : > { %5675 = vmatpush1.bf16.msra.mxu1 %v21859_v0  ;;  %5635 = vmatprep.subr.bf16.mxu0 %v21864_v30 }
 0x453   : > { %5676 = vmatprep.subr.bf16.mxu1 %v21867_v40 }
 0x455   : > { %5636 = vmatpush1.bf16.msra.mxu0 %v21862_v18  ;;  %v21922_v18 = vld [vmem:[%s31178_s3 + $0xec0] ss:$16 sps:$4 sm:$0xff]  }
 0x456   : > { %5677 = vmatpush1.bf16.msra.mxu1 %v21865_v32  ;;  %5637 = vmatprep.subr.bf16.mxu0 %v21870_v33 }
 0x457   : > { %5678 = vmatprep.subr.bf16.mxu1 %v21873_v38 }
 0x459   : > { %5638 = vmatpush1.bf16.msra.mxu0 %v21868_v41  ;;  %v21933_v41 = vld [vmem:[%s31178_s3 + $0xeec] ss:$16 sps:$4 sm:$0xff]  }
 0x45a   : > { %5679 = vmatpush1.bf16.msra.mxu1 %v21871_v43  ;;  %5639 = vmatprep.subr.bf16.mxu0 %v21876_v47  ;;  %v21931_v43 = vld [vmem:[%s31178_s3 + $0xee8] ss:$16 sps:$4 sm:$0xff]   ;;  %v21936_v47 = vld [vmem:[%s31178_s3 + $0xf04] ss:$16 sps:$4 sm:$0xff]  }
 0x45b   : > { %5680 = vmatprep.subr.bf16.mxu1 %v21879_v19  ;;  %v21939_v19 = vld [vmem:[%s31178_s3 + $0xf0c] ss:$16 sps:$4 sm:$0xff]  }
 0x45d   : > { %5640 = vmatpush1.bf16.msra.mxu0 %v21874_v55  ;;  %v21934_v55 = vld [vmem:[%s31178_s3 + $0xf00] ss:$16 sps:$4 sm:$0xff]  }
 0x45e   : > { %5681 = vmatpush1.bf16.msra.mxu1 %v21877_v56  ;;  %5641 = vmatprep.subr.bf16.mxu0 %v21882_v1  ;;  %v21937_v56 = vld [vmem:[%s31178_s3 + $0xf08] ss:$16 sps:$4 sm:$0xff]   ;;  %v21942_v1 = vld [vmem:[%s31178_s3 + $0xf24] ss:$16 sps:$4 sm:$0xff]  }
 0x45f   : > { %5682 = vmatprep.subr.bf16.mxu1 %v21885_v2  ;;  %v21945_v2 = vld [vmem:[%s31178_s3 + $0xf2c] ss:$16 sps:$4 sm:$0xff]  }
 0x461   : > { %5642 = vmatpush1.bf16.msra.mxu0 %v21880_v58  ;;  %v21940_v58 = vld [vmem:[%s31178_s3 + $0xf20] ss:$16 sps:$4 sm:$0xff]  }
 0x462   : > { %5683 = vmatpush1.bf16.msra.mxu1 %v21883_v4  ;;  %6084 = vmatprep.subr.bf16.mxu0 %v21888_v5  ;;  %v21943_v4 = vld [vmem:[%s31178_s3 + $0xf28] ss:$16 sps:$4 sm:$0xff]   ;;  %v21948_v5 = vld [vmem:[%s31178_s3 + $0xf44] ss:$16 sps:$4 sm:$0xff]  }
 0x463   : > { %6125 = vmatprep.subr.bf16.mxu1 %v21891_v54  ;;  %v21951_v54 = vld [vmem:[%s31178_s3 + $0xf4c] ss:$16 sps:$4 sm:$0xff]  }
 0x464   : > { %18112 = vmatmul.mubr.msk.bf16.vlgmr.msra.gmra.mrb[28].mxu0 %vm25140_vm1, %v18111_v8 }
 0x465   : > { %18117 = vmatmul.mubr.msk.bf16.vlgmr.msra.gmra.mrb[32].mxu1 %vm25140_vm1, %v18111_v8  ;;  %6085 = vmatpush1.bf16.msra.mxu0 %v21886_v6  ;;  %v21946_v6 = vld [vmem:[%s31178_s3 + $0xf40] ss:$16 sps:$4 sm:$0xff]   ;;  %v21949_v8 = vld [vmem:[%s31178_s3 + $0xf48] ss:$16 sps:$4 sm:$0xff]  }
 0x466   : > { %18248 = vmatprep.mubr.msk.bf16.mxu0 %vm26191_vm4, %v18247_v46  ;;  %6126 = vmatpush1.bf16.msra.mxu1 %v21889_v11  ;;  %v21954_v11 = vld [vmem:[%s31178_s3 + $0xf64] ss:$16 sps:$4 sm:$0xff]  }
 0x467   : > { %18254 = vmatprep.mubr.msk.bf16.mxu1 %vm26191_vm4, %v18247_v46  ;;  %6086 = vmatprep.subr.bf16.mxu0 %v21894_v17  ;;  %v21957_v17 = vld [vmem:[%s31178_s3 + $0xf6c] ss:$16 sps:$4 sm:$0xff]   ;;  %v21952_v46 = vld [vmem:[%s31178_s3 + $0xf60] ss:$16 sps:$4 sm:$0xff]  }
 0x468   : > { %6127 = vmatprep.subr.bf16.mxu1 %v21897_v20  ;;  %v21955_v20 = vld [vmem:[%s31178_s3 + $0xf68] ss:$16 sps:$4 sm:$0xff]  }
 0x469   : > { %6087 = vmatpush1.bf16.msra.mxu0 %v21892_v21  ;;  %v21960_v21 = vld [vmem:[%s31178_s3 + $0xf84] ss:$16 sps:$4 sm:$0xff]  }
 0x46a   : > { %6128 = vmatpush1.bf16.msra.mxu1 %v21895_v15  ;;  %6088 = vmatprep.subr.bf16.mxu0 %v21900_v51  ;;  %v21963_v15 = vld [vmem:[%s31178_s3 + $0xf8c] ss:$16 sps:$4 sm:$0xff]   ;;  %v21958_v51 = vld [vmem:[%s31178_s3 + $0xf80] ss:$16 sps:$4 sm:$0xff]  }
 0x46b   : > { %6129 = vmatprep.subr.bf16.mxu1 %v21903_v50  ;;  %v21961_v50 = vld [vmem:[%s31178_s3 + $0xf88] ss:$16 sps:$4 sm:$0xff]  }
 0x46d   : > { %6089 = vmatpush1.bf16.msra.mxu0 %v21898_v22  ;;  %v21966_v22 = vld [vmem:[%s31178_s3 + $0xfa4] ss:$16 sps:$4 sm:$0xff]  }
 0x46e   : > { %6130 = vmatpush1.bf16.msra.mxu1 %v21901_v52  ;;  %6090 = vmatprep.subr.bf16.mxu0 %v21906_v39  ;;  %v21969_v52 = vld [vmem:[%s31178_s3 + $0xfac] ss:$16 sps:$4 sm:$0xff]   ;;  %v21964_v39 = vld [vmem:[%s31178_s3 + $0xfa0] ss:$16 sps:$4 sm:$0xff]  }
 0x46f   : > { %6131 = vmatprep.subr.bf16.mxu1 %v21909_v28  ;;  %v21967_v28 = vld [vmem:[%s31178_s3 + $0xfa8] ss:$16 sps:$4 sm:$0xff]  }
 0x471   : > { %6091 = vmatpush1.bf16.msra.mxu0 %v21904_v23  ;;  %v21972_v23 = vld [vmem:[%s31178_s3 + $0xfc4] ss:$16 sps:$4 sm:$0xff]  }
 0x472   : > { %6132 = vmatpush1.bf16.msra.mxu1 %v21907_v24  ;;  %6092 = vmatprep.subr.bf16.mxu0 %v21912_v25  ;;  %v21975_v24 = vld [vmem:[%s31178_s3 + $0xfcc] ss:$16 sps:$4 sm:$0xff]   ;;  %v21970_v25 = vld [vmem:[%s31178_s3 + $0xfc0] ss:$16 sps:$4 sm:$0xff]  }
 0x473   : > { %6133 = vmatprep.subr.bf16.mxu1 %v21915_v44  ;;  %v21973_v44 = vld [vmem:[%s31178_s3 + $0xfc8] ss:$16 sps:$4 sm:$0xff]  }
 0x475   : > { %6093 = vmatpush1.bf16.msra.mxu0 %v21910_v49  ;;  %v21978_v49 = vld [vmem:[%s31178_s3 + $0xfe4] ss:$16 sps:$4 sm:$0xff]  }
 0x476   : > { %6134 = vmatpush1.bf16.msra.mxu1 %v21913_v48  ;;  %6094 = vmatprep.subr.bf16.mxu0 %v21918_v7  ;;  %v21981_v48 = vld [vmem:[%s31178_s3 + $0xfec] ss:$16 sps:$4 sm:$0xff]   ;;  %v26391_v7 = vpop.permute.xlu1 %21180 }
 0x477   : > { %v4202_v57 = vpop.f32.mrb[16].mxu0  ;;  %6135 = vmatprep.subr.bf16.mxu1 %v21921_v26  ;;  %v21976_v26 = vld [vmem:[%s31178_s3 + $0xfe0] ss:$16 sps:$4 sm:$0xff]  }
 0x478   : > { %v26272_v59 = vadd.f32 %v4202_v57, %v26050_v9  ;;  %v4243_v53 = vpop.f32.mrb[20].mxu1  ;;  %v4204_v62 = vpop.f32.mrb[17].mxu0  ;;  %v26406_v57 = vunpack.i.h.bf16 %v26391_v7 }
 0x479   : > { %v26275_v63 = vadd.f32 %v4243_v53, %v26053_v10  ;;  %v26278_v0 = vadd.f32 %v4204_v62, %v26056_v13  ;;  %v4245_v30 = vpop.f32.mrb[21].mxu1  ;;  %v4206_v40 = vpop.f32.mrb[18].mxu0  ;;  %6095 = vmatpush1.bf16.msra.mxu0 %v21916_v42  ;;  %v21925_v10 = vld [vmem:[%s31178_s3 + $0xec8] ss:$16 sps:$4 sm:$0xff]   ;;  %v21930_v13 = vld [vmem:[%s31178_s3 + $0xee4] ss:$16 sps:$4 sm:$0xff]   ;;  %v18250_v53 = vpack.c.bf16 %v24930_v14, %v24930_v14 }
 0x47a   : > { %v26284_v32 = vadd.f32 %v4245_v30, %v26059_v16  ;;  %v4247_v9 = vpop.f32.mrb[22].mxu1  ;;  %6136 = vmatpush1.bf16.msra.mxu1 %v21919_v29  ;;  %v4207_v33 = vpop.f32.mrb[19].mxu0  ;;  %6096 = vmatprep.subr.bf16.mxu0 %v21924_v60  ;;  %v21928_v16 = vld [vmem:[%s31178_s3 + $0xee0] ss:$16 sps:$4 sm:$0xff]   ;;  %v21979_v42 = vld [vmem:[%s31178_s3 + $0xfe8] ss:$16 sps:$4 sm:$0xff]   ;;  %v18387_v40 = vpack.c.bf16 %v26406_v57, %v26406_v57 }
 0x47b   : > { %v4248_v38 = vpop.f32.mrb[23].mxu1  ;;  %6137 = vmatprep.subr.bf16.mxu1 %v21927_v45  ;;  %v21984_v29 = vld [vmem:[%s31178_s3 + $0x1004] ss:$16 sps:$4 sm:$0xff]   ;;  %v21987_v60 = vld [vmem:[%s31178_s3 + $0x100c] ss:$16 sps:$4 sm:$0xff]  }
 0x47c   : > { %v21982_v45 = vld [vmem:[%s31178_s3 + $0x1000] ss:$16 sps:$4 sm:$0xff]   ;;  %v21985_v62 = vld [vmem:[%s31178_s3 + $0x1008] ss:$16 sps:$4 sm:$0xff]   ;;  %v21990_v30 = vld [vmem:[%s31178_s3 + $0x1024] ss:$16 sps:$4 sm:$0xff]  }
 0x47d   : > { %6097 = vmatpush1.bf16.msra.mxu0 %v21922_v18  ;;  %v21993_v14 = vld [vmem:[%s31178_s3 + $0x102c] ss:$16 sps:$4 sm:$0xff]   ;;  %v21988_v18 = vld [vmem:[%s31178_s3 + $0x1020] ss:$16 sps:$4 sm:$0xff]   ;;  %v21991_v9 = vld [vmem:[%s31178_s3 + $0x1028] ss:$16 sps:$4 sm:$0xff]  }
 0x47e   : > { %6138 = vmatpush1.bf16.msra.mxu1 %v21925_v10  ;;  %6098 = vmatprep.subr.bf16.mxu0 %v21930_v13  ;;  %v21996_v33 = vld [vmem:[%s31178_s3 + $0x1044] ss:$16 sps:$4 sm:$0xff]   ;;  %v21994_v10 = vld [vmem:[%s31178_s3 + $0x1040] ss:$16 sps:$4 sm:$0xff]   ;;  %v21997_v13 = vld [vmem:[%s31178_s3 + $0x1048] ss:$16 sps:$4 sm:$0xff]  }
 0x47f   : > { %6139 = vmatprep.subr.bf16.mxu1 %v21933_v41  ;;  %v22005_v38 = vld [vmem:[%s31178_s3 + $0x106c] ss:$16 sps:$4 sm:$0xff]   ;;  %v22000_v41 = vld [vmem:[%s31178_s3 + $0x1060] ss:$16 sps:$4 sm:$0xff]  }
 0x481   : > { %6099 = vmatpush1.bf16.msra.mxu0 %v21928_v16  ;;  %v22003_v16 = vld [vmem:[%s31178_s3 + $0x1068] ss:$16 sps:$4 sm:$0xff]  }
 0x482   : > { %6140 = vmatpush1.bf16.msra.mxu1 %v21931_v43  ;;  %6100 = vmatprep.subr.bf16.mxu0 %v21936_v47  ;;  %v22008_v43 = vld [vmem:[%s31178_s3 + $0x1084] ss:$16 sps:$4 sm:$0xff]   ;;  %v22011_v47 = vld [vmem:[%s31178_s3 + $0x108c] ss:$16 sps:$4 sm:$0xff]  }
 0x483   : > { %6141 = vmatprep.subr.bf16.mxu1 %v21939_v19  ;;  %v22006_v19 = vld [vmem:[%s31178_s3 + $0x1080] ss:$16 sps:$4 sm:$0xff]  }
 0x485   : > { %6101 = vmatpush1.bf16.msra.mxu0 %v21934_v55  ;;  %v22009_v55 = vld [vmem:[%s31178_s3 + $0x1088] ss:$16 sps:$4 sm:$0xff]  }
 0x486   : > { %6142 = vmatpush1.bf16.msra.mxu1 %v21937_v56  ;;  %6102 = vmatprep.subr.bf16.mxu0 %v21942_v1  ;;  %v22014_v56 = vld [vmem:[%s31178_s3 + $0x10a4] ss:$16 sps:$4 sm:$0xff]   ;;  %v22017_v1 = vld [vmem:[%s31178_s3 + $0x10ac] ss:$16 sps:$4 sm:$0xff]  }
 0x487   : > { %6143 = vmatprep.subr.bf16.mxu1 %v21945_v2  ;;  %v22012_v2 = vld [vmem:[%s31178_s3 + $0x10a0] ss:$16 sps:$4 sm:$0xff]  }
 0x489   : > { %6103 = vmatpush1.bf16.msra.mxu0 %v21940_v58  ;;  %v22015_v58 = vld [vmem:[%s31178_s3 + $0x10a8] ss:$16 sps:$4 sm:$0xff]  }
 0x48a   : > { %6144 = vmatpush1.bf16.msra.mxu1 %v21943_v4  ;;  %6104 = vmatprep.subr.bf16.mxu0 %v21948_v5  ;;  %v22020_v4 = vld [vmem:[%s31178_s3 + $0x10c4] ss:$16 sps:$4 sm:$0xff]  }
 0x48b   : > { %6145 = vmatprep.subr.bf16.mxu1 %v21951_v54  ;;  %v22023_v54 = vld [vmem:[%s31178_s3 + $0x10cc] ss:$16 sps:$4 sm:$0xff]  }
 0x48d   : > { %6105 = vmatpush1.bf16.msra.mxu0 %v21946_v6 }
 0x48e   : > { %6146 = vmatpush1.bf16.msra.mxu1 %v21949_v8  ;;  %6106 = vmatprep.subr.bf16.mxu0 %v21954_v11 }
 0x48f   : > { %6147 = vmatprep.subr.bf16.mxu1 %v21957_v17 }
 0x491   : > { %6107 = vmatpush1.bf16.msra.mxu0 %v21952_v46 }
 0x492   : > { %6148 = vmatpush1.bf16.msra.mxu1 %v21955_v20  ;;  %6108 = vmatprep.subr.bf16.mxu0 %v21960_v21 }
 0x493   : > { %6149 = vmatprep.subr.bf16.mxu1 %v21963_v15  ;;  %v22018_v15 = vld [vmem:[%s31178_s3 + $0x10c0] ss:$16 sps:$4 sm:$0xff]  }
 0x495   : > { %6109 = vmatpush1.bf16.msra.mxu0 %v21958_v51 }
 0x496   : > { %6150 = vmatpush1.bf16.msra.mxu1 %v21961_v50  ;;  %6110 = vmatprep.subr.bf16.mxu0 %v21966_v22 }
 0x497   : > { %6151 = vmatprep.subr.bf16.mxu1 %v21969_v52  ;;  %v22029_v52 = vld [vmem:[%s31178_s3 + $0x10ec] ss:$16 sps:$4 sm:$0xff]  }
 0x499   : > { %6111 = vmatpush1.bf16.msra.mxu0 %v21964_v39  ;;  %v22027_v39 = vld [vmem:[%s31178_s3 + $0x10e8] ss:$16 sps:$4 sm:$0xff]  }
 0x49a   : > { %6152 = vmatpush1.bf16.msra.mxu1 %v21967_v28  ;;  %6112 = vmatprep.subr.bf16.mxu0 %v21972_v23  ;;  %v22032_v28 = vld [vmem:[%s31178_s3 + $0x1104] ss:$16 sps:$4 sm:$0xff]   ;;  %v22035_v23 = vld [vmem:[%s31178_s3 + $0x110c] ss:$16 sps:$4 sm:$0xff]  }
 0x49b   : > { %6153 = vmatprep.subr.bf16.mxu1 %v21975_v24  ;;  %v22030_v24 = vld [vmem:[%s31178_s3 + $0x1100] ss:$16 sps:$4 sm:$0xff]  }
 0x49d   : > { %6113 = vmatpush1.bf16.msra.mxu0 %v21970_v25  ;;  %v22033_v25 = vld [vmem:[%s31178_s3 + $0x1108] ss:$16 sps:$4 sm:$0xff]  }
 0x49e   : > { %6154 = vmatpush1.bf16.msra.mxu1 %v21973_v44  ;;  %6114 = vmatprep.subr.bf16.mxu0 %v21978_v49  ;;  %v22038_v44 = vld [vmem:[%s31178_s3 + $0x1124] ss:$16 sps:$4 sm:$0xff]   ;;  %v22041_v49 = vld [vmem:[%s31178_s3 + $0x112c] ss:$16 sps:$4 sm:$0xff]  }
 0x49f   : > { %6155 = vmatprep.subr.bf16.mxu1 %v21981_v48  ;;  %v22036_v48 = vld [vmem:[%s31178_s3 + $0x1120] ss:$16 sps:$4 sm:$0xff]  }
 0x4a1   : > { %6115 = vmatpush1.bf16.msra.mxu0 %v21976_v26  ;;  %v22039_v26 = vld [vmem:[%s31178_s3 + $0x1128] ss:$16 sps:$4 sm:$0xff]  }
 0x4a2   : > { %6156 = vmatpush1.bf16.msra.mxu1 %v21979_v42  ;;  %6565 = vmatprep.subr.bf16.mxu0 %v21984_v29  ;;  %v22044_v42 = vld [vmem:[%s31178_s3 + $0x1144] ss:$16 sps:$4 sm:$0xff]   ;;  %v22047_v29 = vld [vmem:[%s31178_s3 + $0x114c] ss:$16 sps:$4 sm:$0xff]  }
 0x4a3   : > { %6606 = vmatprep.subr.bf16.mxu1 %v21987_v60  ;;  %v22042_v60 = vld [vmem:[%s31178_s3 + $0x1140] ss:$16 sps:$4 sm:$0xff]  }
 0x4a4   : > { %18251 = vmatmul.mubr.msk.bf16.vlgmr.msra.gmra.mrb[32].mxu0 %vm26191_vm4, %v18250_v53 }
 0x4a5   : > { %18257 = vmatmul.mubr.msk.bf16.vlgmr.msra.gmra.mrb[36].mxu1 %vm26191_vm4, %v18250_v53  ;;  %6566 = vmatpush1.bf16.msra.mxu0 %v21982_v45  ;;  %v22045_v45 = vld [vmem:[%s31178_s3 + $0x1148] ss:$16 sps:$4 sm:$0xff]   ;;  %v22050_v53 = vld [vmem:[%s31178_s3 + $0x1164] ss:$16 sps:$4 sm:$0xff]  }
 0x4a6   : > { %18388 = vmatprep.mubr.msk.bf16.mxu0 %vm25146_vm3, %v18387_v40  ;;  %6607 = vmatpush1.bf16.msra.mxu1 %v21985_v62  ;;  %v22053_v62 = vld [vmem:[%s31178_s3 + $0x116c] ss:$16 sps:$4 sm:$0xff]  }
 0x4a7   : > { %18391 = vmatprep.mubr.msk.bf16.mxu1 %vm25146_vm3, %v18387_v40  ;;  %6567 = vmatprep.subr.bf16.mxu0 %v21990_v30  ;;  %v22048_v30 = vld [vmem:[%s31178_s3 + $0x1160] ss:$16 sps:$4 sm:$0xff]   ;;  %v22051_v40 = vld [vmem:[%s31178_s3 + $0x1168] ss:$16 sps:$4 sm:$0xff]  }
 0x4a8   : > { %6608 = vmatprep.subr.bf16.mxu1 %v21993_v14  ;;  %v22056_v14 = vld [vmem:[%s31178_s3 + $0x1184] ss:$16 sps:$4 sm:$0xff]  }
 0x4a9   : > { %6568 = vmatpush1.bf16.msra.mxu0 %v21988_v18  ;;  %v22059_v18 = vld [vmem:[%s31178_s3 + $0x118c] ss:$16 sps:$4 sm:$0xff]  }
 0x4aa   : > { %6609 = vmatpush1.bf16.msra.mxu1 %v21991_v9  ;;  %6569 = vmatprep.subr.bf16.mxu0 %v21996_v33  ;;  %v22054_v9 = vld [vmem:[%s31178_s3 + $0x1180] ss:$16 sps:$4 sm:$0xff]   ;;  %v22057_v33 = vld [vmem:[%s31178_s3 + $0x1188] ss:$16 sps:$4 sm:$0xff]  }
 0x4ab   : > { %6610 = vmatprep.subr.bf16.mxu1 %v21999_v12  ;;  %v22062_v12 = vld [vmem:[%s31178_s3 + $0x11a4] ss:$16 sps:$4 sm:$0xff]  }
 0x4ad   : > { %6570 = vmatpush1.bf16.msra.mxu0 %v21994_v10  ;;  %v22065_v10 = vld [vmem:[%s31178_s3 + $0x11ac] ss:$16 sps:$4 sm:$0xff]  }
 0x4ae   : > { %6611 = vmatpush1.bf16.msra.mxu1 %v21997_v13  ;;  %6571 = vmatprep.subr.bf16.mxu0 %v22002_v61  ;;  %v22060_v13 = vld [vmem:[%s31178_s3 + $0x11a0] ss:$16 sps:$4 sm:$0xff]   ;;  %v22063_v61 = vld [vmem:[%s31178_s3 + $0x11a8] ss:$16 sps:$4 sm:$0xff]  }
 0x4af   : > { %6612 = vmatprep.subr.bf16.mxu1 %v22005_v38  ;;  %v22068_v38 = vld [vmem:[%s31178_s3 + $0x11c4] ss:$16 sps:$4 sm:$0xff]  }
 0x4b1   : > { %6572 = vmatpush1.bf16.msra.mxu0 %v22000_v41  ;;  %v22071_v41 = vld [vmem:[%s31178_s3 + $0x11cc] ss:$16 sps:$4 sm:$0xff]  }
 0x4b2   : > { %6613 = vmatpush1.bf16.msra.mxu1 %v22003_v16  ;;  %6573 = vmatprep.subr.bf16.mxu0 %v22008_v43  ;;  %v22066_v16 = vld [vmem:[%s31178_s3 + $0x11c0] ss:$16 sps:$4 sm:$0xff]   ;;  %v22069_v43 = vld [vmem:[%s31178_s3 + $0x11c8] ss:$16 sps:$4 sm:$0xff]  }
 0x4b3   : > { %6614 = vmatprep.subr.bf16.mxu1 %v22011_v47  ;;  %v22074_v47 = vld [vmem:[%s31178_s3 + $0x11e4] ss:$16 sps:$4 sm:$0xff]  }
 0x4b5   : > { %6574 = vmatpush1.bf16.msra.mxu0 %v22006_v19  ;;  %v21182_v19 = vunpack.i.l.bf16 %v26391_v7 }
 0x4b6   : > { %6615 = vmatpush1.bf16.msra.mxu1 %v22009_v55  ;;  %6575 = vmatprep.subr.bf16.mxu0 %v22014_v56  ;;  %v22077_v55 = vld [vmem:[%s31178_s3 + $0x11ec] ss:$16 sps:$4 sm:$0xff]   ;;  %v22072_v56 = vld [vmem:[%s31178_s3 + $0x11e0] ss:$16 sps:$4 sm:$0xff]  }
 0x4b7   : > { %v4675_v5 = vpop.f32.mrb[20].mxu0  ;;  %6616 = vmatprep.subr.bf16.mxu1 %v22017_v1  ;;  %v22075_v1 = vld [vmem:[%s31178_s3 + $0x11e8] ss:$16 sps:$4 sm:$0xff]  }
 0x4b8   : > { %v26493_v6 = vadd.f32 %v4675_v5, %v26272_v59  ;;  %v4716_v8 = vpop.f32.mrb[24].mxu1  ;;  %v4677_v11 = vpop.f32.mrb[21].mxu0 }
 0x4b9   : > { %v26496_v17 = vadd.f32 %v4716_v8, %v26275_v63  ;;  %v26499_v46 = vadd.f32 %v4677_v11, %v26278_v0  ;;  %v4718_v20 = vpop.f32.mrb[25].mxu1  ;;  %v4679_v21 = vpop.f32.mrb[22].mxu0  ;;  %6576 = vmatpush1.bf16.msra.mxu0 %v22012_v2  ;;  %v22021_v63 = vld [vmem:[%s31178_s3 + $0x10c8] ss:$16 sps:$4 sm:$0xff]   ;;  %v22026_v0 = vld [vmem:[%s31178_s3 + $0x10e4] ss:$16 sps:$4 sm:$0xff]   ;;  %v6174_v2 = vsel %vm2261_vm7, %v21182_v19, %v26406_v57  ;;  %vm27110_vm7 = vmpackc.low %vm2258_vm6, %vm2258_vm6 }
 0x4ba   : > { %v26505_v51 = vadd.f32 %v4718_v20, %v26284_v32  ;;  %v4720_v59 = vpop.f32.mrb[26].mxu1  ;;  %6617 = vmatpush1.bf16.msra.mxu1 %v22015_v58  ;;  %v4680_v50 = vpop.f32.mrb[23].mxu0  ;;  %6577 = vmatprep.subr.bf16.mxu0 %v22020_v4  ;;  %v22024_v32 = vld [vmem:[%s31178_s3 + $0x10e0] ss:$16 sps:$4 sm:$0xff]   ;;  %v6243_v7 = vpack.c.bf16 %v6174_v2, %v6174_v2 }
 0x4bb   : > { %v4721_v22 = vpop.f32.mrb[27].mxu1  ;;  %6618 = vmatprep.subr.bf16.mxu1 %v22023_v54 }
 0x4bd   : > { %6578 = vmatpush1.bf16.msra.mxu0 %v22018_v15 }
 0x4be   : > { %6619 = vmatpush1.bf16.msra.mxu1 %v22021_v63  ;;  %6579 = vmatprep.subr.bf16.mxu0 %v22026_v0 }
 0x4bf   : > { %6620 = vmatprep.subr.bf16.mxu1 %v22029_v52 }
 0x4c1   : > { %6580 = vmatpush1.bf16.msra.mxu0 %v22024_v32 }
 0x4c2   : > { %6621 = vmatpush1.bf16.msra.mxu1 %v22027_v39  ;;  %6581 = vmatprep.subr.bf16.mxu0 %v22032_v28 }
 0x4c3   : > { %6622 = vmatprep.subr.bf16.mxu1 %v22035_v23 }
 0x4c5   : > { %6582 = vmatpush1.bf16.msra.mxu0 %v22030_v24 }
 0x4c6   : > { %6623 = vmatpush1.bf16.msra.mxu1 %v22033_v25  ;;  %6583 = vmatprep.subr.bf16.mxu0 %v22038_v44 }
 0x4c7   : > { %6624 = vmatprep.subr.bf16.mxu1 %v22041_v49 }
 0x4c9   : > { %6584 = vmatpush1.bf16.msra.mxu0 %v22036_v48 }
 0x4ca   : > { %6625 = vmatpush1.bf16.msra.mxu1 %v22039_v26  ;;  %6585 = vmatprep.subr.bf16.mxu0 %v22044_v42 }
 0x4cb   : > { %6626 = vmatprep.subr.bf16.mxu1 %v22047_v29 }
 0x4cd   : > { %6586 = vmatpush1.bf16.msra.mxu0 %v22042_v60 }
 0x4ce   : > { %6627 = vmatpush1.bf16.msra.mxu1 %v22045_v45  ;;  %6587 = vmatprep.subr.bf16.mxu0 %v22050_v53 }
 0x4cf   : > { %6628 = vmatprep.subr.bf16.mxu1 %v22053_v62 }
 0x4d1   : > { %6588 = vmatpush1.bf16.msra.mxu0 %v22048_v30  ;;  %v6651_v30 = vld [vmem:[%s31179_s4] sm:$0xf] }
 0x4d2   : > { %6629 = vmatpush1.bf16.msra.mxu1 %v22051_v40  ;;  %6589 = vmatprep.subr.bf16.mxu0 %v22056_v14  ;;  %v6656_v40 = vrot.slane %v6651_v30, %v24581_v34 }
 0x4d3   : > { %6630 = vmatprep.subr.bf16.mxu1 %v22059_v18  ;;  %v6664_v18 = vrot.slane %v6651_v30, %v24587_v36 }
 0x4d5   : > { %6590 = vmatpush1.bf16.msra.mxu0 %v22054_v9  ;;  %v6660_v9 = vrot.slane %v6651_v30, %v24584_v35 }
 0x4d6   : > { %6631 = vmatpush1.bf16.msra.mxu1 %v22057_v33  ;;  %6591 = vmatprep.subr.bf16.mxu0 %v22062_v12 }
 0x4d7   : > { %6632 = vmatprep.subr.bf16.mxu1 %v22065_v10 }
 0x4d9   : > { %6592 = vmatpush1.bf16.msra.mxu0 %v22060_v13  ;;  %v6668_v13 = vrot.slane %v6651_v30, %v24590_v37  ;;  %v22120_v30 = vld [vmem:[%s31180_s5 + $0x2e0] ss:$16 sps:$4 sm:$0xff]  }
 0x4da   : > { %6633 = vmatpush1.bf16.msra.mxu1 %v22063_v61  ;;  %6593 = vmatprep.subr.bf16.mxu0 %v22068_v38 }
 0x4db   : > { %6634 = vmatprep.subr.bf16.mxu1 %v22071_v41 }
 0x4dd   : > { %6594 = vmatpush1.bf16.msra.mxu0 %v22066_v16 }
 0x4de   : > { %6635 = vmatpush1.bf16.msra.mxu1 %v22069_v43  ;;  %6595 = vmatprep.subr.bf16.mxu0 %v22074_v47 }
 0x4df   : > { %6636 = vmatprep.subr.bf16.mxu1 %v22077_v55 }
 0x4e1   : > { %6596 = vmatpush1.bf16.msra.mxu0 %v22072_v56 }
 0x4e2   : > { %6637 = vmatpush1.bf16.msra.mxu1 %v22075_v1 }
 0x4e4   : > { %6598 = vmatmul.mubr.bf16.vlgmr.msra.gmra.mrb[36].mxu0 %v6243_v7 }
 0x4e5   : > { %6639 = vmatmul.mubr.bf16.vlgmr.msra.gmra.mrb[40].mxu1 %v6243_v7  ;;  %v22078_v7 = vld [vmem:[%s31180_s5 + $0x200] ss:$16 sps:$4 sm:$0xff]  }
 0x4f7   : > { %v5156_v58 = vpop.f32.mrb[24].mxu0 }
 0x4f8   : > { %v5204_v4 = vadd.f32 %v5156_v58, %v26493_v6  ;;  %v5197_v5 = vpop.f32.mrb[28].mxu1  ;;  %v5158_v54 = vpop.f32.mrb[25].mxu0  ;;  %v22080_v58 = vld [vmem:[%s31180_s5 + $0x204] ss:$16 sps:$4 sm:$0xff]  }
 0x4f9   : > { %v5206_v8 = vadd.f32 %v5197_v5, %v26496_v17  ;;  %v5205_v11 = vadd.f32 %v5158_v54, %v26499_v46  ;;  %v5199_v20 = vpop.f32.mrb[29].mxu1  ;;  %v5160_v21 = vpop.f32.mrb[26].mxu0  ;;  %v22081_v54 = vld [vmem:[%s31180_s5 + $0x208] ss:$16 sps:$4 sm:$0xff]   ;;  %7210 = vmatprep.subr.bf16.mxu0 %v22080_v58  ;;  %v22152_v58 = vld [vmem:[%s31180_s5 + $0x384] ss:$16 sps:$4 sm:$0xff]  }
 0x4fa   : > { %v5207_v15 = vadd.f32 %v5199_v20, %v26505_v51  ;;  %v5201_v57 = vpop.f32.mrb[30].mxu1  ;;  %v5161_v59 = vpop.f32.mrb[27].mxu0  ;;  %v22086_v21 = vld [vmem:[%s31180_s5 + $0x224] ss:$16 sps:$4 sm:$0xff]   ;;  %7211 = vmatpush1.bf16.msra.mxu0 %v22078_v7  ;;  %v22147_v7 = vld [vmem:[%s31180_s5 + $0x368] ss:$16 sps:$4 sm:$0xff]  }
 0x4fb   : > { %v5202_v50 = vpop.f32.mrb[31].mxu1  ;;  %v22084_v57 = vld [vmem:[%s31180_s5 + $0x220] ss:$16 sps:$4 sm:$0xff]   ;;  %v22089_v59 = vld [vmem:[%s31180_s5 + $0x22c] ss:$16 sps:$4 sm:$0xff]   ;;  %7212 = vmatprep.subr.bf16.mxu0 %v22086_v21 }
 0x4fc   : > { %v22153_v21 = vld [vmem:[%s31180_s5 + $0x388] ss:$16 sps:$4 sm:$0xff]  }
 0x4fe   : > { %7213 = vmatpush1.bf16.msra.mxu0 %v22084_v57  ;;  %v22158_v57 = vld [vmem:[%s31180_s5 + $0x3a4] ss:$16 sps:$4 sm:$0xff]  }
 0x537   : > { %v5645_v63 = vpop.f32.mrb[28].mxu0 }
 0x538   : > { %v5693_v0 = vadd.f32 %v5645_v63, %v5204_v4  ;;  %v5686_v22 = vpop.f32.mrb[32].mxu1  ;;  %v5647_v52 = vpop.f32.mrb[29].mxu0  ;;  %v22087_v63 = vld [vmem:[%s31180_s5 + $0x228] ss:$16 sps:$4 sm:$0xff]  }
 0x539   : > { %v5695_v32 = vadd.f32 %v5686_v22, %v5206_v8  ;;  %v5694_v39 = vadd.f32 %v5647_v52, %v5205_v11  ;;  %v5688_v6 = vpop.f32.mrb[33].mxu1  ;;  %v5649_v28 = vpop.f32.mrb[30].mxu0  ;;  %v22083_v8 = vld [vmem:[%s31180_s5 + $0x20c] ss:$16 sps:$4 sm:$0xff]  }
 0x53a   : > { %v5696_v23 = vadd.f32 %v5688_v6, %v5207_v15  ;;  %v5690_v24 = vpop.f32.mrb[34].mxu1  ;;  %v5650_v17 = vpop.f32.mrb[31].mxu0  ;;  %7251 = vmatprep.subr.bf16.mxu1 %v22083_v8  ;;  %v22095_v52 = vld [vmem:[%s31180_s5 + $0x24c] ss:$16 sps:$4 sm:$0xff]   ;;  %v22098_v6 = vld [vmem:[%s31180_s5 + $0x264] ss:$16 sps:$4 sm:$0xff]  }
 0x53b   : > { %v5691_v25 = vpop.f32.mrb[35].mxu1  ;;  %7252 = vmatpush1.bf16.msra.mxu1 %v22081_v54  ;;  %v22101_v28 = vld [vmem:[%s31180_s5 + $0x26c] ss:$16 sps:$4 sm:$0xff]   ;;  %v22099_v24 = vld [vmem:[%s31180_s5 + $0x268] ss:$16 sps:$4 sm:$0xff]  }
 0x53c   : > { %7253 = vmatprep.subr.bf16.mxu1 %v22089_v59  ;;  %v22104_v17 = vld [vmem:[%s31180_s5 + $0x284] ss:$16 sps:$4 sm:$0xff]   ;;  %v22107_v25 = vld [vmem:[%s31180_s5 + $0x28c] ss:$16 sps:$4 sm:$0xff]   ;;  %v22150_v8 = vld [vmem:[%s31180_s5 + $0x380] ss:$16 sps:$4 sm:$0xff]  }
 0x53d   : > { %v22155_v54 = vld [vmem:[%s31180_s5 + $0x38c] ss:$16 sps:$4 sm:$0xff]  }
 0x53e   : > { %v22161_v59 = vld [vmem:[%s31180_s5 + $0x3ac] ss:$16 sps:$4 sm:$0xff]  }
 0x53f   : > { %7254 = vmatpush1.bf16.msra.mxu1 %v22087_v63  ;;  %v22159_v63 = vld [vmem:[%s31180_s5 + $0x3a8] ss:$16 sps:$4 sm:$0xff]  }
 0x540   : > { %7255 = vmatprep.subr.bf16.mxu1 %v22095_v52 }
 0x577   : > { %v6118_v46 = vpop.f32.mrb[32].mxu0 }
 0x578   : > { %v6166_v44 = vadd.f32 %v6118_v46, %v5693_v0  ;;  %v6159_v49 = vpop.f32.mrb[36].mxu1  ;;  %v6120_v48 = vpop.f32.mrb[33].mxu0  ;;  %v22092_v0 = vld [vmem:[%s31180_s5 + $0x244] ss:$16 sps:$4 sm:$0xff]   ;;  %v22102_v46 = vld [vmem:[%s31180_s5 + $0x280] ss:$16 sps:$4 sm:$0xff]  }
 0x579   : > { %v6168_v51 = vadd.f32 %v6159_v49, %v5695_v32  ;;  %v6167_v26 = vadd.f32 %v6120_v48, %v5694_v39  ;;  %v6161_v42 = vpop.f32.mrb[37].mxu1  ;;  %v6122_v29 = vpop.f32.mrb[34].mxu0  ;;  %v22090_v32 = vld [vmem:[%s31180_s5 + $0x240] ss:$16 sps:$4 sm:$0xff]   ;;  %7214 = vmatprep.subr.bf16.mxu0 %v22092_v0  ;;  %v22093_v39 = vld [vmem:[%s31180_s5 + $0x248] ss:$16 sps:$4 sm:$0xff]  }
 0x57a   : > { %v6169_v60 = vadd.f32 %v6161_v42, %v5696_v23  ;;  %v6163_v45 = vpop.f32.mrb[38].mxu1  ;;  %v6123_v53 = vpop.f32.mrb[35].mxu0  ;;  %7215 = vmatpush1.bf16.msra.mxu0 %v22090_v32  ;;  %v22096_v23 = vld [vmem:[%s31180_s5 + $0x260] ss:$16 sps:$4 sm:$0xff]   ;;  %7256 = vmatpush1.bf16.msra.mxu1 %v22093_v39  ;;  %v22110_v49 = vld [vmem:[%s31180_s5 + $0x2a4] ss:$16 sps:$4 sm:$0xff]  }
 0x57b   : > { %v6164_v62 = vpop.f32.mrb[39].mxu1  ;;  %7216 = vmatprep.subr.bf16.mxu0 %v22098_v6  ;;  %7257 = vmatprep.subr.bf16.mxu1 %v22101_v28  ;;  %v22113_v48 = vld [vmem:[%s31180_s5 + $0x2ac] ss:$16 sps:$4 sm:$0xff]   ;;  %v22116_v42 = vld [vmem:[%s31180_s5 + $0x2c4] ss:$16 sps:$4 sm:$0xff]  }
 0x57c   : > { %v22119_v29 = vld [vmem:[%s31180_s5 + $0x2cc] ss:$16 sps:$4 sm:$0xff]   ;;  %v22117_v45 = vld [vmem:[%s31180_s5 + $0x2c8] ss:$16 sps:$4 sm:$0xff]   ;;  %v22122_v53 = vld [vmem:[%s31180_s5 + $0x2e4] ss:$16 sps:$4 sm:$0xff]  }
 0x57d   : > { %v22125_v62 = vld [vmem:[%s31180_s5 + $0x2ec] ss:$16 sps:$4 sm:$0xff]   ;;  %v22162_v32 = vld [vmem:[%s31180_s5 + $0x3c0] ss:$16 sps:$4 sm:$0xff]   ;;  %v22164_v39 = vld [vmem:[%s31180_s5 + $0x3c4] ss:$16 sps:$4 sm:$0xff]  }
 0x57e   : > { %7217 = vmatpush1.bf16.msra.mxu0 %v22096_v23  ;;  %7258 = vmatpush1.bf16.msra.mxu1 %v22099_v24  ;;  %v22165_v6 = vld [vmem:[%s31180_s5 + $0x3c8] ss:$16 sps:$4 sm:$0xff]   ;;  %v22167_v28 = vld [vmem:[%s31180_s5 + $0x3cc] ss:$16 sps:$4 sm:$0xff]   ;;  %v22170_v23 = vld [vmem:[%s31180_s5 + $0x3e4] ss:$16 sps:$4 sm:$0xff]  }
 0x57f   : > { %7218 = vmatprep.subr.bf16.mxu0 %v22104_v17  ;;  %7259 = vmatprep.subr.bf16.mxu1 %v22107_v25  ;;  %v22173_v25 = vld [vmem:[%s31180_s5 + $0x3ec] ss:$16 sps:$4 sm:$0xff]  }
 0x582   : > { %7219 = vmatpush1.bf16.msra.mxu0 %v22102_v46 }
 0x583   : > { %7220 = vmatprep.subr.bf16.mxu0 %v22110_v49 }
 0x5b7   : > { %v6599_v14 = vpop.f32.mrb[36].mxu0 }
 0x5b8   : > { %v6647_v33 = vadd.f32 %v6599_v14, %v6166_v44  ;;  %v6640_v12 = vpop.f32.mrb[40].mxu1  ;;  %v6601_v10 = vpop.f32.mrb[37].mxu0  ;;  %v22105_v44 = vld [vmem:[%s31180_s5 + $0x288] ss:$16 sps:$4 sm:$0xff]   ;;  %v22128_v14 = vld [vmem:[%s31180_s5 + $0x304] ss:$16 sps:$4 sm:$0xff]  }
 0x5b9   : > { %v6649_v61 = vadd.f32 %v6640_v12, %v6168_v51  ;;  %v6648_v38 = vadd.f32 %v6601_v10, %v6167_v26  ;;  %v6642_v41 = vpop.f32.mrb[41].mxu1  ;;  %v6603_v16 = vpop.f32.mrb[38].mxu0  ;;  %v22108_v51 = vld [vmem:[%s31180_s5 + $0x2a0] ss:$16 sps:$4 sm:$0xff]   ;;  %7260 = vmatpush1.bf16.msra.mxu1 %v22105_v44  ;;  %v22111_v26 = vld [vmem:[%s31180_s5 + $0x2a8] ss:$16 sps:$4 sm:$0xff]  }
 0x5ba   : > { %v26632_v43 = vadd.f32 %v6656_v40, %v6647_v33  ;;  %v6650_v47 = vadd.f32 %v6642_v41, %v6169_v60  ;;  %v6644_v19 = vpop.f32.mrb[42].mxu1  ;;  %v6604_v55 = vpop.f32.mrb[39].mxu0  ;;  %7261 = vmatprep.subr.bf16.mxu1 %v22113_v48  ;;  %7221 = vmatpush1.bf16.msra.mxu0 %v22108_v51  ;;  %v22114_v60 = vld [vmem:[%s31180_s5 + $0x2c0] ss:$16 sps:$4 sm:$0xff]   ;;  %v22123_v40 = vld [vmem:[%s31180_s5 + $0x2e8] ss:$16 sps:$4 sm:$0xff]  }
 0x5bb   : > { %v26634_v56 = vadd.f32 %v6664_v18, %v6649_v61  ;;  %v26636_v1 = vadd.f32 %v6660_v9, %v6648_v38  ;;  %v6645_v2 = vpop.f32.mrb[43].mxu1  ;;  %7222 = vmatprep.subr.bf16.mxu0 %v22116_v42  ;;  %v22131_v18 = vld [vmem:[%s31180_s5 + $0x30c] ss:$16 sps:$4 sm:$0xff]   ;;  %v22126_v9 = vld [vmem:[%s31180_s5 + $0x300] ss:$16 sps:$4 sm:$0xff]  }
 0x5bc   : > { %v6677_v4 = vmax.f32 %v26632_v43, 0.0  ;;  %v26645_v5 = vadd.f32 %v6668_v13, %v6650_v47  ;;  %v22129_v33 = vld [vmem:[%s31180_s5 + $0x308] ss:$16 sps:$4 sm:$0xff]   ;;  %v22134_v12 = vld [vmem:[%s31180_s5 + $0x324] ss:$16 sps:$4 sm:$0xff]  }
 0x5bd   : > { %v6679_v11 = vmax.f32 %v26634_v56, 0.0  ;;  %v6678_v20 = vmax.f32 %v26636_v1, 0.0  ;;  %7262 = vmatpush1.bf16.msra.mxu1 %v22111_v26  ;;  %v22137_v10 = vld [vmem:[%s31180_s5 + $0x32c] ss:$16 sps:$4 sm:$0xff]   ;;  %v22132_v13 = vld [vmem:[%s31180_s5 + $0x320] ss:$16 sps:$4 sm:$0xff]  }
 0x5be   : > { %v6680_v15 = vmax.f32 %v26645_v5, 0.0  ;;  %7263 = vmatprep.subr.bf16.mxu1 %v22119_v29  ;;  %7223 = vmatpush1.bf16.msra.mxu0 %v22114_v60  ;;  %v22135_v61 = vld [vmem:[%s31180_s5 + $0x328] ss:$16 sps:$4 sm:$0xff]   ;;  %v22140_v38 = vld [vmem:[%s31180_s5 + $0x344] ss:$16 sps:$4 sm:$0xff]  }
 0x5bf   : > { %v21189_v50 = vpack.i.bf16 %v6677_v4, %v6679_v11  ;;  %7224 = vmatprep.subr.bf16.mxu0 %v22122_v53  ;;  %v22143_v41 = vld [vmem:[%s31180_s5 + $0x34c] ss:$16 sps:$4 sm:$0xff]   ;;  %v22138_v16 = vld [vmem:[%s31180_s5 + $0x340] ss:$16 sps:$4 sm:$0xff]   ;;  %v22141_v47 = vld [vmem:[%s31180_s5 + $0x348] ss:$16 sps:$4 sm:$0xff]  }
 0x5c0   : > { %v21184_v22 = vpack.i.bf16 %v6678_v20, %v6680_v15  ;;  %v22146_v19 = vld [vmem:[%s31180_s5 + $0x364] ss:$16 sps:$4 sm:$0xff]   ;;  %v22149_v55 = vld [vmem:[%s31180_s5 + $0x36c] ss:$16 sps:$4 sm:$0xff]   ;;  %v22144_v2 = vld [vmem:[%s31180_s5 + $0x360] ss:$16 sps:$4 sm:$0xff]  }
 0x5c1   : > { %21190 = vrot.lane.b32.xlu1 %v21189_v50, %s24124_s24  ;;  %7264 = vmatpush1.bf16.msra.mxu1 %v22117_v45  ;;  %v22156_v50 = vld [vmem:[%s31180_s5 + $0x3a0] ss:$16 sps:$4 sm:$0xff]   ;;  %v22171_v1 = vld [vmem:[%s31180_s5 + $0x3e8] ss:$16 sps:$4 sm:$0xff]   ;;  %v22176_v5 = vld [vmem:[%s31180_s5 + $0x4] ss:$16 sps:$4 sm:$0xff]  }
 0x5c2   : > { %21185 = vrot.lane.b32.xlu0 %v21184_v22, %s24124_s24  ;;  %7265 = vmatprep.subr.bf16.mxu1 %v22125_v62  ;;  %v22168_v44 = vld [vmem:[%s31180_s5 + $0x3e0] ss:$16 sps:$4 sm:$0xff]  }
 0x5c3   : > { %7225 = vmatpush1.bf16.msra.mxu0 %v22120_v30 }
 0x5c4   : > { %7226 = vmatprep.subr.bf16.mxu0 %v22128_v14 }
 0x5c5   : > { %7266 = vmatpush1.bf16.msra.mxu1 %v22123_v40 }
 0x5c6   : > { %7267 = vmatprep.subr.bf16.mxu1 %v22131_v18 }
 0x5c7   : > { %7227 = vmatpush1.bf16.msra.mxu0 %v22126_v9 }
 0x5c8   : > { %7228 = vmatprep.subr.bf16.mxu0 %v22134_v12 }
 0x5c9   : > { %7268 = vmatpush1.bf16.msra.mxu1 %v22129_v33 }
 0x5ca   : > { %7269 = vmatprep.subr.bf16.mxu1 %v22137_v10 }
 0x5cb   : > { %7229 = vmatpush1.bf16.msra.mxu0 %v22132_v13 }
 0x5cc   : > { %7230 = vmatprep.subr.bf16.mxu0 %v22140_v38 }
 0x5cd   : > { %7270 = vmatpush1.bf16.msra.mxu1 %v22135_v61 }
 0x5ce   : > { %7271 = vmatprep.subr.bf16.mxu1 %v22143_v41 }
 0x5cf   : > { %7231 = vmatpush1.bf16.msra.mxu0 %v22138_v16 }
 0x5d0   : > { %7232 = vmatprep.subr.bf16.mxu0 %v22146_v19 }
 0x5d1   : > { %7272 = vmatpush1.bf16.msra.mxu1 %v22141_v47 }
 0x5d2   : > { %7273 = vmatprep.subr.bf16.mxu1 %v22149_v55 }
 0x5d3   : > { %7233 = vmatpush1.bf16.msra.mxu0 %v22144_v2 }
 0x5d4   : > { %7234 = vmatprep.subr.bf16.mxu0 %v22152_v58 }
 0x5d5   : > { %7274 = vmatpush1.bf16.msra.mxu1 %v22147_v7 }
 0x5d6   : > { %7275 = vmatprep.subr.bf16.mxu1 %v22155_v54 }
 0x5d7   : > { %7235 = vmatpush1.bf16.msra.mxu0 %v22150_v8  ;;  %v22174_v8 = vld [vmem:[%s31180_s5] ss:$16 sps:$4 sm:$0xff]  }
 0x5d8   : > { %7236 = vmatprep.subr.bf16.mxu0 %v22158_v57  ;;  %v22177_v57 = vld [vmem:[%s31180_s5 + $0x8] ss:$16 sps:$4 sm:$0xff]  }
 0x5d9   : > { %7276 = vmatpush1.bf16.msra.mxu1 %v22153_v21 }
 0x5da   : > { %7277 = vmatprep.subr.bf16.mxu1 %v22161_v59  ;;  %v22182_v59 = vld [vmem:[%s31180_s5 + $0x24] ss:$16 sps:$4 sm:$0xff]  }
 0x5db   : > { %7237 = vmatpush1.bf16.msra.mxu0 %v22156_v50  ;;  %v22185_v50 = vld [vmem:[%s31180_s5 + $0x2c] ss:$16 sps:$4 sm:$0xff]  }
 0x5dc   : > { %7238 = vmatprep.subr.bf16.mxu0 %v22164_v39 }
 0x5dd   : > { %7278 = vmatpush1.bf16.msra.mxu1 %v22159_v63 }
 0x5de   : > { %7279 = vmatprep.subr.bf16.mxu1 %v22167_v28  ;;  %v22186_v28 = vld [vmem:[%s31180_s5 + $0x40] ss:$16 sps:$4 sm:$0xff]  }
 0x5df   : > { %7239 = vmatpush1.bf16.msra.mxu0 %v22162_v32  ;;  %v22188_v32 = vld [vmem:[%s31180_s5 + $0x44] ss:$16 sps:$4 sm:$0xff]  }
 0x5e0   : > { %7240 = vmatprep.subr.bf16.mxu0 %v22170_v23  ;;  %v22189_v23 = vld [vmem:[%s31180_s5 + $0x48] ss:$16 sps:$4 sm:$0xff]  }
 0x5e1   : > { %7280 = vmatpush1.bf16.msra.mxu1 %v22165_v6  ;;  %v22191_v6 = vld [vmem:[%s31180_s5 + $0x4c] ss:$16 sps:$4 sm:$0xff]  }
 0x5e2   : > { %7281 = vmatprep.subr.bf16.mxu1 %v22173_v25  ;;  %v22192_v25 = vld [vmem:[%s31180_s5 + $0x60] ss:$16 sps:$4 sm:$0xff]  }
 0x5e3   : > { %7241 = vmatpush1.bf16.msra.mxu0 %v22168_v44  ;;  %v22200_v44 = vld [vmem:[%s31180_s5 + $0x84] ss:$16 sps:$4 sm:$0xff]  }
 0x5e4   : > { %7612 = vmatprep.subr.bf16.mxu0 %v22176_v5  ;;  %v22198_v5 = vld [vmem:[%s31180_s5 + $0x80] ss:$16 sps:$4 sm:$0xff]  }
 0x5e5   : > { %7282 = vmatpush1.bf16.msra.mxu1 %v22171_v1  ;;  %v22203_v1 = vld [vmem:[%s31180_s5 + $0x8c] ss:$16 sps:$4 sm:$0xff]  }
 0x634   : > { %v21186_v0 = vpop.permute.xlu0 %21185 }
 0x635   : > { %v21188_v22 = vunpack.i.h.bf16 %v21186_v0  ;;  %v21187_v52 = vunpack.i.l.bf16 %v21186_v0 }
 0x637   : > { %v6690_v24 = vmax.f32 %v6678_v20, %v21188_v22  ;;  %v6700_v17 = vmax.f32 %v6680_v15, %v21187_v52  ;;  %v22179_v20 = vld [vmem:[%s31180_s5 + $0xc] ss:$16 sps:$4 sm:$0xff]   ;;  %v21191_v15 = vpop.permute.xlu1 %21190  ;;  %v22180_v22 = vld [vmem:[%s31180_s5 + $0x20] ss:$16 sps:$4 sm:$0xff]   ;;  %v22183_v52 = vld [vmem:[%s31180_s5 + $0x28] ss:$16 sps:$4 sm:$0xff]  }
 0x638   : > { %7653 = vmatprep.subr.bf16.mxu1 %v22179_v20  ;;  %v21193_v49 = vunpack.i.h.bf16 %v21191_v15  ;;  %v21192_v48 = vunpack.i.l.bf16 %v21191_v15  ;;  %v22201_v20 = vld [vmem:[%s31180_s5 + $0x88] ss:$16 sps:$4 sm:$0xff]   ;;  %v22206_v15 = vld [vmem:[%s31180_s5 + $0xa4] ss:$16 sps:$4 sm:$0xff]  }
 0x639   : > { %v21194_v46 = vpack.i.bf16 %v6690_v24, %v6700_v17  ;;  %v22194_v24 = vld [vmem:[%s31180_s5 + $0x64] ss:$16 sps:$4 sm:$0xff]   ;;  %v22197_v17 = vld [vmem:[%s31180_s5 + $0x6c] ss:$16 sps:$4 sm:$0xff]  }
 0x63a   : > { %v6685_v26 = vmax.f32 %v6677_v4, %v21193_v49  ;;  %v6695_v42 = vmax.f32 %v6679_v11, %v21192_v48  ;;  %v22209_v49 = vld [vmem:[%s31180_s5 + $0xac] ss:$16 sps:$4 sm:$0xff]   ;;  %v22204_v48 = vld [vmem:[%s31180_s5 + $0xa0] ss:$16 sps:$4 sm:$0xff]  }
 0x63b   : > { %21195 = vrot.lane.b32.xlu0 %v21194_v46, %s24124_s24  ;;  %v22195_v46 = vld [vmem:[%s31180_s5 + $0x68] ss:$16 sps:$4 sm:$0xff]  }
 0x6ad   : > { %v21196_v51 = vpop.permute.xlu0 %21195 }
 0x6ae   : > { %v21198_v29 = vunpack.i.h.bf16 %v21196_v51  ;;  %v21197_v60 = vunpack.i.l.bf16 %v21196_v51  ;;  %v22207_v51 = vld [vmem:[%s31180_s5 + $0xa8] ss:$16 sps:$4 sm:$0xff]  }
 0x6b0   : > { %v6709_v45 = vsel %vm2258_vm6, %v6685_v26, %v21198_v29  ;;  %v6710_v53 = vsel %vm2258_vm6, %v6695_v42, %v21197_v60  ;;  %v22212_v26 = vld [vmem:[%s31180_s5 + $0xc4] ss:$16 sps:$4 sm:$0xff]   ;;  %v22215_v42 = vld [vmem:[%s31180_s5 + $0xcc] ss:$16 sps:$4 sm:$0xff]   ;;  %v22210_v29 = vld [vmem:[%s31180_s5 + $0xc0] ss:$16 sps:$4 sm:$0xff]  }
 0x6b1   : > { %v6713_v62 = vrot.slane %v6709_v45, 1  ;;  %v6714_v30 = vrot.slane %v6710_v53, 1  ;;  %v22213_v60 = vld [vmem:[%s31180_s5 + $0xc8] ss:$16 sps:$4 sm:$0xff]  }
 0x6b3   : > { %v6717_v40 = vmax.f32 %v6709_v45, %v6713_v62  ;;  %v6718_v14 = vmax.f32 %v6710_v53, %v6714_v30  ;;  %v22218_v45 = vld [vmem:[%s31180_s5 + $0xe4] ss:$16 sps:$4 sm:$0xff]   ;;  %v22221_v53 = vld [vmem:[%s31180_s5 + $0xec] ss:$16 sps:$4 sm:$0xff]   ;;  %v22216_v62 = vld [vmem:[%s31180_s5 + $0xe0] ss:$16 sps:$4 sm:$0xff]  }
 0x6b4   : > { %v22219_v30 = vld [vmem:[%s31180_s5 + $0xe8] ss:$16 sps:$4 sm:$0xff]  }
 0x6b5   : > { %v6721_v18 = vrot.slane %v6717_v40, 1  ;;  %v6722_v9 = vrot.slane %v6718_v14, 1  ;;  %v6725_v33 = vrot.slane %v6717_v40, 2  ;;  %v6726_v12 = vrot.slane %v6718_v14, 2 }
 0x6b6   : > { %v6729_v10 = vrot.slane %v6717_v40, 3  ;;  %v6730_v43 = vrot.slane %v6718_v14, 3 }
 0x6b7   : > { %v6733_v4 = vsel %vm498_vm0, %v6717_v40, %v6721_v18  ;;  %v6734_v56 = vsel %vm498_vm0, %v6718_v14, %v6722_v9  ;;  %v22224_v40 = vld [vmem:[%s31180_s5 + $0x104] ss:$16 sps:$4 sm:$0xff]   ;;  %v22227_v14 = vld [vmem:[%s31180_s5 + $0x10c] ss:$16 sps:$4 sm:$0xff]   ;;  %v22222_v18 = vld [vmem:[%s31180_s5 + $0x100] ss:$16 sps:$4 sm:$0xff]  }
 0x6b8   : > { %v6735_v11 = vsel %vm2320_vm8, %v6733_v4, %v6725_v33  ;;  %v6736_v13 = vsel %vm2320_vm8, %v6734_v56, %v6726_v12  ;;  %v22225_v9 = vld [vmem:[%s31180_s5 + $0x108] ss:$16 sps:$4 sm:$0xff]   ;;  %v22230_v33 = vld [vmem:[%s31180_s5 + $0x124] ss:$16 sps:$4 sm:$0xff]   ;;  %v22233_v12 = vld [vmem:[%s31180_s5 + $0x12c] ss:$16 sps:$4 sm:$0xff]  }
 0x6b9   : > { %v26868_v61 = vsel %vm2323_vm9, %v6735_v11, %v6729_v10  ;;  %v26871_v38 = vsel %vm2323_vm9, %v6736_v13, %v6730_v43  ;;  %v22228_v10 = vld [vmem:[%s31180_s5 + $0x120] ss:$16 sps:$4 sm:$0xff]   ;;  %v22231_v43 = vld [vmem:[%s31180_s5 + $0x128] ss:$16 sps:$4 sm:$0xff]   ;;  %v22236_v4 = vld [vmem:[%s31180_s5 + $0x144] ss:$16 sps:$4 sm:$0xff]  }
 0x6ba   : > { %v6741_v41 = vrot.slane %v26868_v61, 7  ;;  %v21204_v16 = vpack.i.bf16 %v26871_v38, %v26868_v61  ;;  %v6742_v47 = vrot.slane %v26871_v38, 7  ;;  %v26878_v19 = vrot.slane %v26868_v61, 1  ;;  %v22239_v56 = vld [vmem:[%s31180_s5 + $0x14c] ss:$16 sps:$4 sm:$0xff]   ;;  %vm29846_vm8 = vmpackc.low %vm498_vm0, %vm498_vm0 }
 0x6bb   : > { %v26881_v55 = vrot.slane %v26871_v38, 1  ;;  %v22234_v11 = vld [vmem:[%s31180_s5 + $0x140] ss:$16 sps:$4 sm:$0xff]   ;;  %v22237_v13 = vld [vmem:[%s31180_s5 + $0x148] ss:$16 sps:$4 sm:$0xff]  }
 0x6bc   : > { %21205 = vrot.lane.b32.xlu0 %v21204_v16, %s24124_s24  ;;  %v18523_v2 = vpack.c.bf16 %v6742_v47, %v6742_v47  ;;  %v18528_v7 = vpack.c.bf16 %v6741_v41, %v6741_v41  ;;  %v6745_v58 = vsel %vm498_vm0, 0.0, %v6741_v41  ;;  %v6746_v54 = vsel %vm498_vm0, 0.0, %v6742_v47  ;;  %v22242_v41 = vld [vmem:[%s31180_s5 + $0x164] ss:$16 sps:$4 sm:$0xff]   ;;  %v22245_v16 = vld [vmem:[%s31180_s5 + $0x16c] ss:$16 sps:$4 sm:$0xff]  }
 0x6bd   : > { %v21199_v21 = vpack.i.bf16 %v6746_v54, %v6745_v58  ;;  %v9600_v63 = vsel %vm2323_vm9, %v26878_v19, 0.0  ;;  %v9601_v0 = vsel %vm2323_vm9, %v26881_v55, 0.0  ;;  %v22240_v47 = vld [vmem:[%s31180_s5 + $0x160] ss:$16 sps:$4 sm:$0xff]   ;;  %v22251_v58 = vld [vmem:[%s31180_s5 + $0x18c] ss:$16 sps:$4 sm:$0xff]  }
 0x6be   : > { %18524 = vmatprep.mubr.msk.bf16.mxu0 %vm24903_vm14, %v18523_v2  ;;  %18534 = vmatprep.mubr.msk.bf16.mxu1 %vm24903_vm14, %v18523_v2  ;;  %v21209_v39 = vpack.i.bf16 %v9601_v0, %v9600_v63  ;;  %v22243_v2 = vld [vmem:[%s31180_s5 + $0x168] ss:$16 sps:$4 sm:$0xff]   ;;  %v22246_v54 = vld [vmem:[%s31180_s5 + $0x180] ss:$16 sps:$4 sm:$0xff]   ;;  %v22260_v63 = vld [vmem:[%s31180_s5 + $0x1c4] ss:$16 sps:$4 sm:$0xff]  }
 0x6bf   : > { %18529 = vmatmul.mubr.msk.bf16.vlgmr.msra.gmra.mrb[40].mxu0 %vm24903_vm14, %v18528_v7  ;;  %18539 = vmatmul.mubr.msk.bf16.vlgmr.msra.gmra.mrb[44].mxu1 %vm24903_vm14, %v18528_v7  ;;  %v22248_v7 = vld [vmem:[%s31180_s5 + $0x184] ss:$16 sps:$4 sm:$0xff]   ;;  %v22263_v0 = vld [vmem:[%s31180_s5 + $0x1cc] ss:$16 sps:$4 sm:$0xff]  }
 0x6c0   : > { %21200 = vrot.lane.b32.xlu1 %v21199_v21, %s24124_s24  ;;  %7613 = vmatpush1.bf16.msra.mxu0 %v22174_v8  ;;  %v22249_v8 = vld [vmem:[%s31180_s5 + $0x188] ss:$16 sps:$4 sm:$0xff]   ;;  %v22254_v21 = vld [vmem:[%s31180_s5 + $0x1a4] ss:$16 sps:$4 sm:$0xff]  }
 0x6c1   : > { %7654 = vmatpush1.bf16.msra.mxu1 %v22177_v57  ;;  %7614 = vmatprep.subr.bf16.mxu0 %v22182_v59  ;;  %v22257_v57 = vld [vmem:[%s31180_s5 + $0x1ac] ss:$16 sps:$4 sm:$0xff]   ;;  %v22252_v59 = vld [vmem:[%s31180_s5 + $0x1a0] ss:$16 sps:$4 sm:$0xff]  }
 0x6c2   : > { %7655 = vmatprep.subr.bf16.mxu1 %v22185_v50  ;;  %v22255_v50 = vld [vmem:[%s31180_s5 + $0x1a8] ss:$16 sps:$4 sm:$0xff]  }
 0x6c4   : > { %21210 = vrot.lane.b32.xlu1 %v21209_v39, %s24124_s24  ;;  %7615 = vmatpush1.bf16.msra.mxu0 %v22180_v22  ;;  %v22258_v22 = vld [vmem:[%s31180_s5 + $0x1c0] ss:$16 sps:$4 sm:$0xff]   ;;  %v22269_v39 = vld [vmem:[%s31180_s5 + $0x1ec] ss:$16 sps:$4 sm:$0xff]   ;;  %s21087_s24 = smul.u32 5, %s31208_s19 }
 0x6c5   : > { %7656 = vmatpush1.bf16.msra.mxu1 %v22183_v52  ;;  %7616 = vmatprep.subr.bf16.mxu0 %v22188_v32  ;;  %v22261_v52 = vld [vmem:[%s31180_s5 + $0x1c8] ss:$16 sps:$4 sm:$0xff]   ;;  %v22266_v32 = vld [vmem:[%s31180_s5 + $0x1e4] ss:$16 sps:$4 sm:$0xff]  }
 0x6c6   : > { %7657 = vmatprep.subr.bf16.mxu1 %v22191_v6  ;;  %v22264_v6 = vld [vmem:[%s31180_s5 + $0x1e0] ss:$16 sps:$4 sm:$0xff]   ;;  %s492_s28 = scalar_lea.vmem %s31190_s15, %s21087_s24 }
 0x6c8   : > { %7617 = vmatpush1.bf16.msra.mxu0 %v22186_v28  ;;  %v22267_v28 = vld [vmem:[%s31180_s5 + $0x1e8] ss:$16 sps:$4 sm:$0xff]  }
 0x6c9   : > { %7658 = vmatpush1.bf16.msra.mxu1 %v22189_v23  ;;  %7618 = vmatprep.subr.bf16.mxu0 %v22194_v24  ;;  %v22272_v23 = vld [vmem:[%s31180_s5 + $0x404] ss:$16 sps:$4 sm:$0xff]   ;;  %v22275_v24 = vld [vmem:[%s31180_s5 + $0x40c] ss:$16 sps:$4 sm:$0xff]  }
 0x6ca   : > { %7659 = vmatprep.subr.bf16.mxu1 %v22197_v17 }
 0x6cc   : > { %7619 = vmatpush1.bf16.msra.mxu0 %v22192_v25 }
 0x6cd   : > { %7660 = vmatpush1.bf16.msra.mxu1 %v22195_v46  ;;  %7620 = vmatprep.subr.bf16.mxu0 %v22200_v44 }
 0x6ce   : > { %7661 = vmatprep.subr.bf16.mxu1 %v22203_v1 }
 0x6d0   : > { %7621 = vmatpush1.bf16.msra.mxu0 %v22198_v5  ;;  %v22270_v5 = vld [vmem:[%s31180_s5 + $0x400] ss:$16 sps:$4 sm:$0xff]  }
 0x6d1   : > { %7662 = vmatpush1.bf16.msra.mxu1 %v22201_v20  ;;  %7622 = vmatprep.subr.bf16.mxu0 %v22206_v15  ;;  %v22273_v20 = vld [vmem:[%s31180_s5 + $0x408] ss:$16 sps:$4 sm:$0xff]   ;;  %v22767_v15 = vld [vmem:[%s31180_s5 + $0xe4c] ss:$16 sps:$4 sm:$0xff]  }
 0x6d2   : > { %7663 = vmatprep.subr.bf16.mxu1 %v22209_v49 }
 0x6d4   : > { %7623 = vmatpush1.bf16.msra.mxu0 %v22204_v48  ;;  %v22866_v48 = vld [vmem:[%s31180_s5 + $0x1064] ss:$16 sps:$4 sm:$0xff]  }
 0x6d5   : > { %7664 = vmatpush1.bf16.msra.mxu1 %v22207_v51  ;;  %7624 = vmatprep.subr.bf16.mxu0 %v22212_v26  ;;  %v22278_v51 = vld [vmem:[%s31180_s5 + $0x424] ss:$16 sps:$4 sm:$0xff]   ;;  %v22281_v26 = vld [vmem:[%s31180_s5 + $0x42c] ss:$16 sps:$4 sm:$0xff]  }
 0x6d6   : > { %7665 = vmatprep.subr.bf16.mxu1 %v22215_v42 }
 0x6d8   : > { %7625 = vmatpush1.bf16.msra.mxu0 %v22210_v29  ;;  %v22276_v29 = vld [vmem:[%s31180_s5 + $0x420] ss:$16 sps:$4 sm:$0xff]  }
 0x6d9   : > { %7666 = vmatpush1.bf16.msra.mxu1 %v22213_v60  ;;  %7626 = vmatprep.subr.bf16.mxu0 %v22218_v45  ;;  %v22279_v60 = vld [vmem:[%s31180_s5 + $0x428] ss:$16 sps:$4 sm:$0xff]   ;;  %v22284_v45 = vld [vmem:[%s31180_s5 + $0x444] ss:$16 sps:$4 sm:$0xff]  }
 0x6da   : > { %7667 = vmatprep.subr.bf16.mxu1 %v22221_v53  ;;  %v22287_v53 = vld [vmem:[%s31180_s5 + $0x44c] ss:$16 sps:$4 sm:$0xff]  }
 0x6dc   : > { %7627 = vmatpush1.bf16.msra.mxu0 %v22216_v62  ;;  %v22282_v62 = vld [vmem:[%s31180_s5 + $0x440] ss:$16 sps:$4 sm:$0xff]  }
 0x6dd   : > { %7668 = vmatpush1.bf16.msra.mxu1 %v22219_v30  ;;  %7628 = vmatprep.subr.bf16.mxu0 %v22224_v40  ;;  %v22285_v30 = vld [vmem:[%s31180_s5 + $0x448] ss:$16 sps:$4 sm:$0xff]   ;;  %v22290_v40 = vld [vmem:[%s31180_s5 + $0x464] ss:$16 sps:$4 sm:$0xff]  }
 0x6de   : > { %7669 = vmatprep.subr.bf16.mxu1 %v22227_v14  ;;  %v22293_v14 = vld [vmem:[%s31180_s5 + $0x46c] ss:$16 sps:$4 sm:$0xff]  }
 0x6e0   : > { %7629 = vmatpush1.bf16.msra.mxu0 %v22222_v18  ;;  %v22288_v18 = vld [vmem:[%s31180_s5 + $0x460] ss:$16 sps:$4 sm:$0xff]  }
 0x6e1   : > { %7670 = vmatpush1.bf16.msra.mxu1 %v22225_v9  ;;  %7630 = vmatprep.subr.bf16.mxu0 %v22230_v33  ;;  %v22291_v9 = vld [vmem:[%s31180_s5 + $0x468] ss:$16 sps:$4 sm:$0xff]   ;;  %v22296_v33 = vld [vmem:[%s31180_s5 + $0x484] ss:$16 sps:$4 sm:$0xff]  }
 0x6e2   : > { %7671 = vmatprep.subr.bf16.mxu1 %v22233_v12  ;;  %v22299_v12 = vld [vmem:[%s31180_s5 + $0x48c] ss:$16 sps:$4 sm:$0xff]  }
 0x6e4   : > { %7631 = vmatpush1.bf16.msra.mxu0 %v22228_v10  ;;  %v22294_v10 = vld [vmem:[%s31180_s5 + $0x480] ss:$16 sps:$4 sm:$0xff]  }
 0x6e5   : > { %7672 = vmatpush1.bf16.msra.mxu1 %v22231_v43  ;;  %7632 = vmatprep.subr.bf16.mxu0 %v22236_v4  ;;  %v22297_v43 = vld [vmem:[%s31180_s5 + $0x488] ss:$16 sps:$4 sm:$0xff]   ;;  %v22302_v4 = vld [vmem:[%s31180_s5 + $0x4a4] ss:$16 sps:$4 sm:$0xff]  }
 0x6e6   : > { %7673 = vmatprep.subr.bf16.mxu1 %v22239_v56  ;;  %v22305_v56 = vld [vmem:[%s31180_s5 + $0x4ac] ss:$16 sps:$4 sm:$0xff]  }
 0x6e8   : > { %7633 = vmatpush1.bf16.msra.mxu0 %v22234_v11  ;;  %v22300_v11 = vld [vmem:[%s31180_s5 + $0x4a0] ss:$16 sps:$4 sm:$0xff]  }
 0x6e9   : > { %7674 = vmatpush1.bf16.msra.mxu1 %v22237_v13  ;;  %7634 = vmatprep.subr.bf16.mxu0 %v22242_v41  ;;  %v22303_v13 = vld [vmem:[%s31180_s5 + $0x4a8] ss:$16 sps:$4 sm:$0xff]   ;;  %v22308_v41 = vld [vmem:[%s31180_s5 + $0x4c4] ss:$16 sps:$4 sm:$0xff]  }
 0x6ea   : > { %7675 = vmatprep.subr.bf16.mxu1 %v22245_v16  ;;  %v22311_v16 = vld [vmem:[%s31180_s5 + $0x4cc] ss:$16 sps:$4 sm:$0xff]  }
 0x6ec   : > { %7635 = vmatpush1.bf16.msra.mxu0 %v22240_v47  ;;  %v22306_v47 = vld [vmem:[%s31180_s5 + $0x4c0] ss:$16 sps:$4 sm:$0xff]  }
 0x6ed   : > { %7676 = vmatpush1.bf16.msra.mxu1 %v22243_v2  ;;  %7636 = vmatprep.subr.bf16.mxu0 %v22248_v7  ;;  %v22309_v2 = vld [vmem:[%s31180_s5 + $0x4c8] ss:$16 sps:$4 sm:$0xff]   ;;  %v22314_v7 = vld [vmem:[%s31180_s5 + $0x4e4] ss:$16 sps:$4 sm:$0xff]  }
 0x6ee   : > { %7677 = vmatprep.subr.bf16.mxu1 %v22251_v58  ;;  %v22317_v58 = vld [vmem:[%s31180_s5 + $0x4ec] ss:$16 sps:$4 sm:$0xff]  }
 0x6f0   : > { %7637 = vmatpush1.bf16.msra.mxu0 %v22246_v54  ;;  %v22312_v54 = vld [vmem:[%s31180_s5 + $0x4e0] ss:$16 sps:$4 sm:$0xff]  }
 0x6f1   : > { %7678 = vmatpush1.bf16.msra.mxu1 %v22249_v8  ;;  %7638 = vmatprep.subr.bf16.mxu0 %v22254_v21  ;;  %v22315_v8 = vld [vmem:[%s31180_s5 + $0x4e8] ss:$16 sps:$4 sm:$0xff]   ;;  %v22320_v21 = vld [vmem:[%s31180_s5 + $0x504] ss:$16 sps:$4 sm:$0xff]  }
 0x6f2   : > { %7679 = vmatprep.subr.bf16.mxu1 %v22257_v57  ;;  %v22323_v57 = vld [vmem:[%s31180_s5 + $0x50c] ss:$16 sps:$4 sm:$0xff]  }
 0x6f4   : > { %7639 = vmatpush1.bf16.msra.mxu0 %v22252_v59  ;;  %v22318_v59 = vld [vmem:[%s31180_s5 + $0x500] ss:$16 sps:$4 sm:$0xff]  }
 0x6f5   : > { %7680 = vmatpush1.bf16.msra.mxu1 %v22255_v50  ;;  %7640 = vmatprep.subr.bf16.mxu0 %v22260_v63  ;;  %v22321_v50 = vld [vmem:[%s31180_s5 + $0x508] ss:$16 sps:$4 sm:$0xff]   ;;  %v22326_v63 = vld [vmem:[%s31180_s5 + $0x524] ss:$16 sps:$4 sm:$0xff]  }
 0x6f6   : > { %7681 = vmatprep.subr.bf16.mxu1 %v22263_v0  ;;  %v22329_v0 = vld [vmem:[%s31180_s5 + $0x52c] ss:$16 sps:$4 sm:$0xff]  }
 0x6f8   : > { %7641 = vmatpush1.bf16.msra.mxu0 %v22258_v22  ;;  %v22324_v22 = vld [vmem:[%s31180_s5 + $0x520] ss:$16 sps:$4 sm:$0xff]  }
 0x6f9   : > { %7682 = vmatpush1.bf16.msra.mxu1 %v22261_v52  ;;  %7642 = vmatprep.subr.bf16.mxu0 %v22266_v32  ;;  %v22327_v52 = vld [vmem:[%s31180_s5 + $0x528] ss:$16 sps:$4 sm:$0xff]   ;;  %v22332_v32 = vld [vmem:[%s31180_s5 + $0x544] ss:$16 sps:$4 sm:$0xff]  }
 0x6fa   : > { %7683 = vmatprep.subr.bf16.mxu1 %v22269_v39  ;;  %v22335_v39 = vld [vmem:[%s31180_s5 + $0x54c] ss:$16 sps:$4 sm:$0xff]  }
 0x6fc   : > { %7643 = vmatpush1.bf16.msra.mxu0 %v22264_v6  ;;  %v22330_v6 = vld [vmem:[%s31180_s5 + $0x540] ss:$16 sps:$4 sm:$0xff]  }
 0x6fd   : > { %7684 = vmatpush1.bf16.msra.mxu1 %v22267_v28  ;;  %8082 = vmatprep.subr.bf16.mxu0 %v22272_v23  ;;  %v22333_v28 = vld [vmem:[%s31180_s5 + $0x548] ss:$16 sps:$4 sm:$0xff]   ;;  %v22338_v23 = vld [vmem:[%s31180_s5 + $0x564] ss:$16 sps:$4 sm:$0xff]  }
 0x6fe   : > { %8123 = vmatprep.subr.bf16.mxu1 %v22275_v24  ;;  %v22341_v24 = vld [vmem:[%s31180_s5 + $0x56c] ss:$16 sps:$4 sm:$0xff]  }
 0x732   : > { %v21201_v17 = vpop.permute.xlu1 %21200 }
 0x733   : > { %v21203_v25 = vunpack.i.h.bf16 %v21201_v17  ;;  %v21202_v46 = vunpack.i.l.bf16 %v21201_v17  ;;  %v22336_v17 = vld [vmem:[%s31180_s5 + $0x560] ss:$16 sps:$4 sm:$0xff]  }
 0x735   : > { %v6753_v44 = vsel %vm2258_vm6, %v21202_v46, %v21203_v25  ;;  %v18607_v49 = vpack.c.bf16 %v21202_v46, %v21202_v46  ;;  %v18743_v42 = vpack.c.bf16 %v21203_v25, %v21203_v25  ;;  %v22339_v25 = vld [vmem:[%s31180_s5 + $0x568] ss:$16 sps:$4 sm:$0xff]   ;;  %v22344_v46 = vld [vmem:[%s31180_s5 + $0x584] ss:$16 sps:$4 sm:$0xff]  }
 0x736   : > { %v27094_v1 = vpack.c.bf16 %v6753_v44, %v6753_v44  ;;  %v22347_v44 = vld [vmem:[%s31180_s5 + $0x58c] ss:$16 sps:$4 sm:$0xff]  }
 0x738   : > { %7644 = vmatprep.mubr.bf16.mxu0 %v27094_v1  ;;  %7685 = vmatprep.mubr.bf16.mxu1 %v27094_v1 }
 0x739   : > { %18608 = vmatmul.mubr.msk.bf16.vlgmr.msra.gmra.mrb[44].mxu0 %vm27102_vm5, %v18607_v49  ;;  %18613 = vmatmul.mubr.msk.bf16.vlgmr.msra.gmra.mrb[48].mxu1 %vm27102_vm5, %v18607_v49  ;;  %v22350_v49 = vld [vmem:[%s31180_s5 + $0x5a4] ss:$16 sps:$4 sm:$0xff]  }
 0x73a   : > { %8083 = vmatpush1.bf16.msra.mxu0 %v22270_v5  ;;  %8124 = vmatpush1.bf16.msra.mxu1 %v22273_v20  ;;  %v22342_v5 = vld [vmem:[%s31180_s5 + $0x580] ss:$16 sps:$4 sm:$0xff]   ;;  %v22345_v20 = vld [vmem:[%s31180_s5 + $0x588] ss:$16 sps:$4 sm:$0xff]  }
 0x73b   : > { %18744 = vmatprep.mubr.msk.bf16.mxu0 %vm27110_vm7, %v18743_v42  ;;  %18747 = vmatprep.mubr.msk.bf16.mxu1 %vm27110_vm7, %v18743_v42  ;;  %v22351_v42 = vld [vmem:[%s31180_s5 + $0x5a8] ss:$16 sps:$4 sm:$0xff]  }
 0x73c   : > { %8084 = vmatprep.subr.bf16.mxu0 %v22278_v51  ;;  %8125 = vmatprep.subr.bf16.mxu1 %v22281_v26  ;;  %v22353_v51 = vld [vmem:[%s31180_s5 + $0x5ac] ss:$16 sps:$4 sm:$0xff]   ;;  %v22348_v26 = vld [vmem:[%s31180_s5 + $0x5a0] ss:$16 sps:$4 sm:$0xff]  }
 0x73e   : > { %8085 = vmatpush1.bf16.msra.mxu0 %v22276_v29  ;;  %8126 = vmatpush1.bf16.msra.mxu1 %v22279_v60  ;;  %v22356_v29 = vld [vmem:[%s31180_s5 + $0x5c4] ss:$16 sps:$4 sm:$0xff]   ;;  %v22359_v60 = vld [vmem:[%s31180_s5 + $0x5cc] ss:$16 sps:$4 sm:$0xff]  }
 0x73f   : > { %8086 = vmatprep.subr.bf16.mxu0 %v22284_v45  ;;  %8127 = vmatprep.subr.bf16.mxu1 %v22287_v53  ;;  %v21206_v45 = vpop.permute.xlu0 %21205  ;;  %v22354_v53 = vld [vmem:[%s31180_s5 + $0x5c0] ss:$16 sps:$4 sm:$0xff]  }
 0x742   : > { %8087 = vmatpush1.bf16.msra.mxu0 %v22282_v62  ;;  %8128 = vmatpush1.bf16.msra.mxu1 %v22285_v30  ;;  %v22357_v62 = vld [vmem:[%s31180_s5 + $0x5c8] ss:$16 sps:$4 sm:$0xff]   ;;  %v22362_v30 = vld [vmem:[%s31180_s5 + $0x5e4] ss:$16 sps:$4 sm:$0xff]  }
 0x743   : > { %8088 = vmatprep.subr.bf16.mxu0 %v22290_v40  ;;  %8129 = vmatprep.subr.bf16.mxu1 %v22293_v14  ;;  %v22365_v40 = vld [vmem:[%s31180_s5 + $0x5ec] ss:$16 sps:$4 sm:$0xff]   ;;  %v27296_v14 = vunpack.i.h.bf16 %v21206_v45 }
 0x746   : > { %8089 = vmatpush1.bf16.msra.mxu0 %v22288_v18  ;;  %8130 = vmatpush1.bf16.msra.mxu1 %v22291_v9  ;;  %v27298_v18 = vunpack.i.l.bf16 %v21206_v45  ;;  %v22360_v9 = vld [vmem:[%s31180_s5 + $0x5e0] ss:$16 sps:$4 sm:$0xff]  }
 0x747   : > { %8090 = vmatprep.subr.bf16.mxu0 %v22296_v33  ;;  %8131 = vmatprep.subr.bf16.mxu1 %v22299_v12  ;;  %v22363_v33 = vld [vmem:[%s31180_s5 + $0x5e8] ss:$16 sps:$4 sm:$0xff]   ;;  %v22368_v12 = vld [vmem:[%s31180_s5 + $0x604] ss:$16 sps:$4 sm:$0xff]  }
 0x74a   : > { %8091 = vmatpush1.bf16.msra.mxu0 %v22294_v10  ;;  %8132 = vmatpush1.bf16.msra.mxu1 %v22297_v43  ;;  %v22371_v10 = vld [vmem:[%s31180_s5 + $0x60c] ss:$16 sps:$4 sm:$0xff]   ;;  %v8172_v43 = vsel %vm2258_vm6, %v27298_v18, %v27296_v14 }
 0x74b   : > { %8092 = vmatprep.subr.bf16.mxu0 %v22302_v4  ;;  %8133 = vmatprep.subr.bf16.mxu1 %v22305_v56  ;;  %v22366_v4 = vld [vmem:[%s31180_s5 + $0x600] ss:$16 sps:$4 sm:$0xff]   ;;  %v22369_v56 = vld [vmem:[%s31180_s5 + $0x608] ss:$16 sps:$4 sm:$0xff]  }
 0x74e   : > { %8093 = vmatpush1.bf16.msra.mxu0 %v22300_v11  ;;  %8134 = vmatpush1.bf16.msra.mxu1 %v22303_v13  ;;  %v27321_v11 = vpack.c.bf16 %v8172_v43, %v8172_v43  ;;  %v22374_v13 = vld [vmem:[%s31180_s5 + $0x624] ss:$16 sps:$4 sm:$0xff]   ;;  %v22431_v43 = vld [vmem:[%s31180_s5 + $0x74c] ss:$16 sps:$4 sm:$0xff]  }
 0x74f   : > { %8094 = vmatprep.subr.bf16.mxu0 %v22308_v41  ;;  %8135 = vmatprep.subr.bf16.mxu1 %v22311_v16  ;;  %v22377_v41 = vld [vmem:[%s31180_s5 + $0x62c] ss:$16 sps:$4 sm:$0xff]   ;;  %v22372_v16 = vld [vmem:[%s31180_s5 + $0x620] ss:$16 sps:$4 sm:$0xff]  }
 0x752   : > { %8095 = vmatpush1.bf16.msra.mxu0 %v22306_v47  ;;  %8136 = vmatpush1.bf16.msra.mxu1 %v22309_v2  ;;  %v22375_v47 = vld [vmem:[%s31180_s5 + $0x628] ss:$16 sps:$4 sm:$0xff]   ;;  %v22380_v2 = vld [vmem:[%s31180_s5 + $0x644] ss:$16 sps:$4 sm:$0xff]  }
 0x753   : > { %8096 = vmatprep.subr.bf16.mxu0 %v22314_v7  ;;  %8137 = vmatprep.subr.bf16.mxu1 %v22317_v58  ;;  %v22378_v7 = vld [vmem:[%s31180_s5 + $0x640] ss:$16 sps:$4 sm:$0xff]   ;;  %v22381_v58 = vld [vmem:[%s31180_s5 + $0x648] ss:$16 sps:$4 sm:$0xff]  }
 0x756   : > { %8097 = vmatpush1.bf16.msra.mxu0 %v22312_v54  ;;  %8138 = vmatpush1.bf16.msra.mxu1 %v22315_v8  ;;  %v22386_v54 = vld [vmem:[%s31180_s5 + $0x664] ss:$16 sps:$4 sm:$0xff]   ;;  %v22389_v8 = vld [vmem:[%s31180_s5 + $0x66c] ss:$16 sps:$4 sm:$0xff]  }
 0x757   : > { %8098 = vmatprep.subr.bf16.mxu0 %v22320_v21  ;;  %8139 = vmatprep.subr.bf16.mxu1 %v22323_v57  ;;  %v22384_v21 = vld [vmem:[%s31180_s5 + $0x660] ss:$16 sps:$4 sm:$0xff]   ;;  %v22387_v57 = vld [vmem:[%s31180_s5 + $0x668] ss:$16 sps:$4 sm:$0xff]  }
 0x75a   : > { %8099 = vmatpush1.bf16.msra.mxu0 %v22318_v59  ;;  %8140 = vmatpush1.bf16.msra.mxu1 %v22321_v50  ;;  %v22392_v59 = vld [vmem:[%s31180_s5 + $0x684] ss:$16 sps:$4 sm:$0xff]   ;;  %v22395_v50 = vld [vmem:[%s31180_s5 + $0x68c] ss:$16 sps:$4 sm:$0xff]  }
 0x75b   : > { %8100 = vmatprep.subr.bf16.mxu0 %v22326_v63  ;;  %8141 = vmatprep.subr.bf16.mxu1 %v22329_v0  ;;  %v22390_v63 = vld [vmem:[%s31180_s5 + $0x680] ss:$16 sps:$4 sm:$0xff]   ;;  %v22393_v0 = vld [vmem:[%s31180_s5 + $0x688] ss:$16 sps:$4 sm:$0xff]  }
 0x75e   : > { %8101 = vmatpush1.bf16.msra.mxu0 %v22324_v22  ;;  %8142 = vmatpush1.bf16.msra.mxu1 %v22327_v52  ;;  %v22398_v22 = vld [vmem:[%s31180_s5 + $0x6a4] ss:$16 sps:$4 sm:$0xff]   ;;  %v22401_v52 = vld [vmem:[%s31180_s5 + $0x6ac] ss:$16 sps:$4 sm:$0xff]  }
 0x75f   : > { %8102 = vmatprep.subr.bf16.mxu0 %v22332_v32  ;;  %8143 = vmatprep.subr.bf16.mxu1 %v22335_v39  ;;  %v22396_v32 = vld [vmem:[%s31180_s5 + $0x6a0] ss:$16 sps:$4 sm:$0xff]   ;;  %v22399_v39 = vld [vmem:[%s31180_s5 + $0x6a8] ss:$16 sps:$4 sm:$0xff]  }
 0x762   : > { %8103 = vmatpush1.bf16.msra.mxu0 %v22330_v6  ;;  %8144 = vmatpush1.bf16.msra.mxu1 %v22333_v28  ;;  %v22404_v6 = vld [vmem:[%s31180_s5 + $0x6c4] ss:$16 sps:$4 sm:$0xff]   ;;  %v22407_v28 = vld [vmem:[%s31180_s5 + $0x6cc] ss:$16 sps:$4 sm:$0xff]  }
 0x763   : > { %8104 = vmatprep.subr.bf16.mxu0 %v22338_v23  ;;  %8145 = vmatprep.subr.bf16.mxu1 %v22341_v24  ;;  %v22402_v23 = vld [vmem:[%s31180_s5 + $0x6c0] ss:$16 sps:$4 sm:$0xff]   ;;  %v22405_v24 = vld [vmem:[%s31180_s5 + $0x6c8] ss:$16 sps:$4 sm:$0xff]  }
 0x766   : > { %8105 = vmatpush1.bf16.msra.mxu0 %v22336_v17  ;;  %8146 = vmatpush1.bf16.msra.mxu1 %v22339_v25  ;;  %v22410_v17 = vld [vmem:[%s31180_s5 + $0x6e4] ss:$16 sps:$4 sm:$0xff]   ;;  %v22413_v25 = vld [vmem:[%s31180_s5 + $0x6ec] ss:$16 sps:$4 sm:$0xff]  }
 0x767   : > { %8106 = vmatprep.subr.bf16.mxu0 %v22344_v46  ;;  %8147 = vmatprep.subr.bf16.mxu1 %v22347_v44 }
 0x76a   : > { %8107 = vmatpush1.bf16.msra.mxu0 %v22342_v5  ;;  %8148 = vmatpush1.bf16.msra.mxu1 %v22345_v20  ;;  %v22408_v5 = vld [vmem:[%s31180_s5 + $0x6e0] ss:$16 sps:$4 sm:$0xff]  }
 0x76b   : > { %8108 = vmatprep.subr.bf16.mxu0 %v22350_v49  ;;  %8149 = vmatprep.subr.bf16.mxu1 %v22353_v51  ;;  %v22411_v51 = vld [vmem:[%s31180_s5 + $0x6e8] ss:$16 sps:$4 sm:$0xff]  }
 0x76e   : > { %8109 = vmatpush1.bf16.msra.mxu0 %v22348_v26  ;;  %8150 = vmatpush1.bf16.msra.mxu1 %v22351_v42  ;;  %v22416_v26 = vld [vmem:[%s31180_s5 + $0x704] ss:$16 sps:$4 sm:$0xff]  }
 0x76f   : > { %8110 = vmatprep.subr.bf16.mxu0 %v22356_v29  ;;  %8151 = vmatprep.subr.bf16.mxu1 %v22359_v60  ;;  %v22419_v60 = vld [vmem:[%s31180_s5 + $0x70c] ss:$16 sps:$4 sm:$0xff]  }
 0x772   : > { %8111 = vmatpush1.bf16.msra.mxu0 %v22354_v53  ;;  %8152 = vmatpush1.bf16.msra.mxu1 %v22357_v62  ;;  %v22414_v62 = vld [vmem:[%s31180_s5 + $0x700] ss:$16 sps:$4 sm:$0xff]  }
 0x773   : > { %8112 = vmatprep.subr.bf16.mxu0 %v22362_v30  ;;  %8153 = vmatprep.subr.bf16.mxu1 %v22365_v40  ;;  %v22417_v30 = vld [vmem:[%s31180_s5 + $0x708] ss:$16 sps:$4 sm:$0xff]   ;;  %v22422_v40 = vld [vmem:[%s31180_s5 + $0x724] ss:$16 sps:$4 sm:$0xff]  }
 0x776   : > { %8113 = vmatpush1.bf16.msra.mxu0 %v22360_v9  ;;  %8154 = vmatpush1.bf16.msra.mxu1 %v22363_v33  ;;  %v22425_v9 = vld [vmem:[%s31180_s5 + $0x72c] ss:$16 sps:$4 sm:$0xff]   ;;  %v22420_v33 = vld [vmem:[%s31180_s5 + $0x720] ss:$16 sps:$4 sm:$0xff]  }
 0x777   : > { %8563 = vmatprep.subr.bf16.mxu0 %v22368_v12  ;;  %8604 = vmatprep.subr.bf16.mxu1 %v22371_v10  ;;  %v22423_v12 = vld [vmem:[%s31180_s5 + $0x728] ss:$16 sps:$4 sm:$0xff]   ;;  %v22428_v10 = vld [vmem:[%s31180_s5 + $0x744] ss:$16 sps:$4 sm:$0xff]  }
 0x779   : > { %8115 = vmatmul.mubr.bf16.vlgmr.msra.gmra.mrb[48].mxu0 %v27094_v1  ;;  %8156 = vmatmul.mubr.bf16.vlgmr.msra.gmra.mrb[52].mxu1 %v27094_v1  ;;  %v22383_v1 = vld [vmem:[%s31180_s5 + $0x64c] ss:$16 sps:$4 sm:$0xff]  }
 0x77a   : > { %8564 = vmatpush1.bf16.msra.mxu0 %v22366_v4  ;;  %8595 = vmatprep.mubr.bf16.mxu0 %v27321_v11  ;;  %v22426_v4 = vld [vmem:[%s31180_s5 + $0x740] ss:$16 sps:$4 sm:$0xff]  }
 0x77b   : > { %8605 = vmatpush1.bf16.msra.mxu1 %v22369_v56  ;;  %8636 = vmatprep.mubr.bf16.mxu1 %v27321_v11  ;;  %v22429_v56 = vld [vmem:[%s31180_s5 + $0x748] ss:$16 sps:$4 sm:$0xff]  }
 0x77c   : > { %8565 = vmatprep.subr.bf16.mxu0 %v22374_v13  ;;  %8606 = vmatprep.subr.bf16.mxu1 %v22377_v41  ;;  %v22434_v13 = vld [vmem:[%s31180_s5 + $0x764] ss:$16 sps:$4 sm:$0xff]   ;;  %v22437_v41 = vld [vmem:[%s31180_s5 + $0x76c] ss:$16 sps:$4 sm:$0xff]  }
 0x77e   : > { %8566 = vmatpush1.bf16.msra.mxu0 %v22372_v16  ;;  %v22432_v16 = vld [vmem:[%s31180_s5 + $0x760] ss:$16 sps:$4 sm:$0xff]  }
 0x77f   : > { %8607 = vmatpush1.bf16.msra.mxu1 %v22375_v47  ;;  %8567 = vmatprep.subr.bf16.mxu0 %v22380_v2  ;;  %v22435_v47 = vld [vmem:[%s31180_s5 + $0x768] ss:$16 sps:$4 sm:$0xff]   ;;  %v22440_v2 = vld [vmem:[%s31180_s5 + $0x784] ss:$16 sps:$4 sm:$0xff]  }
 0x780   : > { %8608 = vmatprep.subr.bf16.mxu1 %v22383_v1  ;;  %v22443_v1 = vld [vmem:[%s31180_s5 + $0x78c] ss:$16 sps:$4 sm:$0xff]  }
 0x782   : > { %8568 = vmatpush1.bf16.msra.mxu0 %v22378_v7  ;;  %v22438_v7 = vld [vmem:[%s31180_s5 + $0x780] ss:$16 sps:$4 sm:$0xff]  }
 0x783   : > { %8609 = vmatpush1.bf16.msra.mxu1 %v22381_v58  ;;  %8569 = vmatprep.subr.bf16.mxu0 %v22386_v54  ;;  %v22441_v58 = vld [vmem:[%s31180_s5 + $0x788] ss:$16 sps:$4 sm:$0xff]   ;;  %v22446_v54 = vld [vmem:[%s31180_s5 + $0x7a4] ss:$16 sps:$4 sm:$0xff]  }
 0x784   : > { %8610 = vmatprep.subr.bf16.mxu1 %v22389_v8  ;;  %v22449_v8 = vld [vmem:[%s31180_s5 + $0x7ac] ss:$16 sps:$4 sm:$0xff]  }
 0x786   : > { %8570 = vmatpush1.bf16.msra.mxu0 %v22384_v21  ;;  %v22444_v21 = vld [vmem:[%s31180_s5 + $0x7a0] ss:$16 sps:$4 sm:$0xff]  }
 0x787   : > { %8611 = vmatpush1.bf16.msra.mxu1 %v22387_v57  ;;  %8571 = vmatprep.subr.bf16.mxu0 %v22392_v59  ;;  %v22447_v57 = vld [vmem:[%s31180_s5 + $0x7a8] ss:$16 sps:$4 sm:$0xff]   ;;  %v22452_v59 = vld [vmem:[%s31180_s5 + $0x7c4] ss:$16 sps:$4 sm:$0xff]  }
 0x788   : > { %8612 = vmatprep.subr.bf16.mxu1 %v22395_v50  ;;  %v22455_v50 = vld [vmem:[%s31180_s5 + $0x7cc] ss:$16 sps:$4 sm:$0xff]  }
 0x78a   : > { %8572 = vmatpush1.bf16.msra.mxu0 %v22390_v63  ;;  %v22450_v63 = vld [vmem:[%s31180_s5 + $0x7c0] ss:$16 sps:$4 sm:$0xff]  }
 0x78b   : > { %8613 = vmatpush1.bf16.msra.mxu1 %v22393_v0  ;;  %8573 = vmatprep.subr.bf16.mxu0 %v22398_v22  ;;  %v22453_v0 = vld [vmem:[%s31180_s5 + $0x7c8] ss:$16 sps:$4 sm:$0xff]   ;;  %v22458_v22 = vld [vmem:[%s31180_s5 + $0x7e4] ss:$16 sps:$4 sm:$0xff]  }
 0x78c   : > { %8614 = vmatprep.subr.bf16.mxu1 %v22401_v52  ;;  %v22461_v52 = vld [vmem:[%s31180_s5 + $0x7ec] ss:$16 sps:$4 sm:$0xff]  }
 0x78e   : > { %8574 = vmatpush1.bf16.msra.mxu0 %v22396_v32  ;;  %v22456_v32 = vld [vmem:[%s31180_s5 + $0x7e0] ss:$16 sps:$4 sm:$0xff]  }
 0x78f   : > { %8615 = vmatpush1.bf16.msra.mxu1 %v22399_v39  ;;  %8575 = vmatprep.subr.bf16.mxu0 %v22404_v6  ;;  %v22459_v39 = vld [vmem:[%s31180_s5 + $0x7e8] ss:$16 sps:$4 sm:$0xff]   ;;  %v22464_v6 = vld [vmem:[%s31180_s5 + $0x804] ss:$16 sps:$4 sm:$0xff]  }
 0x790   : > { %8616 = vmatprep.subr.bf16.mxu1 %v22407_v28  ;;  %v22467_v28 = vld [vmem:[%s31180_s5 + $0x80c] ss:$16 sps:$4 sm:$0xff]  }
 0x792   : > { %8576 = vmatpush1.bf16.msra.mxu0 %v22402_v23  ;;  %v27405_v46 = vpop.f32.mrb[40].mxu0  ;;  %v27407_v44 = vpop.f32.mrb[44].mxu1  ;;  %v22462_v23 = vld [vmem:[%s31180_s5 + $0x800] ss:$16 sps:$4 sm:$0xff]  }
 0x793   : > { %8617 = vmatpush1.bf16.msra.mxu1 %v22405_v24  ;;  %v27412_v20 = vpop.f32.mrb[41].mxu0  ;;  %v27414_v49 = vpop.f32.mrb[45].mxu1  ;;  %8577 = vmatprep.subr.bf16.mxu0 %v22410_v17  ;;  %v18879_v24 = vpack.c.bf16 %v27298_v18, %v27298_v18  ;;  %v22465_v17 = vld [vmem:[%s31180_s5 + $0x808] ss:$16 sps:$4 sm:$0xff]   ;;  %v22473_v18 = vld [vmem:[%s31180_s5 + $0x82c] ss:$16 sps:$4 sm:$0xff]  }
 0x794   : > { %8618 = vmatprep.subr.bf16.mxu1 %v22413_v25  ;;  %v7248_v42 = vpop.f32.mrb[42].mxu0  ;;  %v7289_v29 = vpop.f32.mrb[46].mxu1  ;;  %v22470_v25 = vld [vmem:[%s31180_s5 + $0x824] ss:$16 sps:$4 sm:$0xff]  }
 0x795   : > { %v7249_v45 = vpop.f32.mrb[43].mxu0  ;;  %v7290_v53 = vpop.f32.mrb[47].mxu1  ;;  %v22479_v42 = vld [vmem:[%s31180_s5 + $0x84c] ss:$16 sps:$4 sm:$0xff]   ;;  %v22474_v29 = vld [vmem:[%s31180_s5 + $0x840] ss:$16 sps:$4 sm:$0xff]  }
 0x796   : > { %8578 = vmatpush1.bf16.msra.mxu0 %v22408_v5  ;;  %v8715_v5 = vpack.c.bf16 %v26871_v38, %v26871_v38  ;;  %v22476_v38 = vld [vmem:[%s31180_s5 + $0x844] ss:$16 sps:$4 sm:$0xff]   ;;  %v22485_v53 = vld [vmem:[%s31180_s5 + $0x86c] ss:$16 sps:$4 sm:$0xff]  }
 0x797   : > { %8619 = vmatpush1.bf16.msra.mxu1 %v22411_v51  ;;  %8579 = vmatprep.subr.bf16.mxu0 %v22416_v26  ;;  %v22468_v51 = vld [vmem:[%s31180_s5 + $0x820] ss:$16 sps:$4 sm:$0xff]   ;;  %v22471_v26 = vld [vmem:[%s31180_s5 + $0x828] ss:$16 sps:$4 sm:$0xff]   ;;  %v22482_v45 = vld [vmem:[%s31180_s5 + $0x864] ss:$16 sps:$4 sm:$0xff]  }
 0x798   : > { %8620 = vmatprep.subr.bf16.mxu1 %v22419_v60  ;;  %v22477_v60 = vld [vmem:[%s31180_s5 + $0x848] ss:$16 sps:$4 sm:$0xff]  }
 0x79a   : > { %8580 = vmatpush1.bf16.msra.mxu0 %v22414_v62  ;;  %v22480_v62 = vld [vmem:[%s31180_s5 + $0x860] ss:$16 sps:$4 sm:$0xff]  }
 0x79b   : > { %8621 = vmatpush1.bf16.msra.mxu1 %v22417_v30  ;;  %8581 = vmatprep.subr.bf16.mxu0 %v22422_v40  ;;  %v22483_v30 = vld [vmem:[%s31180_s5 + $0x868] ss:$16 sps:$4 sm:$0xff]   ;;  %v22488_v40 = vld [vmem:[%s31180_s5 + $0x884] ss:$16 sps:$4 sm:$0xff]  }
 0x79c   : > { %8622 = vmatprep.subr.bf16.mxu1 %v22425_v9  ;;  %v22491_v9 = vld [vmem:[%s31180_s5 + $0x88c] ss:$16 sps:$4 sm:$0xff]  }
 0x79e   : > { %8582 = vmatpush1.bf16.msra.mxu0 %v22420_v33  ;;  %v22486_v33 = vld [vmem:[%s31180_s5 + $0x880] ss:$16 sps:$4 sm:$0xff]  }
 0x79f   : > { %8623 = vmatpush1.bf16.msra.mxu1 %v22423_v12  ;;  %8583 = vmatprep.subr.bf16.mxu0 %v22428_v10  ;;  %v22489_v12 = vld [vmem:[%s31180_s5 + $0x888] ss:$16 sps:$4 sm:$0xff]   ;;  %v22494_v10 = vld [vmem:[%s31180_s5 + $0x8a4] ss:$16 sps:$4 sm:$0xff]  }
 0x7a0   : > { %8624 = vmatprep.subr.bf16.mxu1 %v22431_v43  ;;  %v22497_v43 = vld [vmem:[%s31180_s5 + $0x8ac] ss:$16 sps:$4 sm:$0xff]  }
 0x7a2   : > { %8584 = vmatpush1.bf16.msra.mxu0 %v22426_v4  ;;  %v22492_v4 = vld [vmem:[%s31180_s5 + $0x8a0] ss:$16 sps:$4 sm:$0xff]  }
 0x7a3   : > { %8625 = vmatpush1.bf16.msra.mxu1 %v22429_v56  ;;  %8585 = vmatprep.subr.bf16.mxu0 %v22434_v13  ;;  %v22495_v56 = vld [vmem:[%s31180_s5 + $0x8a8] ss:$16 sps:$4 sm:$0xff]   ;;  %v22500_v13 = vld [vmem:[%s31180_s5 + $0x8c4] ss:$16 sps:$4 sm:$0xff]  }
 0x7a4   : > { %8626 = vmatprep.subr.bf16.mxu1 %v22437_v41  ;;  %v22503_v41 = vld [vmem:[%s31180_s5 + $0x8cc] ss:$16 sps:$4 sm:$0xff]  }
 0x7a6   : > { %8586 = vmatpush1.bf16.msra.mxu0 %v22432_v16  ;;  %v22498_v16 = vld [vmem:[%s31180_s5 + $0x8c0] ss:$16 sps:$4 sm:$0xff]  }
 0x7a7   : > { %8627 = vmatpush1.bf16.msra.mxu1 %v22435_v47  ;;  %8587 = vmatprep.subr.bf16.mxu0 %v22440_v2  ;;  %v22501_v47 = vld [vmem:[%s31180_s5 + $0x8c8] ss:$16 sps:$4 sm:$0xff]   ;;  %v22506_v2 = vld [vmem:[%s31180_s5 + $0x8e4] ss:$16 sps:$4 sm:$0xff]  }
 0x7a8   : > { %8628 = vmatprep.subr.bf16.mxu1 %v22443_v1  ;;  %v22509_v1 = vld [vmem:[%s31180_s5 + $0x8ec] ss:$16 sps:$4 sm:$0xff]  }
 0x7aa   : > { %8588 = vmatpush1.bf16.msra.mxu0 %v22438_v7  ;;  %v22504_v7 = vld [vmem:[%s31180_s5 + $0x8e0] ss:$16 sps:$4 sm:$0xff]  }
 0x7ab   : > { %8629 = vmatpush1.bf16.msra.mxu1 %v22441_v58  ;;  %8589 = vmatprep.subr.bf16.mxu0 %v22446_v54  ;;  %v22507_v58 = vld [vmem:[%s31180_s5 + $0x8e8] ss:$16 sps:$4 sm:$0xff]   ;;  %v22512_v54 = vld [vmem:[%s31180_s5 + $0x904] ss:$16 sps:$4 sm:$0xff]  }
 0x7ac   : > { %8630 = vmatprep.subr.bf16.mxu1 %v22449_v8  ;;  %v22515_v8 = vld [vmem:[%s31180_s5 + $0x90c] ss:$16 sps:$4 sm:$0xff]  }
 0x7ae   : > { %8590 = vmatpush1.bf16.msra.mxu0 %v22444_v21  ;;  %v22510_v21 = vld [vmem:[%s31180_s5 + $0x900] ss:$16 sps:$4 sm:$0xff]  }
 0x7af   : > { %8631 = vmatpush1.bf16.msra.mxu1 %v22447_v57  ;;  %8591 = vmatprep.subr.bf16.mxu0 %v22452_v59  ;;  %v22513_v57 = vld [vmem:[%s31180_s5 + $0x908] ss:$16 sps:$4 sm:$0xff]   ;;  %v22518_v59 = vld [vmem:[%s31180_s5 + $0x924] ss:$16 sps:$4 sm:$0xff]  }
 0x7b0   : > { %8632 = vmatprep.subr.bf16.mxu1 %v22455_v50  ;;  %v22521_v50 = vld [vmem:[%s31180_s5 + $0x92c] ss:$16 sps:$4 sm:$0xff]  }
 0x7b2   : > { %8592 = vmatpush1.bf16.msra.mxu0 %v22450_v63  ;;  %v22516_v63 = vld [vmem:[%s31180_s5 + $0x920] ss:$16 sps:$4 sm:$0xff]  }
 0x7b3   : > { %8633 = vmatpush1.bf16.msra.mxu1 %v22453_v0  ;;  %8593 = vmatprep.subr.bf16.mxu0 %v22458_v22  ;;  %v22519_v0 = vld [vmem:[%s31180_s5 + $0x928] ss:$16 sps:$4 sm:$0xff]   ;;  %v22524_v22 = vld [vmem:[%s31180_s5 + $0x944] ss:$16 sps:$4 sm:$0xff]  }
 0x7b4   : > { %8634 = vmatprep.subr.bf16.mxu1 %v22461_v52  ;;  %v22527_v52 = vld [vmem:[%s31180_s5 + $0x94c] ss:$16 sps:$4 sm:$0xff]  }
 0x7b6   : > { %8594 = vmatpush1.bf16.msra.mxu0 %v22456_v32  ;;  %v22522_v32 = vld [vmem:[%s31180_s5 + $0x940] ss:$16 sps:$4 sm:$0xff]  }
 0x7b7   : > { %8635 = vmatpush1.bf16.msra.mxu1 %v22459_v39  ;;  %9036 = vmatprep.subr.bf16.mxu0 %v22464_v6  ;;  %v22525_v39 = vld [vmem:[%s31180_s5 + $0x948] ss:$16 sps:$4 sm:$0xff]   ;;  %v22530_v6 = vld [vmem:[%s31180_s5 + $0x964] ss:$16 sps:$4 sm:$0xff]  }
 0x7b8   : > { %9077 = vmatprep.subr.bf16.mxu1 %v22467_v28  ;;  %v22533_v28 = vld [vmem:[%s31180_s5 + $0x96c] ss:$16 sps:$4 sm:$0xff]  }
 0x7b9   : > { %18880 = vmatmul.mubr.msk.bf16.vlgmr.msra.gmra.mrb[52].mxu0 %vm27102_vm5, %v18879_v24 }
 0x7ba   : > { %18885 = vmatmul.mubr.msk.bf16.vlgmr.msra.gmra.mrb[56].mxu1 %vm27102_vm5, %v18879_v24  ;;  %9037 = vmatpush1.bf16.msra.mxu0 %v22462_v23  ;;  %v22528_v23 = vld [vmem:[%s31180_s5 + $0x960] ss:$16 sps:$4 sm:$0xff]   ;;  %v22531_v24 = vld [vmem:[%s31180_s5 + $0x968] ss:$16 sps:$4 sm:$0xff]  }
 0x7bb   : > { %9068 = vmatprep.mubr.bf16.mxu0 %v8715_v5  ;;  %9078 = vmatpush1.bf16.msra.mxu1 %v22465_v17  ;;  %v22536_v17 = vld [vmem:[%s31180_s5 + $0x984] ss:$16 sps:$4 sm:$0xff]  }
 0x7bc   : > { %9109 = vmatprep.mubr.bf16.mxu1 %v8715_v5  ;;  %9038 = vmatprep.subr.bf16.mxu0 %v22470_v25  ;;  %v22539_v25 = vld [vmem:[%s31180_s5 + $0x98c] ss:$16 sps:$4 sm:$0xff]   ;;  %v22534_v5 = vld [vmem:[%s31180_s5 + $0x980] ss:$16 sps:$4 sm:$0xff]  }
 0x7bd   : > { %9079 = vmatprep.subr.bf16.mxu1 %v22473_v18  ;;  %v22537_v18 = vld [vmem:[%s31180_s5 + $0x988] ss:$16 sps:$4 sm:$0xff]  }
 0x7be   : > { %9039 = vmatpush1.bf16.msra.mxu0 %v22468_v51  ;;  %v22542_v51 = vld [vmem:[%s31180_s5 + $0x9a4] ss:$16 sps:$4 sm:$0xff]  }
 0x7bf   : > { %9080 = vmatpush1.bf16.msra.mxu1 %v22471_v26  ;;  %9040 = vmatprep.subr.bf16.mxu0 %v22476_v38  ;;  %v22545_v26 = vld [vmem:[%s31180_s5 + $0x9ac] ss:$16 sps:$4 sm:$0xff]   ;;  %v22540_v38 = vld [vmem:[%s31180_s5 + $0x9a0] ss:$16 sps:$4 sm:$0xff]  }
 0x7c0   : > { %9081 = vmatprep.subr.bf16.mxu1 %v22479_v42  ;;  %v22543_v42 = vld [vmem:[%s31180_s5 + $0x9a8] ss:$16 sps:$4 sm:$0xff]  }
 0x7c2   : > { %9041 = vmatpush1.bf16.msra.mxu0 %v22474_v29  ;;  %v22548_v29 = vld [vmem:[%s31180_s5 + $0x9c4] ss:$16 sps:$4 sm:$0xff]  }
 0x7c3   : > { %9082 = vmatpush1.bf16.msra.mxu1 %v22477_v60  ;;  %9042 = vmatprep.subr.bf16.mxu0 %v22482_v45  ;;  %v22551_v60 = vld [vmem:[%s31180_s5 + $0x9cc] ss:$16 sps:$4 sm:$0xff]   ;;  %v22546_v45 = vld [vmem:[%s31180_s5 + $0x9c0] ss:$16 sps:$4 sm:$0xff]  }
 0x7c4   : > { %9083 = vmatprep.subr.bf16.mxu1 %v22485_v53  ;;  %v22549_v53 = vld [vmem:[%s31180_s5 + $0x9c8] ss:$16 sps:$4 sm:$0xff]  }
 0x7c6   : > { %9043 = vmatpush1.bf16.msra.mxu0 %v22480_v62  ;;  %v22554_v62 = vld [vmem:[%s31180_s5 + $0x9e4] ss:$16 sps:$4 sm:$0xff]  }
 0x7c7   : > { %9084 = vmatpush1.bf16.msra.mxu1 %v22483_v30  ;;  %9044 = vmatprep.subr.bf16.mxu0 %v22488_v40  ;;  %v22557_v30 = vld [vmem:[%s31180_s5 + $0x9ec] ss:$16 sps:$4 sm:$0xff]   ;;  %v22552_v40 = vld [vmem:[%s31180_s5 + $0x9e0] ss:$16 sps:$4 sm:$0xff]  }
 0x7c8   : > { %9085 = vmatprep.subr.bf16.mxu1 %v22491_v9  ;;  %v22555_v9 = vld [vmem:[%s31180_s5 + $0x9e8] ss:$16 sps:$4 sm:$0xff]  }
 0x7ca   : > { %9045 = vmatpush1.bf16.msra.mxu0 %v22486_v33  ;;  %v22560_v33 = vld [vmem:[%s31180_s5 + $0xa04] ss:$16 sps:$4 sm:$0xff]  }
 0x7cb   : > { %9086 = vmatpush1.bf16.msra.mxu1 %v22489_v12  ;;  %9046 = vmatprep.subr.bf16.mxu0 %v22494_v10  ;;  %v22563_v12 = vld [vmem:[%s31180_s5 + $0xa0c] ss:$16 sps:$4 sm:$0xff]   ;;  %v22558_v10 = vld [vmem:[%s31180_s5 + $0xa00] ss:$16 sps:$4 sm:$0xff]  }
 0x7cc   : > { %9087 = vmatprep.subr.bf16.mxu1 %v22497_v43  ;;  %v8714_v43 = vpack.c.bf16 %v26868_v61, %v26868_v61  ;;  %v22564_v61 = vld [vmem:[%s31180_s5 + $0xa20] ss:$16 sps:$4 sm:$0xff]  }
 0x7ce   : > { %9047 = vmatpush1.bf16.msra.mxu0 %v22492_v4  ;;  %v22561_v4 = vld [vmem:[%s31180_s5 + $0xa08] ss:$16 sps:$4 sm:$0xff]  }
 0x7cf   : > { %9088 = vmatpush1.bf16.msra.mxu1 %v22495_v56  ;;  %9048 = vmatprep.subr.bf16.mxu0 %v22500_v13  ;;  %v22566_v56 = vld [vmem:[%s31180_s5 + $0xa24] ss:$16 sps:$4 sm:$0xff]   ;;  %v19143_v13 = vpack.c.bf16 %v27296_v14, %v27296_v14 }
 0x7d0   : > { %9089 = vmatprep.subr.bf16.mxu1 %v22503_v41  ;;  %v22569_v41 = vld [vmem:[%s31180_s5 + $0xa2c] ss:$16 sps:$4 sm:$0xff]   ;;  %v22572_v14 = vld [vmem:[%s31180_s5 + $0xa44] ss:$16 sps:$4 sm:$0xff]  }
 0x7d2   : > { %9049 = vmatpush1.bf16.msra.mxu0 %v22498_v16  ;;  %v22567_v16 = vld [vmem:[%s31180_s5 + $0xa28] ss:$16 sps:$4 sm:$0xff]  }
 0x7d3   : > { %9090 = vmatpush1.bf16.msra.mxu1 %v22501_v47  ;;  %9050 = vmatprep.subr.bf16.mxu0 %v22506_v2  ;;  %v22575_v47 = vld [vmem:[%s31180_s5 + $0xa4c] ss:$16 sps:$4 sm:$0xff]   ;;  %v22570_v2 = vld [vmem:[%s31180_s5 + $0xa40] ss:$16 sps:$4 sm:$0xff]  }
 0x7d4   : > { %9091 = vmatprep.subr.bf16.mxu1 %v22509_v1  ;;  %v22573_v1 = vld [vmem:[%s31180_s5 + $0xa48] ss:$16 sps:$4 sm:$0xff]  }
 0x7d6   : > { %9051 = vmatpush1.bf16.msra.mxu0 %v22504_v7  ;;  %v22578_v7 = vld [vmem:[%s31180_s5 + $0xa64] ss:$16 sps:$4 sm:$0xff]  }
 0x7d7   : > { %9092 = vmatpush1.bf16.msra.mxu1 %v22507_v58  ;;  %9052 = vmatprep.subr.bf16.mxu0 %v22512_v54  ;;  %v22581_v58 = vld [vmem:[%s31180_s5 + $0xa6c] ss:$16 sps:$4 sm:$0xff]   ;;  %v22576_v54 = vld [vmem:[%s31180_s5 + $0xa60] ss:$16 sps:$4 sm:$0xff]  }
 0x7d8   : > { %9093 = vmatprep.subr.bf16.mxu1 %v22515_v8  ;;  %v22579_v8 = vld [vmem:[%s31180_s5 + $0xa68] ss:$16 sps:$4 sm:$0xff]  }
 0x7da   : > { %9053 = vmatpush1.bf16.msra.mxu0 %v22510_v21  ;;  %v22584_v21 = vld [vmem:[%s31180_s5 + $0xa84] ss:$16 sps:$4 sm:$0xff]  }
 0x7db   : > { %9094 = vmatpush1.bf16.msra.mxu1 %v22513_v57  ;;  %9054 = vmatprep.subr.bf16.mxu0 %v22518_v59  ;;  %v22587_v57 = vld [vmem:[%s31180_s5 + $0xa8c] ss:$16 sps:$4 sm:$0xff]   ;;  %v22582_v59 = vld [vmem:[%s31180_s5 + $0xa80] ss:$16 sps:$4 sm:$0xff]  }
 0x7dc   : > { %9095 = vmatprep.subr.bf16.mxu1 %v22521_v50  ;;  %v22585_v50 = vld [vmem:[%s31180_s5 + $0xa88] ss:$16 sps:$4 sm:$0xff]  }
 0x7de   : > { %9055 = vmatpush1.bf16.msra.mxu0 %v22516_v63  ;;  %v22590_v63 = vld [vmem:[%s31180_s5 + $0xaa4] ss:$16 sps:$4 sm:$0xff]  }
 0x7df   : > { %9096 = vmatpush1.bf16.msra.mxu1 %v22519_v0  ;;  %9056 = vmatprep.subr.bf16.mxu0 %v22524_v22  ;;  %v22593_v0 = vld [vmem:[%s31180_s5 + $0xaac] ss:$16 sps:$4 sm:$0xff]   ;;  %v22588_v22 = vld [vmem:[%s31180_s5 + $0xaa0] ss:$16 sps:$4 sm:$0xff]  }
 0x7e0   : > { %9097 = vmatprep.subr.bf16.mxu1 %v22527_v52  ;;  %v22591_v52 = vld [vmem:[%s31180_s5 + $0xaa8] ss:$16 sps:$4 sm:$0xff]  }
 0x7e2   : > { %9057 = vmatpush1.bf16.msra.mxu0 %v22522_v32  ;;  %v22596_v32 = vld [vmem:[%s31180_s5 + $0xac4] ss:$16 sps:$4 sm:$0xff]  }
 0x7e3   : > { %9098 = vmatpush1.bf16.msra.mxu1 %v22525_v39  ;;  %9058 = vmatprep.subr.bf16.mxu0 %v22530_v6 }
 0x7e4   : > { %9099 = vmatprep.subr.bf16.mxu1 %v22533_v28  ;;  %v22599_v28 = vld [vmem:[%s31180_s5 + $0xacc] ss:$16 sps:$4 sm:$0xff]  }
 0x7e6   : > { %9059 = vmatpush1.bf16.msra.mxu0 %v22528_v23 }
 0x7e7   : > { %9100 = vmatpush1.bf16.msra.mxu1 %v22531_v24  ;;  %9060 = vmatprep.subr.bf16.mxu0 %v22536_v17 }
 0x7e8   : > { %9101 = vmatprep.subr.bf16.mxu1 %v22539_v25 }
 0x7ea   : > { %9061 = vmatpush1.bf16.msra.mxu0 %v22534_v5 }
 0x7eb   : > { %9102 = vmatpush1.bf16.msra.mxu1 %v22537_v18  ;;  %9062 = vmatprep.subr.bf16.mxu0 %v22542_v51 }
 0x7ec   : > { %9103 = vmatprep.subr.bf16.mxu1 %v22545_v26 }
 0x7ee   : > { %9063 = vmatpush1.bf16.msra.mxu0 %v22540_v38  ;;  %v22594_v38 = vld [vmem:[%s31180_s5 + $0xac0] ss:$16 sps:$4 sm:$0xff]  }
 0x7ef   : > { %9104 = vmatpush1.bf16.msra.mxu1 %v22543_v42  ;;  %9064 = vmatprep.subr.bf16.mxu0 %v22548_v29  ;;  %v22600_v29 = vld [vmem:[%s31180_s5 + $0xae0] ss:$16 sps:$4 sm:$0xff]  }
 0x7f0   : > { %9105 = vmatprep.subr.bf16.mxu1 %v22551_v60  ;;  %v22603_v60 = vld [vmem:[%s31180_s5 + $0xae8] ss:$16 sps:$4 sm:$0xff]  }
 0x7f2   : > { %9065 = vmatpush1.bf16.msra.mxu0 %v22546_v45  ;;  %v22608_v45 = vld [vmem:[%s31180_s5 + $0xb04] ss:$16 sps:$4 sm:$0xff]  }
 0x7f3   : > { %9106 = vmatpush1.bf16.msra.mxu1 %v22549_v53  ;;  %9066 = vmatprep.subr.bf16.mxu0 %v22554_v62  ;;  %v22611_v53 = vld [vmem:[%s31180_s5 + $0xb0c] ss:$16 sps:$4 sm:$0xff]   ;;  %v22606_v62 = vld [vmem:[%s31180_s5 + $0xb00] ss:$16 sps:$4 sm:$0xff]  }
 0x7f4   : > { %9107 = vmatprep.subr.bf16.mxu1 %v22557_v30  ;;  %v22609_v30 = vld [vmem:[%s31180_s5 + $0xb08] ss:$16 sps:$4 sm:$0xff]  }
 0x7f6   : > { %9067 = vmatpush1.bf16.msra.mxu0 %v22552_v40  ;;  %v22614_v40 = vld [vmem:[%s31180_s5 + $0xb24] ss:$16 sps:$4 sm:$0xff]  }
 0x7f7   : > { %9108 = vmatpush1.bf16.msra.mxu1 %v22555_v9  ;;  %9510 = vmatprep.subr.bf16.mxu0 %v22560_v33  ;;  %v22617_v9 = vld [vmem:[%s31180_s5 + $0xb2c] ss:$16 sps:$4 sm:$0xff]   ;;  %v22612_v33 = vld [vmem:[%s31180_s5 + $0xb20] ss:$16 sps:$4 sm:$0xff]  }
 0x7f8   : > { %9551 = vmatprep.subr.bf16.mxu1 %v22563_v12  ;;  %v22615_v12 = vld [vmem:[%s31180_s5 + $0xb28] ss:$16 sps:$4 sm:$0xff]  }
 0x7f9   : > { %9069 = vmatmul.mubr.bf16.vlgmr.msra.gmra.mrb[56].mxu0 %v8714_v43 }
 0x7fa   : > { %9110 = vmatmul.mubr.bf16.vlgmr.msra.gmra.mrb[60].mxu1 %v8714_v43  ;;  %9511 = vmatpush1.bf16.msra.mxu0 %v22558_v10  ;;  %v22620_v10 = vld [vmem:[%s31180_s5 + $0xb44] ss:$16 sps:$4 sm:$0xff]   ;;  %v22623_v43 = vld [vmem:[%s31180_s5 + $0xb4c] ss:$16 sps:$4 sm:$0xff]  }
 0x7fb   : > { %19144 = vmatprep.mubr.msk.bf16.mxu0 %vm27110_vm7, %v19143_v13  ;;  %9552 = vmatpush1.bf16.msra.mxu1 %v22561_v4  ;;  %v22618_v4 = vld [vmem:[%s31180_s5 + $0xb40] ss:$16 sps:$4 sm:$0xff]  }
 0x7fc   : > { %19147 = vmatprep.mubr.msk.bf16.mxu1 %vm27110_vm7, %v19143_v13  ;;  %9512 = vmatprep.subr.bf16.mxu0 %v22566_v56  ;;  %v22621_v56 = vld [vmem:[%s31180_s5 + $0xb48] ss:$16 sps:$4 sm:$0xff]   ;;  %v22626_v13 = vld [vmem:[%s31180_s5 + $0xb64] ss:$16 sps:$4 sm:$0xff]  }
 0x7fd   : > { %9553 = vmatprep.subr.bf16.mxu1 %v22569_v41  ;;  %v22629_v41 = vld [vmem:[%s31180_s5 + $0xb6c] ss:$16 sps:$4 sm:$0xff]  }
 0x7fe   : > { %9513 = vmatpush1.bf16.msra.mxu0 %v22564_v61  ;;  %v22624_v61 = vld [vmem:[%s31180_s5 + $0xb60] ss:$16 sps:$4 sm:$0xff]  }
 0x7ff   : > { %9554 = vmatpush1.bf16.msra.mxu1 %v22567_v16  ;;  %9514 = vmatprep.subr.bf16.mxu0 %v22572_v14  ;;  %v22627_v16 = vld [vmem:[%s31180_s5 + $0xb68] ss:$16 sps:$4 sm:$0xff]   ;;  %v22632_v14 = vld [vmem:[%s31180_s5 + $0xb84] ss:$16 sps:$4 sm:$0xff]  }
 0x800   : > { %9555 = vmatprep.subr.bf16.mxu1 %v22575_v47  ;;  %v22635_v47 = vld [vmem:[%s31180_s5 + $0xb8c] ss:$16 sps:$4 sm:$0xff]  }
 0x802   : > { %9515 = vmatpush1.bf16.msra.mxu0 %v22570_v2  ;;  %v22630_v2 = vld [vmem:[%s31180_s5 + $0xb80] ss:$16 sps:$4 sm:$0xff]  }
 0x803   : > { %9556 = vmatpush1.bf16.msra.mxu1 %v22573_v1  ;;  %9516 = vmatprep.subr.bf16.mxu0 %v22578_v7  ;;  %v22633_v1 = vld [vmem:[%s31180_s5 + $0xb88] ss:$16 sps:$4 sm:$0xff]   ;;  %v22638_v7 = vld [vmem:[%s31180_s5 + $0xba4] ss:$16 sps:$4 sm:$0xff]  }
 0x804   : > { %9557 = vmatprep.subr.bf16.mxu1 %v22581_v58  ;;  %v22641_v58 = vld [vmem:[%s31180_s5 + $0xbac] ss:$16 sps:$4 sm:$0xff]  }
 0x806   : > { %9517 = vmatpush1.bf16.msra.mxu0 %v22576_v54  ;;  %v22636_v54 = vld [vmem:[%s31180_s5 + $0xba0] ss:$16 sps:$4 sm:$0xff]  }
 0x807   : > { %9558 = vmatpush1.bf16.msra.mxu1 %v22579_v8  ;;  %9518 = vmatprep.subr.bf16.mxu0 %v22584_v21  ;;  %v22639_v8 = vld [vmem:[%s31180_s5 + $0xba8] ss:$16 sps:$4 sm:$0xff]   ;;  %v22644_v21 = vld [vmem:[%s31180_s5 + $0xbc4] ss:$16 sps:$4 sm:$0xff]  }
 0x808   : > { %9559 = vmatprep.subr.bf16.mxu1 %v22587_v57  ;;  %v22647_v57 = vld [vmem:[%s31180_s5 + $0xbcc] ss:$16 sps:$4 sm:$0xff]  }
 0x80a   : > { %9519 = vmatpush1.bf16.msra.mxu0 %v22582_v59  ;;  %v22642_v59 = vld [vmem:[%s31180_s5 + $0xbc0] ss:$16 sps:$4 sm:$0xff]  }
 0x80b   : > { %9560 = vmatpush1.bf16.msra.mxu1 %v22585_v50  ;;  %9520 = vmatprep.subr.bf16.mxu0 %v22590_v63  ;;  %v21211_v50 = vpop.permute.xlu1 %21210  ;;  %v22645_v63 = vld [vmem:[%s31180_s5 + $0xbc8] ss:$16 sps:$4 sm:$0xff]  }
 0x80c   : > { %v7646_v39 = vpop.f32.mrb[44].mxu0  ;;  %v7687_v6 = vpop.f32.mrb[48].mxu1  ;;  %9561 = vmatprep.subr.bf16.mxu1 %v22593_v0  ;;  %v22650_v0 = vld [vmem:[%s31180_s5 + $0xbe4] ss:$16 sps:$4 sm:$0xff]  }
 0x80d   : > { %v27802_v23 = vadd.f32 %v7646_v39, %v27405_v46  ;;  %v27805_v24 = vadd.f32 %v7687_v6, %v27407_v44  ;;  %v7648_v17 = vpop.f32.mrb[45].mxu0  ;;  %v7689_v25 = vpop.f32.mrb[49].mxu1  ;;  %v22597_v44 = vld [vmem:[%s31180_s5 + $0xac8] ss:$16 sps:$4 sm:$0xff]   ;;  %v22648_v39 = vld [vmem:[%s31180_s5 + $0xbe0] ss:$16 sps:$4 sm:$0xff]  }
 0x80e   : > { %v27808_v5 = vadd.f32 %v7648_v17, %v27412_v20  ;;  %v27811_v18 = vadd.f32 %v7689_v25, %v27414_v49  ;;  %9521 = vmatpush1.bf16.msra.mxu0 %v22588_v22  ;;  %v7650_v51 = vpop.f32.mrb[46].mxu0  ;;  %v7691_v26 = vpop.f32.mrb[50].mxu1  ;;  %v22602_v20 = vld [vmem:[%s31180_s5 + $0xae4] ss:$16 sps:$4 sm:$0xff]   ;;  %v22605_v49 = vld [vmem:[%s31180_s5 + $0xaec] ss:$16 sps:$4 sm:$0xff]  }
 0x80f   : > { %9562 = vmatpush1.bf16.msra.mxu1 %v22591_v52  ;;  %v7651_v46 = vpop.f32.mrb[47].mxu0  ;;  %v7692_v42 = vpop.f32.mrb[51].mxu1  ;;  %9522 = vmatprep.subr.bf16.mxu0 %v22596_v32  ;;  %v22653_v22 = vld [vmem:[%s31180_s5 + $0xbec] ss:$16 sps:$4 sm:$0xff]   ;;  %v27921_v52 = vunpack.i.h.bf16 %v21211_v50  ;;  %v27923_v32 = vunpack.i.l.bf16 %v21211_v50  ;;  %v22651_v6 = vld [vmem:[%s31180_s5 + $0xbe8] ss:$16 sps:$4 sm:$0xff]  }
 0x810   : > { %9563 = vmatprep.subr.bf16.mxu1 %v22599_v28  ;;  %v22656_v28 = vld [vmem:[%s31180_s5 + $0xc04] ss:$16 sps:$4 sm:$0xff]   ;;  %v22659_v17 = vld [vmem:[%s31180_s5 + $0xc0c] ss:$16 sps:$4 sm:$0xff]   ;;  %v22654_v51 = vld [vmem:[%s31180_s5 + $0xc00] ss:$16 sps:$4 sm:$0xff]  }
 0x811   : > { %v9608_v25 = vsel %vm2258_vm6, %v27923_v32, %v27921_v52  ;;  %v22657_v26 = vld [vmem:[%s31180_s5 + $0xc08] ss:$16 sps:$4 sm:$0xff]   ;;  %v22665_v42 = vld [vmem:[%s31180_s5 + $0xc2c] ss:$16 sps:$4 sm:$0xff]   ;;  %vm28160_vm6 = vmpackc.low %vm2323_vm9, %vm2323_vm9 }
 0x812   : > { %9523 = vmatpush1.bf16.msra.mxu0 %v22594_v38  ;;  %v22662_v38 = vld [vmem:[%s31180_s5 + $0xc24] ss:$16 sps:$4 sm:$0xff]   ;;  %v27949_v46 = vpack.c.bf16 %v9608_v25, %v9608_v25  ;;  %v22699_v50 = vld [vmem:[%s31180_s5 + $0xce8] ss:$16 sps:$4 sm:$0xff]  }
 0x813   : > { %9564 = vmatpush1.bf16.msra.mxu1 %v22597_v44  ;;  %9524 = vmatprep.subr.bf16.mxu0 %v22602_v20  ;;  %v22660_v44 = vld [vmem:[%s31180_s5 + $0xc20] ss:$16 sps:$4 sm:$0xff]   ;;  %v22663_v20 = vld [vmem:[%s31180_s5 + $0xc28] ss:$16 sps:$4 sm:$0xff]  }
 0x814   : > { %9565 = vmatprep.subr.bf16.mxu1 %v22605_v49  ;;  %v22668_v49 = vld [vmem:[%s31180_s5 + $0xc44] ss:$16 sps:$4 sm:$0xff]   ;;  %v22711_v25 = vld [vmem:[%s31180_s5 + $0xd28] ss:$16 sps:$4 sm:$0xff]  }
 0x816   : > { %9525 = vmatpush1.bf16.msra.mxu0 %v22600_v29  ;;  %v22666_v29 = vld [vmem:[%s31180_s5 + $0xc40] ss:$16 sps:$4 sm:$0xff]  }
 0x817   : > { %9566 = vmatpush1.bf16.msra.mxu1 %v22603_v60  ;;  %9526 = vmatprep.subr.bf16.mxu0 %v22608_v45  ;;  %v22669_v60 = vld [vmem:[%s31180_s5 + $0xc48] ss:$16 sps:$4 sm:$0xff]   ;;  %v22674_v45 = vld [vmem:[%s31180_s5 + $0xc64] ss:$16 sps:$4 sm:$0xff]  }
 0x818   : > { %9567 = vmatprep.subr.bf16.mxu1 %v22611_v53  ;;  %v22677_v53 = vld [vmem:[%s31180_s5 + $0xc6c] ss:$16 sps:$4 sm:$0xff]  }
 0x81a   : > { %9527 = vmatpush1.bf16.msra.mxu0 %v22606_v62  ;;  %v22672_v62 = vld [vmem:[%s31180_s5 + $0xc60] ss:$16 sps:$4 sm:$0xff]  }
 0x81b   : > { %9568 = vmatpush1.bf16.msra.mxu1 %v22609_v30  ;;  %9528 = vmatprep.subr.bf16.mxu0 %v22614_v40  ;;  %v22675_v30 = vld [vmem:[%s31180_s5 + $0xc68] ss:$16 sps:$4 sm:$0xff]   ;;  %v22680_v40 = vld [vmem:[%s31180_s5 + $0xc84] ss:$16 sps:$4 sm:$0xff]  }
 0x81c   : > { %9569 = vmatprep.subr.bf16.mxu1 %v22617_v9  ;;  %v22683_v9 = vld [vmem:[%s31180_s5 + $0xc8c] ss:$16 sps:$4 sm:$0xff]  }
 0x81e   : > { %9529 = vmatpush1.bf16.msra.mxu0 %v22612_v33  ;;  %v22678_v33 = vld [vmem:[%s31180_s5 + $0xc80] ss:$16 sps:$4 sm:$0xff]  }
 0x81f   : > { %9570 = vmatpush1.bf16.msra.mxu1 %v22615_v12  ;;  %9530 = vmatprep.subr.bf16.mxu0 %v22620_v10  ;;  %v22681_v12 = vld [vmem:[%s31180_s5 + $0xc88] ss:$16 sps:$4 sm:$0xff]   ;;  %v22686_v10 = vld [vmem:[%s31180_s5 + $0xca4] ss:$16 sps:$4 sm:$0xff]  }
 0x820   : > { %9571 = vmatprep.subr.bf16.mxu1 %v22623_v43  ;;  %v22689_v43 = vld [vmem:[%s31180_s5 + $0xcac] ss:$16 sps:$4 sm:$0xff]  }
 0x822   : > { %9531 = vmatpush1.bf16.msra.mxu0 %v22618_v4  ;;  %v22684_v4 = vld [vmem:[%s31180_s5 + $0xca0] ss:$16 sps:$4 sm:$0xff]  }
 0x823   : > { %9572 = vmatpush1.bf16.msra.mxu1 %v22621_v56  ;;  %9532 = vmatprep.subr.bf16.mxu0 %v22626_v13  ;;  %v22687_v56 = vld [vmem:[%s31180_s5 + $0xca8] ss:$16 sps:$4 sm:$0xff]   ;;  %v22692_v13 = vld [vmem:[%s31180_s5 + $0xcc4] ss:$16 sps:$4 sm:$0xff]  }
 0x824   : > { %9573 = vmatprep.subr.bf16.mxu1 %v22629_v41 }
 0x826   : > { %9533 = vmatpush1.bf16.msra.mxu0 %v22624_v61 }
 0x827   : > { %9574 = vmatpush1.bf16.msra.mxu1 %v22627_v16  ;;  %9534 = vmatprep.subr.bf16.mxu0 %v22632_v14  ;;  %v22695_v16 = vld [vmem:[%s31180_s5 + $0xccc] ss:$16 sps:$4 sm:$0xff]  }
 0x828   : > { %9575 = vmatprep.subr.bf16.mxu1 %v22635_v47 }
 0x82a   : > { %9535 = vmatpush1.bf16.msra.mxu0 %v22630_v2 }
 0x82b   : > { %9576 = vmatpush1.bf16.msra.mxu1 %v22633_v1  ;;  %9536 = vmatprep.subr.bf16.mxu0 %v22638_v7 }
 0x82c   : > { %9577 = vmatprep.subr.bf16.mxu1 %v22641_v58 }
 0x82e   : > { %9537 = vmatpush1.bf16.msra.mxu0 %v22636_v54 }
 0x82f   : > { %9578 = vmatpush1.bf16.msra.mxu1 %v22639_v8  ;;  %9538 = vmatprep.subr.bf16.mxu0 %v22644_v21  ;;  %v22690_v21 = vld [vmem:[%s31180_s5 + $0xcc0] ss:$16 sps:$4 sm:$0xff]  }
 0x830   : > { %9579 = vmatprep.subr.bf16.mxu1 %v22647_v57 }
 0x832   : > { %9539 = vmatpush1.bf16.msra.mxu0 %v22642_v59  ;;  %v22696_v59 = vld [vmem:[%s31180_s5 + $0xce0] ss:$16 sps:$4 sm:$0xff]  }
 0x833   : > { %9580 = vmatpush1.bf16.msra.mxu1 %v22645_v63  ;;  %9540 = vmatprep.subr.bf16.mxu0 %v22650_v0  ;;  %v22704_v63 = vld [vmem:[%s31180_s5 + $0xd04] ss:$16 sps:$4 sm:$0xff]   ;;  %v22707_v0 = vld [vmem:[%s31180_s5 + $0xd0c] ss:$16 sps:$4 sm:$0xff]  }
 0x834   : > { %9581 = vmatprep.subr.bf16.mxu1 %v22653_v22  ;;  %v22702_v22 = vld [vmem:[%s31180_s5 + $0xd00] ss:$16 sps:$4 sm:$0xff]  }
 0x836   : > { %9541 = vmatpush1.bf16.msra.mxu0 %v22648_v39  ;;  %v22705_v39 = vld [vmem:[%s31180_s5 + $0xd08] ss:$16 sps:$4 sm:$0xff]  }
 0x837   : > { %9582 = vmatpush1.bf16.msra.mxu1 %v22651_v6  ;;  %9999 = vmatprep.subr.bf16.mxu0 %v22656_v28  ;;  %v22710_v6 = vld [vmem:[%s31180_s5 + $0xd24] ss:$16 sps:$4 sm:$0xff]   ;;  %v22713_v28 = vld [vmem:[%s31180_s5 + $0xd2c] ss:$16 sps:$4 sm:$0xff]  }
 0x838   : > { %10040 = vmatprep.subr.bf16.mxu1 %v22659_v17  ;;  %v22708_v17 = vld [vmem:[%s31180_s5 + $0xd20] ss:$16 sps:$4 sm:$0xff]  }
 0x839   : > { %9543 = vmatmul.mubr.bf16.vlgmr.msra.gmra.mrb[60].mxu0 %v27321_v11 }
 0x83a   : > { %9584 = vmatmul.mubr.bf16.vlgmr.msra.gmra.mrb[64].mxu1 %v27321_v11  ;;  %10000 = vmatpush1.bf16.msra.mxu0 %v22654_v51  ;;  %v22671_v11 = vld [vmem:[%s31180_s5 + $0xc4c] ss:$16 sps:$4 sm:$0xff]   ;;  %v22716_v51 = vld [vmem:[%s31180_s5 + $0xd44] ss:$16 sps:$4 sm:$0xff]  }
 0x83b   : > { %10031 = vmatprep.mubr.bf16.mxu0 %v27949_v46  ;;  %10041 = vmatpush1.bf16.msra.mxu1 %v22657_v26  ;;  %v22719_v26 = vld [vmem:[%s31180_s5 + $0xd4c] ss:$16 sps:$4 sm:$0xff]  }
 0x83c   : > { %10072 = vmatprep.mubr.bf16.mxu1 %v27949_v46  ;;  %10001 = vmatprep.subr.bf16.mxu0 %v22662_v38  ;;  %v22714_v38 = vld [vmem:[%s31180_s5 + $0xd40] ss:$16 sps:$4 sm:$0xff]  }
 0x83d   : > { %10042 = vmatprep.subr.bf16.mxu1 %v22665_v42  ;;  %v22717_v42 = vld [vmem:[%s31180_s5 + $0xd48] ss:$16 sps:$4 sm:$0xff]  }
 0x83e   : > { %10002 = vmatpush1.bf16.msra.mxu0 %v22660_v44  ;;  %v22722_v44 = vld [vmem:[%s31180_s5 + $0xd64] ss:$16 sps:$4 sm:$0xff]  }
 0x83f   : > { %10043 = vmatpush1.bf16.msra.mxu1 %v22663_v20  ;;  %10003 = vmatprep.subr.bf16.mxu0 %v22668_v49  ;;  %v22725_v20 = vld [vmem:[%s31180_s5 + $0xd6c] ss:$16 sps:$4 sm:$0xff]   ;;  %v22720_v49 = vld [vmem:[%s31180_s5 + $0xd60] ss:$16 sps:$4 sm:$0xff]  }
 0x840   : > { %10044 = vmatprep.subr.bf16.mxu1 %v22671_v11  ;;  %v22723_v11 = vld [vmem:[%s31180_s5 + $0xd68] ss:$16 sps:$4 sm:$0xff]  }
 0x842   : > { %10004 = vmatpush1.bf16.msra.mxu0 %v22666_v29  ;;  %v22728_v29 = vld [vmem:[%s31180_s5 + $0xd84] ss:$16 sps:$4 sm:$0xff]  }
 0x843   : > { %10045 = vmatpush1.bf16.msra.mxu1 %v22669_v60  ;;  %10005 = vmatprep.subr.bf16.mxu0 %v22674_v45  ;;  %v22731_v60 = vld [vmem:[%s31180_s5 + $0xd8c] ss:$16 sps:$4 sm:$0xff]   ;;  %v22726_v45 = vld [vmem:[%s31180_s5 + $0xd80] ss:$16 sps:$4 sm:$0xff]  }
 0x844   : > { %10046 = vmatprep.subr.bf16.mxu1 %v22677_v53  ;;  %v22729_v53 = vld [vmem:[%s31180_s5 + $0xd88] ss:$16 sps:$4 sm:$0xff]  }
 0x846   : > { %10006 = vmatpush1.bf16.msra.mxu0 %v22672_v62  ;;  %v22734_v62 = vld [vmem:[%s31180_s5 + $0xda4] ss:$16 sps:$4 sm:$0xff]  }
 0x847   : > { %10047 = vmatpush1.bf16.msra.mxu1 %v22675_v30  ;;  %10007 = vmatprep.subr.bf16.mxu0 %v22680_v40  ;;  %v22737_v30 = vld [vmem:[%s31180_s5 + $0xdac] ss:$16 sps:$4 sm:$0xff]   ;;  %v22732_v40 = vld [vmem:[%s31180_s5 + $0xda0] ss:$16 sps:$4 sm:$0xff]  }
 0x848   : > { %10048 = vmatprep.subr.bf16.mxu1 %v22683_v9  ;;  %v22735_v9 = vld [vmem:[%s31180_s5 + $0xda8] ss:$16 sps:$4 sm:$0xff]  }
 0x84a   : > { %10008 = vmatpush1.bf16.msra.mxu0 %v22678_v33  ;;  %v22740_v33 = vld [vmem:[%s31180_s5 + $0xdc4] ss:$16 sps:$4 sm:$0xff]  }
 0x84b   : > { %10049 = vmatpush1.bf16.msra.mxu1 %v22681_v12  ;;  %10009 = vmatprep.subr.bf16.mxu0 %v22686_v10  ;;  %v22743_v12 = vld [vmem:[%s31180_s5 + $0xdcc] ss:$16 sps:$4 sm:$0xff]   ;;  %v22738_v10 = vld [vmem:[%s31180_s5 + $0xdc0] ss:$16 sps:$4 sm:$0xff]  }
 0x84c   : > { %v8116_v41 = vpop.f32.mrb[48].mxu0  ;;  %v8157_v61 = vpop.f32.mrb[52].mxu1  ;;  %10050 = vmatprep.subr.bf16.mxu1 %v22689_v43  ;;  %v22741_v43 = vld [vmem:[%s31180_s5 + $0xdc8] ss:$16 sps:$4 sm:$0xff]  }
 0x84d   : > { %v28019_v14 = vadd.f32 %v8116_v41, %v27802_v23  ;;  %v28022_v47 = vadd.f32 %v8157_v61, %v27805_v24  ;;  %v8118_v2 = vpop.f32.mrb[49].mxu0  ;;  %v8159_v1 = vpop.f32.mrb[53].mxu1  ;;  %v22693_v24 = vld [vmem:[%s31180_s5 + $0xcc8] ss:$16 sps:$4 sm:$0xff]   ;;  %v22752_v61 = vld [vmem:[%s31180_s5 + $0xe04] ss:$16 sps:$4 sm:$0xff]  }
 0x84e   : > { %v28025_v7 = vadd.f32 %v8118_v2, %v27808_v5  ;;  %v28028_v58 = vadd.f32 %v8159_v1, %v27811_v18  ;;  %v8120_v54 = vpop.f32.mrb[50].mxu0  ;;  %v8161_v8 = vpop.f32.mrb[54].mxu1  ;;  %10010 = vmatpush1.bf16.msra.mxu0 %v22684_v4  ;;  %v22698_v5 = vld [vmem:[%s31180_s5 + $0xce4] ss:$16 sps:$4 sm:$0xff]   ;;  %v22701_v18 = vld [vmem:[%s31180_s5 + $0xcec] ss:$16 sps:$4 sm:$0xff]   ;;  %v19279_v1 = vpack.c.bf16 %v27923_v32, %v27923_v32  ;;  %v19415_v32 = vpack.c.bf16 %v26881_v55, %v26881_v55 }
 0x84f   : > { %10051 = vmatpush1.bf16.msra.mxu1 %v22687_v56  ;;  %v8121_v23 = vpop.f32.mrb[51].mxu0  ;;  %v8162_v57 = vpop.f32.mrb[55].mxu1  ;;  %10011 = vmatprep.subr.bf16.mxu0 %v22692_v13  ;;  %v22746_v4 = vld [vmem:[%s31180_s5 + $0xde4] ss:$16 sps:$4 sm:$0xff]   ;;  %v22749_v56 = vld [vmem:[%s31180_s5 + $0xdec] ss:$16 sps:$4 sm:$0xff]  }
 0x850   : > { %10052 = vmatprep.subr.bf16.mxu1 %v22695_v16  ;;  %v22744_v13 = vld [vmem:[%s31180_s5 + $0xde0] ss:$16 sps:$4 sm:$0xff]   ;;  %v22747_v41 = vld [vmem:[%s31180_s5 + $0xde8] ss:$16 sps:$4 sm:$0xff]   ;;  %v22755_v16 = vld [vmem:[%s31180_s5 + $0xe0c] ss:$16 sps:$4 sm:$0xff]  }
 0x851   : > { %v22750_v2 = vld [vmem:[%s31180_s5 + $0xe00] ss:$16 sps:$4 sm:$0xff]   ;;  %v22753_v54 = vld [vmem:[%s31180_s5 + $0xe08] ss:$16 sps:$4 sm:$0xff]   ;;  %v22761_v23 = vld [vmem:[%s31180_s5 + $0xe2c] ss:$16 sps:$4 sm:$0xff]  }
 0x852   : > { %10012 = vmatpush1.bf16.msra.mxu0 %v22690_v21  ;;  %v22758_v21 = vld [vmem:[%s31180_s5 + $0xe24] ss:$16 sps:$4 sm:$0xff]   ;;  %v22756_v57 = vld [vmem:[%s31180_s5 + $0xe20] ss:$16 sps:$4 sm:$0xff]   ;;  %v22759_v55 = vld [vmem:[%s31180_s5 + $0xe28] ss:$16 sps:$4 sm:$0xff]  }
 0x853   : > { %10053 = vmatpush1.bf16.msra.mxu1 %v22693_v24  ;;  %10013 = vmatprep.subr.bf16.mxu0 %v22698_v5  ;;  %v22764_v24 = vld [vmem:[%s31180_s5 + $0xe44] ss:$16 sps:$4 sm:$0xff]   ;;  %v22762_v5 = vld [vmem:[%s31180_s5 + $0xe40] ss:$16 sps:$4 sm:$0xff]   ;;  %v22863_v8 = vld [vmem:[%s31180_s5 + $0x104c] ss:$16 sps:$4 sm:$0xff]  }
 0x854   : > { %10054 = vmatprep.subr.bf16.mxu1 %v22701_v18  ;;  %v22765_v18 = vld [vmem:[%s31180_s5 + $0xe48] ss:$16 sps:$4 sm:$0xff]  }
 0x856   : > { %10014 = vmatpush1.bf16.msra.mxu0 %v22696_v59  ;;  %v22770_v59 = vld [vmem:[%s31180_s5 + $0xe64] ss:$16 sps:$4 sm:$0xff]  }
 0x857   : > { %10055 = vmatpush1.bf16.msra.mxu1 %v22699_v50  ;;  %10015 = vmatprep.subr.bf16.mxu0 %v22704_v63  ;;  %v22773_v50 = vld [vmem:[%s31180_s5 + $0xe6c] ss:$16 sps:$4 sm:$0xff]   ;;  %v22768_v63 = vld [vmem:[%s31180_s5 + $0xe60] ss:$16 sps:$4 sm:$0xff]  }
 0x858   : > { %10056 = vmatprep.subr.bf16.mxu1 %v22707_v0  ;;  %v22771_v0 = vld [vmem:[%s31180_s5 + $0xe68] ss:$16 sps:$4 sm:$0xff]  }
 0x85a   : > { %10016 = vmatpush1.bf16.msra.mxu0 %v22702_v22  ;;  %v22776_v22 = vld [vmem:[%s31180_s5 + $0xe84] ss:$16 sps:$4 sm:$0xff]  }
 0x85b   : > { %10057 = vmatpush1.bf16.msra.mxu1 %v22705_v39  ;;  %10017 = vmatprep.subr.bf16.mxu0 %v22710_v6  ;;  %v22779_v39 = vld [vmem:[%s31180_s5 + $0xe8c] ss:$16 sps:$4 sm:$0xff]   ;;  %v22774_v6 = vld [vmem:[%s31180_s5 + $0xe80] ss:$16 sps:$4 sm:$0xff]  }
 0x85c   : > { %10058 = vmatprep.subr.bf16.mxu1 %v22713_v28  ;;  %v22777_v28 = vld [vmem:[%s31180_s5 + $0xe88] ss:$16 sps:$4 sm:$0xff]  }
 0x85e   : > { %10018 = vmatpush1.bf16.msra.mxu0 %v22708_v17  ;;  %v22782_v17 = vld [vmem:[%s31180_s5 + $0xea4] ss:$16 sps:$4 sm:$0xff]  }
 0x85f   : > { %10059 = vmatpush1.bf16.msra.mxu1 %v22711_v25  ;;  %10019 = vmatprep.subr.bf16.mxu0 %v22716_v51  ;;  %v22785_v25 = vld [vmem:[%s31180_s5 + $0xeac] ss:$16 sps:$4 sm:$0xff]   ;;  %v22780_v51 = vld [vmem:[%s31180_s5 + $0xea0] ss:$16 sps:$4 sm:$0xff]  }
 0x860   : > { %10060 = vmatprep.subr.bf16.mxu1 %v22719_v26  ;;  %v22783_v26 = vld [vmem:[%s31180_s5 + $0xea8] ss:$16 sps:$4 sm:$0xff]  }
 0x862   : > { %10020 = vmatpush1.bf16.msra.mxu0 %v22714_v38  ;;  %v22788_v38 = vld [vmem:[%s31180_s5 + $0xec4] ss:$16 sps:$4 sm:$0xff]  }
 0x863   : > { %10061 = vmatpush1.bf16.msra.mxu1 %v22717_v42  ;;  %10021 = vmatprep.subr.bf16.mxu0 %v22722_v44  ;;  %v22791_v44 = vld [vmem:[%s31180_s5 + $0xecc] ss:$16 sps:$4 sm:$0xff]  }
 0x864   : > { %10062 = vmatprep.subr.bf16.mxu1 %v22725_v20 }
 0x866   : > { %10022 = vmatpush1.bf16.msra.mxu0 %v22720_v49 }
 0x867   : > { %10063 = vmatpush1.bf16.msra.mxu1 %v22723_v11  ;;  %10023 = vmatprep.subr.bf16.mxu0 %v22728_v29 }
 0x868   : > { %10064 = vmatprep.subr.bf16.mxu1 %v22731_v60 }
 0x86a   : > { %10024 = vmatpush1.bf16.msra.mxu0 %v22726_v45 }
 0x86b   : > { %10065 = vmatpush1.bf16.msra.mxu1 %v22729_v53  ;;  %10025 = vmatprep.subr.bf16.mxu0 %v22734_v62  ;;  %v22786_v62 = vld [vmem:[%s31180_s5 + $0xec0] ss:$16 sps:$4 sm:$0xff]  }
 0x86c   : > { %10066 = vmatprep.subr.bf16.mxu1 %v22737_v30 }
 0x86e   : > { %10026 = vmatpush1.bf16.msra.mxu0 %v22732_v40 }
 0x86f   : > { %10067 = vmatpush1.bf16.msra.mxu1 %v22735_v9  ;;  %10027 = vmatprep.subr.bf16.mxu0 %v22740_v33  ;;  %v22797_v33 = vld [vmem:[%s31180_s5 + $0xeec] ss:$16 sps:$4 sm:$0xff]  }
 0x870   : > { %10068 = vmatprep.subr.bf16.mxu1 %v22743_v12  ;;  %v22795_v12 = vld [vmem:[%s31180_s5 + $0xee8] ss:$16 sps:$4 sm:$0xff]  }
 0x872   : > { %10028 = vmatpush1.bf16.msra.mxu0 %v22738_v10  ;;  %v22800_v10 = vld [vmem:[%s31180_s5 + $0xf04] ss:$16 sps:$4 sm:$0xff]  }
 0x873   : > { %10069 = vmatpush1.bf16.msra.mxu1 %v22741_v43  ;;  %10029 = vmatprep.subr.bf16.mxu0 %v22746_v4  ;;  %v22803_v43 = vld [vmem:[%s31180_s5 + $0xf0c] ss:$16 sps:$4 sm:$0xff]   ;;  %v22798_v4 = vld [vmem:[%s31180_s5 + $0xf00] ss:$16 sps:$4 sm:$0xff]  }
 0x874   : > { %10070 = vmatprep.subr.bf16.mxu1 %v22749_v56  ;;  %v22801_v56 = vld [vmem:[%s31180_s5 + $0xf08] ss:$16 sps:$4 sm:$0xff]  }
 0x876   : > { %10030 = vmatpush1.bf16.msra.mxu0 %v22744_v13  ;;  %v22806_v13 = vld [vmem:[%s31180_s5 + $0xf24] ss:$16 sps:$4 sm:$0xff]  }
 0x877   : > { %10071 = vmatpush1.bf16.msra.mxu1 %v22747_v41  ;;  %10472 = vmatprep.subr.bf16.mxu0 %v22752_v61  ;;  %v22809_v41 = vld [vmem:[%s31180_s5 + $0xf2c] ss:$16 sps:$4 sm:$0xff]   ;;  %v22804_v61 = vld [vmem:[%s31180_s5 + $0xf20] ss:$16 sps:$4 sm:$0xff]  }
 0x878   : > { %10513 = vmatprep.subr.bf16.mxu1 %v22755_v16  ;;  %v22807_v16 = vld [vmem:[%s31180_s5 + $0xf28] ss:$16 sps:$4 sm:$0xff]  }
 0x879   : > { %19280 = vmatmul.mubr.msk.bf16.vlgmr.msra.gmra.mrb[64].mxu0 %vm27102_vm5, %v19279_v1 }
 0x87a   : > { %19285 = vmatmul.mubr.msk.bf16.vlgmr.msra.gmra.mrb[68].mxu1 %vm27102_vm5, %v19279_v1  ;;  %10473 = vmatpush1.bf16.msra.mxu0 %v22750_v2  ;;  %v22812_v2 = vld [vmem:[%s31180_s5 + $0xf44] ss:$16 sps:$4 sm:$0xff]   ;;  %v22815_v1 = vld [vmem:[%s31180_s5 + $0xf4c] ss:$16 sps:$4 sm:$0xff]  }
 0x87b   : > { %19416 = vmatprep.mubr.msk.bf16.mxu0 %vm28160_vm6, %v19415_v32  ;;  %10514 = vmatpush1.bf16.msra.mxu1 %v22753_v54  ;;  %v22810_v54 = vld [vmem:[%s31180_s5 + $0xf40] ss:$16 sps:$4 sm:$0xff]  }
 0x87c   : > { %19422 = vmatprep.mubr.msk.bf16.mxu1 %vm28160_vm6, %v19415_v32  ;;  %10474 = vmatprep.subr.bf16.mxu0 %v22758_v21  ;;  %v22813_v21 = vld [vmem:[%s31180_s5 + $0xf48] ss:$16 sps:$4 sm:$0xff]   ;;  %v22818_v32 = vld [vmem:[%s31180_s5 + $0xf64] ss:$16 sps:$4 sm:$0xff]  }
 0x87d   : > { %10515 = vmatprep.subr.bf16.mxu1 %v22761_v23  ;;  %v22821_v23 = vld [vmem:[%s31180_s5 + $0xf6c] ss:$16 sps:$4 sm:$0xff]  }
 0x87e   : > { %10475 = vmatpush1.bf16.msra.mxu0 %v22756_v57  ;;  %v22816_v57 = vld [vmem:[%s31180_s5 + $0xf60] ss:$16 sps:$4 sm:$0xff]  }
 0x87f   : > { %10516 = vmatpush1.bf16.msra.mxu1 %v22759_v55  ;;  %10476 = vmatprep.subr.bf16.mxu0 %v22764_v24  ;;  %v22819_v55 = vld [vmem:[%s31180_s5 + $0xf68] ss:$16 sps:$4 sm:$0xff]   ;;  %v22824_v24 = vld [vmem:[%s31180_s5 + $0xf84] ss:$16 sps:$4 sm:$0xff]  }
 0x880   : > { %10517 = vmatprep.subr.bf16.mxu1 %v22767_v15  ;;  %v22827_v15 = vld [vmem:[%s31180_s5 + $0xf8c] ss:$16 sps:$4 sm:$0xff]  }
 0x882   : > { %10477 = vmatpush1.bf16.msra.mxu0 %v22762_v5  ;;  %v22822_v5 = vld [vmem:[%s31180_s5 + $0xf80] ss:$16 sps:$4 sm:$0xff]  }
 0x883   : > { %10518 = vmatpush1.bf16.msra.mxu1 %v22765_v18  ;;  %10478 = vmatprep.subr.bf16.mxu0 %v22770_v59  ;;  %v22825_v18 = vld [vmem:[%s31180_s5 + $0xf88] ss:$16 sps:$4 sm:$0xff]   ;;  %v22830_v59 = vld [vmem:[%s31180_s5 + $0xfa4] ss:$16 sps:$4 sm:$0xff]  }
 0x884   : > { %10519 = vmatprep.subr.bf16.mxu1 %v22773_v50  ;;  %v22833_v50 = vld [vmem:[%s31180_s5 + $0xfac] ss:$16 sps:$4 sm:$0xff]  }
 0x886   : > { %10479 = vmatpush1.bf16.msra.mxu0 %v22768_v63  ;;  %v22828_v63 = vld [vmem:[%s31180_s5 + $0xfa0] ss:$16 sps:$4 sm:$0xff]  }
 0x887   : > { %10520 = vmatpush1.bf16.msra.mxu1 %v22771_v0  ;;  %10480 = vmatprep.subr.bf16.mxu0 %v22776_v22  ;;  %v22831_v0 = vld [vmem:[%s31180_s5 + $0xfa8] ss:$16 sps:$4 sm:$0xff]   ;;  %v22836_v22 = vld [vmem:[%s31180_s5 + $0xfc4] ss:$16 sps:$4 sm:$0xff]  }
 0x888   : > { %10521 = vmatprep.subr.bf16.mxu1 %v22779_v39  ;;  %v22839_v39 = vld [vmem:[%s31180_s5 + $0xfcc] ss:$16 sps:$4 sm:$0xff]  }
 0x88a   : > { %10481 = vmatpush1.bf16.msra.mxu0 %v22774_v6  ;;  %v22834_v6 = vld [vmem:[%s31180_s5 + $0xfc0] ss:$16 sps:$4 sm:$0xff]  }
 0x88b   : > { %10522 = vmatpush1.bf16.msra.mxu1 %v22777_v28  ;;  %10482 = vmatprep.subr.bf16.mxu0 %v22782_v17  ;;  %v22837_v28 = vld [vmem:[%s31180_s5 + $0xfc8] ss:$16 sps:$4 sm:$0xff]   ;;  %v22842_v17 = vld [vmem:[%s31180_s5 + $0xfe4] ss:$16 sps:$4 sm:$0xff]  }
 0x88c   : > { %v8597_v42 = vpop.f32.mrb[52].mxu0  ;;  %10523 = vmatprep.subr.bf16.mxu1 %v22785_v25  ;;  %v22845_v25 = vld [vmem:[%s31180_s5 + $0xfec] ss:$16 sps:$4 sm:$0xff]  }
 0x88d   : > { %v28241_v20 = vadd.f32 %v8597_v42, %v28019_v14  ;;  %v8638_v49 = vpop.f32.mrb[56].mxu1  ;;  %v8599_v11 = vpop.f32.mrb[53].mxu0  ;;  %v22851_v42 = vld [vmem:[%s31180_s5 + $0x100c] ss:$16 sps:$4 sm:$0xff]  }
 0x88e   : > { %v28244_v29 = vadd.f32 %v8638_v49, %v28022_v47  ;;  %v28247_v60 = vadd.f32 %v8599_v11, %v28025_v7  ;;  %v8640_v45 = vpop.f32.mrb[57].mxu1  ;;  %v8601_v53 = vpop.f32.mrb[54].mxu0  ;;  %10483 = vmatpush1.bf16.msra.mxu0 %v22780_v51  ;;  %v22789_v47 = vld [vmem:[%s31180_s5 + $0xec8] ss:$16 sps:$4 sm:$0xff]   ;;  %v22794_v7 = vld [vmem:[%s31180_s5 + $0xee4] ss:$16 sps:$4 sm:$0xff]   ;;  %v19418_v49 = vpack.c.bf16 %v26878_v19, %v26878_v19 }
 0x88f   : > { %v28253_v30 = vadd.f32 %v8640_v45, %v28028_v58  ;;  %v8642_v14 = vpop.f32.mrb[58].mxu1  ;;  %10524 = vmatpush1.bf16.msra.mxu1 %v22783_v26  ;;  %v8602_v40 = vpop.f32.mrb[55].mxu0  ;;  %10484 = vmatprep.subr.bf16.mxu0 %v22788_v38  ;;  %v22792_v58 = vld [vmem:[%s31180_s5 + $0xee0] ss:$16 sps:$4 sm:$0xff]   ;;  %v22843_v26 = vld [vmem:[%s31180_s5 + $0xfe8] ss:$16 sps:$4 sm:$0xff]   ;;  %v19555_v53 = vpack.c.bf16 %v27921_v52, %v27921_v52 }
 0x890   : > { %v8643_v9 = vpop.f32.mrb[59].mxu1  ;;  %10525 = vmatprep.subr.bf16.mxu1 %v22791_v44  ;;  %v22840_v51 = vld [vmem:[%s31180_s5 + $0xfe0] ss:$16 sps:$4 sm:$0xff]   ;;  %v22848_v38 = vld [vmem:[%s31180_s5 + $0x1004] ss:$16 sps:$4 sm:$0xff]  }
 0x891   : > { %v22846_v44 = vld [vmem:[%s31180_s5 + $0x1000] ss:$16 sps:$4 sm:$0xff]   ;;  %v22849_v11 = vld [vmem:[%s31180_s5 + $0x1008] ss:$16 sps:$4 sm:$0xff]   ;;  %v22854_v45 = vld [vmem:[%s31180_s5 + $0x1024] ss:$16 sps:$4 sm:$0xff]  }
 0x892   : > { %10485 = vmatpush1.bf16.msra.mxu0 %v22786_v62  ;;  %v22857_v19 = vld [vmem:[%s31180_s5 + $0x102c] ss:$16 sps:$4 sm:$0xff]   ;;  %v22852_v62 = vld [vmem:[%s31180_s5 + $0x1020] ss:$16 sps:$4 sm:$0xff]   ;;  %v22855_v52 = vld [vmem:[%s31180_s5 + $0x1028] ss:$16 sps:$4 sm:$0xff]  }
 0x893   : > { %10526 = vmatpush1.bf16.msra.mxu1 %v22789_v47  ;;  %10486 = vmatprep.subr.bf16.mxu0 %v22794_v7  ;;  %v22860_v14 = vld [vmem:[%s31180_s5 + $0x1044] ss:$16 sps:$4 sm:$0xff]   ;;  %v22858_v40 = vld [vmem:[%s31180_s5 + $0x1040] ss:$16 sps:$4 sm:$0xff]   ;;  %v22861_v47 = vld [vmem:[%s31180_s5 + $0x1048] ss:$16 sps:$4 sm:$0xff]  }
 0x894   : > { %10527 = vmatprep.subr.bf16.mxu1 %v22797_v33  ;;  %v22869_v7 = vld [vmem:[%s31180_s5 + $0x106c] ss:$16 sps:$4 sm:$0xff]   ;;  %v22864_v9 = vld [vmem:[%s31180_s5 + $0x1060] ss:$16 sps:$4 sm:$0xff]   ;;  %v22867_v33 = vld [vmem:[%s31180_s5 + $0x1068] ss:$16 sps:$4 sm:$0xff]  }
 0x896   : > { %10487 = vmatpush1.bf16.msra.mxu0 %v22792_v58  ;;  %v22872_v58 = vld [vmem:[%s31180_s5 + $0x1084] ss:$16 sps:$4 sm:$0xff]  }
 0x897   : > { %10528 = vmatpush1.bf16.msra.mxu1 %v22795_v12  ;;  %10488 = vmatprep.subr.bf16.mxu0 %v22800_v10  ;;  %v22875_v12 = vld [vmem:[%s31180_s5 + $0x108c] ss:$16 sps:$4 sm:$0xff]   ;;  %v22870_v10 = vld [vmem:[%s31180_s5 + $0x1080] ss:$16 sps:$4 sm:$0xff]  }
 0x898   : > { %10529 = vmatprep.subr.bf16.mxu1 %v22803_v43  ;;  %v22873_v43 = vld [vmem:[%s31180_s5 + $0x1088] ss:$16 sps:$4 sm:$0xff]  }
 0x89a   : > { %10489 = vmatpush1.bf16.msra.mxu0 %v22798_v4  ;;  %v22878_v4 = vld [vmem:[%s31180_s5 + $0x10a4] ss:$16 sps:$4 sm:$0xff]  }
 0x89b   : > { %10530 = vmatpush1.bf16.msra.mxu1 %v22801_v56  ;;  %10490 = vmatprep.subr.bf16.mxu0 %v22806_v13  ;;  %v22881_v56 = vld [vmem:[%s31180_s5 + $0x10ac] ss:$16 sps:$4 sm:$0xff]   ;;  %v22876_v13 = vld [vmem:[%s31180_s5 + $0x10a0] ss:$16 sps:$4 sm:$0xff]  }
 0x89c   : > { %10531 = vmatprep.subr.bf16.mxu1 %v22809_v41  ;;  %v22879_v41 = vld [vmem:[%s31180_s5 + $0x10a8] ss:$16 sps:$4 sm:$0xff]  }
 0x89e   : > { %10491 = vmatpush1.bf16.msra.mxu0 %v22804_v61  ;;  %v22884_v61 = vld [vmem:[%s31180_s5 + $0x10c4] ss:$16 sps:$4 sm:$0xff]  }
 0x89f   : > { %10532 = vmatpush1.bf16.msra.mxu1 %v22807_v16  ;;  %10492 = vmatprep.subr.bf16.mxu0 %v22812_v2  ;;  %v22887_v2 = vld [vmem:[%s31180_s5 + $0x10cc] ss:$16 sps:$4 sm:$0xff]  }
 0x8a0   : > { %10533 = vmatprep.subr.bf16.mxu1 %v22815_v1 }
 0x8a2   : > { %10493 = vmatpush1.bf16.msra.mxu0 %v22810_v54 }
 0x8a3   : > { %10534 = vmatpush1.bf16.msra.mxu1 %v22813_v21  ;;  %10494 = vmatprep.subr.bf16.mxu0 %v22818_v32 }
 0x8a4   : > { %10535 = vmatprep.subr.bf16.mxu1 %v22821_v23 }
 0x8a6   : > { %10495 = vmatpush1.bf16.msra.mxu0 %v22816_v57 }
 0x8a7   : > { %10536 = vmatpush1.bf16.msra.mxu1 %v22819_v55  ;;  %10496 = vmatprep.subr.bf16.mxu0 %v22824_v24  ;;  %v22882_v24 = vld [vmem:[%s31180_s5 + $0x10c0] ss:$16 sps:$4 sm:$0xff]  }
 0x8a8   : > { %10537 = vmatprep.subr.bf16.mxu1 %v22827_v15 }
 0x8aa   : > { %10497 = vmatpush1.bf16.msra.mxu0 %v22822_v5 }
 0x8ab   : > { %10538 = vmatpush1.bf16.msra.mxu1 %v22825_v18  ;;  %10498 = vmatprep.subr.bf16.mxu0 %v22830_v59  ;;  %v22893_v59 = vld [vmem:[%s31180_s5 + $0x10ec] ss:$16 sps:$4 sm:$0xff]  }
 0x8ac   : > { %10539 = vmatprep.subr.bf16.mxu1 %v22833_v50  ;;  %v22891_v50 = vld [vmem:[%s31180_s5 + $0x10e8] ss:$16 sps:$4 sm:$0xff]  }
 0x8ae   : > { %10499 = vmatpush1.bf16.msra.mxu0 %v22828_v63  ;;  %v22896_v63 = vld [vmem:[%s31180_s5 + $0x1104] ss:$16 sps:$4 sm:$0xff]  }
 0x8af   : > { %10540 = vmatpush1.bf16.msra.mxu1 %v22831_v0  ;;  %10500 = vmatprep.subr.bf16.mxu0 %v22836_v22  ;;  %v22899_v0 = vld [vmem:[%s31180_s5 + $0x110c] ss:$16 sps:$4 sm:$0xff]   ;;  %v22894_v22 = vld [vmem:[%s31180_s5 + $0x1100] ss:$16 sps:$4 sm:$0xff]  }
 0x8b0   : > { %10541 = vmatprep.subr.bf16.mxu1 %v22839_v39  ;;  %v22897_v39 = vld [vmem:[%s31180_s5 + $0x1108] ss:$16 sps:$4 sm:$0xff]  }
 0x8b2   : > { %10501 = vmatpush1.bf16.msra.mxu0 %v22834_v6  ;;  %v22902_v6 = vld [vmem:[%s31180_s5 + $0x1124] ss:$16 sps:$4 sm:$0xff]  }
 0x8b3   : > { %10542 = vmatpush1.bf16.msra.mxu1 %v22837_v28  ;;  %10502 = vmatprep.subr.bf16.mxu0 %v22842_v17  ;;  %v22905_v28 = vld [vmem:[%s31180_s5 + $0x112c] ss:$16 sps:$4 sm:$0xff]   ;;  %v22900_v17 = vld [vmem:[%s31180_s5 + $0x1120] ss:$16 sps:$4 sm:$0xff]  }
 0x8b4   : > { %10543 = vmatprep.subr.bf16.mxu1 %v22845_v25  ;;  %v22903_v25 = vld [vmem:[%s31180_s5 + $0x1128] ss:$16 sps:$4 sm:$0xff]  }
 0x8b6   : > { %10503 = vmatpush1.bf16.msra.mxu0 %v22840_v51  ;;  %v22908_v51 = vld [vmem:[%s31180_s5 + $0x1144] ss:$16 sps:$4 sm:$0xff]  }
 0x8b7   : > { %10544 = vmatpush1.bf16.msra.mxu1 %v22843_v26  ;;  %10946 = vmatprep.subr.bf16.mxu0 %v22848_v38  ;;  %v22911_v26 = vld [vmem:[%s31180_s5 + $0x114c] ss:$16 sps:$4 sm:$0xff]   ;;  %v22906_v38 = vld [vmem:[%s31180_s5 + $0x1140] ss:$16 sps:$4 sm:$0xff]  }
 0x8b8   : > { %10987 = vmatprep.subr.bf16.mxu1 %v22851_v42  ;;  %v22909_v42 = vld [vmem:[%s31180_s5 + $0x1148] ss:$16 sps:$4 sm:$0xff]  }
 0x8b9   : > { %19419 = vmatmul.mubr.msk.bf16.vlgmr.msra.gmra.mrb[68].mxu0 %vm28160_vm6, %v19418_v49 }
 0x8ba   : > { %19425 = vmatmul.mubr.msk.bf16.vlgmr.msra.gmra.mrb[72].mxu1 %vm28160_vm6, %v19418_v49  ;;  %10947 = vmatpush1.bf16.msra.mxu0 %v22846_v44  ;;  %v22914_v44 = vld [vmem:[%s31180_s5 + $0x1164] ss:$16 sps:$4 sm:$0xff]   ;;  %v22917_v49 = vld [vmem:[%s31180_s5 + $0x116c] ss:$16 sps:$4 sm:$0xff]  }
 0x8bb   : > { %19556 = vmatprep.mubr.msk.bf16.mxu0 %vm27110_vm7, %v19555_v53  ;;  %10988 = vmatpush1.bf16.msra.mxu1 %v22849_v11  ;;  %v22912_v11 = vld [vmem:[%s31180_s5 + $0x1160] ss:$16 sps:$4 sm:$0xff]  }
 0x8bc   : > { %19559 = vmatprep.mubr.msk.bf16.mxu1 %vm27110_vm7, %v19555_v53  ;;  %10948 = vmatprep.subr.bf16.mxu0 %v22854_v45  ;;  %v22915_v45 = vld [vmem:[%s31180_s5 + $0x1168] ss:$16 sps:$4 sm:$0xff]   ;;  %v22920_v53 = vld [vmem:[%s31180_s5 + $0x1184] ss:$16 sps:$4 sm:$0xff]  }
 0x8bd   : > { %10989 = vmatprep.subr.bf16.mxu1 %v22857_v19  ;;  %v22923_v19 = vld [vmem:[%s31180_s5 + $0x118c] ss:$16 sps:$4 sm:$0xff]  }
 0x8be   : > { %10949 = vmatpush1.bf16.msra.mxu0 %v22852_v62  ;;  %v22918_v62 = vld [vmem:[%s31180_s5 + $0x1180] ss:$16 sps:$4 sm:$0xff]  }
 0x8bf   : > { %10990 = vmatpush1.bf16.msra.mxu1 %v22855_v52  ;;  %10950 = vmatprep.subr.bf16.mxu0 %v22860_v14  ;;  %v22921_v52 = vld [vmem:[%s31180_s5 + $0x1188] ss:$16 sps:$4 sm:$0xff]   ;;  %v22926_v14 = vld [vmem:[%s31180_s5 + $0x11a4] ss:$16 sps:$4 sm:$0xff]  }
 0x8c0   : > { %10991 = vmatprep.subr.bf16.mxu1 %v22863_v8  ;;  %v22929_v8 = vld [vmem:[%s31180_s5 + $0x11ac] ss:$16 sps:$4 sm:$0xff]  }
 0x8c2   : > { %10951 = vmatpush1.bf16.msra.mxu0 %v22858_v40  ;;  %v22924_v40 = vld [vmem:[%s31180_s5 + $0x11a0] ss:$16 sps:$4 sm:$0xff]  }
 0x8c3   : > { %10992 = vmatpush1.bf16.msra.mxu1 %v22861_v47  ;;  %10952 = vmatprep.subr.bf16.mxu0 %v22866_v48  ;;  %v22927_v47 = vld [vmem:[%s31180_s5 + $0x11a8] ss:$16 sps:$4 sm:$0xff]   ;;  %v22932_v48 = vld [vmem:[%s31180_s5 + $0x11c4] ss:$16 sps:$4 sm:$0xff]  }
 0x8c4   : > { %10993 = vmatprep.subr.bf16.mxu1 %v22869_v7  ;;  %v22935_v7 = vld [vmem:[%s31180_s5 + $0x11cc] ss:$16 sps:$4 sm:$0xff]  }
 0x8c6   : > { %10953 = vmatpush1.bf16.msra.mxu0 %v22864_v9  ;;  %v22930_v9 = vld [vmem:[%s31180_s5 + $0x11c0] ss:$16 sps:$4 sm:$0xff]  }
 0x8c7   : > { %10994 = vmatpush1.bf16.msra.mxu1 %v22867_v33  ;;  %10954 = vmatprep.subr.bf16.mxu0 %v22872_v58  ;;  %v22933_v33 = vld [vmem:[%s31180_s5 + $0x11c8] ss:$16 sps:$4 sm:$0xff]   ;;  %v22938_v58 = vld [vmem:[%s31180_s5 + $0x11e4] ss:$16 sps:$4 sm:$0xff]  }
 0x8c8   : > { %10995 = vmatprep.subr.bf16.mxu1 %v22875_v12  ;;  %v22941_v12 = vld [vmem:[%s31180_s5 + $0x11ec] ss:$16 sps:$4 sm:$0xff]  }
 0x8ca   : > { %10955 = vmatpush1.bf16.msra.mxu0 %v22870_v10  ;;  %v22936_v10 = vld [vmem:[%s31180_s5 + $0x11e0] ss:$16 sps:$4 sm:$0xff]  }
 0x8cb   : > { %10996 = vmatpush1.bf16.msra.mxu1 %v22873_v43  ;;  %10956 = vmatprep.subr.bf16.mxu0 %v22878_v4  ;;  %v22939_v43 = vld [vmem:[%s31180_s5 + $0x11e8] ss:$16 sps:$4 sm:$0xff]  }
 0x8cc   : > { %v9070_v16 = vpop.f32.mrb[56].mxu0  ;;  %10997 = vmatprep.subr.bf16.mxu1 %v22881_v56 }
 0x8cd   : > { %v28457_v1 = vadd.f32 %v9070_v16, %v28241_v20  ;;  %v9111_v54 = vpop.f32.mrb[60].mxu1  ;;  %v9072_v21 = vpop.f32.mrb[57].mxu0 }
 0x8ce   : > { %v28460_v32 = vadd.f32 %v9111_v54, %v28244_v29  ;;  %v28463_v23 = vadd.f32 %v9072_v21, %v28247_v60  ;;  %v9113_v57 = vpop.f32.mrb[61].mxu1  ;;  %v9074_v55 = vpop.f32.mrb[58].mxu0  ;;  %10957 = vmatpush1.bf16.msra.mxu0 %v22876_v13  ;;  %v22885_v29 = vld [vmem:[%s31180_s5 + $0x10c8] ss:$16 sps:$4 sm:$0xff]   ;;  %v22890_v60 = vld [vmem:[%s31180_s5 + $0x10e4] ss:$16 sps:$4 sm:$0xff]  }
 0x8cf   : > { %v28469_v15 = vadd.f32 %v9113_v57, %v28253_v30  ;;  %v9115_v20 = vpop.f32.mrb[62].mxu1  ;;  %10998 = vmatpush1.bf16.msra.mxu1 %v22879_v41  ;;  %v9075_v5 = vpop.f32.mrb[59].mxu0  ;;  %10958 = vmatprep.subr.bf16.mxu0 %v22884_v61  ;;  %v22888_v30 = vld [vmem:[%s31180_s5 + $0x10e0] ss:$16 sps:$4 sm:$0xff]  }
 0x8d0   : > { %v9116_v18 = vpop.f32.mrb[63].mxu1  ;;  %10999 = vmatprep.subr.bf16.mxu1 %v22887_v2  ;;  %v22953_v20 = vld [vmem:[%s31182_s7 + $0x22c] ss:$16 sps:$4 sm:$0xff]   ;;  %v22948_v5 = vld [vmem:[%s31182_s7 + $0x220] ss:$16 sps:$4 sm:$0xff]  }
 0x8d1   : > { %v22959_v18 = vld [vmem:[%s31182_s7 + $0x24c] ss:$16 sps:$4 sm:$0xff]  }
 0x8d2   : > { %10959 = vmatpush1.bf16.msra.mxu0 %v22882_v24  ;;  %v22947_v24 = vld [vmem:[%s31182_s7 + $0x20c] ss:$16 sps:$4 sm:$0xff]  }
 0x8d3   : > { %11000 = vmatpush1.bf16.msra.mxu1 %v22885_v29  ;;  %10960 = vmatprep.subr.bf16.mxu0 %v22890_v60  ;;  %v22951_v29 = vld [vmem:[%s31182_s7 + $0x228] ss:$16 sps:$4 sm:$0xff]   ;;  %v22956_v60 = vld [vmem:[%s31182_s7 + $0x244] ss:$16 sps:$4 sm:$0xff]  }
 0x8d4   : > { %11001 = vmatprep.subr.bf16.mxu1 %v22893_v59  ;;  %v22954_v59 = vld [vmem:[%s31182_s7 + $0x240] ss:$16 sps:$4 sm:$0xff]  }
 0x8d6   : > { %10961 = vmatpush1.bf16.msra.mxu0 %v22888_v30  ;;  %v22957_v30 = vld [vmem:[%s31182_s7 + $0x248] ss:$16 sps:$4 sm:$0xff]  }
 0x8d7   : > { %11002 = vmatpush1.bf16.msra.mxu1 %v22891_v50  ;;  %10962 = vmatprep.subr.bf16.mxu0 %v22896_v63  ;;  %v22962_v50 = vld [vmem:[%s31182_s7 + $0x264] ss:$16 sps:$4 sm:$0xff]   ;;  %v22965_v63 = vld [vmem:[%s31182_s7 + $0x26c] ss:$16 sps:$4 sm:$0xff]  }
 0x8d8   : > { %11003 = vmatprep.subr.bf16.mxu1 %v22899_v0  ;;  %v22960_v0 = vld [vmem:[%s31182_s7 + $0x260] ss:$16 sps:$4 sm:$0xff]  }
 0x8da   : > { %10963 = vmatpush1.bf16.msra.mxu0 %v22894_v22  ;;  %v22963_v22 = vld [vmem:[%s31182_s7 + $0x268] ss:$16 sps:$4 sm:$0xff]  }
 0x8db   : > { %11004 = vmatpush1.bf16.msra.mxu1 %v22897_v39  ;;  %10964 = vmatprep.subr.bf16.mxu0 %v22902_v6  ;;  %v22968_v39 = vld [vmem:[%s31182_s7 + $0x284] ss:$16 sps:$4 sm:$0xff]   ;;  %v22971_v6 = vld [vmem:[%s31182_s7 + $0x28c] ss:$16 sps:$4 sm:$0xff]  }
 0x8dc   : > { %11005 = vmatprep.subr.bf16.mxu1 %v22905_v28  ;;  %v22966_v28 = vld [vmem:[%s31182_s7 + $0x280] ss:$16 sps:$4 sm:$0xff]  }
 0x8de   : > { %10965 = vmatpush1.bf16.msra.mxu0 %v22900_v17  ;;  %v22969_v17 = vld [vmem:[%s31182_s7 + $0x288] ss:$16 sps:$4 sm:$0xff]  }
 0x8df   : > { %11006 = vmatpush1.bf16.msra.mxu1 %v22903_v25  ;;  %10966 = vmatprep.subr.bf16.mxu0 %v22908_v51  ;;  %v22974_v25 = vld [vmem:[%s31182_s7 + $0x2a4] ss:$16 sps:$4 sm:$0xff]   ;;  %v22977_v51 = vld [vmem:[%s31182_s7 + $0x2ac] ss:$16 sps:$4 sm:$0xff]  }
 0x8e0   : > { %11007 = vmatprep.subr.bf16.mxu1 %v22911_v26  ;;  %v22972_v26 = vld [vmem:[%s31182_s7 + $0x2a0] ss:$16 sps:$4 sm:$0xff]  }
 0x8e2   : > { %10967 = vmatpush1.bf16.msra.mxu0 %v22906_v38  ;;  %v22975_v38 = vld [vmem:[%s31182_s7 + $0x2a8] ss:$16 sps:$4 sm:$0xff]  }
 0x8e3   : > { %11008 = vmatpush1.bf16.msra.mxu1 %v22909_v42  ;;  %10968 = vmatprep.subr.bf16.mxu0 %v22914_v44  ;;  %v22980_v42 = vld [vmem:[%s31182_s7 + $0x2c4] ss:$16 sps:$4 sm:$0xff]   ;;  %v22983_v44 = vld [vmem:[%s31182_s7 + $0x2cc] ss:$16 sps:$4 sm:$0xff]  }
 0x8e4   : > { %11009 = vmatprep.subr.bf16.mxu1 %v22917_v49  ;;  %v22978_v49 = vld [vmem:[%s31182_s7 + $0x2c0] ss:$16 sps:$4 sm:$0xff]  }
 0x8e6   : > { %10969 = vmatpush1.bf16.msra.mxu0 %v22912_v11  ;;  %v22981_v11 = vld [vmem:[%s31182_s7 + $0x2c8] ss:$16 sps:$4 sm:$0xff]  }
 0x8e7   : > { %11010 = vmatpush1.bf16.msra.mxu1 %v22915_v45  ;;  %10970 = vmatprep.subr.bf16.mxu0 %v22920_v53  ;;  %v22986_v45 = vld [vmem:[%s31182_s7 + $0x2e4] ss:$16 sps:$4 sm:$0xff]   ;;  %v22989_v53 = vld [vmem:[%s31182_s7 + $0x2ec] ss:$16 sps:$4 sm:$0xff]  }
 0x8e8   : > { %11011 = vmatprep.subr.bf16.mxu1 %v22923_v19  ;;  %v22984_v19 = vld [vmem:[%s31182_s7 + $0x2e0] ss:$16 sps:$4 sm:$0xff]  }
 0x8ea   : > { %10971 = vmatpush1.bf16.msra.mxu0 %v22918_v62  ;;  %v22987_v62 = vld [vmem:[%s31182_s7 + $0x2e8] ss:$16 sps:$4 sm:$0xff]  }
 0x8eb   : > { %11012 = vmatpush1.bf16.msra.mxu1 %v22921_v52  ;;  %10972 = vmatprep.subr.bf16.mxu0 %v22926_v14  ;;  %v22992_v52 = vld [vmem:[%s31182_s7 + $0x304] ss:$16 sps:$4 sm:$0xff]   ;;  %v22995_v14 = vld [vmem:[%s31182_s7 + $0x30c] ss:$16 sps:$4 sm:$0xff]  }
 0x8ec   : > { %11013 = vmatprep.subr.bf16.mxu1 %v22929_v8  ;;  %v22990_v8 = vld [vmem:[%s31182_s7 + $0x300] ss:$16 sps:$4 sm:$0xff]  }
 0x8ee   : > { %10973 = vmatpush1.bf16.msra.mxu0 %v22924_v40  ;;  %v22993_v40 = vld [vmem:[%s31182_s7 + $0x308] ss:$16 sps:$4 sm:$0xff]  }
 0x8ef   : > { %11014 = vmatpush1.bf16.msra.mxu1 %v22927_v47  ;;  %10974 = vmatprep.subr.bf16.mxu0 %v22932_v48  ;;  %v22998_v47 = vld [vmem:[%s31182_s7 + $0x324] ss:$16 sps:$4 sm:$0xff]   ;;  %v23001_v48 = vld [vmem:[%s31182_s7 + $0x32c] ss:$16 sps:$4 sm:$0xff]  }
 0x8f0   : > { %11015 = vmatprep.subr.bf16.mxu1 %v22935_v7  ;;  %v22996_v7 = vld [vmem:[%s31182_s7 + $0x320] ss:$16 sps:$4 sm:$0xff]  }
 0x8f2   : > { %10975 = vmatpush1.bf16.msra.mxu0 %v22930_v9  ;;  %v22999_v9 = vld [vmem:[%s31182_s7 + $0x328] ss:$16 sps:$4 sm:$0xff]  }
 0x8f3   : > { %11016 = vmatpush1.bf16.msra.mxu1 %v22933_v33  ;;  %10976 = vmatprep.subr.bf16.mxu0 %v22938_v58  ;;  %v23004_v33 = vld [vmem:[%s31182_s7 + $0x344] ss:$16 sps:$4 sm:$0xff]   ;;  %v23007_v58 = vld [vmem:[%s31182_s7 + $0x34c] ss:$16 sps:$4 sm:$0xff]  }
 0x8f4   : > { %11017 = vmatprep.subr.bf16.mxu1 %v22941_v12  ;;  %v23002_v12 = vld [vmem:[%s31182_s7 + $0x340] ss:$16 sps:$4 sm:$0xff]  }
 0x8f6   : > { %10977 = vmatpush1.bf16.msra.mxu0 %v22936_v10  ;;  %v23005_v10 = vld [vmem:[%s31182_s7 + $0x348] ss:$16 sps:$4 sm:$0xff]  }
 0x8f7   : > { %11018 = vmatpush1.bf16.msra.mxu1 %v22939_v43 }
 0x8f8   : > { %11581 = vmatprep.subr.bf16.mxu1 %v22947_v24 }
 0x8f9   : > { %10979 = vmatmul.mubr.bf16.vlgmr.msra.gmra.mrb[72].mxu0 %v27949_v46 }
 0x8fa   : > { %11020 = vmatmul.mubr.bf16.vlgmr.msra.gmra.mrb[76].mxu1 %v27949_v46 }
 0x90c   : > { %v9544_v4 = vpop.f32.mrb[60].mxu0 }
 0x90d   : > { %v28585_v56 = vadd.f32 %v9544_v4, %v28457_v1  ;;  %v9585_v13 = vpop.f32.mrb[64].mxu1  ;;  %v9546_v41 = vpop.f32.mrb[61].mxu0  ;;  %v22942_v1 = vld [vmem:[%s31182_s7 + $0x200] ss:$16 sps:$4 sm:$0xff]  }
 0x90e   : > { %v28588_v61 = vadd.f32 %v9585_v13, %v28460_v32  ;;  %v28591_v16 = vadd.f32 %v9546_v41, %v28463_v23  ;;  %v9587_v2 = vpop.f32.mrb[65].mxu1  ;;  %v9548_v54 = vpop.f32.mrb[62].mxu0  ;;  %v22944_v32 = vld [vmem:[%s31182_s7 + $0x204] ss:$16 sps:$4 sm:$0xff]   ;;  %v22945_v23 = vld [vmem:[%s31182_s7 + $0x208] ss:$16 sps:$4 sm:$0xff]  }
 0x90f   : > { %v28594_v21 = vadd.f32 %v9587_v2, %v28469_v15  ;;  %v9589_v57 = vpop.f32.mrb[66].mxu1  ;;  %v9549_v55 = vpop.f32.mrb[63].mxu0  ;;  %11540 = vmatprep.subr.bf16.mxu0 %v22944_v32  ;;  %v22950_v15 = vld [vmem:[%s31182_s7 + $0x224] ss:$16 sps:$4 sm:$0xff]   ;;  %11582 = vmatpush1.bf16.msra.mxu1 %v22945_v23 }
 0x910   : > { %v9590_v46 = vpop.f32.mrb[67].mxu1  ;;  %11541 = vmatpush1.bf16.msra.mxu0 %v22942_v1  ;;  %11583 = vmatprep.subr.bf16.mxu1 %v22953_v20  ;;  %v23010_v2 = vld [vmem:[%s31182_s7 + $0x364] ss:$16 sps:$4 sm:$0xff]   ;;  %v23008_v1 = vld [vmem:[%s31182_s7 + $0x360] ss:$16 sps:$4 sm:$0xff]  }
 0x911   : > { %11542 = vmatprep.subr.bf16.mxu0 %v22950_v15  ;;  %v23016_v15 = vld [vmem:[%s31182_s7 + $0x384] ss:$16 sps:$4 sm:$0xff]   ;;  %v23019_v20 = vld [vmem:[%s31182_s7 + $0x38c] ss:$16 sps:$4 sm:$0xff]  }
 0x913   : > { %11584 = vmatpush1.bf16.msra.mxu1 %v22951_v29  ;;  %v23022_v29 = vld [vmem:[%s31182_s7 + $0x3a4] ss:$16 sps:$4 sm:$0xff]  }
 0x914   : > { %11543 = vmatpush1.bf16.msra.mxu0 %v22948_v5  ;;  %11585 = vmatprep.subr.bf16.mxu1 %v22959_v18  ;;  %v23017_v5 = vld [vmem:[%s31182_s7 + $0x388] ss:$16 sps:$4 sm:$0xff]   ;;  %v23020_v18 = vld [vmem:[%s31182_s7 + $0x3a0] ss:$16 sps:$4 sm:$0xff]  }
 0x915   : > { %11544 = vmatprep.subr.bf16.mxu0 %v22956_v60  ;;  %v23025_v60 = vld [vmem:[%s31182_s7 + $0x3ac] ss:$16 sps:$4 sm:$0xff]  }
 0x917   : > { %11586 = vmatpush1.bf16.msra.mxu1 %v22957_v30  ;;  %v23028_v30 = vld [vmem:[%s31182_s7 + $0x3c4] ss:$16 sps:$4 sm:$0xff]  }
 0x918   : > { %11545 = vmatpush1.bf16.msra.mxu0 %v22954_v59  ;;  %11587 = vmatprep.subr.bf16.mxu1 %v22965_v63  ;;  %v23023_v59 = vld [vmem:[%s31182_s7 + $0x3a8] ss:$16 sps:$4 sm:$0xff]   ;;  %v23026_v63 = vld [vmem:[%s31182_s7 + $0x3c0] ss:$16 sps:$4 sm:$0xff]  }
 0x919   : > { %11546 = vmatprep.subr.bf16.mxu0 %v22962_v50  ;;  %v23031_v50 = vld [vmem:[%s31182_s7 + $0x3cc] ss:$16 sps:$4 sm:$0xff]  }
 0x91b   : > { %11588 = vmatpush1.bf16.msra.mxu1 %v22963_v22  ;;  %v23032_v22 = vld [vmem:[%s31182_s7 + $0x3e0] ss:$16 sps:$4 sm:$0xff]  }
 0x91c   : > { %11547 = vmatpush1.bf16.msra.mxu0 %v22960_v0  ;;  %11589 = vmatprep.subr.bf16.mxu1 %v22971_v6  ;;  %v23029_v0 = vld [vmem:[%s31182_s7 + $0x3c8] ss:$16 sps:$4 sm:$0xff]   ;;  %v23037_v6 = vld [vmem:[%s31182_s7 + $0x3ec] ss:$16 sps:$4 sm:$0xff]  }
 0x91d   : > { %11548 = vmatprep.subr.bf16.mxu0 %v22968_v39  ;;  %v23034_v39 = vld [vmem:[%s31182_s7 + $0x3e4] ss:$16 sps:$4 sm:$0xff]  }
 0x91f   : > { %11590 = vmatpush1.bf16.msra.mxu1 %v22969_v17  ;;  %v23040_v17 = vld [vmem:[%s31182_s7 + $0x4] ss:$16 sps:$4 sm:$0xff]  }
 0x920   : > { %11549 = vmatpush1.bf16.msra.mxu0 %v22966_v28  ;;  %11591 = vmatprep.subr.bf16.mxu1 %v22977_v51  ;;  %v23035_v28 = vld [vmem:[%s31182_s7 + $0x3e8] ss:$16 sps:$4 sm:$0xff]  }
 0x921   : > { %11550 = vmatprep.subr.bf16.mxu0 %v22974_v25  ;;  %v23043_v25 = vld [vmem:[%s31182_s7 + $0xc] ss:$16 sps:$4 sm:$0xff]  }
 0x923   : > { %11592 = vmatpush1.bf16.msra.mxu1 %v22975_v38 }
 0x924   : > { %11551 = vmatpush1.bf16.msra.mxu0 %v22972_v26  ;;  %11593 = vmatprep.subr.bf16.mxu1 %v22983_v44 }
 0x925   : > { %11552 = vmatprep.subr.bf16.mxu0 %v22980_v42 }
 0x927   : > { %11594 = vmatpush1.bf16.msra.mxu1 %v22981_v11 }
 0x928   : > { %11553 = vmatpush1.bf16.msra.mxu0 %v22978_v49  ;;  %11595 = vmatprep.subr.bf16.mxu1 %v22989_v53 }
 0x929   : > { %11554 = vmatprep.subr.bf16.mxu0 %v22986_v45 }
 0x92b   : > { %11596 = vmatpush1.bf16.msra.mxu1 %v22987_v62 }
 0x92c   : > { %11555 = vmatpush1.bf16.msra.mxu0 %v22984_v19  ;;  %11597 = vmatprep.subr.bf16.mxu1 %v22995_v14  ;;  %v11032_v14 = vld [vmem:[%s31181_s6] sm:$0xf] }
 0x92d   : > { %11556 = vmatprep.subr.bf16.mxu0 %v22992_v52 }
 0x92f   : > { %11598 = vmatpush1.bf16.msra.mxu1 %v22993_v40 }
 0x930   : > { %11557 = vmatpush1.bf16.msra.mxu0 %v22990_v8  ;;  %11599 = vmatprep.subr.bf16.mxu1 %v23001_v48  ;;  %v11037_v8 = vrot.slane %v11032_v14, %v24581_v34  ;;  %v11041_v48 = vrot.slane %v11032_v14, %v24584_v35 }
 0x931   : > { %11558 = vmatprep.subr.bf16.mxu0 %v22998_v47  ;;  %v11045_v47 = vrot.slane %v11032_v14, %v24587_v36 }
 0x933   : > { %11600 = vmatpush1.bf16.msra.mxu1 %v22999_v9 }
 0x934   : > { %11559 = vmatpush1.bf16.msra.mxu0 %v22996_v7  ;;  %11601 = vmatprep.subr.bf16.mxu1 %v23007_v58  ;;  %v11049_v58 = vrot.slane %v11032_v14, %v24590_v37  ;;  %v23070_v14 = vld [vmem:[%s31182_s7 + $0xa4] ss:$16 sps:$4 sm:$0xff]  }
 0x935   : > { %11560 = vmatprep.subr.bf16.mxu0 %v23004_v33 }
 0x937   : > { %11602 = vmatpush1.bf16.msra.mxu1 %v23005_v10 }
 0x938   : > { %11561 = vmatpush1.bf16.msra.mxu0 %v23002_v12 }
 0x939   : > { %11562 = vmatprep.subr.bf16.mxu0 %v23010_v2 }
 0x93c   : > { %11563 = vmatpush1.bf16.msra.mxu0 %v23008_v1 }
 0x93d   : > { %11564 = vmatprep.subr.bf16.mxu0 %v23016_v15 }
 0x94c   : > { %v10033_v43 = vpop.f32.mrb[64].mxu0 }
 0x94d   : > { %v10081_v4 = vadd.f32 %v10033_v43, %v28585_v56  ;;  %v10074_v13 = vpop.f32.mrb[68].mxu1  ;;  %v10035_v41 = vpop.f32.mrb[65].mxu0  ;;  %v23011_v56 = vld [vmem:[%s31182_s7 + $0x368] ss:$16 sps:$4 sm:$0xff]  }
 0x94e   : > { %v10083_v54 = vadd.f32 %v10074_v13, %v28588_v61  ;;  %v10082_v57 = vadd.f32 %v10035_v41, %v28591_v16  ;;  %v10076_v55 = vpop.f32.mrb[69].mxu1  ;;  %v10037_v46 = vpop.f32.mrb[66].mxu0  ;;  %v23013_v61 = vld [vmem:[%s31182_s7 + $0x36c] ss:$16 sps:$4 sm:$0xff]  }
 0x94f   : > { %v10084_v32 = vadd.f32 %v10076_v55, %v28594_v21  ;;  %v10078_v23 = vpop.f32.mrb[70].mxu1  ;;  %v10038_v24 = vpop.f32.mrb[67].mxu0  ;;  %11603 = vmatprep.subr.bf16.mxu1 %v23013_v61  ;;  %v23014_v21 = vld [vmem:[%s31182_s7 + $0x380] ss:$16 sps:$4 sm:$0xff]  }
 0x950   : > { %v10079_v16 = vpop.f32.mrb[71].mxu1  ;;  %11604 = vmatpush1.bf16.msra.mxu1 %v23011_v56  ;;  %11565 = vmatpush1.bf16.msra.mxu0 %v23014_v21 }
 0x951   : > { %11605 = vmatprep.subr.bf16.mxu1 %v23019_v20  ;;  %11566 = vmatprep.subr.bf16.mxu0 %v23022_v29 }
 0x954   : > { %11606 = vmatpush1.bf16.msra.mxu1 %v23017_v5  ;;  %11567 = vmatpush1.bf16.msra.mxu0 %v23020_v18 }
 0x955   : > { %11607 = vmatprep.subr.bf16.mxu1 %v23025_v60  ;;  %11568 = vmatprep.subr.bf16.mxu0 %v23028_v30 }
 0x958   : > { %11608 = vmatpush1.bf16.msra.mxu1 %v23023_v59  ;;  %11569 = vmatpush1.bf16.msra.mxu0 %v23026_v63 }
 0x959   : > { %11609 = vmatprep.subr.bf16.mxu1 %v23031_v50  ;;  %11570 = vmatprep.subr.bf16.mxu0 %v23034_v39  ;;  %v23041_v39 = vld [vmem:[%s31182_s7 + $0x8] ss:$16 sps:$4 sm:$0xff]  }
 0x95c   : > { %11610 = vmatpush1.bf16.msra.mxu1 %v23029_v0  ;;  %11571 = vmatpush1.bf16.msra.mxu0 %v23032_v22  ;;  %v23038_v22 = vld [vmem:[%s31182_s7] ss:$16 sps:$4 sm:$0xff]  }
 0x95d   : > { %11611 = vmatprep.subr.bf16.mxu1 %v23037_v6  ;;  %11942 = vmatprep.subr.bf16.mxu0 %v23040_v17  ;;  %v23046_v6 = vld [vmem:[%s31182_s7 + $0x24] ss:$16 sps:$4 sm:$0xff]   ;;  %v23044_v17 = vld [vmem:[%s31182_s7 + $0x20] ss:$16 sps:$4 sm:$0xff]  }
 0x960   : > { %11612 = vmatpush1.bf16.msra.mxu1 %v23035_v28  ;;  %v23049_v28 = vld [vmem:[%s31182_s7 + $0x2c] ss:$16 sps:$4 sm:$0xff]  }
 0x961   : > { %11983 = vmatprep.subr.bf16.mxu1 %v23043_v25  ;;  %v23047_v25 = vld [vmem:[%s31182_s7 + $0x28] ss:$16 sps:$4 sm:$0xff]  }
 0x98c   : > { %v10506_v51 = vpop.f32.mrb[68].mxu0 }
 0x98d   : > { %v10554_v26 = vadd.f32 %v10506_v51, %v10081_v4  ;;  %v10547_v38 = vpop.f32.mrb[72].mxu1  ;;  %v10508_v42 = vpop.f32.mrb[69].mxu0  ;;  %v23052_v51 = vld [vmem:[%s31182_s7 + $0x44] ss:$16 sps:$4 sm:$0xff]  }
 0x98e   : > { %v10556_v44 = vadd.f32 %v10547_v38, %v10083_v54  ;;  %v10555_v49 = vadd.f32 %v10508_v42, %v10082_v57  ;;  %v10549_v11 = vpop.f32.mrb[73].mxu1  ;;  %v10510_v45 = vpop.f32.mrb[70].mxu0  ;;  %v23050_v38 = vld [vmem:[%s31182_s7 + $0x40] ss:$16 sps:$4 sm:$0xff]   ;;  %v23053_v42 = vld [vmem:[%s31182_s7 + $0x48] ss:$16 sps:$4 sm:$0xff]  }
 0x98f   : > { %v10557_v53 = vadd.f32 %v10549_v11, %v10084_v32  ;;  %v10551_v19 = vpop.f32.mrb[74].mxu1  ;;  %v10511_v62 = vpop.f32.mrb[71].mxu0  ;;  %v23056_v11 = vld [vmem:[%s31182_s7 + $0x60] ss:$16 sps:$4 sm:$0xff]   ;;  %v23059_v45 = vld [vmem:[%s31182_s7 + $0x68] ss:$16 sps:$4 sm:$0xff]  }
 0x990   : > { %v10552_v52 = vpop.f32.mrb[75].mxu1  ;;  %v23067_v19 = vld [vmem:[%s31182_s7 + $0x8c] ss:$16 sps:$4 sm:$0xff]   ;;  %v23062_v62 = vld [vmem:[%s31182_s7 + $0x80] ss:$16 sps:$4 sm:$0xff]  }
 0x991   : > { %v23065_v52 = vld [vmem:[%s31182_s7 + $0x88] ss:$16 sps:$4 sm:$0xff]  }
 0x9cc   : > { %v10980_v40 = vpop.f32.mrb[72].mxu0 }
 0x9cd   : > { %v11028_v7 = vadd.f32 %v10980_v40, %v10554_v26  ;;  %v11021_v9 = vpop.f32.mrb[76].mxu1  ;;  %v10982_v33 = vpop.f32.mrb[73].mxu0  ;;  %v23055_v26 = vld [vmem:[%s31182_s7 + $0x4c] ss:$16 sps:$4 sm:$0xff]   ;;  %v23068_v40 = vld [vmem:[%s31182_s7 + $0xa0] ss:$16 sps:$4 sm:$0xff]  }
 0x9ce   : > { %v11030_v12 = vadd.f32 %v11021_v9, %v10556_v44  ;;  %v11029_v10 = vadd.f32 %v10982_v33, %v10555_v49  ;;  %v11023_v43 = vpop.f32.mrb[77].mxu1  ;;  %v10984_v4 = vpop.f32.mrb[74].mxu0  ;;  %v23058_v44 = vld [vmem:[%s31182_s7 + $0x64] ss:$16 sps:$4 sm:$0xff]   ;;  %v23061_v49 = vld [vmem:[%s31182_s7 + $0x6c] ss:$16 sps:$4 sm:$0xff]  }
 0x9cf   : > { %v11054_v13 = vadd.f32 %v11037_v8, %v11028_v7  ;;  %v11031_v41 = vadd.f32 %v11023_v43, %v10557_v53  ;;  %v11025_v2 = vpop.f32.mrb[78].mxu1  ;;  %v10985_v54 = vpop.f32.mrb[75].mxu0  ;;  %v23064_v53 = vld [vmem:[%s31182_s7 + $0x84] ss:$16 sps:$4 sm:$0xff]   ;;  %v23073_v8 = vld [vmem:[%s31182_s7 + $0xac] ss:$16 sps:$4 sm:$0xff]  }
 0x9d0   : > { %v11056_v57 = vadd.f32 %v11045_v47, %v11030_v12  ;;  %v11055_v55 = vadd.f32 %v11041_v48, %v11029_v10  ;;  %v11026_v46 = vpop.f32.mrb[79].mxu1  ;;  %v23071_v47 = vld [vmem:[%s31182_s7 + $0xa8] ss:$16 sps:$4 sm:$0xff]   ;;  %v23076_v48 = vld [vmem:[%s31182_s7 + $0xc4] ss:$16 sps:$4 sm:$0xff]  }
 0x9d1   : > { %v11058_v1 = vmax.f32 %v11054_v13, 0.0  ;;  %v11057_v56 = vadd.f32 %v11049_v58, %v11031_v41  ;;  %v23079_v7 = vld [vmem:[%s31182_s7 + $0xcc] ss:$16 sps:$4 sm:$0xff]   ;;  %v23074_v9 = vld [vmem:[%s31182_s7 + $0xc0] ss:$16 sps:$4 sm:$0xff]  }
 0x9d2   : > { %v11060_v32 = vmax.f32 %v11056_v57, 0.0  ;;  %v11059_v23 = vmax.f32 %v11055_v55, 0.0  ;;  %v23077_v33 = vld [vmem:[%s31182_s7 + $0xc8] ss:$16 sps:$4 sm:$0xff]   ;;  %v23082_v58 = vld [vmem:[%s31182_s7 + $0xe4] ss:$16 sps:$4 sm:$0xff]  }
 0x9d3   : > { %v11061_v24 = vmax.f32 %v11057_v56, 0.0  ;;  %v23085_v12 = vld [vmem:[%s31182_s7 + $0xec] ss:$16 sps:$4 sm:$0xff]   ;;  %v23080_v10 = vld [vmem:[%s31182_s7 + $0xe0] ss:$16 sps:$4 sm:$0xff]  }
 0x9d4   : > { %v11062_v61 = vmax.f32 %v11058_v1, %v11059_v23  ;;  %v23083_v43 = vld [vmem:[%s31182_s7 + $0xe8] ss:$16 sps:$4 sm:$0xff]   ;;  %v23088_v4 = vld [vmem:[%s31182_s7 + $0x104] ss:$16 sps:$4 sm:$0xff]   ;;  %v23091_v13 = vld [vmem:[%s31182_s7 + $0x10c] ss:$16 sps:$4 sm:$0xff]  }
 0x9d5   : > { %v11063_v16 = vmax.f32 %v11060_v32, %v11061_v24  ;;  %v23086_v41 = vld [vmem:[%s31182_s7 + $0x100] ss:$16 sps:$4 sm:$0xff]   ;;  %v23089_v2 = vld [vmem:[%s31182_s7 + $0x108] ss:$16 sps:$4 sm:$0xff]   ;;  %v23094_v54 = vld [vmem:[%s31182_s7 + $0x124] ss:$16 sps:$4 sm:$0xff]  }
 0x9d6   : > { %v11066_v15 = vrot.slane %v11062_v61, 1  ;;  %v23097_v57 = vld [vmem:[%s31182_s7 + $0x12c] ss:$16 sps:$4 sm:$0xff]   ;;  %v23092_v55 = vld [vmem:[%s31182_s7 + $0x120] ss:$16 sps:$4 sm:$0xff]  }
 0x9d7   : > { %v11067_v20 = vrot.slane %v11063_v16, 1  ;;  %v23095_v46 = vld [vmem:[%s31182_s7 + $0x128] ss:$16 sps:$4 sm:$0xff]   ;;  %v23100_v1 = vld [vmem:[%s31182_s7 + $0x144] ss:$16 sps:$4 sm:$0xff]  }
 0x9d8   : > { %v11070_v21 = vmax.f32 %v11062_v61, %v11066_v15  ;;  %v23103_v56 = vld [vmem:[%s31182_s7 + $0x14c] ss:$16 sps:$4 sm:$0xff]   ;;  %v23098_v32 = vld [vmem:[%s31182_s7 + $0x140] ss:$16 sps:$4 sm:$0xff]   ;;  %v23101_v23 = vld [vmem:[%s31182_s7 + $0x148] ss:$16 sps:$4 sm:$0xff]  }
 0x9d9   : > { %v11071_v5 = vmax.f32 %v11063_v16, %v11067_v20  ;;  %v23106_v24 = vld [vmem:[%s31182_s7 + $0x164] ss:$16 sps:$4 sm:$0xff]   ;;  %v23109_v61 = vld [vmem:[%s31182_s7 + $0x16c] ss:$16 sps:$4 sm:$0xff]   ;;  %v23104_v16 = vld [vmem:[%s31182_s7 + $0x160] ss:$16 sps:$4 sm:$0xff]  }
 0x9da   : > { %v11074_v29 = vrot.slane %v11070_v21, 1  ;;  %v23107_v15 = vld [vmem:[%s31182_s7 + $0x168] ss:$16 sps:$4 sm:$0xff]   ;;  %v23112_v20 = vld [vmem:[%s31182_s7 + $0x184] ss:$16 sps:$4 sm:$0xff]  }
 0x9db   : > { %v11075_v60 = vrot.slane %v11071_v5, 1 }
 0x9dc   : > { %v28806_v18 = vsel %vm498_vm0, %v11070_v21, %v11074_v29  ;;  %v23115_v21 = vld [vmem:[%s31182_s7 + $0x18c] ss:$16 sps:$4 sm:$0xff]   ;;  %v23113_v29 = vld [vmem:[%s31182_s7 + $0x188] ss:$16 sps:$4 sm:$0xff]  }
 0x9dd   : > { %v28809_v59 = vsel %vm498_vm0, %v11071_v5, %v11075_v60  ;;  %v11082_v30 = vrot.slane %v28806_v18, 7  ;;  %v23110_v5 = vld [vmem:[%s31182_s7 + $0x180] ss:$16 sps:$4 sm:$0xff]   ;;  %v23118_v60 = vld [vmem:[%s31182_s7 + $0x1a4] ss:$16 sps:$4 sm:$0xff]   ;;  %vm17061_vm0 = vcmp.lt.s32.totalorder %v2135_v27, 600 }
 0x9de   : > { %v11083_v50 = vrot.slane %v28809_v59, 7 }
 0x9df   : > { %v19696_v63 = vpack.c.bf16 %v11082_v30, %v11082_v30  ;;  %v23121_v30 = vld [vmem:[%s31182_s7 + $0x1ac] ss:$16 sps:$4 sm:$0xff]  }
 0x9e0   : > { %v28813_v0 = vpack.c.bf16 %v11083_v50, %v11083_v50  ;;  %v23116_v50 = vld [vmem:[%s31182_s7 + $0x1a0] ss:$16 sps:$4 sm:$0xff]  }
 0x9e2   : > { %19692 = vmatprep.mubr.msk.bf16.mxu0 %vm24903_vm14, %v28813_v0  ;;  %19702 = vmatprep.mubr.msk.bf16.mxu1 %vm24903_vm14, %v28813_v0 }
 0x9e3   : > { %19697 = vmatmul.mubr.msk.bf16.vlgmr.msra.gmra.mrb[76].mxu0 %vm24903_vm14, %v19696_v63  ;;  %19707 = vmatmul.mubr.msk.bf16.vlgmr.msra.gmra.mrb[80].mxu1 %vm24903_vm14, %v19696_v63 }
 0x9e4   : > { %11943 = vmatpush1.bf16.msra.mxu0 %v23038_v22  ;;  %11984 = vmatpush1.bf16.msra.mxu1 %v23041_v39  ;;  %v23124_v22 = vld [vmem:[%s31182_s7 + $0x1c4] ss:$16 sps:$4 sm:$0xff]   ;;  %v23127_v39 = vld [vmem:[%s31182_s7 + $0x1cc] ss:$16 sps:$4 sm:$0xff]  }
 0x9e5   : > { %19776 = vmatprep.mubr.msk.bf16.mxu0 %vm24903_vm14, %v19696_v63  ;;  %19781 = vmatprep.mubr.msk.bf16.mxu1 %vm24903_vm14, %v19696_v63  ;;  %v23119_v63 = vld [vmem:[%s31182_s7 + $0x1a8] ss:$16 sps:$4 sm:$0xff]  }
 0x9e6   : > { %11944 = vmatprep.subr.bf16.mxu0 %v23046_v6  ;;  %11985 = vmatprep.subr.bf16.mxu1 %v23049_v28  ;;  %v23122_v6 = vld [vmem:[%s31182_s7 + $0x1c0] ss:$16 sps:$4 sm:$0xff]   ;;  %v23125_v28 = vld [vmem:[%s31182_s7 + $0x1c8] ss:$16 sps:$4 sm:$0xff]  }
 0x9e8   : > { %11945 = vmatpush1.bf16.msra.mxu0 %v23044_v17  ;;  %11986 = vmatpush1.bf16.msra.mxu1 %v23047_v25  ;;  %v23130_v17 = vld [vmem:[%s31182_s7 + $0x1e4] ss:$16 sps:$4 sm:$0xff]   ;;  %v23133_v25 = vld [vmem:[%s31182_s7 + $0x1ec] ss:$16 sps:$4 sm:$0xff]  }
 0x9e9   : > { %11946 = vmatprep.subr.bf16.mxu0 %v23052_v51  ;;  %11987 = vmatprep.subr.bf16.mxu1 %v23055_v26  ;;  %v23128_v51 = vld [vmem:[%s31182_s7 + $0x1e0] ss:$16 sps:$4 sm:$0xff]   ;;  %v23131_v26 = vld [vmem:[%s31182_s7 + $0x1e8] ss:$16 sps:$4 sm:$0xff]  }
 0x9ec   : > { %11947 = vmatpush1.bf16.msra.mxu0 %v23050_v38  ;;  %11988 = vmatpush1.bf16.msra.mxu1 %v23053_v42  ;;  %v23136_v38 = vld [vmem:[%s31182_s7 + $0x404] ss:$16 sps:$4 sm:$0xff]   ;;  %v23139_v42 = vld [vmem:[%s31182_s7 + $0x40c] ss:$16 sps:$4 sm:$0xff]  }
 0x9ed   : > { %11948 = vmatprep.subr.bf16.mxu0 %v23058_v44  ;;  %11989 = vmatprep.subr.bf16.mxu1 %v23061_v49  ;;  %v23134_v44 = vld [vmem:[%s31182_s7 + $0x400] ss:$16 sps:$4 sm:$0xff]   ;;  %v23137_v49 = vld [vmem:[%s31182_s7 + $0x408] ss:$16 sps:$4 sm:$0xff]  }
 0x9f0   : > { %11949 = vmatpush1.bf16.msra.mxu0 %v23056_v11  ;;  %11990 = vmatpush1.bf16.msra.mxu1 %v23059_v45  ;;  %v23142_v11 = vld [vmem:[%s31182_s7 + $0x424] ss:$16 sps:$4 sm:$0xff]   ;;  %v23145_v45 = vld [vmem:[%s31182_s7 + $0x42c] ss:$16 sps:$4 sm:$0xff]  }
 0x9f1   : > { %11950 = vmatprep.subr.bf16.mxu0 %v23064_v53  ;;  %11991 = vmatprep.subr.bf16.mxu1 %v23067_v19  ;;  %v24126_v53 = vmov 0.0|0.0   ;;  %v23140_v19 = vld [vmem:[%s31182_s7 + $0x420] ss:$16 sps:$4 sm:$0xff]  }
 0x9f4   : > { %11951 = vmatpush1.bf16.msra.mxu0 %v23062_v62  ;;  %11992 = vmatpush1.bf16.msra.mxu1 %v23065_v52  ;;  %v23143_v62 = vld [vmem:[%s31182_s7 + $0x428] ss:$16 sps:$4 sm:$0xff]   ;;  %v23148_v52 = vld [vmem:[%s31182_s7 + $0x444] ss:$16 sps:$4 sm:$0xff]  }
 0x9f5   : > { %11952 = vmatprep.subr.bf16.mxu0 %v23070_v14  ;;  %11993 = vmatprep.subr.bf16.mxu1 %v23073_v8  ;;  %v23151_v14 = vld [vmem:[%s31182_s7 + $0x44c] ss:$16 sps:$4 sm:$0xff]   ;;  %v23146_v8 = vld [vmem:[%s31182_s7 + $0x440] ss:$16 sps:$4 sm:$0xff]  }
 0x9f8   : > { %11953 = vmatpush1.bf16.msra.mxu0 %v23068_v40  ;;  %11994 = vmatpush1.bf16.msra.mxu1 %v23071_v47  ;;  %v23149_v40 = vld [vmem:[%s31182_s7 + $0x448] ss:$16 sps:$4 sm:$0xff]   ;;  %v23154_v47 = vld [vmem:[%s31182_s7 + $0x464] ss:$16 sps:$4 sm:$0xff]  }
 0x9f9   : > { %11954 = vmatprep.subr.bf16.mxu0 %v23076_v48  ;;  %11995 = vmatprep.subr.bf16.mxu1 %v23079_v7  ;;  %v23157_v48 = vld [vmem:[%s31182_s7 + $0x46c] ss:$16 sps:$4 sm:$0xff]   ;;  %v23152_v7 = vld [vmem:[%s31182_s7 + $0x460] ss:$16 sps:$4 sm:$0xff]  }
 0x9fc   : > { %11955 = vmatpush1.bf16.msra.mxu0 %v23074_v9  ;;  %11996 = vmatpush1.bf16.msra.mxu1 %v23077_v33  ;;  %v23155_v9 = vld [vmem:[%s31182_s7 + $0x468] ss:$16 sps:$4 sm:$0xff]   ;;  %v23160_v33 = vld [vmem:[%s31182_s7 + $0x484] ss:$16 sps:$4 sm:$0xff]  }
 0x9fd   : > { %11956 = vmatprep.subr.bf16.mxu0 %v23082_v58  ;;  %11997 = vmatprep.subr.bf16.mxu1 %v23085_v12  ;;  %v23163_v58 = vld [vmem:[%s31182_s7 + $0x48c] ss:$16 sps:$4 sm:$0xff]   ;;  %v23158_v12 = vld [vmem:[%s31182_s7 + $0x480] ss:$16 sps:$4 sm:$0xff]  }
 0xa00   : > { %11957 = vmatpush1.bf16.msra.mxu0 %v23080_v10  ;;  %11998 = vmatpush1.bf16.msra.mxu1 %v23083_v43  ;;  %v23161_v10 = vld [vmem:[%s31182_s7 + $0x488] ss:$16 sps:$4 sm:$0xff]   ;;  %v23166_v43 = vld [vmem:[%s31182_s7 + $0x4a4] ss:$16 sps:$4 sm:$0xff]  }
 0xa01   : > { %11958 = vmatprep.subr.bf16.mxu0 %v23088_v4  ;;  %11999 = vmatprep.subr.bf16.mxu1 %v23091_v13  ;;  %v23169_v4 = vld [vmem:[%s31182_s7 + $0x4ac] ss:$16 sps:$4 sm:$0xff]   ;;  %v23164_v13 = vld [vmem:[%s31182_s7 + $0x4a0] ss:$16 sps:$4 sm:$0xff]  }
 0xa04   : > { %11959 = vmatpush1.bf16.msra.mxu0 %v23086_v41  ;;  %12000 = vmatpush1.bf16.msra.mxu1 %v23089_v2  ;;  %v23167_v41 = vld [vmem:[%s31182_s7 + $0x4a8] ss:$16 sps:$4 sm:$0xff]   ;;  %v23172_v2 = vld [vmem:[%s31182_s7 + $0x4c4] ss:$16 sps:$4 sm:$0xff]  }
 0xa05   : > { %11960 = vmatprep.subr.bf16.mxu0 %v23094_v54  ;;  %12001 = vmatprep.subr.bf16.mxu1 %v23097_v57  ;;  %v23175_v54 = vld [vmem:[%s31182_s7 + $0x4cc] ss:$16 sps:$4 sm:$0xff]   ;;  %v23170_v57 = vld [vmem:[%s31182_s7 + $0x4c0] ss:$16 sps:$4 sm:$0xff]  }
 0xa08   : > { %11961 = vmatpush1.bf16.msra.mxu0 %v23092_v55  ;;  %12002 = vmatpush1.bf16.msra.mxu1 %v23095_v46  ;;  %v23173_v55 = vld [vmem:[%s31182_s7 + $0x4c8] ss:$16 sps:$4 sm:$0xff]   ;;  %v23178_v46 = vld [vmem:[%s31182_s7 + $0x4e4] ss:$16 sps:$4 sm:$0xff]  }
 0xa09   : > { %11962 = vmatprep.subr.bf16.mxu0 %v23100_v1  ;;  %12003 = vmatprep.subr.bf16.mxu1 %v23103_v56  ;;  %v23181_v1 = vld [vmem:[%s31182_s7 + $0x4ec] ss:$16 sps:$4 sm:$0xff]   ;;  %v23176_v56 = vld [vmem:[%s31182_s7 + $0x4e0] ss:$16 sps:$4 sm:$0xff]  }
 0xa0c   : > { %11963 = vmatpush1.bf16.msra.mxu0 %v23098_v32  ;;  %12004 = vmatpush1.bf16.msra.mxu1 %v23101_v23  ;;  %v23179_v32 = vld [vmem:[%s31182_s7 + $0x4e8] ss:$16 sps:$4 sm:$0xff]   ;;  %v23184_v23 = vld [vmem:[%s31182_s7 + $0x504] ss:$16 sps:$4 sm:$0xff]  }
 0xa0d   : > { %11964 = vmatprep.subr.bf16.mxu0 %v23106_v24  ;;  %12005 = vmatprep.subr.bf16.mxu1 %v23109_v61  ;;  %v23187_v24 = vld [vmem:[%s31182_s7 + $0x50c] ss:$16 sps:$4 sm:$0xff]   ;;  %v23182_v61 = vld [vmem:[%s31182_s7 + $0x500] ss:$16 sps:$4 sm:$0xff]  }
 0xa10   : > { %11965 = vmatpush1.bf16.msra.mxu0 %v23104_v16  ;;  %12006 = vmatpush1.bf16.msra.mxu1 %v23107_v15  ;;  %v23185_v16 = vld [vmem:[%s31182_s7 + $0x508] ss:$16 sps:$4 sm:$0xff]   ;;  %v23190_v15 = vld [vmem:[%s31182_s7 + $0x524] ss:$16 sps:$4 sm:$0xff]  }
 0xa11   : > { %11966 = vmatprep.subr.bf16.mxu0 %v23112_v20  ;;  %12007 = vmatprep.subr.bf16.mxu1 %v23115_v21  ;;  %v23193_v20 = vld [vmem:[%s31182_s7 + $0x52c] ss:$16 sps:$4 sm:$0xff]   ;;  %v23188_v21 = vld [vmem:[%s31182_s7 + $0x520] ss:$16 sps:$4 sm:$0xff]  }
 0xa14   : > { %11967 = vmatpush1.bf16.msra.mxu0 %v23110_v5  ;;  %12008 = vmatpush1.bf16.msra.mxu1 %v23113_v29  ;;  %v23191_v5 = vld [vmem:[%s31182_s7 + $0x528] ss:$16 sps:$4 sm:$0xff]   ;;  %v23196_v29 = vld [vmem:[%s31182_s7 + $0x544] ss:$16 sps:$4 sm:$0xff]  }
 0xa15   : > { %11968 = vmatprep.subr.bf16.mxu0 %v23118_v60  ;;  %12009 = vmatprep.subr.bf16.mxu1 %v23121_v30  ;;  %v23199_v60 = vld [vmem:[%s31182_s7 + $0x54c] ss:$16 sps:$4 sm:$0xff]   ;;  %v23194_v30 = vld [vmem:[%s31182_s7 + $0x540] ss:$16 sps:$4 sm:$0xff]  }
 0xa18   : > { %11969 = vmatpush1.bf16.msra.mxu0 %v23116_v50  ;;  %12010 = vmatpush1.bf16.msra.mxu1 %v23119_v63  ;;  %v23197_v50 = vld [vmem:[%s31182_s7 + $0x548] ss:$16 sps:$4 sm:$0xff]   ;;  %v23202_v63 = vld [vmem:[%s31182_s7 + $0x564] ss:$16 sps:$4 sm:$0xff]  }
 0xa19   : > { %11970 = vmatprep.subr.bf16.mxu0 %v23124_v22  ;;  %12011 = vmatprep.subr.bf16.mxu1 %v23127_v39  ;;  %v23205_v22 = vld [vmem:[%s31182_s7 + $0x56c] ss:$16 sps:$4 sm:$0xff]   ;;  %v23200_v39 = vld [vmem:[%s31182_s7 + $0x560] ss:$16 sps:$4 sm:$0xff]  }
 0xa1c   : > { %11971 = vmatpush1.bf16.msra.mxu0 %v23122_v6  ;;  %12012 = vmatpush1.bf16.msra.mxu1 %v23125_v28  ;;  %v23203_v6 = vld [vmem:[%s31182_s7 + $0x568] ss:$16 sps:$4 sm:$0xff]   ;;  %v23208_v28 = vld [vmem:[%s31182_s7 + $0x584] ss:$16 sps:$4 sm:$0xff]  }
 0xa1d   : > { %11972 = vmatprep.subr.bf16.mxu0 %v23130_v17  ;;  %12013 = vmatprep.subr.bf16.mxu1 %v23133_v25  ;;  %v23211_v17 = vld [vmem:[%s31182_s7 + $0x58c] ss:$16 sps:$4 sm:$0xff]   ;;  %v23206_v25 = vld [vmem:[%s31182_s7 + $0x580] ss:$16 sps:$4 sm:$0xff]  }
 0xa20   : > { %11973 = vmatpush1.bf16.msra.mxu0 %v23128_v51  ;;  %12014 = vmatpush1.bf16.msra.mxu1 %v23131_v26  ;;  %v23209_v51 = vld [vmem:[%s31182_s7 + $0x588] ss:$16 sps:$4 sm:$0xff]   ;;  %v23214_v26 = vld [vmem:[%s31182_s7 + $0x5a4] ss:$16 sps:$4 sm:$0xff]  }
 0xa21   : > { %12409 = vmatprep.subr.bf16.mxu0 %v23136_v38  ;;  %12450 = vmatprep.subr.bf16.mxu1 %v23139_v42  ;;  %v23217_v38 = vld [vmem:[%s31182_s7 + $0x5ac] ss:$16 sps:$4 sm:$0xff]   ;;  %v23212_v42 = vld [vmem:[%s31182_s7 + $0x5a0] ss:$16 sps:$4 sm:$0xff]  }
 0xa23   : > { %11975 = vmatmul.mubr.bf16.vlgmr.msra.gmra.mrb[80].mxu0 %v24126_v53  ;;  %12016 = vmatmul.mubr.bf16.vlgmr.msra.gmra.mrb[84].mxu1 %v24126_v53 }
 0xa24   : > { %12410 = vmatpush1.bf16.msra.mxu0 %v23134_v44  ;;  %12451 = vmatpush1.bf16.msra.mxu1 %v23137_v49  ;;  %v23215_v44 = vld [vmem:[%s31182_s7 + $0x5a8] ss:$16 sps:$4 sm:$0xff]   ;;  %v23220_v49 = vld [vmem:[%s31182_s7 + $0x5c4] ss:$16 sps:$4 sm:$0xff]  }
 0xa25   : > { %12411 = vmatprep.subr.bf16.mxu0 %v23142_v11  ;;  %12452 = vmatprep.subr.bf16.mxu1 %v23145_v45  ;;  %v23223_v11 = vld [vmem:[%s31182_s7 + $0x5cc] ss:$16 sps:$4 sm:$0xff]   ;;  %v23218_v45 = vld [vmem:[%s31182_s7 + $0x5c0] ss:$16 sps:$4 sm:$0xff]  }
 0xa26   : > { %12441 = vmatprep.mubr.bf16.mxu0 %v24126_v53  ;;  %12482 = vmatprep.mubr.bf16.mxu1 %v24126_v53 }
 0xa28   : > { %12412 = vmatpush1.bf16.msra.mxu0 %v23140_v19  ;;  %12453 = vmatpush1.bf16.msra.mxu1 %v23143_v62  ;;  %v23221_v19 = vld [vmem:[%s31182_s7 + $0x5c8] ss:$16 sps:$4 sm:$0xff]   ;;  %v23226_v62 = vld [vmem:[%s31182_s7 + $0x5e4] ss:$16 sps:$4 sm:$0xff]  }
 0xa29   : > { %12413 = vmatprep.subr.bf16.mxu0 %v23148_v52  ;;  %12454 = vmatprep.subr.bf16.mxu1 %v23151_v14  ;;  %v23229_v52 = vld [vmem:[%s31182_s7 + $0x5ec] ss:$16 sps:$4 sm:$0xff]   ;;  %v23224_v14 = vld [vmem:[%s31182_s7 + $0x5e0] ss:$16 sps:$4 sm:$0xff]  }
 0xa2c   : > { %12414 = vmatpush1.bf16.msra.mxu0 %v23146_v8  ;;  %12455 = vmatpush1.bf16.msra.mxu1 %v23149_v40  ;;  %v23227_v8 = vld [vmem:[%s31182_s7 + $0x5e8] ss:$16 sps:$4 sm:$0xff]   ;;  %v23232_v40 = vld [vmem:[%s31182_s7 + $0x604] ss:$16 sps:$4 sm:$0xff]  }
 0xa2d   : > { %12415 = vmatprep.subr.bf16.mxu0 %v23154_v47  ;;  %12456 = vmatprep.subr.bf16.mxu1 %v23157_v48  ;;  %v23235_v47 = vld [vmem:[%s31182_s7 + $0x60c] ss:$16 sps:$4 sm:$0xff]   ;;  %v23230_v48 = vld [vmem:[%s31182_s7 + $0x600] ss:$16 sps:$4 sm:$0xff]  }
 0xa30   : > { %12416 = vmatpush1.bf16.msra.mxu0 %v23152_v7  ;;  %12457 = vmatpush1.bf16.msra.mxu1 %v23155_v9  ;;  %v23233_v7 = vld [vmem:[%s31182_s7 + $0x608] ss:$16 sps:$4 sm:$0xff]   ;;  %v29225_v9 = vpack.c.bf16 %v28806_v18, %v28806_v18 }
 0xa31   : > { %12417 = vmatprep.subr.bf16.mxu0 %v23160_v33  ;;  %12458 = vmatprep.subr.bf16.mxu1 %v23163_v58  ;;  %v23238_v33 = vld [vmem:[%s31182_s7 + $0x624] ss:$16 sps:$4 sm:$0xff]   ;;  %v23241_v58 = vld [vmem:[%s31182_s7 + $0x62c] ss:$16 sps:$4 sm:$0xff]  }
 0xa34   : > { %12418 = vmatpush1.bf16.msra.mxu0 %v23158_v12  ;;  %12459 = vmatpush1.bf16.msra.mxu1 %v23161_v10  ;;  %v23236_v12 = vld [vmem:[%s31182_s7 + $0x620] ss:$16 sps:$4 sm:$0xff]   ;;  %v23239_v10 = vld [vmem:[%s31182_s7 + $0x628] ss:$16 sps:$4 sm:$0xff]  }
 0xa35   : > { %12419 = vmatprep.subr.bf16.mxu0 %v23166_v43  ;;  %12460 = vmatprep.subr.bf16.mxu1 %v23169_v4  ;;  %v23244_v43 = vld [vmem:[%s31182_s7 + $0x644] ss:$16 sps:$4 sm:$0xff]   ;;  %v23245_v4 = vld [vmem:[%s31182_s7 + $0x648] ss:$16 sps:$4 sm:$0xff]  }
 0xa38   : > { %12420 = vmatpush1.bf16.msra.mxu0 %v23164_v13  ;;  %12461 = vmatpush1.bf16.msra.mxu1 %v23167_v41  ;;  %v23250_v13 = vld [vmem:[%s31182_s7 + $0x664] ss:$16 sps:$4 sm:$0xff]   ;;  %v23253_v41 = vld [vmem:[%s31182_s7 + $0x66c] ss:$16 sps:$4 sm:$0xff]  }
 0xa39   : > { %12421 = vmatprep.subr.bf16.mxu0 %v23172_v2  ;;  %12462 = vmatprep.subr.bf16.mxu1 %v23175_v54  ;;  %v23248_v2 = vld [vmem:[%s31182_s7 + $0x660] ss:$16 sps:$4 sm:$0xff]   ;;  %v23251_v54 = vld [vmem:[%s31182_s7 + $0x668] ss:$16 sps:$4 sm:$0xff]  }
 0xa3c   : > { %12422 = vmatpush1.bf16.msra.mxu0 %v23170_v57  ;;  %12463 = vmatpush1.bf16.msra.mxu1 %v23173_v55  ;;  %v23256_v57 = vld [vmem:[%s31182_s7 + $0x684] ss:$16 sps:$4 sm:$0xff]   ;;  %v23259_v55 = vld [vmem:[%s31182_s7 + $0x68c] ss:$16 sps:$4 sm:$0xff]  }
 0xa3d   : > { %12423 = vmatprep.subr.bf16.mxu0 %v23178_v46  ;;  %12464 = vmatprep.subr.bf16.mxu1 %v23181_v1  ;;  %v23254_v46 = vld [vmem:[%s31182_s7 + $0x680] ss:$16 sps:$4 sm:$0xff]   ;;  %v23257_v1 = vld [vmem:[%s31182_s7 + $0x688] ss:$16 sps:$4 sm:$0xff]  }
 0xa40   : > { %12424 = vmatpush1.bf16.msra.mxu0 %v23176_v56  ;;  %12465 = vmatpush1.bf16.msra.mxu1 %v23179_v32  ;;  %v23262_v56 = vld [vmem:[%s31182_s7 + $0x6a4] ss:$16 sps:$4 sm:$0xff]   ;;  %v23265_v32 = vld [vmem:[%s31182_s7 + $0x6ac] ss:$16 sps:$4 sm:$0xff]  }
 0xa41   : > { %12425 = vmatprep.subr.bf16.mxu0 %v23184_v23  ;;  %12466 = vmatprep.subr.bf16.mxu1 %v23187_v24  ;;  %v23260_v23 = vld [vmem:[%s31182_s7 + $0x6a0] ss:$16 sps:$4 sm:$0xff]   ;;  %v23263_v24 = vld [vmem:[%s31182_s7 + $0x6a8] ss:$16 sps:$4 sm:$0xff]  }
 0xa44   : > { %12426 = vmatpush1.bf16.msra.mxu0 %v23182_v61  ;;  %12467 = vmatpush1.bf16.msra.mxu1 %v23185_v16  ;;  %v23268_v61 = vld [vmem:[%s31182_s7 + $0x6c4] ss:$16 sps:$4 sm:$0xff]   ;;  %v23271_v16 = vld [vmem:[%s31182_s7 + $0x6cc] ss:$16 sps:$4 sm:$0xff]  }
 0xa45   : > { %12427 = vmatprep.subr.bf16.mxu0 %v23190_v15  ;;  %12468 = vmatprep.subr.bf16.mxu1 %v23193_v20  ;;  %v23266_v15 = vld [vmem:[%s31182_s7 + $0x6c0] ss:$16 sps:$4 sm:$0xff]   ;;  %v23269_v20 = vld [vmem:[%s31182_s7 + $0x6c8] ss:$16 sps:$4 sm:$0xff]  }
 0xa48   : > { %12428 = vmatpush1.bf16.msra.mxu0 %v23188_v21  ;;  %12469 = vmatpush1.bf16.msra.mxu1 %v23191_v5  ;;  %v23274_v21 = vld [vmem:[%s31182_s7 + $0x6e4] ss:$16 sps:$4 sm:$0xff]   ;;  %v23277_v5 = vld [vmem:[%s31182_s7 + $0x6ec] ss:$16 sps:$4 sm:$0xff]  }
 0xa49   : > { %12429 = vmatprep.subr.bf16.mxu0 %v23196_v29  ;;  %12470 = vmatprep.subr.bf16.mxu1 %v23199_v60  ;;  %v23272_v29 = vld [vmem:[%s31182_s7 + $0x6e0] ss:$16 sps:$4 sm:$0xff]   ;;  %v23275_v60 = vld [vmem:[%s31182_s7 + $0x6e8] ss:$16 sps:$4 sm:$0xff]  }
 0xa4c   : > { %12430 = vmatpush1.bf16.msra.mxu0 %v23194_v30  ;;  %12471 = vmatpush1.bf16.msra.mxu1 %v23197_v50  ;;  %v23280_v30 = vld [vmem:[%s31182_s7 + $0x704] ss:$16 sps:$4 sm:$0xff]   ;;  %v23283_v50 = vld [vmem:[%s31182_s7 + $0x70c] ss:$16 sps:$4 sm:$0xff]  }
 0xa4d   : > { %12431 = vmatprep.subr.bf16.mxu0 %v23202_v63  ;;  %12472 = vmatprep.subr.bf16.mxu1 %v23205_v22  ;;  %v23278_v63 = vld [vmem:[%s31182_s7 + $0x700] ss:$16 sps:$4 sm:$0xff]   ;;  %v23281_v22 = vld [vmem:[%s31182_s7 + $0x708] ss:$16 sps:$4 sm:$0xff]  }
 0xa50   : > { %12432 = vmatpush1.bf16.msra.mxu0 %v23200_v39  ;;  %12473 = vmatpush1.bf16.msra.mxu1 %v23203_v6  ;;  %v23286_v39 = vld [vmem:[%s31182_s7 + $0x724] ss:$16 sps:$4 sm:$0xff]   ;;  %v23289_v6 = vld [vmem:[%s31182_s7 + $0x72c] ss:$16 sps:$4 sm:$0xff]  }
 0xa51   : > { %12433 = vmatprep.subr.bf16.mxu0 %v23208_v28  ;;  %12474 = vmatprep.subr.bf16.mxu1 %v23211_v17  ;;  %v23284_v28 = vld [vmem:[%s31182_s7 + $0x720] ss:$16 sps:$4 sm:$0xff]   ;;  %v23287_v17 = vld [vmem:[%s31182_s7 + $0x728] ss:$16 sps:$4 sm:$0xff]  }
 0xa54   : > { %12434 = vmatpush1.bf16.msra.mxu0 %v23206_v25  ;;  %12475 = vmatpush1.bf16.msra.mxu1 %v23209_v51  ;;  %v23292_v25 = vld [vmem:[%s31182_s7 + $0x744] ss:$16 sps:$4 sm:$0xff]   ;;  %v23295_v51 = vld [vmem:[%s31182_s7 + $0x74c] ss:$16 sps:$4 sm:$0xff]  }
 0xa55   : > { %12435 = vmatprep.subr.bf16.mxu0 %v23214_v26  ;;  %12476 = vmatprep.subr.bf16.mxu1 %v23217_v38  ;;  %v23290_v26 = vld [vmem:[%s31182_s7 + $0x740] ss:$16 sps:$4 sm:$0xff]   ;;  %v23293_v38 = vld [vmem:[%s31182_s7 + $0x748] ss:$16 sps:$4 sm:$0xff]  }
 0xa58   : > { %12436 = vmatpush1.bf16.msra.mxu0 %v23212_v42  ;;  %12477 = vmatpush1.bf16.msra.mxu1 %v23215_v44  ;;  %v23298_v42 = vld [vmem:[%s31182_s7 + $0x764] ss:$16 sps:$4 sm:$0xff]   ;;  %v23301_v44 = vld [vmem:[%s31182_s7 + $0x76c] ss:$16 sps:$4 sm:$0xff]  }
 0xa59   : > { %12437 = vmatprep.subr.bf16.mxu0 %v23220_v49  ;;  %12478 = vmatprep.subr.bf16.mxu1 %v23223_v11  ;;  %v23296_v49 = vld [vmem:[%s31182_s7 + $0x760] ss:$16 sps:$4 sm:$0xff]   ;;  %v23299_v11 = vld [vmem:[%s31182_s7 + $0x768] ss:$16 sps:$4 sm:$0xff]  }
 0xa5c   : > { %12438 = vmatpush1.bf16.msra.mxu0 %v23218_v45  ;;  %12479 = vmatpush1.bf16.msra.mxu1 %v23221_v19  ;;  %v23304_v45 = vld [vmem:[%s31182_s7 + $0x784] ss:$16 sps:$4 sm:$0xff]   ;;  %v23307_v19 = vld [vmem:[%s31182_s7 + $0x78c] ss:$16 sps:$4 sm:$0xff]  }
 0xa5d   : > { %12439 = vmatprep.subr.bf16.mxu0 %v23226_v62  ;;  %12480 = vmatprep.subr.bf16.mxu1 %v23229_v52  ;;  %v23302_v62 = vld [vmem:[%s31182_s7 + $0x780] ss:$16 sps:$4 sm:$0xff]   ;;  %v23305_v52 = vld [vmem:[%s31182_s7 + $0x788] ss:$16 sps:$4 sm:$0xff]  }
 0xa60   : > { %12440 = vmatpush1.bf16.msra.mxu0 %v23224_v14  ;;  %12481 = vmatpush1.bf16.msra.mxu1 %v23227_v8  ;;  %v23310_v14 = vld [vmem:[%s31182_s7 + $0x7a4] ss:$16 sps:$4 sm:$0xff]   ;;  %v23313_v8 = vld [vmem:[%s31182_s7 + $0x7ac] ss:$16 sps:$4 sm:$0xff]  }
 0xa61   : > { %12881 = vmatprep.subr.bf16.mxu0 %v23232_v40  ;;  %12922 = vmatprep.subr.bf16.mxu1 %v23235_v47  ;;  %v23308_v40 = vld [vmem:[%s31182_s7 + $0x7a0] ss:$16 sps:$4 sm:$0xff]   ;;  %v23311_v47 = vld [vmem:[%s31182_s7 + $0x7a8] ss:$16 sps:$4 sm:$0xff]  }
 0xa63   : > { %19914 = vmatmul.mubr.msk.bf16.vlgmr.msra.gmra.mrb[84].mxu0 %vm24903_vm14, %v28813_v0  ;;  %19919 = vmatmul.mubr.msk.bf16.vlgmr.msra.gmra.mrb[88].mxu1 %vm24903_vm14, %v28813_v0  ;;  %v23242_v0 = vld [vmem:[%s31182_s7 + $0x640] ss:$16 sps:$4 sm:$0xff]  }
 0xa64   : > { %12882 = vmatpush1.bf16.msra.mxu0 %v23230_v48  ;;  %12913 = vmatprep.mubr.bf16.mxu0 %v29225_v9  ;;  %v23316_v48 = vld [vmem:[%s31182_s7 + $0x7c4] ss:$16 sps:$4 sm:$0xff]  }
 0xa65   : > { %12923 = vmatpush1.bf16.msra.mxu1 %v23233_v7  ;;  %12954 = vmatprep.mubr.bf16.mxu1 %v29225_v9  ;;  %v23319_v7 = vld [vmem:[%s31182_s7 + $0x7cc] ss:$16 sps:$4 sm:$0xff]  }
 0xa66   : > { %12883 = vmatprep.subr.bf16.mxu0 %v23238_v33  ;;  %12924 = vmatprep.subr.bf16.mxu1 %v23241_v58  ;;  %v23314_v33 = vld [vmem:[%s31182_s7 + $0x7c0] ss:$16 sps:$4 sm:$0xff]   ;;  %v23317_v58 = vld [vmem:[%s31182_s7 + $0x7c8] ss:$16 sps:$4 sm:$0xff]  }
 0xa68   : > { %12884 = vmatpush1.bf16.msra.mxu0 %v23236_v12  ;;  %v23322_v12 = vld [vmem:[%s31182_s7 + $0x7e4] ss:$16 sps:$4 sm:$0xff]  }
 0xa69   : > { %12925 = vmatpush1.bf16.msra.mxu1 %v23239_v10  ;;  %12885 = vmatprep.subr.bf16.mxu0 %v23244_v43  ;;  %v23325_v10 = vld [vmem:[%s31182_s7 + $0x7ec] ss:$16 sps:$4 sm:$0xff]   ;;  %v23320_v43 = vld [vmem:[%s31182_s7 + $0x7e0] ss:$16 sps:$4 sm:$0xff]  }
 0xa6a   : > { %12926 = vmatprep.subr.bf16.mxu1 %v23247_v3  ;;  %v23323_v3 = vld [vmem:[%s31182_s7 + $0x7e8] ss:$16 sps:$4 sm:$0xff]  }
 0xa6c   : > { %12886 = vmatpush1.bf16.msra.mxu0 %v23242_v0  ;;  %v23328_v0 = vld [vmem:[%s31182_s7 + $0x804] ss:$16 sps:$4 sm:$0xff]  }
 0xa6d   : > { %12927 = vmatpush1.bf16.msra.mxu1 %v23245_v4  ;;  %12887 = vmatprep.subr.bf16.mxu0 %v23250_v13  ;;  %v23331_v4 = vld [vmem:[%s31182_s7 + $0x80c] ss:$16 sps:$4 sm:$0xff]   ;;  %v23326_v13 = vld [vmem:[%s31182_s7 + $0x800] ss:$16 sps:$4 sm:$0xff]  }
 0xa6e   : > { %12928 = vmatprep.subr.bf16.mxu1 %v23253_v41  ;;  %v23329_v41 = vld [vmem:[%s31182_s7 + $0x808] ss:$16 sps:$4 sm:$0xff]  }
 0xa70   : > { %12888 = vmatpush1.bf16.msra.mxu0 %v23248_v2  ;;  %v23334_v2 = vld [vmem:[%s31182_s7 + $0x824] ss:$16 sps:$4 sm:$0xff]  }
 0xa71   : > { %12929 = vmatpush1.bf16.msra.mxu1 %v23251_v54  ;;  %12889 = vmatprep.subr.bf16.mxu0 %v23256_v57  ;;  %v29433_v54 = vpack.c.bf16 %v28809_v59, %v28809_v59  ;;  %v23337_v57 = vld [vmem:[%s31182_s7 + $0x82c] ss:$16 sps:$4 sm:$0xff]  }
 0xa72   : > { %12930 = vmatprep.subr.bf16.mxu1 %v23259_v55  ;;  %v23332_v55 = vld [vmem:[%s31182_s7 + $0x820] ss:$16 sps:$4 sm:$0xff]  }
 0xa74   : > { %12890 = vmatpush1.bf16.msra.mxu0 %v23254_v46  ;;  %v23335_v46 = vld [vmem:[%s31182_s7 + $0x828] ss:$16 sps:$4 sm:$0xff]  }
 0xa75   : > { %12931 = vmatpush1.bf16.msra.mxu1 %v23257_v1  ;;  %12891 = vmatprep.subr.bf16.mxu0 %v23262_v56  ;;  %v23340_v1 = vld [vmem:[%s31182_s7 + $0x844] ss:$16 sps:$4 sm:$0xff]   ;;  %v23343_v56 = vld [vmem:[%s31182_s7 + $0x84c] ss:$16 sps:$4 sm:$0xff]  }
 0xa76   : > { %12932 = vmatprep.subr.bf16.mxu1 %v23265_v32  ;;  %v23338_v32 = vld [vmem:[%s31182_s7 + $0x840] ss:$16 sps:$4 sm:$0xff]  }
 0xa78   : > { %12892 = vmatpush1.bf16.msra.mxu0 %v23260_v23  ;;  %v23341_v23 = vld [vmem:[%s31182_s7 + $0x848] ss:$16 sps:$4 sm:$0xff]  }
 0xa79   : > { %12933 = vmatpush1.bf16.msra.mxu1 %v23263_v24  ;;  %12893 = vmatprep.subr.bf16.mxu0 %v23268_v61  ;;  %v23346_v24 = vld [vmem:[%s31182_s7 + $0x864] ss:$16 sps:$4 sm:$0xff]   ;;  %v23349_v61 = vld [vmem:[%s31182_s7 + $0x86c] ss:$16 sps:$4 sm:$0xff]  }
 0xa7a   : > { %12934 = vmatprep.subr.bf16.mxu1 %v23271_v16  ;;  %v23344_v16 = vld [vmem:[%s31182_s7 + $0x860] ss:$16 sps:$4 sm:$0xff]  }
 0xa7c   : > { %12894 = vmatpush1.bf16.msra.mxu0 %v23266_v15  ;;  %v23347_v15 = vld [vmem:[%s31182_s7 + $0x868] ss:$16 sps:$4 sm:$0xff]  }
 0xa7d   : > { %12935 = vmatpush1.bf16.msra.mxu1 %v23269_v20  ;;  %12895 = vmatprep.subr.bf16.mxu0 %v23274_v21  ;;  %v23352_v20 = vld [vmem:[%s31182_s7 + $0x884] ss:$16 sps:$4 sm:$0xff]   ;;  %v23355_v21 = vld [vmem:[%s31182_s7 + $0x88c] ss:$16 sps:$4 sm:$0xff]  }
 0xa7e   : > { %12936 = vmatprep.subr.bf16.mxu1 %v23277_v5  ;;  %v23350_v5 = vld [vmem:[%s31182_s7 + $0x880] ss:$16 sps:$4 sm:$0xff]  }
 0xa80   : > { %12896 = vmatpush1.bf16.msra.mxu0 %v23272_v29  ;;  %v23353_v29 = vld [vmem:[%s31182_s7 + $0x888] ss:$16 sps:$4 sm:$0xff]  }
 0xa81   : > { %12937 = vmatpush1.bf16.msra.mxu1 %v23275_v60  ;;  %12897 = vmatprep.subr.bf16.mxu0 %v23280_v30  ;;  %v23358_v60 = vld [vmem:[%s31182_s7 + $0x8a4] ss:$16 sps:$4 sm:$0xff]   ;;  %v23361_v30 = vld [vmem:[%s31182_s7 + $0x8ac] ss:$16 sps:$4 sm:$0xff]  }
 0xa82   : > { %12938 = vmatprep.subr.bf16.mxu1 %v23283_v50  ;;  %v23356_v50 = vld [vmem:[%s31182_s7 + $0x8a0] ss:$16 sps:$4 sm:$0xff]  }
 0xa84   : > { %12898 = vmatpush1.bf16.msra.mxu0 %v23278_v63  ;;  %v23359_v63 = vld [vmem:[%s31182_s7 + $0x8a8] ss:$16 sps:$4 sm:$0xff]  }
 0xa85   : > { %12939 = vmatpush1.bf16.msra.mxu1 %v23281_v22  ;;  %12899 = vmatprep.subr.bf16.mxu0 %v23286_v39  ;;  %v23364_v22 = vld [vmem:[%s31182_s7 + $0x8c4] ss:$16 sps:$4 sm:$0xff]  }
 0xa86   : > { %12940 = vmatprep.subr.bf16.mxu1 %v23289_v6 }
 0xa88   : > { %12900 = vmatpush1.bf16.msra.mxu0 %v23284_v28  ;;  %v23367_v28 = vld [vmem:[%s31182_s7 + $0x8cc] ss:$16 sps:$4 sm:$0xff]  }
 0xa89   : > { %12941 = vmatpush1.bf16.msra.mxu1 %v23287_v17  ;;  %12901 = vmatprep.subr.bf16.mxu0 %v23292_v25 }
 0xa8a   : > { %12942 = vmatprep.subr.bf16.mxu1 %v23295_v51 }
 0xa8c   : > { %12902 = vmatpush1.bf16.msra.mxu0 %v23290_v26 }
 0xa8d   : > { %12943 = vmatpush1.bf16.msra.mxu1 %v23293_v38  ;;  %12903 = vmatprep.subr.bf16.mxu0 %v23298_v42  ;;  %v23362_v38 = vld [vmem:[%s31182_s7 + $0x8c0] ss:$16 sps:$4 sm:$0xff]  }
 0xa8e   : > { %12944 = vmatprep.subr.bf16.mxu1 %v23301_v44 }
 0xa90   : > { %12904 = vmatpush1.bf16.msra.mxu0 %v23296_v49  ;;  %v23365_v49 = vld [vmem:[%s31182_s7 + $0x8c8] ss:$16 sps:$4 sm:$0xff]  }
 0xa91   : > { %12945 = vmatpush1.bf16.msra.mxu1 %v23299_v11  ;;  %12905 = vmatprep.subr.bf16.mxu0 %v23304_v45  ;;  %v23370_v11 = vld [vmem:[%s31182_s7 + $0x8e4] ss:$16 sps:$4 sm:$0xff]   ;;  %v23373_v45 = vld [vmem:[%s31182_s7 + $0x8ec] ss:$16 sps:$4 sm:$0xff]  }
 0xa92   : > { %12946 = vmatprep.subr.bf16.mxu1 %v23307_v19  ;;  %v23368_v19 = vld [vmem:[%s31182_s7 + $0x8e0] ss:$16 sps:$4 sm:$0xff]  }
 0xa94   : > { %12906 = vmatpush1.bf16.msra.mxu0 %v23302_v62  ;;  %v23371_v62 = vld [vmem:[%s31182_s7 + $0x8e8] ss:$16 sps:$4 sm:$0xff]  }
 0xa95   : > { %12947 = vmatpush1.bf16.msra.mxu1 %v23305_v52  ;;  %12907 = vmatprep.subr.bf16.mxu0 %v23310_v14  ;;  %v23376_v52 = vld [vmem:[%s31182_s7 + $0x904] ss:$16 sps:$4 sm:$0xff]   ;;  %v23379_v14 = vld [vmem:[%s31182_s7 + $0x90c] ss:$16 sps:$4 sm:$0xff]  }
 0xa96   : > { %12948 = vmatprep.subr.bf16.mxu1 %v23313_v8  ;;  %v23374_v8 = vld [vmem:[%s31182_s7 + $0x900] ss:$16 sps:$4 sm:$0xff]  }
 0xa98   : > { %12908 = vmatpush1.bf16.msra.mxu0 %v23308_v40  ;;  %v23377_v40 = vld [vmem:[%s31182_s7 + $0x908] ss:$16 sps:$4 sm:$0xff]  }
 0xa99   : > { %12949 = vmatpush1.bf16.msra.mxu1 %v23311_v47  ;;  %12909 = vmatprep.subr.bf16.mxu0 %v23316_v48  ;;  %v23382_v47 = vld [vmem:[%s31182_s7 + $0x924] ss:$16 sps:$4 sm:$0xff]   ;;  %v23385_v48 = vld [vmem:[%s31182_s7 + $0x92c] ss:$16 sps:$4 sm:$0xff]  }
 0xa9a   : > { %12950 = vmatprep.subr.bf16.mxu1 %v23319_v7  ;;  %v23380_v7 = vld [vmem:[%s31182_s7 + $0x920] ss:$16 sps:$4 sm:$0xff]  }
 0xa9c   : > { %12910 = vmatpush1.bf16.msra.mxu0 %v23314_v33  ;;  %v23383_v33 = vld [vmem:[%s31182_s7 + $0x928] ss:$16 sps:$4 sm:$0xff]  }
 0xa9d   : > { %12951 = vmatpush1.bf16.msra.mxu1 %v23317_v58  ;;  %12911 = vmatprep.subr.bf16.mxu0 %v23322_v12  ;;  %v23388_v58 = vld [vmem:[%s31182_s7 + $0x944] ss:$16 sps:$4 sm:$0xff]   ;;  %v23391_v12 = vld [vmem:[%s31182_s7 + $0x94c] ss:$16 sps:$4 sm:$0xff]  }
 0xa9e   : > { %12952 = vmatprep.subr.bf16.mxu1 %v23325_v10  ;;  %v23386_v10 = vld [vmem:[%s31182_s7 + $0x940] ss:$16 sps:$4 sm:$0xff]  }
 0xaa0   : > { %12912 = vmatpush1.bf16.msra.mxu0 %v23320_v43  ;;  %v23389_v43 = vld [vmem:[%s31182_s7 + $0x948] ss:$16 sps:$4 sm:$0xff]  }
 0xaa1   : > { %12953 = vmatpush1.bf16.msra.mxu1 %v23323_v3  ;;  %13353 = vmatprep.subr.bf16.mxu0 %v23328_v0  ;;  %v23394_v3 = vld [vmem:[%s31182_s7 + $0x964] ss:$16 sps:$4 sm:$0xff]   ;;  %v23397_v0 = vld [vmem:[%s31182_s7 + $0x96c] ss:$16 sps:$4 sm:$0xff]  }
 0xaa2   : > { %13394 = vmatprep.subr.bf16.mxu1 %v23331_v4  ;;  %v23392_v4 = vld [vmem:[%s31182_s7 + $0x960] ss:$16 sps:$4 sm:$0xff]  }
 0xaa3   : > { %12914 = vmatmul.mubr.bf16.vlgmr.msra.gmra.mrb[88].mxu0 %v24126_v53 }
 0xaa4   : > { %12955 = vmatmul.mubr.bf16.vlgmr.msra.gmra.mrb[92].mxu1 %v24126_v53  ;;  %13354 = vmatpush1.bf16.msra.mxu0 %v23326_v13  ;;  %v23395_v13 = vld [vmem:[%s31182_s7 + $0x968] ss:$16 sps:$4 sm:$0xff]  }
 0xaa5   : > { %13385 = vmatprep.mubr.bf16.mxu0 %v29433_v54  ;;  %13395 = vmatpush1.bf16.msra.mxu1 %v23329_v41  ;;  %v23400_v41 = vld [vmem:[%s31182_s7 + $0x984] ss:$16 sps:$4 sm:$0xff]  }
 0xaa6   : > { %13426 = vmatprep.mubr.bf16.mxu1 %v29433_v54  ;;  %13355 = vmatprep.subr.bf16.mxu0 %v23334_v2  ;;  %v23403_v2 = vld [vmem:[%s31182_s7 + $0x98c] ss:$16 sps:$4 sm:$0xff]  }
 0xaa7   : > { %13396 = vmatprep.subr.bf16.mxu1 %v23337_v57  ;;  %v23398_v57 = vld [vmem:[%s31182_s7 + $0x980] ss:$16 sps:$4 sm:$0xff]  }
 0xaa8   : > { %13356 = vmatpush1.bf16.msra.mxu0 %v23332_v55  ;;  %v23401_v55 = vld [vmem:[%s31182_s7 + $0x988] ss:$16 sps:$4 sm:$0xff]  }
 0xaa9   : > { %13397 = vmatpush1.bf16.msra.mxu1 %v23335_v46  ;;  %13357 = vmatprep.subr.bf16.mxu0 %v23340_v1  ;;  %v23406_v46 = vld [vmem:[%s31182_s7 + $0x9a4] ss:$16 sps:$4 sm:$0xff]   ;;  %v23409_v1 = vld [vmem:[%s31182_s7 + $0x9ac] ss:$16 sps:$4 sm:$0xff]  }
 0xaaa   : > { %13398 = vmatprep.subr.bf16.mxu1 %v23343_v56  ;;  %v23404_v56 = vld [vmem:[%s31182_s7 + $0x9a0] ss:$16 sps:$4 sm:$0xff]  }
 0xaac   : > { %13358 = vmatpush1.bf16.msra.mxu0 %v23338_v32  ;;  %v23407_v32 = vld [vmem:[%s31182_s7 + $0x9a8] ss:$16 sps:$4 sm:$0xff]  }
 0xaad   : > { %13399 = vmatpush1.bf16.msra.mxu1 %v23341_v23  ;;  %13359 = vmatprep.subr.bf16.mxu0 %v23346_v24  ;;  %v23412_v23 = vld [vmem:[%s31182_s7 + $0x9c4] ss:$16 sps:$4 sm:$0xff]   ;;  %v23415_v24 = vld [vmem:[%s31182_s7 + $0x9cc] ss:$16 sps:$4 sm:$0xff]  }
 0xaae   : > { %13400 = vmatprep.subr.bf16.mxu1 %v23349_v61  ;;  %v23410_v61 = vld [vmem:[%s31182_s7 + $0x9c0] ss:$16 sps:$4 sm:$0xff]  }
 0xab0   : > { %13360 = vmatpush1.bf16.msra.mxu0 %v23344_v16  ;;  %v23413_v16 = vld [vmem:[%s31182_s7 + $0x9c8] ss:$16 sps:$4 sm:$0xff]  }
 0xab1   : > { %13401 = vmatpush1.bf16.msra.mxu1 %v23347_v15  ;;  %13361 = vmatprep.subr.bf16.mxu0 %v23352_v20  ;;  %v23418_v15 = vld [vmem:[%s31182_s7 + $0x9e4] ss:$16 sps:$4 sm:$0xff]   ;;  %v23421_v20 = vld [vmem:[%s31182_s7 + $0x9ec] ss:$16 sps:$4 sm:$0xff]  }
 0xab2   : > { %13402 = vmatprep.subr.bf16.mxu1 %v23355_v21  ;;  %v23416_v21 = vld [vmem:[%s31182_s7 + $0x9e0] ss:$16 sps:$4 sm:$0xff]  }
 0xab4   : > { %13362 = vmatpush1.bf16.msra.mxu0 %v23350_v5  ;;  %v23419_v5 = vld [vmem:[%s31182_s7 + $0x9e8] ss:$16 sps:$4 sm:$0xff]  }
 0xab5   : > { %13403 = vmatpush1.bf16.msra.mxu1 %v23353_v29  ;;  %13363 = vmatprep.subr.bf16.mxu0 %v23358_v60  ;;  %v23424_v29 = vld [vmem:[%s31182_s7 + $0xa04] ss:$16 sps:$4 sm:$0xff]   ;;  %v23427_v60 = vld [vmem:[%s31182_s7 + $0xa0c] ss:$16 sps:$4 sm:$0xff]  }
 0xab6   : > { %v29498_v39 = vpop.f32.mrb[76].mxu0  ;;  %v29500_v6 = vpop.f32.mrb[80].mxu1  ;;  %13404 = vmatprep.subr.bf16.mxu1 %v23361_v30  ;;  %v23422_v30 = vld [vmem:[%s31182_s7 + $0xa00] ss:$16 sps:$4 sm:$0xff]  }
 0xab7   : > { %v29505_v17 = vpop.f32.mrb[77].mxu0  ;;  %v29507_v25 = vpop.f32.mrb[81].mxu1 }
 0xab8   : > { %13364 = vmatpush1.bf16.msra.mxu0 %v23356_v50  ;;  %v11578_v51 = vpop.f32.mrb[78].mxu0  ;;  %v11619_v26 = vpop.f32.mrb[82].mxu1  ;;  %v23425_v50 = vld [vmem:[%s31182_s7 + $0xa08] ss:$16 sps:$4 sm:$0xff]  }
 0xab9   : > { %13405 = vmatpush1.bf16.msra.mxu1 %v23359_v63  ;;  %v11579_v42 = vpop.f32.mrb[79].mxu0  ;;  %v11620_v44 = vpop.f32.mrb[83].mxu1  ;;  %13365 = vmatprep.subr.bf16.mxu0 %v23364_v22  ;;  %v23430_v63 = vld [vmem:[%s31182_s7 + $0xa24] ss:$16 sps:$4 sm:$0xff]   ;;  %v23433_v22 = vld [vmem:[%s31182_s7 + $0xa2c] ss:$16 sps:$4 sm:$0xff]  }
 0xaba   : > { %13406 = vmatprep.subr.bf16.mxu1 %v23367_v28  ;;  %v23428_v28 = vld [vmem:[%s31182_s7 + $0xa20] ss:$16 sps:$4 sm:$0xff]   ;;  %v23431_v51 = vld [vmem:[%s31182_s7 + $0xa28] ss:$16 sps:$4 sm:$0xff]   ;;  %v23436_v26 = vld [vmem:[%s31182_s7 + $0xa44] ss:$16 sps:$4 sm:$0xff]  }
 0xabb   : > { %v23437_v42 = vld [vmem:[%s31182_s7 + $0xa48] ss:$16 sps:$4 sm:$0xff]   ;;  %v23442_v44 = vld [vmem:[%s31182_s7 + $0xa64] ss:$16 sps:$4 sm:$0xff]  }
 0xabc   : > { %13366 = vmatpush1.bf16.msra.mxu0 %v23362_v38  ;;  %v23434_v38 = vld [vmem:[%s31182_s7 + $0xa40] ss:$16 sps:$4 sm:$0xff]  }
 0xabd   : > { %13407 = vmatpush1.bf16.msra.mxu1 %v23365_v49  ;;  %13367 = vmatprep.subr.bf16.mxu0 %v23370_v11  ;;  %v23445_v49 = vld [vmem:[%s31182_s7 + $0xa6c] ss:$16 sps:$4 sm:$0xff]   ;;  %v23440_v11 = vld [vmem:[%s31182_s7 + $0xa60] ss:$16 sps:$4 sm:$0xff]  }
 0xabe   : > { %13408 = vmatprep.subr.bf16.mxu1 %v23373_v45  ;;  %v23443_v45 = vld [vmem:[%s31182_s7 + $0xa68] ss:$16 sps:$4 sm:$0xff]  }
 0xac0   : > { %13368 = vmatpush1.bf16.msra.mxu0 %v23368_v19  ;;  %v23448_v19 = vld [vmem:[%s31182_s7 + $0xa84] ss:$16 sps:$4 sm:$0xff]  }
 0xac1   : > { %13409 = vmatpush1.bf16.msra.mxu1 %v23371_v62  ;;  %13369 = vmatprep.subr.bf16.mxu0 %v23376_v52  ;;  %v23451_v62 = vld [vmem:[%s31182_s7 + $0xa8c] ss:$16 sps:$4 sm:$0xff]   ;;  %v23446_v52 = vld [vmem:[%s31182_s7 + $0xa80] ss:$16 sps:$4 sm:$0xff]  }
 0xac2   : > { %13410 = vmatprep.subr.bf16.mxu1 %v23379_v14  ;;  %v23449_v14 = vld [vmem:[%s31182_s7 + $0xa88] ss:$16 sps:$4 sm:$0xff]  }
 0xac4   : > { %13370 = vmatpush1.bf16.msra.mxu0 %v23374_v8  ;;  %v23454_v8 = vld [vmem:[%s31182_s7 + $0xaa4] ss:$16 sps:$4 sm:$0xff]  }
 0xac5   : > { %13411 = vmatpush1.bf16.msra.mxu1 %v23377_v40  ;;  %13371 = vmatprep.subr.bf16.mxu0 %v23382_v47  ;;  %v23457_v40 = vld [vmem:[%s31182_s7 + $0xaac] ss:$16 sps:$4 sm:$0xff]   ;;  %v23452_v47 = vld [vmem:[%s31182_s7 + $0xaa0] ss:$16 sps:$4 sm:$0xff]  }
 0xac6   : > { %13412 = vmatprep.subr.bf16.mxu1 %v23385_v48  ;;  %v23455_v48 = vld [vmem:[%s31182_s7 + $0xaa8] ss:$16 sps:$4 sm:$0xff]  }
 0xac8   : > { %13372 = vmatpush1.bf16.msra.mxu0 %v23380_v7  ;;  %v23460_v7 = vld [vmem:[%s31182_s7 + $0xac4] ss:$16 sps:$4 sm:$0xff]  }
 0xac9   : > { %13413 = vmatpush1.bf16.msra.mxu1 %v23383_v33  ;;  %13373 = vmatprep.subr.bf16.mxu0 %v23388_v58 }
 0xaca   : > { %13414 = vmatprep.subr.bf16.mxu1 %v23391_v12  ;;  %v23463_v12 = vld [vmem:[%s31182_s7 + $0xacc] ss:$16 sps:$4 sm:$0xff]  }
 0xacc   : > { %13374 = vmatpush1.bf16.msra.mxu0 %v23386_v10 }
 0xacd   : > { %13415 = vmatpush1.bf16.msra.mxu1 %v23389_v43  ;;  %13375 = vmatprep.subr.bf16.mxu0 %v23394_v3 }
 0xace   : > { %13416 = vmatprep.subr.bf16.mxu1 %v23397_v0 }
 0xad0   : > { %13376 = vmatpush1.bf16.msra.mxu0 %v23392_v4 }
 0xad1   : > { %13417 = vmatpush1.bf16.msra.mxu1 %v23395_v13  ;;  %13377 = vmatprep.subr.bf16.mxu0 %v23400_v41 }
 0xad2   : > { %13418 = vmatprep.subr.bf16.mxu1 %v23403_v2 }
 0xad4   : > { %13378 = vmatpush1.bf16.msra.mxu0 %v23398_v57  ;;  %v23458_v57 = vld [vmem:[%s31182_s7 + $0xac0] ss:$16 sps:$4 sm:$0xff]  }
 0xad5   : > { %13419 = vmatpush1.bf16.msra.mxu1 %v23401_v55  ;;  %13379 = vmatprep.subr.bf16.mxu0 %v23406_v46  ;;  %v23464_v46 = vld [vmem:[%s31182_s7 + $0xae0] ss:$16 sps:$4 sm:$0xff]  }
 0xad6   : > { %13420 = vmatprep.subr.bf16.mxu1 %v23409_v1  ;;  %v23467_v1 = vld [vmem:[%s31182_s7 + $0xae8] ss:$16 sps:$4 sm:$0xff]  }
 0xad8   : > { %13380 = vmatpush1.bf16.msra.mxu0 %v23404_v56  ;;  %v23472_v56 = vld [vmem:[%s31182_s7 + $0xb04] ss:$16 sps:$4 sm:$0xff]  }
 0xad9   : > { %13421 = vmatpush1.bf16.msra.mxu1 %v23407_v32  ;;  %13381 = vmatprep.subr.bf16.mxu0 %v23412_v23  ;;  %v23475_v32 = vld [vmem:[%s31182_s7 + $0xb0c] ss:$16 sps:$4 sm:$0xff]   ;;  %v23470_v23 = vld [vmem:[%s31182_s7 + $0xb00] ss:$16 sps:$4 sm:$0xff]  }
 0xada   : > { %13422 = vmatprep.subr.bf16.mxu1 %v23415_v24  ;;  %v23473_v24 = vld [vmem:[%s31182_s7 + $0xb08] ss:$16 sps:$4 sm:$0xff]  }
 0xadc   : > { %13382 = vmatpush1.bf16.msra.mxu0 %v23410_v61  ;;  %v23478_v61 = vld [vmem:[%s31182_s7 + $0xb24] ss:$16 sps:$4 sm:$0xff]  }
 0xadd   : > { %13423 = vmatpush1.bf16.msra.mxu1 %v23413_v16  ;;  %13383 = vmatprep.subr.bf16.mxu0 %v23418_v15  ;;  %v23481_v16 = vld [vmem:[%s31182_s7 + $0xb2c] ss:$16 sps:$4 sm:$0xff]   ;;  %v23476_v15 = vld [vmem:[%s31182_s7 + $0xb20] ss:$16 sps:$4 sm:$0xff]  }
 0xade   : > { %13424 = vmatprep.subr.bf16.mxu1 %v23421_v20  ;;  %v23479_v20 = vld [vmem:[%s31182_s7 + $0xb28] ss:$16 sps:$4 sm:$0xff]  }
 0xae0   : > { %13384 = vmatpush1.bf16.msra.mxu0 %v23416_v21  ;;  %v23484_v21 = vld [vmem:[%s31182_s7 + $0xb44] ss:$16 sps:$4 sm:$0xff]  }
 0xae1   : > { %13425 = vmatpush1.bf16.msra.mxu1 %v23419_v5  ;;  %13824 = vmatprep.subr.bf16.mxu0 %v23424_v29  ;;  %v23487_v5 = vld [vmem:[%s31182_s7 + $0xb4c] ss:$16 sps:$4 sm:$0xff]   ;;  %v23482_v29 = vld [vmem:[%s31182_s7 + $0xb40] ss:$16 sps:$4 sm:$0xff]  }
 0xae2   : > { %13865 = vmatprep.subr.bf16.mxu1 %v23427_v60  ;;  %v23485_v60 = vld [vmem:[%s31182_s7 + $0xb48] ss:$16 sps:$4 sm:$0xff]  }
 0xae3   : > { %13386 = vmatmul.mubr.bf16.vlgmr.msra.gmra.mrb[92].mxu0 %v29225_v9 }
 0xae4   : > { %13427 = vmatmul.mubr.bf16.vlgmr.msra.gmra.mrb[96].mxu1 %v29225_v9  ;;  %13825 = vmatpush1.bf16.msra.mxu0 %v23422_v30  ;;  %v23439_v9 = vld [vmem:[%s31182_s7 + $0xa4c] ss:$16 sps:$4 sm:$0xff]   ;;  %v23490_v30 = vld [vmem:[%s31182_s7 + $0xb64] ss:$16 sps:$4 sm:$0xff]  }
 0xae5   : > { %13866 = vmatpush1.bf16.msra.mxu1 %v23425_v50  ;;  %13826 = vmatprep.subr.bf16.mxu0 %v23430_v63  ;;  %v23493_v50 = vld [vmem:[%s31182_s7 + $0xb6c] ss:$16 sps:$4 sm:$0xff]   ;;  %v23488_v63 = vld [vmem:[%s31182_s7 + $0xb60] ss:$16 sps:$4 sm:$0xff]  }
 0xae6   : > { %13867 = vmatprep.subr.bf16.mxu1 %v23433_v22  ;;  %13856 = vmatprep.mubr.bf16.mxu0 %v24126_v53  ;;  %v23491_v22 = vld [vmem:[%s31182_s7 + $0xb68] ss:$16 sps:$4 sm:$0xff]  }
 0xae7   : > { %13897 = vmatprep.mubr.bf16.mxu1 %v24126_v53 }
 0xae8   : > { %13827 = vmatpush1.bf16.msra.mxu0 %v23428_v28  ;;  %v23496_v28 = vld [vmem:[%s31182_s7 + $0xb84] ss:$16 sps:$4 sm:$0xff]  }
 0xae9   : > { %13868 = vmatpush1.bf16.msra.mxu1 %v23431_v51  ;;  %13828 = vmatprep.subr.bf16.mxu0 %v23436_v26  ;;  %v23499_v51 = vld [vmem:[%s31182_s7 + $0xb8c] ss:$16 sps:$4 sm:$0xff]   ;;  %v23494_v26 = vld [vmem:[%s31182_s7 + $0xb80] ss:$16 sps:$4 sm:$0xff]  }
 0xaea   : > { %13869 = vmatprep.subr.bf16.mxu1 %v23439_v9  ;;  %v23497_v9 = vld [vmem:[%s31182_s7 + $0xb88] ss:$16 sps:$4 sm:$0xff]  }
 0xaec   : > { %13829 = vmatpush1.bf16.msra.mxu0 %v23434_v38  ;;  %v23502_v38 = vld [vmem:[%s31182_s7 + $0xba4] ss:$16 sps:$4 sm:$0xff]  }
 0xaed   : > { %13870 = vmatpush1.bf16.msra.mxu1 %v23437_v42  ;;  %13830 = vmatprep.subr.bf16.mxu0 %v23442_v44  ;;  %v23505_v42 = vld [vmem:[%s31182_s7 + $0xbac] ss:$16 sps:$4 sm:$0xff]   ;;  %v23500_v44 = vld [vmem:[%s31182_s7 + $0xba0] ss:$16 sps:$4 sm:$0xff]  }
 0xaee   : > { %13871 = vmatprep.subr.bf16.mxu1 %v23445_v49  ;;  %v23503_v49 = vld [vmem:[%s31182_s7 + $0xba8] ss:$16 sps:$4 sm:$0xff]  }
 0xaf0   : > { %13831 = vmatpush1.bf16.msra.mxu0 %v23440_v11  ;;  %v23508_v11 = vld [vmem:[%s31182_s7 + $0xbc4] ss:$16 sps:$4 sm:$0xff]  }
 0xaf1   : > { %13872 = vmatpush1.bf16.msra.mxu1 %v23443_v45  ;;  %13832 = vmatprep.subr.bf16.mxu0 %v23448_v19  ;;  %v23511_v45 = vld [vmem:[%s31182_s7 + $0xbcc] ss:$16 sps:$4 sm:$0xff]   ;;  %v23506_v19 = vld [vmem:[%s31182_s7 + $0xbc0] ss:$16 sps:$4 sm:$0xff]  }
 0xaf2   : > { %13873 = vmatprep.subr.bf16.mxu1 %v23451_v62  ;;  %v23509_v62 = vld [vmem:[%s31182_s7 + $0xbc8] ss:$16 sps:$4 sm:$0xff]  }
 0xaf4   : > { %13833 = vmatpush1.bf16.msra.mxu0 %v23446_v52  ;;  %v23514_v52 = vld [vmem:[%s31182_s7 + $0xbe4] ss:$16 sps:$4 sm:$0xff]  }
 0xaf5   : > { %13874 = vmatpush1.bf16.msra.mxu1 %v23449_v14  ;;  %13834 = vmatprep.subr.bf16.mxu0 %v23454_v8  ;;  %v23517_v14 = vld [vmem:[%s31182_s7 + $0xbec] ss:$16 sps:$4 sm:$0xff]   ;;  %v23512_v8 = vld [vmem:[%s31182_s7 + $0xbe0] ss:$16 sps:$4 sm:$0xff]  }
 0xaf6   : > { %v11976_v33 = vpop.f32.mrb[80].mxu0  ;;  %v12017_v58 = vpop.f32.mrb[84].mxu1  ;;  %13875 = vmatprep.subr.bf16.mxu1 %v23457_v40  ;;  %v23515_v40 = vld [vmem:[%s31182_s7 + $0xbe8] ss:$16 sps:$4 sm:$0xff]  }
 0xaf7   : > { %v29706_v10 = vadd.f32 %v11976_v33, %v29498_v39  ;;  %v29709_v43 = vadd.f32 %v12017_v58, %v29500_v6  ;;  %v11978_v3 = vpop.f32.mrb[81].mxu0  ;;  %v12019_v0 = vpop.f32.mrb[85].mxu1  ;;  %v23461_v6 = vld [vmem:[%s31182_s7 + $0xac8] ss:$16 sps:$4 sm:$0xff]   ;;  %v23518_v33 = vld [vmem:[%s31182_s7 + $0xc00] ss:$16 sps:$4 sm:$0xff]  }
 0xaf8   : > { %v29712_v4 = vadd.f32 %v11978_v3, %v29505_v17  ;;  %v29715_v13 = vadd.f32 %v12019_v0, %v29507_v25  ;;  %v11980_v41 = vpop.f32.mrb[82].mxu0  ;;  %v12021_v2 = vpop.f32.mrb[86].mxu1  ;;  %13835 = vmatpush1.bf16.msra.mxu0 %v23452_v47  ;;  %v23466_v17 = vld [vmem:[%s31182_s7 + $0xae4] ss:$16 sps:$4 sm:$0xff]   ;;  %v23469_v25 = vld [vmem:[%s31182_s7 + $0xaec] ss:$16 sps:$4 sm:$0xff]  }
 0xaf9   : > { %13876 = vmatpush1.bf16.msra.mxu1 %v23455_v48  ;;  %v11981_v39 = vpop.f32.mrb[83].mxu0  ;;  %v12022_v55 = vpop.f32.mrb[87].mxu1  ;;  %13836 = vmatprep.subr.bf16.mxu0 %v23460_v7  ;;  %v23520_v47 = vld [vmem:[%s31182_s7 + $0xc04] ss:$16 sps:$4 sm:$0xff]   ;;  %v23523_v48 = vld [vmem:[%s31182_s7 + $0xc0c] ss:$16 sps:$4 sm:$0xff]  }
 0xafa   : > { %13877 = vmatprep.subr.bf16.mxu1 %v23463_v12  ;;  %v13910_v7 = vrot.slane %v28806_v18, 1  ;;  %v23521_v58 = vld [vmem:[%s31182_s7 + $0xc08] ss:$16 sps:$4 sm:$0xff]   ;;  %v23526_v18 = vld [vmem:[%s31182_s7 + $0xc24] ss:$16 sps:$4 sm:$0xff]  }
 0xafb   : > { %v23529_v0 = vld [vmem:[%s31182_s7 + $0xc2c] ss:$16 sps:$4 sm:$0xff]   ;;  %v23524_v41 = vld [vmem:[%s31182_s7 + $0xc20] ss:$16 sps:$4 sm:$0xff]   ;;  %v23527_v2 = vld [vmem:[%s31182_s7 + $0xc28] ss:$16 sps:$4 sm:$0xff]  }
 0xafc   : > { %13837 = vmatpush1.bf16.msra.mxu0 %v23458_v57  ;;  %v29854_v3 = vpack.c.bf16 %v13910_v7, %v13910_v7  ;;  %v23532_v57 = vld [vmem:[%s31182_s7 + $0xc44] ss:$16 sps:$4 sm:$0xff]   ;;  %v23530_v39 = vld [vmem:[%s31182_s7 + $0xc40] ss:$16 sps:$4 sm:$0xff]   ;;  %v23533_v55 = vld [vmem:[%s31182_s7 + $0xc48] ss:$16 sps:$4 sm:$0xff]  }
 0xafd   : > { %13878 = vmatpush1.bf16.msra.mxu1 %v23461_v6  ;;  %13838 = vmatprep.subr.bf16.mxu0 %v23466_v17  ;;  %v23538_v6 = vld [vmem:[%s31182_s7 + $0xc64] ss:$16 sps:$4 sm:$0xff]   ;;  %v23541_v17 = vld [vmem:[%s31182_s7 + $0xc6c] ss:$16 sps:$4 sm:$0xff]   ;;  %v23581_v7 = vld [vmem:[%s31182_s7 + $0xd48] ss:$16 sps:$4 sm:$0xff]  }
 0xafe   : > { %13879 = vmatprep.subr.bf16.mxu1 %v23469_v25  ;;  %v23536_v25 = vld [vmem:[%s31182_s7 + $0xc60] ss:$16 sps:$4 sm:$0xff]  }
 0xb00   : > { %13839 = vmatpush1.bf16.msra.mxu0 %v23464_v46  ;;  %v23539_v46 = vld [vmem:[%s31182_s7 + $0xc68] ss:$16 sps:$4 sm:$0xff]  }
 0xb01   : > { %13880 = vmatpush1.bf16.msra.mxu1 %v23467_v1  ;;  %13840 = vmatprep.subr.bf16.mxu0 %v23472_v56  ;;  %v23544_v1 = vld [vmem:[%s31182_s7 + $0xc84] ss:$16 sps:$4 sm:$0xff]   ;;  %v23547_v56 = vld [vmem:[%s31182_s7 + $0xc8c] ss:$16 sps:$4 sm:$0xff]  }
 0xb02   : > { %13881 = vmatprep.subr.bf16.mxu1 %v23475_v32  ;;  %v23542_v32 = vld [vmem:[%s31182_s7 + $0xc80] ss:$16 sps:$4 sm:$0xff]  }
 0xb04   : > { %13841 = vmatpush1.bf16.msra.mxu0 %v23470_v23  ;;  %v23545_v23 = vld [vmem:[%s31182_s7 + $0xc88] ss:$16 sps:$4 sm:$0xff]  }
 0xb05   : > { %13882 = vmatpush1.bf16.msra.mxu1 %v23473_v24  ;;  %13842 = vmatprep.subr.bf16.mxu0 %v23478_v61  ;;  %v23550_v24 = vld [vmem:[%s31182_s7 + $0xca4] ss:$16 sps:$4 sm:$0xff]   ;;  %v23553_v61 = vld [vmem:[%s31182_s7 + $0xcac] ss:$16 sps:$4 sm:$0xff]  }
 0xb06   : > { %13883 = vmatprep.subr.bf16.mxu1 %v23481_v16  ;;  %v23548_v16 = vld [vmem:[%s31182_s7 + $0xca0] ss:$16 sps:$4 sm:$0xff]  }
 0xb08   : > { %13843 = vmatpush1.bf16.msra.mxu0 %v23476_v15  ;;  %v23551_v15 = vld [vmem:[%s31182_s7 + $0xca8] ss:$16 sps:$4 sm:$0xff]  }
 0xb09   : > { %13884 = vmatpush1.bf16.msra.mxu1 %v23479_v20  ;;  %13844 = vmatprep.subr.bf16.mxu0 %v23484_v21  ;;  %v23556_v20 = vld [vmem:[%s31182_s7 + $0xcc4] ss:$16 sps:$4 sm:$0xff]  }
 0xb0a   : > { %13885 = vmatprep.subr.bf16.mxu1 %v23487_v5 }
 0xb0c   : > { %13845 = vmatpush1.bf16.msra.mxu0 %v23482_v29  ;;  %v23559_v29 = vld [vmem:[%s31182_s7 + $0xccc] ss:$16 sps:$4 sm:$0xff]  }
 0xb0d   : > { %13886 = vmatpush1.bf16.msra.mxu1 %v23485_v60  ;;  %13846 = vmatprep.subr.bf16.mxu0 %v23490_v30 }
 0xb0e   : > { %13887 = vmatprep.subr.bf16.mxu1 %v23493_v50 }
 0xb10   : > { %13847 = vmatpush1.bf16.msra.mxu0 %v23488_v63 }
 0xb11   : > { %13888 = vmatpush1.bf16.msra.mxu1 %v23491_v22  ;;  %13848 = vmatprep.subr.bf16.mxu0 %v23496_v28 }
 0xb12   : > { %13889 = vmatprep.subr.bf16.mxu1 %v23499_v51 }
 0xb14   : > { %13849 = vmatpush1.bf16.msra.mxu0 %v23494_v26 }
 0xb15   : > { %13890 = vmatpush1.bf16.msra.mxu1 %v23497_v9  ;;  %13850 = vmatprep.subr.bf16.mxu0 %v23502_v38  ;;  %v23554_v9 = vld [vmem:[%s31182_s7 + $0xcc0] ss:$16 sps:$4 sm:$0xff]  }
 0xb16   : > { %13891 = vmatprep.subr.bf16.mxu1 %v23505_v42  ;;  %v23560_v42 = vld [vmem:[%s31182_s7 + $0xce0] ss:$16 sps:$4 sm:$0xff]  }
 0xb18   : > { %13851 = vmatpush1.bf16.msra.mxu0 %v23500_v44  ;;  %v23563_v44 = vld [vmem:[%s31182_s7 + $0xce8] ss:$16 sps:$4 sm:$0xff]  }
 0xb19   : > { %13892 = vmatpush1.bf16.msra.mxu1 %v23503_v49  ;;  %13852 = vmatprep.subr.bf16.mxu0 %v23508_v11  ;;  %v23568_v49 = vld [vmem:[%s31182_s7 + $0xd04] ss:$16 sps:$4 sm:$0xff]   ;;  %v23571_v11 = vld [vmem:[%s31182_s7 + $0xd0c] ss:$16 sps:$4 sm:$0xff]  }
 0xb1a   : > { %13893 = vmatprep.subr.bf16.mxu1 %v23511_v45  ;;  %v23566_v45 = vld [vmem:[%s31182_s7 + $0xd00] ss:$16 sps:$4 sm:$0xff]  }
 0xb1c   : > { %13853 = vmatpush1.bf16.msra.mxu0 %v23506_v19  ;;  %v23569_v19 = vld [vmem:[%s31182_s7 + $0xd08] ss:$16 sps:$4 sm:$0xff]  }
 0xb1d   : > { %13894 = vmatpush1.bf16.msra.mxu1 %v23509_v62  ;;  %13854 = vmatprep.subr.bf16.mxu0 %v23514_v52  ;;  %v23574_v62 = vld [vmem:[%s31182_s7 + $0xd24] ss:$16 sps:$4 sm:$0xff]   ;;  %v23577_v52 = vld [vmem:[%s31182_s7 + $0xd2c] ss:$16 sps:$4 sm:$0xff]  }
 0xb1e   : > { %13895 = vmatprep.subr.bf16.mxu1 %v23517_v14  ;;  %v23572_v14 = vld [vmem:[%s31182_s7 + $0xd20] ss:$16 sps:$4 sm:$0xff]  }
 0xb20   : > { %13855 = vmatpush1.bf16.msra.mxu0 %v23512_v8  ;;  %v23575_v8 = vld [vmem:[%s31182_s7 + $0xd28] ss:$16 sps:$4 sm:$0xff]  }
 0xb21   : > { %13896 = vmatpush1.bf16.msra.mxu1 %v23515_v40  ;;  %14302 = vmatprep.subr.bf16.mxu0 %v23520_v47  ;;  %v23580_v40 = vld [vmem:[%s31182_s7 + $0xd44] ss:$16 sps:$4 sm:$0xff]   ;;  %v23583_v47 = vld [vmem:[%s31182_s7 + $0xd4c] ss:$16 sps:$4 sm:$0xff]  }
 0xb22   : > { %14343 = vmatprep.subr.bf16.mxu1 %v23523_v48  ;;  %v23578_v48 = vld [vmem:[%s31182_s7 + $0xd40] ss:$16 sps:$4 sm:$0xff]  }
 0xb23   : > { %13857 = vmatmul.mubr.bf16.vlgmr.msra.gmra.mrb[96].mxu0 %v29433_v54 }
 0xb24   : > { %13898 = vmatmul.mubr.bf16.vlgmr.msra.gmra.mrb[100].mxu1 %v29433_v54  ;;  %14303 = vmatpush1.bf16.msra.mxu0 %v23518_v33  ;;  %v23535_v54 = vld [vmem:[%s31182_s7 + $0xc4c] ss:$16 sps:$4 sm:$0xff]   ;;  %v23586_v33 = vld [vmem:[%s31182_s7 + $0xd64] ss:$16 sps:$4 sm:$0xff]  }
 0xb25   : > { %20434 = vmatprep.mubr.msk.bf16.mxu0 %vm29846_vm8, %v29854_v3  ;;  %14344 = vmatpush1.bf16.msra.mxu1 %v23521_v58  ;;  %v23589_v58 = vld [vmem:[%s31182_s7 + $0xd6c] ss:$16 sps:$4 sm:$0xff]  }
 0xb26   : > { %20437 = vmatprep.mubr.msk.bf16.mxu1 %vm29846_vm8, %v29854_v3  ;;  %14304 = vmatprep.subr.bf16.mxu0 %v23526_v18  ;;  %v23584_v18 = vld [vmem:[%s31182_s7 + $0xd60] ss:$16 sps:$4 sm:$0xff]  }
 0xb27   : > { %14345 = vmatprep.subr.bf16.mxu1 %v23529_v0  ;;  %v23587_v0 = vld [vmem:[%s31182_s7 + $0xd68] ss:$16 sps:$4 sm:$0xff]  }
 0xb28   : > { %14305 = vmatpush1.bf16.msra.mxu0 %v23524_v41  ;;  %v23592_v41 = vld [vmem:[%s31182_s7 + $0xd84] ss:$16 sps:$4 sm:$0xff]  }
 0xb29   : > { %14346 = vmatpush1.bf16.msra.mxu1 %v23527_v2  ;;  %14306 = vmatprep.subr.bf16.mxu0 %v23532_v57  ;;  %v23595_v2 = vld [vmem:[%s31182_s7 + $0xd8c] ss:$16 sps:$4 sm:$0xff]   ;;  %v23590_v57 = vld [vmem:[%s31182_s7 + $0xd80] ss:$16 sps:$4 sm:$0xff]  }
 0xb2a   : > { %14347 = vmatprep.subr.bf16.mxu1 %v23535_v54  ;;  %v23593_v54 = vld [vmem:[%s31182_s7 + $0xd88] ss:$16 sps:$4 sm:$0xff]  }
 0xb2c   : > { %14307 = vmatpush1.bf16.msra.mxu0 %v23530_v39  ;;  %v23598_v39 = vld [vmem:[%s31182_s7 + $0xda4] ss:$16 sps:$4 sm:$0xff]  }
 0xb2d   : > { %14348 = vmatpush1.bf16.msra.mxu1 %v23533_v55  ;;  %14308 = vmatprep.subr.bf16.mxu0 %v23538_v6  ;;  %v23601_v55 = vld [vmem:[%s31182_s7 + $0xdac] ss:$16 sps:$4 sm:$0xff]   ;;  %v23596_v6 = vld [vmem:[%s31182_s7 + $0xda0] ss:$16 sps:$4 sm:$0xff]  }
 0xb2e   : > { %14349 = vmatprep.subr.bf16.mxu1 %v23541_v17  ;;  %v23599_v17 = vld [vmem:[%s31182_s7 + $0xda8] ss:$16 sps:$4 sm:$0xff]  }
 0xb30   : > { %14309 = vmatpush1.bf16.msra.mxu0 %v23536_v25  ;;  %v23604_v25 = vld [vmem:[%s31182_s7 + $0xdc4] ss:$16 sps:$4 sm:$0xff]  }
 0xb31   : > { %14350 = vmatpush1.bf16.msra.mxu1 %v23539_v46  ;;  %14310 = vmatprep.subr.bf16.mxu0 %v23544_v1  ;;  %v23607_v46 = vld [vmem:[%s31182_s7 + $0xdcc] ss:$16 sps:$4 sm:$0xff]   ;;  %v23602_v1 = vld [vmem:[%s31182_s7 + $0xdc0] ss:$16 sps:$4 sm:$0xff]  }
 0xb32   : > { %14351 = vmatprep.subr.bf16.mxu1 %v23547_v56  ;;  %v23605_v56 = vld [vmem:[%s31182_s7 + $0xdc8] ss:$16 sps:$4 sm:$0xff]  }
 0xb34   : > { %14311 = vmatpush1.bf16.msra.mxu0 %v23542_v32  ;;  %v23610_v32 = vld [vmem:[%s31182_s7 + $0xde4] ss:$16 sps:$4 sm:$0xff]  }
 0xb35   : > { %14352 = vmatpush1.bf16.msra.mxu1 %v23545_v23  ;;  %14312 = vmatprep.subr.bf16.mxu0 %v23550_v24  ;;  %v23613_v23 = vld [vmem:[%s31182_s7 + $0xdec] ss:$16 sps:$4 sm:$0xff]   ;;  %v23608_v24 = vld [vmem:[%s31182_s7 + $0xde0] ss:$16 sps:$4 sm:$0xff]  }
 0xb36   : > { %v12443_v21 = vpop.f32.mrb[84].mxu0  ;;  %v12484_v5 = vpop.f32.mrb[88].mxu1  ;;  %14353 = vmatprep.subr.bf16.mxu1 %v23553_v61  ;;  %v23611_v61 = vld [vmem:[%s31182_s7 + $0xde8] ss:$16 sps:$4 sm:$0xff]  }
 0xb37   : > { %v29927_v60 = vadd.f32 %v12443_v21, %v29706_v10  ;;  %v29930_v30 = vadd.f32 %v12484_v5, %v29709_v43  ;;  %v12445_v50 = vpop.f32.mrb[85].mxu0  ;;  %v12486_v63 = vpop.f32.mrb[89].mxu1  ;;  %v23557_v43 = vld [vmem:[%s31182_s7 + $0xcc8] ss:$16 sps:$4 sm:$0xff]   ;;  %v23614_v21 = vld [vmem:[%s31182_s7 + $0xe00] ss:$16 sps:$4 sm:$0xff]  }
 0xb38   : > { %v29933_v22 = vadd.f32 %v12445_v50, %v29712_v4  ;;  %v29936_v28 = vadd.f32 %v12486_v63, %v29715_v13  ;;  %v12447_v51 = vpop.f32.mrb[86].mxu0  ;;  %v12488_v26 = vpop.f32.mrb[90].mxu1  ;;  %14313 = vmatpush1.bf16.msra.mxu0 %v23548_v16  ;;  %v23562_v4 = vld [vmem:[%s31182_s7 + $0xce4] ss:$16 sps:$4 sm:$0xff]   ;;  %v23565_v13 = vld [vmem:[%s31182_s7 + $0xcec] ss:$16 sps:$4 sm:$0xff]  }
 0xb39   : > { %14354 = vmatpush1.bf16.msra.mxu1 %v23551_v15  ;;  %v12448_v10 = vpop.f32.mrb[87].mxu0  ;;  %v12489_v38 = vpop.f32.mrb[91].mxu1  ;;  %14314 = vmatprep.subr.bf16.mxu0 %v23556_v20  ;;  %v23616_v16 = vld [vmem:[%s31182_s7 + $0xe04] ss:$16 sps:$4 sm:$0xff]   ;;  %v23619_v15 = vld [vmem:[%s31182_s7 + $0xe0c] ss:$16 sps:$4 sm:$0xff]  }
 0xb3a   : > { %14355 = vmatprep.subr.bf16.mxu1 %v23559_v29  ;;  %v13911_v20 = vrot.slane %v28809_v59, 1  ;;  %v23617_v5 = vld [vmem:[%s31182_s7 + $0xe08] ss:$16 sps:$4 sm:$0xff]   ;;  %v23622_v29 = vld [vmem:[%s31182_s7 + $0xe24] ss:$16 sps:$4 sm:$0xff]  }
 0xb3b   : > { %v23625_v59 = vld [vmem:[%s31182_s7 + $0xe2c] ss:$16 sps:$4 sm:$0xff]   ;;  %v23620_v63 = vld [vmem:[%s31182_s7 + $0xe20] ss:$16 sps:$4 sm:$0xff]   ;;  %v23623_v51 = vld [vmem:[%s31182_s7 + $0xe28] ss:$16 sps:$4 sm:$0xff]  }
 0xb3c   : > { %14315 = vmatpush1.bf16.msra.mxu0 %v23554_v9  ;;  %v30069_v50 = vpack.c.bf16 %v13911_v20, %v13911_v20  ;;  %v23628_v26 = vld [vmem:[%s31182_s7 + $0xe44] ss:$16 sps:$4 sm:$0xff]   ;;  %v23631_v9 = vld [vmem:[%s31182_s7 + $0xe4c] ss:$16 sps:$4 sm:$0xff]   ;;  %v23626_v10 = vld [vmem:[%s31182_s7 + $0xe40] ss:$16 sps:$4 sm:$0xff]  }
 0xb3d   : > { %14356 = vmatpush1.bf16.msra.mxu1 %v23557_v43  ;;  %14316 = vmatprep.subr.bf16.mxu0 %v23562_v4  ;;  %v23629_v38 = vld [vmem:[%s31182_s7 + $0xe48] ss:$16 sps:$4 sm:$0xff]   ;;  %v23634_v43 = vld [vmem:[%s31182_s7 + $0xe64] ss:$16 sps:$4 sm:$0xff]   ;;  %v23637_v4 = vld [vmem:[%s31182_s7 + $0xe6c] ss:$16 sps:$4 sm:$0xff]  }
 0xb3e   : > { %14357 = vmatprep.subr.bf16.mxu1 %v23565_v13  ;;  %v23632_v13 = vld [vmem:[%s31182_s7 + $0xe60] ss:$16 sps:$4 sm:$0xff]   ;;  %v23677_v20 = vld [vmem:[%s31182_s7 + $0xf48] ss:$16 sps:$4 sm:$0xff]  }
 0xb40   : > { %14317 = vmatpush1.bf16.msra.mxu0 %v23560_v42  ;;  %v23635_v42 = vld [vmem:[%s31182_s7 + $0xe68] ss:$16 sps:$4 sm:$0xff]  }
 0xb41   : > { %14358 = vmatpush1.bf16.msra.mxu1 %v23563_v44  ;;  %14318 = vmatprep.subr.bf16.mxu0 %v23568_v49  ;;  %v23640_v44 = vld [vmem:[%s31182_s7 + $0xe84] ss:$16 sps:$4 sm:$0xff]   ;;  %v23643_v49 = vld [vmem:[%s31182_s7 + $0xe8c] ss:$16 sps:$4 sm:$0xff]  }
 0xb42   : > { %14359 = vmatprep.subr.bf16.mxu1 %v23571_v11  ;;  %v23638_v11 = vld [vmem:[%s31182_s7 + $0xe80] ss:$16 sps:$4 sm:$0xff]  }
 0xb44   : > { %14319 = vmatpush1.bf16.msra.mxu0 %v23566_v45  ;;  %v23641_v45 = vld [vmem:[%s31182_s7 + $0xe88] ss:$16 sps:$4 sm:$0xff]  }
 0xb45   : > { %14360 = vmatpush1.bf16.msra.mxu1 %v23569_v19  ;;  %14320 = vmatprep.subr.bf16.mxu0 %v23574_v62  ;;  %v23646_v19 = vld [vmem:[%s31182_s7 + $0xea4] ss:$16 sps:$4 sm:$0xff]   ;;  %v23649_v62 = vld [vmem:[%s31182_s7 + $0xeac] ss:$16 sps:$4 sm:$0xff]  }
 0xb46   : > { %14361 = vmatprep.subr.bf16.mxu1 %v23577_v52  ;;  %v23644_v52 = vld [vmem:[%s31182_s7 + $0xea0] ss:$16 sps:$4 sm:$0xff]  }
 0xb48   : > { %14321 = vmatpush1.bf16.msra.mxu0 %v23572_v14  ;;  %v23647_v14 = vld [vmem:[%s31182_s7 + $0xea8] ss:$16 sps:$4 sm:$0xff]  }
 0xb49   : > { %14362 = vmatpush1.bf16.msra.mxu1 %v23575_v8  ;;  %14322 = vmatprep.subr.bf16.mxu0 %v23580_v40  ;;  %v23652_v8 = vld [vmem:[%s31182_s7 + $0xec4] ss:$16 sps:$4 sm:$0xff]  }
 0xb4a   : > { %14363 = vmatprep.subr.bf16.mxu1 %v23583_v47  ;;  %v23655_v47 = vld [vmem:[%s31182_s7 + $0xecc] ss:$16 sps:$4 sm:$0xff]  }
 0xb4c   : > { %14323 = vmatpush1.bf16.msra.mxu0 %v23578_v48 }
 0xb4d   : > { %14364 = vmatpush1.bf16.msra.mxu1 %v23581_v7  ;;  %14324 = vmatprep.subr.bf16.mxu0 %v23586_v33 }
 0xb4e   : > { %14365 = vmatprep.subr.bf16.mxu1 %v23589_v58 }
 0xb50   : > { %14325 = vmatpush1.bf16.msra.mxu0 %v23584_v18 }
 0xb51   : > { %14366 = vmatpush1.bf16.msra.mxu1 %v23587_v0  ;;  %14326 = vmatprep.subr.bf16.mxu0 %v23592_v41 }
 0xb52   : > { %14367 = vmatprep.subr.bf16.mxu1 %v23595_v2  ;;  %v23650_v2 = vld [vmem:[%s31182_s7 + $0xec0] ss:$16 sps:$4 sm:$0xff]  }
 0xb54   : > { %14327 = vmatpush1.bf16.msra.mxu0 %v23590_v57 }
 0xb55   : > { %14368 = vmatpush1.bf16.msra.mxu1 %v23593_v54  ;;  %14328 = vmatprep.subr.bf16.mxu0 %v23598_v39 }
 0xb56   : > { %14369 = vmatprep.subr.bf16.mxu1 %v23601_v55  ;;  %v23661_v55 = vld [vmem:[%s31182_s7 + $0xeec] ss:$16 sps:$4 sm:$0xff]  }
 0xb58   : > { %14329 = vmatpush1.bf16.msra.mxu0 %v23596_v6  ;;  %v23659_v6 = vld [vmem:[%s31182_s7 + $0xee8] ss:$16 sps:$4 sm:$0xff]  }
 0xb59   : > { %14370 = vmatpush1.bf16.msra.mxu1 %v23599_v17  ;;  %14330 = vmatprep.subr.bf16.mxu0 %v23604_v25  ;;  %v23664_v17 = vld [vmem:[%s31182_s7 + $0xf04] ss:$16 sps:$4 sm:$0xff]   ;;  %v23667_v25 = vld [vmem:[%s31182_s7 + $0xf0c] ss:$16 sps:$4 sm:$0xff]  }
 0xb5a   : > { %14371 = vmatprep.subr.bf16.mxu1 %v23607_v46  ;;  %v23662_v46 = vld [vmem:[%s31182_s7 + $0xf00] ss:$16 sps:$4 sm:$0xff]  }
 0xb5c   : > { %14331 = vmatpush1.bf16.msra.mxu0 %v23602_v1  ;;  %v23665_v1 = vld [vmem:[%s31182_s7 + $0xf08] ss:$16 sps:$4 sm:$0xff]  }
 0xb5d   : > { %14372 = vmatpush1.bf16.msra.mxu1 %v23605_v56  ;;  %14332 = vmatprep.subr.bf16.mxu0 %v23610_v32  ;;  %v23670_v56 = vld [vmem:[%s31182_s7 + $0xf24] ss:$16 sps:$4 sm:$0xff]   ;;  %v23673_v32 = vld [vmem:[%s31182_s7 + $0xf2c] ss:$16 sps:$4 sm:$0xff]  }
 0xb5e   : > { %14373 = vmatprep.subr.bf16.mxu1 %v23613_v23  ;;  %v23668_v23 = vld [vmem:[%s31182_s7 + $0xf20] ss:$16 sps:$4 sm:$0xff]  }
 0xb60   : > { %14333 = vmatpush1.bf16.msra.mxu0 %v23608_v24  ;;  %v23671_v24 = vld [vmem:[%s31182_s7 + $0xf28] ss:$16 sps:$4 sm:$0xff]  }
 0xb61   : > { %14374 = vmatpush1.bf16.msra.mxu1 %v23611_v61  ;;  %14774 = vmatprep.subr.bf16.mxu0 %v23616_v16  ;;  %v23676_v61 = vld [vmem:[%s31182_s7 + $0xf44] ss:$16 sps:$4 sm:$0xff]   ;;  %v23679_v16 = vld [vmem:[%s31182_s7 + $0xf4c] ss:$16 sps:$4 sm:$0xff]  }
 0xb62   : > { %14815 = vmatprep.subr.bf16.mxu1 %v23619_v15  ;;  %v23674_v15 = vld [vmem:[%s31182_s7 + $0xf40] ss:$16 sps:$4 sm:$0xff]  }
 0xb63   : > { %14335 = vmatmul.mubr.bf16.vlgmr.msra.gmra.mrb[100].mxu0 %v24126_v53 }
 0xb64   : > { %14376 = vmatmul.mubr.bf16.vlgmr.msra.gmra.mrb[104].mxu1 %v24126_v53  ;;  %14775 = vmatpush1.bf16.msra.mxu0 %v23614_v21  ;;  %v23682_v21 = vld [vmem:[%s31182_s7 + $0xf64] ss:$16 sps:$4 sm:$0xff]  }
 0xb65   : > { %20568 = vmatprep.mubr.msk.bf16.mxu0 %vm29846_vm8, %v30069_v50  ;;  %14816 = vmatpush1.bf16.msra.mxu1 %v23617_v5  ;;  %v23685_v5 = vld [vmem:[%s31182_s7 + $0xf6c] ss:$16 sps:$4 sm:$0xff]  }
 0xb66   : > { %20574 = vmatprep.mubr.msk.bf16.mxu1 %vm29846_vm8, %v30069_v50  ;;  %14776 = vmatprep.subr.bf16.mxu0 %v23622_v29  ;;  %v23680_v29 = vld [vmem:[%s31182_s7 + $0xf60] ss:$16 sps:$4 sm:$0xff]  }
 0xb67   : > { %14817 = vmatprep.subr.bf16.mxu1 %v23625_v59  ;;  %v23683_v59 = vld [vmem:[%s31182_s7 + $0xf68] ss:$16 sps:$4 sm:$0xff]  }
 0xb68   : > { %14777 = vmatpush1.bf16.msra.mxu0 %v23620_v63  ;;  %v23688_v63 = vld [vmem:[%s31182_s7 + $0xf84] ss:$16 sps:$4 sm:$0xff]  }
 0xb69   : > { %14818 = vmatpush1.bf16.msra.mxu1 %v23623_v51  ;;  %14778 = vmatprep.subr.bf16.mxu0 %v23628_v26  ;;  %v23691_v51 = vld [vmem:[%s31182_s7 + $0xf8c] ss:$16 sps:$4 sm:$0xff]   ;;  %v23686_v26 = vld [vmem:[%s31182_s7 + $0xf80] ss:$16 sps:$4 sm:$0xff]  }
 0xb6a   : > { %14819 = vmatprep.subr.bf16.mxu1 %v23631_v9  ;;  %v23689_v9 = vld [vmem:[%s31182_s7 + $0xf88] ss:$16 sps:$4 sm:$0xff]  }
 0xb6c   : > { %14779 = vmatpush1.bf16.msra.mxu0 %v23626_v10  ;;  %v23694_v10 = vld [vmem:[%s31182_s7 + $0xfa4] ss:$16 sps:$4 sm:$0xff]  }
 0xb6d   : > { %14820 = vmatpush1.bf16.msra.mxu1 %v23629_v38  ;;  %14780 = vmatprep.subr.bf16.mxu0 %v23634_v43  ;;  %v23697_v38 = vld [vmem:[%s31182_s7 + $0xfac] ss:$16 sps:$4 sm:$0xff]   ;;  %v23692_v43 = vld [vmem:[%s31182_s7 + $0xfa0] ss:$16 sps:$4 sm:$0xff]  }
 0xb6e   : > { %14821 = vmatprep.subr.bf16.mxu1 %v23637_v4  ;;  %v23695_v4 = vld [vmem:[%s31182_s7 + $0xfa8] ss:$16 sps:$4 sm:$0xff]  }
 0xb70   : > { %14781 = vmatpush1.bf16.msra.mxu0 %v23632_v13  ;;  %v23700_v13 = vld [vmem:[%s31182_s7 + $0xfc4] ss:$16 sps:$4 sm:$0xff]  }
 0xb71   : > { %14822 = vmatpush1.bf16.msra.mxu1 %v23635_v42  ;;  %14782 = vmatprep.subr.bf16.mxu0 %v23640_v44  ;;  %v23703_v42 = vld [vmem:[%s31182_s7 + $0xfcc] ss:$16 sps:$4 sm:$0xff]   ;;  %v23698_v44 = vld [vmem:[%s31182_s7 + $0xfc0] ss:$16 sps:$4 sm:$0xff]  }
 0xb72   : > { %14823 = vmatprep.subr.bf16.mxu1 %v23643_v49  ;;  %v23701_v49 = vld [vmem:[%s31182_s7 + $0xfc8] ss:$16 sps:$4 sm:$0xff]  }
 0xb74   : > { %14783 = vmatpush1.bf16.msra.mxu0 %v23638_v11  ;;  %v23706_v11 = vld [vmem:[%s31182_s7 + $0xfe4] ss:$16 sps:$4 sm:$0xff]  }
 0xb75   : > { %14824 = vmatpush1.bf16.msra.mxu1 %v23641_v45  ;;  %14784 = vmatprep.subr.bf16.mxu0 %v23646_v19  ;;  %v23709_v45 = vld [vmem:[%s31182_s7 + $0xfec] ss:$16 sps:$4 sm:$0xff]   ;;  %v23704_v19 = vld [vmem:[%s31182_s7 + $0xfe0] ss:$16 sps:$4 sm:$0xff]  }
 0xb76   : > { %v12915_v40 = vpop.f32.mrb[88].mxu0  ;;  %14825 = vmatprep.subr.bf16.mxu1 %v23649_v62  ;;  %v23707_v62 = vld [vmem:[%s31182_s7 + $0xfe8] ss:$16 sps:$4 sm:$0xff]  }
 0xb77   : > { %v30142_v48 = vadd.f32 %v12915_v40, %v29927_v60  ;;  %v12956_v7 = vpop.f32.mrb[92].mxu1  ;;  %v12917_v33 = vpop.f32.mrb[89].mxu0  ;;  %v23713_v40 = vld [vmem:[%s31182_s7 + $0x1008] ss:$16 sps:$4 sm:$0xff]  }
 0xb78   : > { %v30145_v58 = vadd.f32 %v12956_v7, %v29930_v30  ;;  %v30148_v18 = vadd.f32 %v12917_v33, %v29933_v22  ;;  %v12958_v0 = vpop.f32.mrb[93].mxu1  ;;  %v12919_v41 = vpop.f32.mrb[90].mxu0  ;;  %14785 = vmatpush1.bf16.msra.mxu0 %v23644_v52  ;;  %v23653_v30 = vld [vmem:[%s31182_s7 + $0xec8] ss:$16 sps:$4 sm:$0xff]   ;;  %v23658_v22 = vld [vmem:[%s31182_s7 + $0xee4] ss:$16 sps:$4 sm:$0xff]  }
 0xb79   : > { %v30154_v57 = vadd.f32 %v12958_v0, %v29936_v28  ;;  %v12960_v60 = vpop.f32.mrb[94].mxu1  ;;  %14826 = vmatpush1.bf16.msra.mxu1 %v23647_v14  ;;  %v12920_v54 = vpop.f32.mrb[91].mxu0  ;;  %14786 = vmatprep.subr.bf16.mxu0 %v23652_v8  ;;  %v23656_v28 = vld [vmem:[%s31182_s7 + $0xee0] ss:$16 sps:$4 sm:$0xff]   ;;  %v23712_v52 = vld [vmem:[%s31182_s7 + $0x1004] ss:$16 sps:$4 sm:$0xff]  }
 0xb7a   : > { %v12961_v39 = vpop.f32.mrb[95].mxu1  ;;  %14827 = vmatprep.subr.bf16.mxu1 %v23655_v47  ;;  %v23715_v14 = vld [vmem:[%s31182_s7 + $0x100c] ss:$16 sps:$4 sm:$0xff]   ;;  %v23710_v8 = vld [vmem:[%s31182_s7 + $0x1000] ss:$16 sps:$4 sm:$0xff]  }
 0xb7b   : > { %v23718_v47 = vld [vmem:[%s31182_s7 + $0x1024] ss:$16 sps:$4 sm:$0xff]   ;;  %v23721_v7 = vld [vmem:[%s31182_s7 + $0x102c] ss:$16 sps:$4 sm:$0xff]   ;;  %v23716_v33 = vld [vmem:[%s31182_s7 + $0x1020] ss:$16 sps:$4 sm:$0xff]  }
 0xb7c   : > { %14787 = vmatpush1.bf16.msra.mxu0 %v23650_v2  ;;  %v23719_v0 = vld [vmem:[%s31182_s7 + $0x1028] ss:$16 sps:$4 sm:$0xff]   ;;  %v23724_v41 = vld [vmem:[%s31182_s7 + $0x1044] ss:$16 sps:$4 sm:$0xff]   ;;  %v23722_v2 = vld [vmem:[%s31182_s7 + $0x1040] ss:$16 sps:$4 sm:$0xff]  }
 0xb7d   : > { %14828 = vmatpush1.bf16.msra.mxu1 %v23653_v30  ;;  %14788 = vmatprep.subr.bf16.mxu0 %v23658_v22  ;;  %v23725_v60 = vld [vmem:[%s31182_s7 + $0x1048] ss:$16 sps:$4 sm:$0xff]   ;;  %v23730_v54 = vld [vmem:[%s31182_s7 + $0x1064] ss:$16 sps:$4 sm:$0xff]   ;;  %v23728_v30 = vld [vmem:[%s31182_s7 + $0x1060] ss:$16 sps:$4 sm:$0xff]  }
 0xb7e   : > { %14829 = vmatprep.subr.bf16.mxu1 %v23661_v55  ;;  %v23731_v22 = vld [vmem:[%s31182_s7 + $0x1068] ss:$16 sps:$4 sm:$0xff]   ;;  %v23736_v39 = vld [vmem:[%s31182_s7 + $0x1084] ss:$16 sps:$4 sm:$0xff]   ;;  %v23739_v55 = vld [vmem:[%s31182_s7 + $0x108c] ss:$16 sps:$4 sm:$0xff]  }
 0xb80   : > { %14789 = vmatpush1.bf16.msra.mxu0 %v23656_v28  ;;  %v23734_v28 = vld [vmem:[%s31182_s7 + $0x1080] ss:$16 sps:$4 sm:$0xff]  }
 0xb81   : > { %14830 = vmatpush1.bf16.msra.mxu1 %v23659_v6  ;;  %14790 = vmatprep.subr.bf16.mxu0 %v23664_v17  ;;  %v23737_v6 = vld [vmem:[%s31182_s7 + $0x1088] ss:$16 sps:$4 sm:$0xff]   ;;  %v23742_v17 = vld [vmem:[%s31182_s7 + $0x10a4] ss:$16 sps:$4 sm:$0xff]  }
 0xb82   : > { %14831 = vmatprep.subr.bf16.mxu1 %v23667_v25  ;;  %v23745_v25 = vld [vmem:[%s31182_s7 + $0x10ac] ss:$16 sps:$4 sm:$0xff]  }
 0xb84   : > { %14791 = vmatpush1.bf16.msra.mxu0 %v23662_v46  ;;  %v23740_v46 = vld [vmem:[%s31182_s7 + $0x10a0] ss:$16 sps:$4 sm:$0xff]  }
 0xb85   : > { %14832 = vmatpush1.bf16.msra.mxu1 %v23665_v1  ;;  %14792 = vmatprep.subr.bf16.mxu0 %v23670_v56  ;;  %v23743_v1 = vld [vmem:[%s31182_s7 + $0x10a8] ss:$16 sps:$4 sm:$0xff]   ;;  %v23748_v56 = vld [vmem:[%s31182_s7 + $0x10c4] ss:$16 sps:$4 sm:$0xff]  }
 0xb86   : > { %14833 = vmatprep.subr.bf16.mxu1 %v23673_v32 }
 0xb88   : > { %14793 = vmatpush1.bf16.msra.mxu0 %v23668_v23  ;;  %v23751_v23 = vld [vmem:[%s31182_s7 + $0x10cc] ss:$16 sps:$4 sm:$0xff]  }
 0xb89   : > { %14834 = vmatpush1.bf16.msra.mxu1 %v23671_v24  ;;  %14794 = vmatprep.subr.bf16.mxu0 %v23676_v61 }
 0xb8a   : > { %14835 = vmatprep.subr.bf16.mxu1 %v23679_v16 }
 0xb8c   : > { %14795 = vmatpush1.bf16.msra.mxu0 %v23674_v15 }
 0xb8d   : > { %14836 = vmatpush1.bf16.msra.mxu1 %v23677_v20  ;;  %14796 = vmatprep.subr.bf16.mxu0 %v23682_v21 }
 0xb8e   : > { %14837 = vmatprep.subr.bf16.mxu1 %v23685_v5 }
 0xb90   : > { %14797 = vmatpush1.bf16.msra.mxu0 %v23680_v29  ;;  %v23746_v29 = vld [vmem:[%s31182_s7 + $0x10c0] ss:$16 sps:$4 sm:$0xff]  }
 0xb91   : > { %14838 = vmatpush1.bf16.msra.mxu1 %v23683_v59  ;;  %14798 = vmatprep.subr.bf16.mxu0 %v23688_v63 }
 0xb92   : > { %14839 = vmatprep.subr.bf16.mxu1 %v23691_v51 }
 0xb94   : > { %14799 = vmatpush1.bf16.msra.mxu0 %v23686_v26  ;;  %v23757_v26 = vld [vmem:[%s31182_s7 + $0x10ec] ss:$16 sps:$4 sm:$0xff]  }
 0xb95   : > { %14840 = vmatpush1.bf16.msra.mxu1 %v23689_v9  ;;  %14800 = vmatprep.subr.bf16.mxu0 %v23694_v10  ;;  %v23755_v9 = vld [vmem:[%s31182_s7 + $0x10e8] ss:$16 sps:$4 sm:$0xff]   ;;  %v23760_v10 = vld [vmem:[%s31182_s7 + $0x1104] ss:$16 sps:$4 sm:$0xff]  }
 0xb96   : > { %14841 = vmatprep.subr.bf16.mxu1 %v23697_v38  ;;  %v23763_v38 = vld [vmem:[%s31182_s7 + $0x110c] ss:$16 sps:$4 sm:$0xff]  }
 0xb98   : > { %14801 = vmatpush1.bf16.msra.mxu0 %v23692_v43  ;;  %v23758_v43 = vld [vmem:[%s31182_s7 + $0x1100] ss:$16 sps:$4 sm:$0xff]  }
 0xb99   : > { %14842 = vmatpush1.bf16.msra.mxu1 %v23695_v4  ;;  %14802 = vmatprep.subr.bf16.mxu0 %v23700_v13  ;;  %v23761_v4 = vld [vmem:[%s31182_s7 + $0x1108] ss:$16 sps:$4 sm:$0xff]   ;;  %v23766_v13 = vld [vmem:[%s31182_s7 + $0x1124] ss:$16 sps:$4 sm:$0xff]  }
 0xb9a   : > { %14843 = vmatprep.subr.bf16.mxu1 %v23703_v42  ;;  %v23769_v42 = vld [vmem:[%s31182_s7 + $0x112c] ss:$16 sps:$4 sm:$0xff]  }
 0xb9c   : > { %14803 = vmatpush1.bf16.msra.mxu0 %v23698_v44  ;;  %v23764_v44 = vld [vmem:[%s31182_s7 + $0x1120] ss:$16 sps:$4 sm:$0xff]  }
 0xb9d   : > { %14844 = vmatpush1.bf16.msra.mxu1 %v23701_v49  ;;  %14804 = vmatprep.subr.bf16.mxu0 %v23706_v11  ;;  %v23767_v49 = vld [vmem:[%s31182_s7 + $0x1128] ss:$16 sps:$4 sm:$0xff]   ;;  %v23772_v11 = vld [vmem:[%s31182_s7 + $0x1144] ss:$16 sps:$4 sm:$0xff]  }
 0xb9e   : > { %14845 = vmatprep.subr.bf16.mxu1 %v23709_v45  ;;  %v23775_v45 = vld [vmem:[%s31182_s7 + $0x114c] ss:$16 sps:$4 sm:$0xff]  }
 0xba0   : > { %14805 = vmatpush1.bf16.msra.mxu0 %v23704_v19  ;;  %v23770_v19 = vld [vmem:[%s31182_s7 + $0x1140] ss:$16 sps:$4 sm:$0xff]  }
 0xba1   : > { %14846 = vmatpush1.bf16.msra.mxu1 %v23707_v62  ;;  %15245 = vmatprep.subr.bf16.mxu0 %v23712_v52  ;;  %v23773_v62 = vld [vmem:[%s31182_s7 + $0x1148] ss:$16 sps:$4 sm:$0xff]   ;;  %v23778_v52 = vld [vmem:[%s31182_s7 + $0x1164] ss:$16 sps:$4 sm:$0xff]  }
 0xba2   : > { %15286 = vmatprep.subr.bf16.mxu1 %v23715_v14  ;;  %v23781_v14 = vld [vmem:[%s31182_s7 + $0x116c] ss:$16 sps:$4 sm:$0xff]  }
 0xba3   : > { %20571 = vmatmul.mubr.msk.bf16.vlgmr.msra.gmra.mrb[104].mxu0 %vm29846_vm8, %v29854_v3 }
 0xba4   : > { %20577 = vmatmul.mubr.msk.bf16.vlgmr.msra.gmra.mrb[108].mxu1 %vm29846_vm8, %v29854_v3  ;;  %15246 = vmatpush1.bf16.msra.mxu0 %v23710_v8  ;;  %v23727_v3 = vld [vmem:[%s31182_s7 + $0x104c] ss:$16 sps:$4 sm:$0xff]   ;;  %v23776_v8 = vld [vmem:[%s31182_s7 + $0x1160] ss:$16 sps:$4 sm:$0xff]  }
 0xba5   : > { %15287 = vmatpush1.bf16.msra.mxu1 %v23713_v40  ;;  %15247 = vmatprep.subr.bf16.mxu0 %v23718_v47  ;;  %v23779_v40 = vld [vmem:[%s31182_s7 + $0x1168] ss:$16 sps:$4 sm:$0xff]   ;;  %v23784_v47 = vld [vmem:[%s31182_s7 + $0x1184] ss:$16 sps:$4 sm:$0xff]  }
 0xba6   : > { %15288 = vmatprep.subr.bf16.mxu1 %v23721_v7  ;;  %15277 = vmatprep.mubr.bf16.mxu0 %v24126_v53  ;;  %v23787_v7 = vld [vmem:[%s31182_s7 + $0x118c] ss:$16 sps:$4 sm:$0xff]  }
 0xba7   : > { %15318 = vmatprep.mubr.bf16.mxu1 %v24126_v53  ;;  %v23733_v53 = vld [vmem:[%s31182_s7 + $0x106c] ss:$16 sps:$4 sm:$0xff]  }
 0xba8   : > { %15248 = vmatpush1.bf16.msra.mxu0 %v23716_v33  ;;  %v23782_v33 = vld [vmem:[%s31182_s7 + $0x1180] ss:$16 sps:$4 sm:$0xff]  }
 0xba9   : > { %15289 = vmatpush1.bf16.msra.mxu1 %v23719_v0  ;;  %15249 = vmatprep.subr.bf16.mxu0 %v23724_v41  ;;  %v23785_v0 = vld [vmem:[%s31182_s7 + $0x1188] ss:$16 sps:$4 sm:$0xff]   ;;  %v23790_v41 = vld [vmem:[%s31182_s7 + $0x11a4] ss:$16 sps:$4 sm:$0xff]  }
 0xbaa   : > { %15290 = vmatprep.subr.bf16.mxu1 %v23727_v3  ;;  %v23793_v3 = vld [vmem:[%s31182_s7 + $0x11ac] ss:$16 sps:$4 sm:$0xff]  }
 0xbac   : > { %15250 = vmatpush1.bf16.msra.mxu0 %v23722_v2  ;;  %v23788_v2 = vld [vmem:[%s31182_s7 + $0x11a0] ss:$16 sps:$4 sm:$0xff]  }
 0xbad   : > { %15291 = vmatpush1.bf16.msra.mxu1 %v23725_v60  ;;  %15251 = vmatprep.subr.bf16.mxu0 %v23730_v54  ;;  %v23791_v60 = vld [vmem:[%s31182_s7 + $0x11a8] ss:$16 sps:$4 sm:$0xff]   ;;  %v23796_v54 = vld [vmem:[%s31182_s7 + $0x11c4] ss:$16 sps:$4 sm:$0xff]  }
 0xbae   : > { %15292 = vmatprep.subr.bf16.mxu1 %v23733_v53  ;;  %v23799_v53 = vld [vmem:[%s31182_s7 + $0x11cc] ss:$16 sps:$4 sm:$0xff]  }
 0xbb0   : > { %15252 = vmatpush1.bf16.msra.mxu0 %v23728_v30  ;;  %v23794_v30 = vld [vmem:[%s31182_s7 + $0x11c0] ss:$16 sps:$4 sm:$0xff]  }
 0xbb1   : > { %15293 = vmatpush1.bf16.msra.mxu1 %v23731_v22  ;;  %15253 = vmatprep.subr.bf16.mxu0 %v23736_v39  ;;  %v23797_v22 = vld [vmem:[%s31182_s7 + $0x11c8] ss:$16 sps:$4 sm:$0xff]   ;;  %v23802_v39 = vld [vmem:[%s31182_s7 + $0x11e4] ss:$16 sps:$4 sm:$0xff]  }
 0xbb2   : > { %15294 = vmatprep.subr.bf16.mxu1 %v23739_v55  ;;  %v23805_v55 = vld [vmem:[%s31182_s7 + $0x11ec] ss:$16 sps:$4 sm:$0xff]  }
 0xbb4   : > { %15254 = vmatpush1.bf16.msra.mxu0 %v23734_v28  ;;  %v23800_v28 = vld [vmem:[%s31182_s7 + $0x11e0] ss:$16 sps:$4 sm:$0xff]  }
 0xbb5   : > { %15295 = vmatpush1.bf16.msra.mxu1 %v23737_v6  ;;  %15255 = vmatprep.subr.bf16.mxu0 %v23742_v17  ;;  %v23803_v6 = vld [vmem:[%s31182_s7 + $0x11e8] ss:$16 sps:$4 sm:$0xff]  }
 0xbb6   : > { %v13387_v32 = vpop.f32.mrb[92].mxu0  ;;  %15296 = vmatprep.subr.bf16.mxu1 %v23745_v25 }
 0xbb7   : > { %v30354_v24 = vadd.f32 %v13387_v32, %v30142_v48  ;;  %v13428_v61 = vpop.f32.mrb[96].mxu1  ;;  %v13389_v16 = vpop.f32.mrb[93].mxu0 }
 0xbb8   : > { %v30357_v15 = vadd.f32 %v13428_v61, %v30145_v58  ;;  %v30360_v20 = vadd.f32 %v13389_v16, %v30148_v18  ;;  %v13430_v21 = vpop.f32.mrb[97].mxu1  ;;  %v13391_v5 = vpop.f32.mrb[94].mxu0  ;;  %15256 = vmatpush1.bf16.msra.mxu0 %v23740_v46  ;;  %v23749_v58 = vld [vmem:[%s31182_s7 + $0x10c8] ss:$16 sps:$4 sm:$0xff]   ;;  %v23754_v18 = vld [vmem:[%s31182_s7 + $0x10e4] ss:$16 sps:$4 sm:$0xff]  }
 0xbb9   : > { %v30366_v59 = vadd.f32 %v13430_v21, %v30154_v57  ;;  %v13432_v48 = vpop.f32.mrb[98].mxu1  ;;  %15297 = vmatpush1.bf16.msra.mxu1 %v23743_v1  ;;  %v13392_v63 = vpop.f32.mrb[95].mxu0  ;;  %15257 = vmatprep.subr.bf16.mxu0 %v23748_v56  ;;  %v23752_v57 = vld [vmem:[%s31182_s7 + $0x10e0] ss:$16 sps:$4 sm:$0xff]   ;;  %v23811_v5 = vld [vmem:[%s31184_s9 + $0xc] ss:$16 sps:$4 sm:$0xff]  }
 0xbba   : > { %v13433_v51 = vpop.f32.mrb[99].mxu1  ;;  %15298 = vmatprep.subr.bf16.mxu1 %v23751_v23  ;;  %v23812_v48 = vld [vmem:[%s31184_s9 + $0x20] ss:$16 sps:$4 sm:$0xff]   ;;  %v23815_v63 = vld [vmem:[%s31184_s9 + $0x28] ss:$16 sps:$4 sm:$0xff]  }
 0xbbb   : > { %v23818_v51 = vld [vmem:[%s31184_s9 + $0x40] ss:$16 sps:$4 sm:$0xff]  }
 0xbbc   : > { %15258 = vmatpush1.bf16.msra.mxu0 %v23746_v29  ;;  %v23814_v29 = vld [vmem:[%s31184_s9 + $0x24] ss:$16 sps:$4 sm:$0xff]  }
 0xbbd   : > { %15299 = vmatpush1.bf16.msra.mxu1 %v23749_v58  ;;  %15259 = vmatprep.subr.bf16.mxu0 %v23754_v18  ;;  %v23820_v58 = vld [vmem:[%s31184_s9 + $0x44] ss:$16 sps:$4 sm:$0xff]   ;;  %v23823_v18 = vld [vmem:[%s31184_s9 + $0x4c] ss:$16 sps:$4 sm:$0xff]  }
 0xbbe   : > { %15300 = vmatprep.subr.bf16.mxu1 %v23757_v26  ;;  %v23821_v26 = vld [vmem:[%s31184_s9 + $0x48] ss:$16 sps:$4 sm:$0xff]  }
 0xbc0   : > { %15260 = vmatpush1.bf16.msra.mxu0 %v23752_v57  ;;  %v23826_v57 = vld [vmem:[%s31184_s9 + $0x64] ss:$16 sps:$4 sm:$0xff]  }
 0xbc1   : > { %15301 = vmatpush1.bf16.msra.mxu1 %v23755_v9  ;;  %15261 = vmatprep.subr.bf16.mxu0 %v23760_v10  ;;  %v23829_v9 = vld [vmem:[%s31184_s9 + $0x6c] ss:$16 sps:$4 sm:$0xff]   ;;  %v23824_v10 = vld [vmem:[%s31184_s9 + $0x60] ss:$16 sps:$4 sm:$0xff]  }
 0xbc2   : > { %15302 = vmatprep.subr.bf16.mxu1 %v23763_v38  ;;  %v23827_v38 = vld [vmem:[%s31184_s9 + $0x68] ss:$16 sps:$4 sm:$0xff]  }
 0xbc4   : > { %15262 = vmatpush1.bf16.msra.mxu0 %v23758_v43  ;;  %v23832_v43 = vld [vmem:[%s31184_s9 + $0x84] ss:$16 sps:$4 sm:$0xff]  }
 0xbc5   : > { %15303 = vmatpush1.bf16.msra.mxu1 %v23761_v4  ;;  %15263 = vmatprep.subr.bf16.mxu0 %v23766_v13  ;;  %v23835_v4 = vld [vmem:[%s31184_s9 + $0x8c] ss:$16 sps:$4 sm:$0xff]   ;;  %v23830_v13 = vld [vmem:[%s31184_s9 + $0x80] ss:$16 sps:$4 sm:$0xff]  }
 0xbc6   : > { %15304 = vmatprep.subr.bf16.mxu1 %v23769_v42  ;;  %v23833_v42 = vld [vmem:[%s31184_s9 + $0x88] ss:$16 sps:$4 sm:$0xff]  }
 0xbc8   : > { %15264 = vmatpush1.bf16.msra.mxu0 %v23764_v44  ;;  %v23838_v44 = vld [vmem:[%s31184_s9 + $0xa4] ss:$16 sps:$4 sm:$0xff]  }
 0xbc9   : > { %15305 = vmatpush1.bf16.msra.mxu1 %v23767_v49  ;;  %15265 = vmatprep.subr.bf16.mxu0 %v23772_v11  ;;  %v23841_v49 = vld [vmem:[%s31184_s9 + $0xac] ss:$16 sps:$4 sm:$0xff]   ;;  %v23836_v11 = vld [vmem:[%s31184_s9 + $0xa0] ss:$16 sps:$4 sm:$0xff]  }
 0xbca   : > { %15306 = vmatprep.subr.bf16.mxu1 %v23775_v45  ;;  %v23839_v45 = vld [vmem:[%s31184_s9 + $0xa8] ss:$16 sps:$4 sm:$0xff]  }
 0xbcc   : > { %15266 = vmatpush1.bf16.msra.mxu0 %v23770_v19  ;;  %v23844_v19 = vld [vmem:[%s31184_s9 + $0xc4] ss:$16 sps:$4 sm:$0xff]  }
 0xbcd   : > { %15307 = vmatpush1.bf16.msra.mxu1 %v23773_v62  ;;  %15267 = vmatprep.subr.bf16.mxu0 %v23778_v52  ;;  %v23847_v62 = vld [vmem:[%s31184_s9 + $0xcc] ss:$16 sps:$4 sm:$0xff]   ;;  %v23842_v52 = vld [vmem:[%s31184_s9 + $0xc0] ss:$16 sps:$4 sm:$0xff]  }
 0xbce   : > { %15308 = vmatprep.subr.bf16.mxu1 %v23781_v14  ;;  %v23845_v14 = vld [vmem:[%s31184_s9 + $0xc8] ss:$16 sps:$4 sm:$0xff]  }
 0xbd0   : > { %15268 = vmatpush1.bf16.msra.mxu0 %v23776_v8  ;;  %v23850_v8 = vld [vmem:[%s31184_s9 + $0xe4] ss:$16 sps:$4 sm:$0xff]  }
 0xbd1   : > { %15309 = vmatpush1.bf16.msra.mxu1 %v23779_v40  ;;  %15269 = vmatprep.subr.bf16.mxu0 %v23784_v47  ;;  %v23853_v40 = vld [vmem:[%s31184_s9 + $0xec] ss:$16 sps:$4 sm:$0xff]   ;;  %v23848_v47 = vld [vmem:[%s31184_s9 + $0xe0] ss:$16 sps:$4 sm:$0xff]  }
 0xbd2   : > { %15310 = vmatprep.subr.bf16.mxu1 %v23787_v7  ;;  %v23851_v7 = vld [vmem:[%s31184_s9 + $0xe8] ss:$16 sps:$4 sm:$0xff]  }
 0xbd4   : > { %15270 = vmatpush1.bf16.msra.mxu0 %v23782_v33  ;;  %v23856_v33 = vld [vmem:[%s31184_s9 + $0x104] ss:$16 sps:$4 sm:$0xff]  }
 0xbd5   : > { %15311 = vmatpush1.bf16.msra.mxu1 %v23785_v0  ;;  %15271 = vmatprep.subr.bf16.mxu0 %v23790_v41  ;;  %v23859_v0 = vld [vmem:[%s31184_s9 + $0x10c] ss:$16 sps:$4 sm:$0xff]   ;;  %v23854_v41 = vld [vmem:[%s31184_s9 + $0x100] ss:$16 sps:$4 sm:$0xff]  }
 0xbd6   : > { %15312 = vmatprep.subr.bf16.mxu1 %v23793_v3  ;;  %v23857_v3 = vld [vmem:[%s31184_s9 + $0x108] ss:$16 sps:$4 sm:$0xff]  }
 0xbd8   : > { %15272 = vmatpush1.bf16.msra.mxu0 %v23788_v2  ;;  %v23862_v2 = vld [vmem:[%s31184_s9 + $0x124] ss:$16 sps:$4 sm:$0xff]  }
 0xbd9   : > { %15313 = vmatpush1.bf16.msra.mxu1 %v23791_v60  ;;  %15273 = vmatprep.subr.bf16.mxu0 %v23796_v54  ;;  %v23865_v60 = vld [vmem:[%s31184_s9 + $0x12c] ss:$16 sps:$4 sm:$0xff]   ;;  %v23860_v54 = vld [vmem:[%s31184_s9 + $0x120] ss:$16 sps:$4 sm:$0xff]  }
 0xbda   : > { %15314 = vmatprep.subr.bf16.mxu1 %v23799_v53  ;;  %v23863_v53 = vld [vmem:[%s31184_s9 + $0x128] ss:$16 sps:$4 sm:$0xff]  }
 0xbdc   : > { %15274 = vmatpush1.bf16.msra.mxu0 %v23794_v30  ;;  %v23868_v30 = vld [vmem:[%s31184_s9 + $0x144] ss:$16 sps:$4 sm:$0xff]  }
 0xbdd   : > { %15315 = vmatpush1.bf16.msra.mxu1 %v23797_v22  ;;  %15275 = vmatprep.subr.bf16.mxu0 %v23802_v39  ;;  %v23871_v22 = vld [vmem:[%s31184_s9 + $0x14c] ss:$16 sps:$4 sm:$0xff]   ;;  %v23866_v39 = vld [vmem:[%s31184_s9 + $0x140] ss:$16 sps:$4 sm:$0xff]  }
 0xbde   : > { %15316 = vmatprep.subr.bf16.mxu1 %v23805_v55  ;;  %v23869_v55 = vld [vmem:[%s31184_s9 + $0x148] ss:$16 sps:$4 sm:$0xff]  }
 0xbe0   : > { %15276 = vmatpush1.bf16.msra.mxu0 %v23800_v28  ;;  %v23874_v28 = vld [vmem:[%s31184_s9 + $0x164] ss:$16 sps:$4 sm:$0xff]  }
 0xbe1   : > { %15317 = vmatpush1.bf16.msra.mxu1 %v23803_v6  ;;  %v23877_v6 = vld [vmem:[%s31184_s9 + $0x16c] ss:$16 sps:$4 sm:$0xff]  }
 0xbe2   : > { %15822 = vmatprep.subr.bf16.mxu1 %v23811_v5  ;;  %v23878_v5 = vld [vmem:[%s31184_s9 + $0x180] ss:$16 sps:$4 sm:$0xff]  }
 0xbe3   : > { %20708 = vmatmul.mubr.msk.bf16.vlgmr.msra.gmra.mrb[108].mxu0 %vm29846_vm8, %v30069_v50 }
 0xbe4   : > { %20711 = vmatmul.mubr.msk.bf16.vlgmr.msra.gmra.mrb[112].mxu1 %vm29846_vm8, %v30069_v50 }
 0xbf6   : > { %v13858_v17 = vpop.f32.mrb[96].mxu0 }
 0xbf7   : > { %v30486_v25 = vadd.f32 %v13858_v17, %v30354_v24  ;;  %v13899_v46 = vpop.f32.mrb[100].mxu1  ;;  %v13860_v1 = vpop.f32.mrb[97].mxu0  ;;  %v23806_v24 = vld [vmem:[%s31184_s9] ss:$16 sps:$4 sm:$0xff]  }
 0xbf8   : > { %v30489_v56 = vadd.f32 %v13899_v46, %v30357_v15  ;;  %v30492_v32 = vadd.f32 %v13860_v1, %v30360_v20  ;;  %v13901_v23 = vpop.f32.mrb[101].mxu1  ;;  %v13862_v61 = vpop.f32.mrb[98].mxu0  ;;  %v23808_v15 = vld [vmem:[%s31184_s9 + $0x4] ss:$16 sps:$4 sm:$0xff]   ;;  %v23809_v20 = vld [vmem:[%s31184_s9 + $0x8] ss:$16 sps:$4 sm:$0xff]  }
 0xbf9   : > { %v30495_v16 = vadd.f32 %v13901_v23, %v30366_v59  ;;  %v13903_v21 = vpop.f32.mrb[102].mxu1  ;;  %v13863_v12 = vpop.f32.mrb[99].mxu0  ;;  %15781 = vmatprep.subr.bf16.mxu0 %v23808_v15  ;;  %v23817_v59 = vld [vmem:[%s31184_s9 + $0x2c] ss:$16 sps:$4 sm:$0xff]   ;;  %15823 = vmatpush1.bf16.msra.mxu1 %v23809_v20  ;;  %v23872_v17 = vld [vmem:[%s31184_s9 + $0x160] ss:$16 sps:$4 sm:$0xff]  }
 0xbfa   : > { %v13904_v50 = vpop.f32.mrb[103].mxu1  ;;  %15782 = vmatpush1.bf16.msra.mxu0 %v23806_v24  ;;  %15824 = vmatprep.subr.bf16.mxu1 %v23817_v59  ;;  %v23875_v46 = vld [vmem:[%s31184_s9 + $0x168] ss:$16 sps:$4 sm:$0xff]   ;;  %v23880_v12 = vld [vmem:[%s31184_s9 + $0x184] ss:$16 sps:$4 sm:$0xff]  }
 0xbfb   : > { %15783 = vmatprep.subr.bf16.mxu0 %v23814_v29 }
 0xbfd   : > { %15825 = vmatpush1.bf16.msra.mxu1 %v23815_v63  ;;  %v23886_v63 = vld [vmem:[%s31184_s9 + $0x1a4] ss:$16 sps:$4 sm:$0xff]  }
 0xbfe   : > { %15784 = vmatpush1.bf16.msra.mxu0 %v23812_v48  ;;  %15826 = vmatprep.subr.bf16.mxu1 %v23823_v18  ;;  %v23887_v18 = vld [vmem:[%s31184_s9 + $0x1a8] ss:$16 sps:$4 sm:$0xff]  }
 0xbff   : > { %15785 = vmatprep.subr.bf16.mxu0 %v23820_v58  ;;  %v23889_v58 = vld [vmem:[%s31184_s9 + $0x1ac] ss:$16 sps:$4 sm:$0xff]  }
 0xc01   : > { %15827 = vmatpush1.bf16.msra.mxu1 %v23821_v26  ;;  %v23895_v26 = vld [vmem:[%s31184_s9 + $0x1cc] ss:$16 sps:$4 sm:$0xff]  }
 0xc02   : > { %15786 = vmatpush1.bf16.msra.mxu0 %v23818_v51  ;;  %15828 = vmatprep.subr.bf16.mxu1 %v23829_v9  ;;  %v23892_v51 = vld [vmem:[%s31184_s9 + $0x1c4] ss:$16 sps:$4 sm:$0xff]   ;;  %v23893_v9 = vld [vmem:[%s31184_s9 + $0x1c8] ss:$16 sps:$4 sm:$0xff]  }
 0xc03   : > { %15787 = vmatprep.subr.bf16.mxu0 %v23826_v57  ;;  %v23890_v57 = vld [vmem:[%s31184_s9 + $0x1c0] ss:$16 sps:$4 sm:$0xff]  }
 0xc05   : > { %15829 = vmatpush1.bf16.msra.mxu1 %v23827_v38  ;;  %v23898_v38 = vld [vmem:[%s31184_s9 + $0x1e4] ss:$16 sps:$4 sm:$0xff]  }
 0xc06   : > { %15788 = vmatpush1.bf16.msra.mxu0 %v23824_v10  ;;  %15830 = vmatprep.subr.bf16.mxu1 %v23835_v4  ;;  %v23896_v10 = vld [vmem:[%s31184_s9 + $0x1e0] ss:$16 sps:$4 sm:$0xff]   ;;  %v23899_v4 = vld [vmem:[%s31184_s9 + $0x1e8] ss:$16 sps:$4 sm:$0xff]  }
 0xc07   : > { %15789 = vmatprep.subr.bf16.mxu0 %v23832_v43  ;;  %v23901_v43 = vld [vmem:[%s31184_s9 + $0x1ec] ss:$16 sps:$4 sm:$0xff]  }
 0xc09   : > { %15831 = vmatpush1.bf16.msra.mxu1 %v23833_v42 }
 0xc0a   : > { %15790 = vmatpush1.bf16.msra.mxu0 %v23830_v13  ;;  %15832 = vmatprep.subr.bf16.mxu1 %v23841_v49  ;;  %v23904_v13 = vld [vmem:[%s31186_s11 + $0x4] ss:$8 sps:$4 sm:$0xff]  }
 0xc0b   : > { %15791 = vmatprep.subr.bf16.mxu0 %v23838_v44 }
 0xc0d   : > { %15833 = vmatpush1.bf16.msra.mxu1 %v23839_v45 }
 0xc0e   : > { %15792 = vmatpush1.bf16.msra.mxu0 %v23836_v11  ;;  %15834 = vmatprep.subr.bf16.mxu1 %v23847_v62 }
 0xc0f   : > { %15793 = vmatprep.subr.bf16.mxu0 %v23844_v19 }
 0xc11   : > { %15835 = vmatpush1.bf16.msra.mxu1 %v23845_v14 }
 0xc12   : > { %15794 = vmatpush1.bf16.msra.mxu0 %v23842_v52  ;;  %15836 = vmatprep.subr.bf16.mxu1 %v23853_v40 }
 0xc13   : > { %15795 = vmatprep.subr.bf16.mxu0 %v23850_v8 }
 0xc15   : > { %15837 = vmatpush1.bf16.msra.mxu1 %v23851_v7  ;;  %v15331_v7 = vld [vmem:[%s31183_s8] sm:$0xf] }
 0xc16   : > { %15796 = vmatpush1.bf16.msra.mxu0 %v23848_v47  ;;  %15838 = vmatprep.subr.bf16.mxu1 %v23859_v0 }
 0xc17   : > { %15797 = vmatprep.subr.bf16.mxu0 %v23856_v33  ;;  %v15336_v33 = vrot.slane %v15331_v7, %v24581_v34 }
 0xc19   : > { %15839 = vmatpush1.bf16.msra.mxu1 %v23857_v3  ;;  %v15340_v3 = vrot.slane %v15331_v7, %v24584_v35 }
 0xc1a   : > { %15798 = vmatpush1.bf16.msra.mxu0 %v23854_v41  ;;  %15840 = vmatprep.subr.bf16.mxu1 %v23865_v60  ;;  %v15344_v41 = vrot.slane %v15331_v7, %v24587_v36 }
 0xc1b   : > { %15799 = vmatprep.subr.bf16.mxu0 %v23862_v2 }
 0xc1d   : > { %15841 = vmatpush1.bf16.msra.mxu1 %v23863_v53  ;;  %v15348_v53 = vrot.slane %v15331_v7, %v24590_v37  ;;  %v23943_v7 = vld [vmem:[%s31186_s11 + $0xd4] ss:$8 sps:$4 sm:$0xff]  }
 0xc1e   : > { %15800 = vmatpush1.bf16.msra.mxu0 %v23860_v54  ;;  %15842 = vmatprep.subr.bf16.mxu1 %v23871_v22 }
 0xc1f   : > { %15801 = vmatprep.subr.bf16.mxu0 %v23868_v30 }
 0xc21   : > { %15843 = vmatpush1.bf16.msra.mxu1 %v23869_v55 }
 0xc22   : > { %15802 = vmatpush1.bf16.msra.mxu0 %v23866_v39  ;;  %15844 = vmatprep.subr.bf16.mxu1 %v23877_v6 }
 0xc23   : > { %15803 = vmatprep.subr.bf16.mxu0 %v23874_v28 }
 0xc25   : > { %15845 = vmatpush1.bf16.msra.mxu1 %v23875_v46 }
 0xc26   : > { %15804 = vmatpush1.bf16.msra.mxu0 %v23872_v17 }
 0xc27   : > { %15805 = vmatprep.subr.bf16.mxu0 %v23880_v12 }
 0xc2a   : > { %15806 = vmatpush1.bf16.msra.mxu0 %v23878_v5 }
 0xc2b   : > { %15807 = vmatprep.subr.bf16.mxu0 %v23886_v63 }
 0xc36   : > { %v14336_v1 = vpop.f32.mrb[100].mxu0 }
 0xc37   : > { %v14384_v23 = vadd.f32 %v14336_v1, %v30486_v25  ;;  %v14377_v61 = vpop.f32.mrb[104].mxu1  ;;  %v14338_v21 = vpop.f32.mrb[101].mxu0  ;;  %v23881_v25 = vld [vmem:[%s31184_s9 + $0x188] ss:$16 sps:$4 sm:$0xff]  }
 0xc38   : > { %v14386_v50 = vadd.f32 %v14377_v61, %v30489_v56  ;;  %v14385_v24 = vadd.f32 %v14338_v21, %v30492_v32  ;;  %v14379_v15 = vpop.f32.mrb[105].mxu1  ;;  %v14340_v20 = vpop.f32.mrb[102].mxu0  ;;  %v23883_v56 = vld [vmem:[%s31184_s9 + $0x18c] ss:$16 sps:$4 sm:$0xff]  }
 0xc39   : > { %v14387_v29 = vadd.f32 %v14379_v15, %v30495_v16  ;;  %v14381_v59 = vpop.f32.mrb[106].mxu1  ;;  %v14341_v48 = vpop.f32.mrb[103].mxu0  ;;  %15846 = vmatprep.subr.bf16.mxu1 %v23883_v56  ;;  %v23884_v16 = vld [vmem:[%s31184_s9 + $0x1a0] ss:$16 sps:$4 sm:$0xff]  }
 0xc3a   : > { %v14382_v32 = vpop.f32.mrb[107].mxu1  ;;  %15847 = vmatpush1.bf16.msra.mxu1 %v23881_v25  ;;  %15808 = vmatpush1.bf16.msra.mxu0 %v23884_v16  ;;  %v23905_v16 = vld [vmem:[%s31186_s11 + $0x10] ss:$8 sps:$4 sm:$0xff]  }
 0xc3b   : > { %15848 = vmatprep.subr.bf16.mxu1 %v23889_v58  ;;  %15809 = vmatprep.subr.bf16.mxu0 %v23892_v51  ;;  %v23902_v32 = vld [vmem:[%s31186_s11] ss:$8 sps:$4 sm:$0xff]   ;;  %v23907_v58 = vld [vmem:[%s31186_s11 + $0x14] ss:$8 sps:$4 sm:$0xff]  }
 0xc3c   : > { %v23908_v51 = vld [vmem:[%s31186_s11 + $0x20] ss:$8 sps:$4 sm:$0xff]  }
 0xc3e   : > { %15849 = vmatpush1.bf16.msra.mxu1 %v23887_v18  ;;  %15810 = vmatpush1.bf16.msra.mxu0 %v23890_v57  ;;  %v23910_v18 = vld [vmem:[%s31186_s11 + $0x24] ss:$8 sps:$4 sm:$0xff]   ;;  %v23911_v57 = vld [vmem:[%s31186_s11 + $0x30] ss:$8 sps:$4 sm:$0xff]  }
 0xc3f   : > { %15850 = vmatprep.subr.bf16.mxu1 %v23895_v26  ;;  %15811 = vmatprep.subr.bf16.mxu0 %v23898_v38  ;;  %v23913_v26 = vld [vmem:[%s31186_s11 + $0x34] ss:$8 sps:$4 sm:$0xff]  }
 0xc40   : > { %v23919_v38 = vld [vmem:[%s31186_s11 + $0x54] ss:$8 sps:$4 sm:$0xff]  }
 0xc42   : > { %15851 = vmatpush1.bf16.msra.mxu1 %v23893_v9  ;;  %15812 = vmatpush1.bf16.msra.mxu0 %v23896_v10  ;;  %v23916_v9 = vld [vmem:[%s31186_s11 + $0x44] ss:$8 sps:$4 sm:$0xff]   ;;  %v23914_v10 = vld [vmem:[%s31186_s11 + $0x40] ss:$8 sps:$4 sm:$0xff]  }
 0xc43   : > { %15852 = vmatprep.subr.bf16.mxu1 %v23901_v43  ;;  %16267 = vmatprep.subr.bf16.mxu0 %v23904_v13  ;;  %v23917_v43 = vld [vmem:[%s31186_s11 + $0x50] ss:$8 sps:$4 sm:$0xff]   ;;  %v23920_v13 = vld [vmem:[%s31186_s11 + $0x60] ss:$8 sps:$4 sm:$0xff]  }
 0xc46   : > { %15853 = vmatpush1.bf16.msra.mxu1 %v23899_v4  ;;  %v23922_v4 = vld [vmem:[%s31186_s11 + $0x64] ss:$8 sps:$4 sm:$0xff]  }
 0xc76   : > { %v14808_v42 = vpop.f32.mrb[104].mxu0 }
 0xc77   : > { %v14856_v44 = vadd.f32 %v14808_v42, %v14384_v23  ;;  %v14849_v49 = vpop.f32.mrb[108].mxu1  ;;  %v14810_v11 = vpop.f32.mrb[105].mxu0  ;;  %v23925_v42 = vld [vmem:[%s31186_s11 + $0x74] ss:$8 sps:$4 sm:$0xff]  }
 0xc78   : > { %v14858_v45 = vadd.f32 %v14849_v49, %v14386_v50  ;;  %v14857_v19 = vadd.f32 %v14810_v11, %v14385_v24  ;;  %v14851_v62 = vpop.f32.mrb[109].mxu1  ;;  %v14812_v52 = vpop.f32.mrb[106].mxu0  ;;  %v23928_v49 = vld [vmem:[%s31186_s11 + $0x84] ss:$8 sps:$4 sm:$0xff]   ;;  %v23926_v11 = vld [vmem:[%s31186_s11 + $0x80] ss:$8 sps:$4 sm:$0xff]  }
 0xc79   : > { %v14859_v14 = vadd.f32 %v14851_v62, %v14387_v29  ;;  %v14853_v8 = vpop.f32.mrb[110].mxu1  ;;  %v14813_v40 = vpop.f32.mrb[107].mxu0  ;;  %v23934_v62 = vld [vmem:[%s31186_s11 + $0xa4] ss:$8 sps:$4 sm:$0xff]   ;;  %v23932_v52 = vld [vmem:[%s31186_s11 + $0xa0] ss:$8 sps:$4 sm:$0xff]  }
 0xc7a   : > { %v14854_v47 = vpop.f32.mrb[111].mxu1  ;;  %v23935_v8 = vld [vmem:[%s31186_s11 + $0xb0] ss:$8 sps:$4 sm:$0xff]   ;;  %v23940_v40 = vld [vmem:[%s31186_s11 + $0xc4] ss:$8 sps:$4 sm:$0xff]  }
 0xc7b   : > { %v23938_v47 = vld [vmem:[%s31186_s11 + $0xc0] ss:$8 sps:$4 sm:$0xff]  }
 0xcb6   : > { %v15279_v0 = vpop.f32.mrb[108].mxu0 }
 0xcb7   : > { %v15327_v2 = vadd.f32 %v15279_v0, %v14856_v44  ;;  %v15320_v60 = vpop.f32.mrb[112].mxu1  ;;  %v15281_v54 = vpop.f32.mrb[109].mxu0  ;;  %v23923_v44 = vld [vmem:[%s31186_s11 + $0x70] ss:$8 sps:$4 sm:$0xff]   ;;  %v23946_v0 = vld [vmem:[%s31186_s11 + $0xe4] ss:$8 sps:$4 sm:$0xff]  }
 0xcb8   : > { %v15329_v30 = vadd.f32 %v15320_v60, %v14858_v45  ;;  %v15328_v22 = vadd.f32 %v15281_v54, %v14857_v19  ;;  %v15322_v39 = vpop.f32.mrb[113].mxu1  ;;  %v15283_v55 = vpop.f32.mrb[110].mxu0  ;;  %v23931_v45 = vld [vmem:[%s31186_s11 + $0x94] ss:$8 sps:$4 sm:$0xff]   ;;  %v23929_v19 = vld [vmem:[%s31186_s11 + $0x90] ss:$8 sps:$4 sm:$0xff]  }
 0xcb9   : > { %v15353_v28 = vadd.f32 %v15336_v33, %v15327_v2  ;;  %v15330_v6 = vadd.f32 %v15322_v39, %v14859_v14  ;;  %v15324_v17 = vpop.f32.mrb[114].mxu1  ;;  %v15284_v46 = vpop.f32.mrb[111].mxu0  ;;  %v23937_v14 = vld [vmem:[%s31186_s11 + $0xb4] ss:$8 sps:$4 sm:$0xff]   ;;  %v23941_v33 = vld [vmem:[%s31186_s11 + $0xd0] ss:$8 sps:$4 sm:$0xff]  }
 0xcba   : > { %v15355_v1 = vadd.f32 %v15344_v41, %v15329_v30  ;;  %v15354_v23 = vadd.f32 %v15340_v3, %v15328_v22  ;;  %v15325_v61 = vpop.f32.mrb[115].mxu1  ;;  %v23944_v41 = vld [vmem:[%s31186_s11 + $0xe0] ss:$8 sps:$4 sm:$0xff]   ;;  %v23949_v3 = vld [vmem:[%s31186_s11 + $0xf4] ss:$8 sps:$4 sm:$0xff]  }
 0xcbb   : > { %v15357_v21 = vmax.f32 %v15353_v28, 0.0  ;;  %v15356_v12 = vadd.f32 %v15348_v53, %v15330_v6  ;;  %v23947_v2 = vld [vmem:[%s31186_s11 + $0xf0] ss:$8 sps:$4 sm:$0xff]   ;;  %v23952_v60 = vld [vmem:[%s31186_s11 + $0x104] ss:$8 sps:$4 sm:$0xff]  }
 0xcbc   : > { %v15359_v50 = vmax.f32 %v15355_v1, 0.0  ;;  %v15358_v24 = vmax.f32 %v15354_v23, 0.0  ;;  %v23998_v54 = vld [vmem:[%s31188_s13] ss:$20 sps:$4 sm:$0xff]   ;;  %v24000_v53 = vld [vmem:[%s31188_s13 + $0x4] ss:$20 sps:$4 sm:$0xff]  }
 0xcbd   : > { %v15360_v15 = vmax.f32 %v15356_v12, 0.0  ;;  %v24003_v30 = vld [vmem:[%s31188_s13 + $0x2c] ss:$20 sps:$4 sm:$0xff]   ;;  %16892 = vmatprep.subr.bf16.mxu1 %v24000_v53  ;;  %v24001_v22 = vld [vmem:[%s31188_s13 + $0x28] ss:$20 sps:$4 sm:$0xff]  }
 0xcbe   : > { %v15361_v20 = vmax.f32 %v15357_v21, %v15359_v50  ;;  %v24006_v39 = vld [vmem:[%s31188_s13 + $0x54] ss:$20 sps:$4 sm:$0xff]   ;;  %v24004_v55 = vld [vmem:[%s31188_s13 + $0x50] ss:$20 sps:$4 sm:$0xff]   ;;  %v24007_v6 = vld [vmem:[%s31188_s13 + $0x78] ss:$20 sps:$4 sm:$0xff]  }
 0xcbf   : > { %v15362_v5 = vmax.f32 %v15358_v24, %v15360_v15  ;;  %v24009_v28 = vld [vmem:[%s31188_s13 + $0x7c] ss:$20 sps:$4 sm:$0xff]   ;;  %v24012_v17 = vld [vmem:[%s31188_s13 + $0xa4] ss:$20 sps:$4 sm:$0xff]   ;;  %v24010_v46 = vld [vmem:[%s31188_s13 + $0xa0] ss:$20 sps:$4 sm:$0xff]  }
 0xcc0   : > { %v15365_v25 = vrot.slane %v15361_v20, 1  ;;  %v24015_v1 = vld [vmem:[%s31188_s13 + $0xcc] ss:$20 sps:$4 sm:$0xff]   ;;  %v24013_v23 = vld [vmem:[%s31188_s13 + $0xc8] ss:$20 sps:$4 sm:$0xff]  }
 0xcc1   : > { %v15366_v29 = vrot.slane %v15362_v5, 1  ;;  %v24018_v61 = vld [vmem:[%s31188_s13 + $0xf4] ss:$20 sps:$4 sm:$0xff]   ;;  %v24016_v21 = vld [vmem:[%s31188_s13 + $0xf0] ss:$20 sps:$4 sm:$0xff]  }
 0xcc2   : > { %v15369_v59 = vmax.f32 %v15361_v20, %v15365_v25  ;;  %v24021_v12 = vld [vmem:[%s31188_s13 + $0x11c] ss:$20 sps:$4 sm:$0xff]   ;;  %v24019_v50 = vld [vmem:[%s31188_s13 + $0x118] ss:$20 sps:$4 sm:$0xff]   ;;  %v24022_v15 = vld [vmem:[%s31188_s13 + $0x140] ss:$20 sps:$4 sm:$0xff]  }
 0xcc3   : > { %v15370_v48 = vmax.f32 %v15362_v5, %v15366_v29  ;;  %v24024_v24 = vld [vmem:[%s31188_s13 + $0x144] ss:$20 sps:$4 sm:$0xff]   ;;  %v24029_v20 = vld [vmem:[%s31188_s13 + $0x16c] ss:$20 sps:$4 sm:$0xff]   ;;  %v24027_v5 = vld [vmem:[%s31188_s13 + $0x168] ss:$20 sps:$4 sm:$0xff]  }
 0xcc4   : > { %v15373_v63 = vpack.c.bf16 %v15369_v59, %v15369_v59  ;;  %v24034_v25 = vld [vmem:[%s31188_s13 + $0x194] ss:$20 sps:$4 sm:$0xff]   ;;  %v24032_v29 = vld [vmem:[%s31188_s13 + $0x190] ss:$20 sps:$4 sm:$0xff]  }
 0xcc5   : > { %v15374_v56 = vpack.c.bf16 %v15370_v48, %v15370_v48  ;;  %v24039_v59 = vld [vmem:[%s31188_s13 + $0x1bc] ss:$20 sps:$4 sm:$0xff]   ;;  %v24037_v48 = vld [vmem:[%s31188_s13 + $0x1b8] ss:$20 sps:$4 sm:$0xff]  }
 0xcc6   : > { %v23965_v53 = vld [vmem:[%s31186_s11 + $0x150] ss:$8 sps:$4 sm:$0xff]  }
 0xcc7   : > { %15813 = vmatprep.mubr.bf16.mxu0 %v15374_v56  ;;  %15854 = vmatprep.mubr.bf16.mxu1 %v15374_v56  ;;  %v24044_v56 = vld [vmem:[%s31188_s13 + $0x1e4] ss:$20 sps:$4 sm:$0xff]  }
 0xcc8   : > { %15814 = vmatmul.mubr.bf16.vlgmr.msra.gmra.mrb[112].mxu0 %v15373_v63  ;;  %15855 = vmatmul.mubr.bf16.vlgmr.msra.gmra.mrb[116].mxu1 %v15373_v63  ;;  %v24049_v63 = vld [vmem:[%s31188_s13 + $0x20c] ss:$20 sps:$4 sm:$0xff]  }
 0xcc9   : > { %16268 = vmatpush1.bf16.msra.mxu0 %v23902_v32  ;;  %16893 = vmatpush1.bf16.msra.mxu1 %v23998_v54  ;;  %v24042_v32 = vld [vmem:[%s31188_s13 + $0x1e0] ss:$20 sps:$4 sm:$0xff]  }
 0xcca   : > { %16269 = vmatprep.subr.bf16.mxu0 %v23907_v58  ;;  %16894 = vmatprep.subr.bf16.mxu1 %v24003_v30  ;;  %v30883_v58 = vld [vmem:[%s31185_s10] sm:$0xf]  ;;  %v23967_v54 = vld [vmem:[%s31186_s11 + $0x154] ss:$8 sps:$4 sm:$0xff]   ;;  %v23970_v30 = vld [vmem:[%s31186_s11 + $0x164] ss:$8 sps:$4 sm:$0xff]  }
 0xccd   : > { %16270 = vmatpush1.bf16.msra.mxu0 %v23905_v16  ;;  %16895 = vmatpush1.bf16.msra.mxu1 %v24001_v22  ;;  %v24047_v16 = vld [vmem:[%s31188_s13 + $0x208] ss:$20 sps:$4 sm:$0xff]  }
 0xcce   : > { %16271 = vmatprep.subr.bf16.mxu0 %v23910_v18  ;;  %16896 = vmatprep.subr.bf16.mxu1 %v24006_v39  ;;  %v15764_v18 = vrot.slane %v30883_v58, %v24581_v34  ;;  %v23968_v22 = vld [vmem:[%s31186_s11 + $0x160] ss:$8 sps:$4 sm:$0xff]   ;;  %v23973_v39 = vld [vmem:[%s31186_s11 + $0x174] ss:$8 sps:$4 sm:$0xff]  }
 0xcd1   : > { %16272 = vmatpush1.bf16.msra.mxu0 %v23908_v51  ;;  %16897 = vmatpush1.bf16.msra.mxu1 %v24004_v55  ;;  %v15768_v51 = vrot.slane %v30883_v58, %v24584_v35  ;;  %v23971_v55 = vld [vmem:[%s31186_s11 + $0x170] ss:$8 sps:$4 sm:$0xff]  }
 0xcd2   : > { %16273 = vmatprep.subr.bf16.mxu0 %v23913_v26  ;;  %16898 = vmatprep.subr.bf16.mxu1 %v24009_v28  ;;  %v15776_v26 = vrot.slane %v30883_v58, %v24590_v37  ;;  %v23976_v28 = vld [vmem:[%s31186_s11 + $0x184] ss:$8 sps:$4 sm:$0xff]  }
 0xcd5   : > { %16274 = vmatpush1.bf16.msra.mxu0 %v23911_v57  ;;  %16899 = vmatpush1.bf16.msra.mxu1 %v24007_v6  ;;  %v23974_v6 = vld [vmem:[%s31186_s11 + $0x180] ss:$8 sps:$4 sm:$0xff]  }
 0xcd6   : > { %16275 = vmatprep.subr.bf16.mxu0 %v23916_v9  ;;  %16900 = vmatprep.subr.bf16.mxu1 %v24012_v17  ;;  %v23979_v17 = vld [vmem:[%s31186_s11 + $0x194] ss:$8 sps:$4 sm:$0xff]  }
 0xcd9   : > { %16276 = vmatpush1.bf16.msra.mxu0 %v23914_v10  ;;  %16901 = vmatpush1.bf16.msra.mxu1 %v24010_v46  ;;  %v23977_v46 = vld [vmem:[%s31186_s11 + $0x190] ss:$8 sps:$4 sm:$0xff]  }
 0xcda   : > { %16277 = vmatprep.subr.bf16.mxu0 %v23919_v38  ;;  %16902 = vmatprep.subr.bf16.mxu1 %v24015_v1  ;;  %v23982_v1 = vld [vmem:[%s31186_s11 + $0x1a4] ss:$8 sps:$4 sm:$0xff]  }
 0xcdd   : > { %16278 = vmatpush1.bf16.msra.mxu0 %v23917_v43  ;;  %16903 = vmatpush1.bf16.msra.mxu1 %v24013_v23  ;;  %v23980_v23 = vld [vmem:[%s31186_s11 + $0x1a0] ss:$8 sps:$4 sm:$0xff]  }
 0xcde   : > { %16279 = vmatprep.subr.bf16.mxu0 %v23922_v4  ;;  %16904 = vmatprep.subr.bf16.mxu1 %v24018_v61  ;;  %v23985_v61 = vld [vmem:[%s31186_s11 + $0x1b4] ss:$8 sps:$4 sm:$0xff]  }
 0xce1   : > { %16280 = vmatpush1.bf16.msra.mxu0 %v23920_v13  ;;  %16905 = vmatpush1.bf16.msra.mxu1 %v24016_v21  ;;  %v23983_v21 = vld [vmem:[%s31186_s11 + $0x1b0] ss:$8 sps:$4 sm:$0xff]  }
 0xce2   : > { %16281 = vmatprep.subr.bf16.mxu0 %v23925_v42  ;;  %16906 = vmatprep.subr.bf16.mxu1 %v24021_v12  ;;  %v23988_v12 = vld [vmem:[%s31186_s11 + $0x1c4] ss:$8 sps:$4 sm:$0xff]  }
 0xce5   : > { %16282 = vmatpush1.bf16.msra.mxu0 %v23923_v44  ;;  %16907 = vmatpush1.bf16.msra.mxu1 %v24019_v50  ;;  %v23986_v50 = vld [vmem:[%s31186_s11 + $0x1c0] ss:$8 sps:$4 sm:$0xff]  }
 0xce6   : > { %16283 = vmatprep.subr.bf16.mxu0 %v23928_v49  ;;  %16908 = vmatprep.subr.bf16.mxu1 %v24024_v24  ;;  %v23991_v24 = vld [vmem:[%s31186_s11 + $0x1d4] ss:$8 sps:$4 sm:$0xff]  }
 0xce9   : > { %16284 = vmatpush1.bf16.msra.mxu0 %v23926_v11  ;;  %16909 = vmatpush1.bf16.msra.mxu1 %v24022_v15  ;;  %v23989_v15 = vld [vmem:[%s31186_s11 + $0x1d0] ss:$8 sps:$4 sm:$0xff]  }
 0xcea   : > { %16285 = vmatprep.subr.bf16.mxu0 %v23931_v45  ;;  %16910 = vmatprep.subr.bf16.mxu1 %v24029_v20  ;;  %v15772_v20 = vrot.slane %v30883_v58, %v24587_v36 }
 0xced   : > { %16286 = vmatpush1.bf16.msra.mxu0 %v23929_v19  ;;  %16911 = vmatpush1.bf16.msra.mxu1 %v24027_v5  ;;  %v23994_v5 = vld [vmem:[%s31186_s11 + $0x1e4] ss:$8 sps:$4 sm:$0xff]  }
 0xcee   : > { %16287 = vmatprep.subr.bf16.mxu0 %v23934_v62  ;;  %16912 = vmatprep.subr.bf16.mxu1 %v24034_v25  ;;  %v23992_v25 = vld [vmem:[%s31186_s11 + $0x1e0] ss:$8 sps:$4 sm:$0xff]  }
 0xcf1   : > { %16288 = vmatpush1.bf16.msra.mxu0 %v23932_v52  ;;  %16913 = vmatpush1.bf16.msra.mxu1 %v24032_v29 }
 0xcf2   : > { %16289 = vmatprep.subr.bf16.mxu0 %v23937_v14  ;;  %16914 = vmatprep.subr.bf16.mxu1 %v24039_v59  ;;  %v23950_v14 = vld [vmem:[%s31186_s11 + $0x100] ss:$8 sps:$4 sm:$0xff]   ;;  %v23997_v59 = vld [vmem:[%s31186_s11 + $0x1f4] ss:$8 sps:$4 sm:$0xff]  }
 0xcf5   : > { %16290 = vmatpush1.bf16.msra.mxu0 %v23935_v8  ;;  %16915 = vmatpush1.bf16.msra.mxu1 %v24037_v48  ;;  %v23995_v48 = vld [vmem:[%s31186_s11 + $0x1f0] ss:$8 sps:$4 sm:$0xff]  }
 0xcf6   : > { %16291 = vmatprep.subr.bf16.mxu0 %v23940_v40  ;;  %16916 = vmatprep.subr.bf16.mxu1 %v24044_v56  ;;  %v23955_v40 = vld [vmem:[%s31186_s11 + $0x114] ss:$8 sps:$4 sm:$0xff]  }
 0xcf9   : > { %16292 = vmatpush1.bf16.msra.mxu0 %v23938_v47  ;;  %16917 = vmatpush1.bf16.msra.mxu1 %v24042_v32  ;;  %v24025_v32 = vld [vmem:[%s31188_s13 + $0x150] ss:$20 sps:$4 sm:$0xff]  }
 0xcfa   : > { %16293 = vmatprep.subr.bf16.mxu0 %v23943_v7  ;;  %16918 = vmatprep.subr.bf16.mxu1 %v24049_v63  ;;  %v23953_v7 = vld [vmem:[%s31186_s11 + $0x110] ss:$8 sps:$4 sm:$0xff]  }
 0xcfb   : > { %v24026_v63 = vld [vmem:[%s31188_s13 + $0x10] ss:$20 sps:$4 sm:$0xff]  }
 0xcfd   : > { %16294 = vmatpush1.bf16.msra.mxu0 %v23941_v33  ;;  %16919 = vmatpush1.bf16.msra.mxu1 %v24047_v16  ;;  %v23958_v33 = vld [vmem:[%s31186_s11 + $0x124] ss:$8 sps:$4 sm:$0xff]  }
 0xcfe   : > { %16295 = vmatprep.subr.bf16.mxu0 %v23946_v0  ;;  %v23956_v0 = vld [vmem:[%s31186_s11 + $0x120] ss:$8 sps:$4 sm:$0xff]   ;;  %v24030_v16 = vld [vmem:[%s31188_s13 + $0x178] ss:$20 sps:$4 sm:$0xff]  }
 0xd01   : > { %16296 = vmatpush1.bf16.msra.mxu0 %v23944_v41  ;;  %v23961_v41 = vld [vmem:[%s31186_s11 + $0x134] ss:$8 sps:$4 sm:$0xff]  }
 0xd02   : > { %16297 = vmatprep.subr.bf16.mxu0 %v23949_v3  ;;  %v23959_v3 = vld [vmem:[%s31186_s11 + $0x130] ss:$8 sps:$4 sm:$0xff]  }
 0xd05   : > { %16298 = vmatpush1.bf16.msra.mxu0 %v23947_v2  ;;  %v23964_v2 = vld [vmem:[%s31186_s11 + $0x144] ss:$8 sps:$4 sm:$0xff]  }
 0xd06   : > { %16308 = vmatprep.subr.bf16.mxu0 %v23952_v60  ;;  %v23962_v60 = vld [vmem:[%s31186_s11 + $0x140] ss:$8 sps:$4 sm:$0xff]  }
 0xd9b   : > { %v15815_v57 = vpop.f32.mrb[112].mxu0  ;;  %v30894_v9 = vpop.f32.mrb[116].mxu1 }
 0xd9c   : > { %v15816_v10 = vadd.f32 %v15815_v57, %v15764_v18  ;;  %v15817_v38 = vpop.f32.mrb[113].mxu0  ;;  %v15858_v43 = vpop.f32.mrb[117].mxu1  ;;  %v15857_v29 = vadd.f32 %v30894_v9, %v15772_v20  ;;  %v24031_v18 = vld [vmem:[%s31188_s13 + $0x38] ss:$20 sps:$4 sm:$0xff]   ;;  %v24040_v57 = vld [vmem:[%s31188_s13 + $0x1c8] ss:$20 sps:$4 sm:$0xff]  }
 0xd9d   : > { %v15818_v4 = vadd.f32 %v15817_v38, %v15768_v51  ;;  %v15859_v13 = vadd.f32 %v15858_v43, %v15776_v26  ;;  %v15819_v42 = vpop.f32.mrb[114].mxu0  ;;  %v15860_v44 = vpop.f32.mrb[118].mxu1  ;;  %v24035_v51 = vld [vmem:[%s31188_s13 + $0x1a0] ss:$20 sps:$4 sm:$0xff]   ;;  %v24041_v9 = vld [vmem:[%s31188_s13 + $0x88] ss:$20 sps:$4 sm:$0xff]  }
 0xd9e   : > { %v15863_v49 = vmax.f32 %v15816_v10, 0.0  ;;  %v15820_v11 = vpop.f32.mrb[115].mxu0  ;;  %v15861_v45 = vpop.f32.mrb[119].mxu1  ;;  %v15865_v56 = vmax.f32 %v15857_v29, 0.0  ;;  %v24036_v26 = vld [vmem:[%s31188_s13 + $0x60] ss:$20 sps:$4 sm:$0xff]  }
 0xd9f   : > { %v15864_v19 = vmax.f32 %v15818_v4, 0.0  ;;  %v15866_v62 = vmax.f32 %v15859_v13, 0.0  ;;  %v24045_v10 = vld [vmem:[%s31188_s13 + $0x1f0] ss:$20 sps:$4 sm:$0xff]   ;;  %v24050_v43 = vld [vmem:[%s31188_s13 + $0x218] ss:$20 sps:$4 sm:$0xff]  }
 0xda0   : > { %v15867_v8 = vpack.c.bf16 %v15863_v49, %v15863_v49  ;;  %v15869_v58 = vpack.c.bf16 %v15865_v56, %v15865_v56  ;;  %v24046_v38 = vld [vmem:[%s31188_s13 + $0xb0] ss:$20 sps:$4 sm:$0xff]   ;;  %v24051_v4 = vld [vmem:[%s31188_s13 + $0xd8] ss:$20 sps:$4 sm:$0xff]   ;;  %v24054_v13 = vld [vmem:[%s31188_s13 + $0x234] ss:$20 sps:$4 sm:$0xff]  }
 0xda1   : > { %v15868_v52 = vpack.c.bf16 %v15864_v19, %v15864_v19  ;;  %v15870_v47 = vpack.c.bf16 %v15866_v62, %v15866_v62  ;;  %v24052_v42 = vld [vmem:[%s31188_s13 + $0x230] ss:$20 sps:$4 sm:$0xff]   ;;  %v24055_v44 = vld [vmem:[%s31188_s13 + $0x240] ss:$20 sps:$4 sm:$0xff]   ;;  %16920 = vmatprep.subr.bf16.mxu1 %v24054_v13  ;;  %v24057_v45 = vld [vmem:[%s31188_s13 + $0x258] ss:$20 sps:$4 sm:$0xff]  }
 0xda2   : > { %v24056_v49 = vld [vmem:[%s31188_s13 + $0x100] ss:$20 sps:$4 sm:$0xff]   ;;  %16921 = vmatpush1.bf16.msra.mxu1 %v24052_v42  ;;  %v24059_v11 = vld [vmem:[%s31188_s13 + $0x25c] ss:$20 sps:$4 sm:$0xff]  }
 0xda3   : > { %16299 = vmatprep.mubr.bf16.mxu0 %v15868_v52  ;;  %v24060_v19 = vld [vmem:[%s31188_s13 + $0x268] ss:$20 sps:$4 sm:$0xff]   ;;  %16922 = vmatprep.subr.bf16.mxu1 %v24059_v11  ;;  %v24064_v52 = vld [vmem:[%s31188_s13 + $0xc] ss:$20 sps:$4 sm:$0xff]  }
 0xda4   : > { %16300 = vmatmul.mubr.bf16.vlgmr.msra.gmra.mrb[116].mxu0 %v15867_v8  ;;  %v24061_v62 = vld [vmem:[%s31188_s13 + $0x128] ss:$20 sps:$4 sm:$0xff]   ;;  %v24095_v56 = vld [vmem:[%s31188_s13 + $0x1c0] ss:$20 sps:$4 sm:$0xff]  }
 0xda5   : > { %16309 = vmatpush1.bf16.msra.mxu0 %v23950_v14  ;;  %16340 = vmatprep.mubr.bf16.mxu0 %v15870_v47  ;;  %v15935_v14 = vld [vmem:[%s31187_s12] sm:$0x3]  ;;  %v24086_v20 = vld [vmem:[%s31188_s13 + $0x148] ss:$20 sps:$4 sm:$0xff]  }
 0xda6   : > { %16310 = vmatprep.subr.bf16.mxu0 %v23955_v40  ;;  %16923 = vmatpush1.bf16.msra.mxu1 %v24057_v45  ;;  %v16260_v8 = vrot.slane %v15935_v14, %v24581_v34  ;;  %v16264_v40 = vrot.slane %v15935_v14, %v24584_v35  ;;  %v24094_v29 = vld [vmem:[%s31188_s13 + $0x19c] ss:$20 sps:$4 sm:$0xff]  }
 0xda7   : > { %16933 = vmatprep.subr.bf16.mxu1 %v24064_v52 }
 0xda9   : > { %16311 = vmatpush1.bf16.msra.mxu0 %v23953_v7 }
 0xdaa   : > { %16312 = vmatprep.subr.bf16.mxu0 %v23958_v33 }
 0xdad   : > { %16313 = vmatpush1.bf16.msra.mxu0 %v23956_v0 }
 0xdae   : > { %16314 = vmatprep.subr.bf16.mxu0 %v23961_v41 }
 0xdb1   : > { %16315 = vmatpush1.bf16.msra.mxu0 %v23959_v3 }
 0xdb2   : > { %16316 = vmatprep.subr.bf16.mxu0 %v23964_v2 }
 0xdb5   : > { %16317 = vmatpush1.bf16.msra.mxu0 %v23962_v60 }
 0xdb6   : > { %16318 = vmatprep.subr.bf16.mxu0 %v23967_v54 }
 0xdb9   : > { %16319 = vmatpush1.bf16.msra.mxu0 %v23965_v53  ;;  %v24062_v53 = vld [vmem:[%s31188_s13 + $0x8] ss:$20 sps:$4 sm:$0xff]  }
 0xdba   : > { %16320 = vmatprep.subr.bf16.mxu0 %v23970_v30 }
 0xdbd   : > { %16321 = vmatpush1.bf16.msra.mxu0 %v23968_v22  ;;  %v24067_v22 = vld [vmem:[%s31188_s13 + $0x34] ss:$20 sps:$4 sm:$0xff]  }
 0xdbe   : > { %16322 = vmatprep.subr.bf16.mxu0 %v23973_v39  ;;  %v24065_v39 = vld [vmem:[%s31188_s13 + $0x30] ss:$20 sps:$4 sm:$0xff]  }
 0xdc1   : > { %16323 = vmatpush1.bf16.msra.mxu0 %v23971_v55  ;;  %v24070_v55 = vld [vmem:[%s31188_s13 + $0x5c] ss:$20 sps:$4 sm:$0xff]  }
 0xdc2   : > { %16324 = vmatprep.subr.bf16.mxu0 %v23976_v28  ;;  %v24068_v28 = vld [vmem:[%s31188_s13 + $0x58] ss:$20 sps:$4 sm:$0xff]  }
 0xdc5   : > { %16325 = vmatpush1.bf16.msra.mxu0 %v23974_v6  ;;  %v24073_v6 = vld [vmem:[%s31188_s13 + $0x84] ss:$20 sps:$4 sm:$0xff]  }
 0xdc6   : > { %16326 = vmatprep.subr.bf16.mxu0 %v23979_v17  ;;  %v24071_v17 = vld [vmem:[%s31188_s13 + $0x80] ss:$20 sps:$4 sm:$0xff]  }
 0xdc9   : > { %16327 = vmatpush1.bf16.msra.mxu0 %v23977_v46  ;;  %v24076_v46 = vld [vmem:[%s31188_s13 + $0xac] ss:$20 sps:$4 sm:$0xff]  }
 0xdca   : > { %16328 = vmatprep.subr.bf16.mxu0 %v23982_v1  ;;  %v24074_v1 = vld [vmem:[%s31188_s13 + $0xa8] ss:$20 sps:$4 sm:$0xff]  }
 0xdcd   : > { %16329 = vmatpush1.bf16.msra.mxu0 %v23980_v23  ;;  %v24079_v23 = vld [vmem:[%s31188_s13 + $0xd4] ss:$20 sps:$4 sm:$0xff]  }
 0xdce   : > { %16330 = vmatprep.subr.bf16.mxu0 %v23985_v61  ;;  %v24077_v61 = vld [vmem:[%s31188_s13 + $0xd0] ss:$20 sps:$4 sm:$0xff]  }
 0xdd1   : > { %16331 = vmatpush1.bf16.msra.mxu0 %v23983_v21  ;;  %v24082_v21 = vld [vmem:[%s31188_s13 + $0xfc] ss:$20 sps:$4 sm:$0xff]  }
 0xdd2   : > { %16332 = vmatprep.subr.bf16.mxu0 %v23988_v12  ;;  %v24080_v12 = vld [vmem:[%s31188_s13 + $0xf8] ss:$20 sps:$4 sm:$0xff]  }
 0xdd5   : > { %16333 = vmatpush1.bf16.msra.mxu0 %v23986_v50  ;;  %v24085_v50 = vld [vmem:[%s31188_s13 + $0x124] ss:$20 sps:$4 sm:$0xff]  }
 0xdd6   : > { %16334 = vmatprep.subr.bf16.mxu0 %v23991_v24  ;;  %v24083_v24 = vld [vmem:[%s31188_s13 + $0x120] ss:$20 sps:$4 sm:$0xff]  }
 0xdd9   : > { %16335 = vmatpush1.bf16.msra.mxu0 %v23989_v15  ;;  %v24088_v15 = vld [vmem:[%s31188_s13 + $0x14c] ss:$20 sps:$4 sm:$0xff]  }
 0xdda   : > { %16336 = vmatprep.subr.bf16.mxu0 %v23994_v5  ;;  %v24091_v5 = vld [vmem:[%s31188_s13 + $0x174] ss:$20 sps:$4 sm:$0xff]  }
 0xddd   : > { %16337 = vmatpush1.bf16.msra.mxu0 %v23992_v25  ;;  %v24089_v25 = vld [vmem:[%s31188_s13 + $0x170] ss:$20 sps:$4 sm:$0xff]  }
 0xdde   : > { %16338 = vmatprep.subr.bf16.mxu0 %v23997_v59  ;;  %v24092_v59 = vld [vmem:[%s31188_s13 + $0x198] ss:$20 sps:$4 sm:$0xff]  }
 0xde1   : > { %16339 = vmatpush1.bf16.msra.mxu0 %v23995_v48  ;;  %v24097_v48 = vld [vmem:[%s31188_s13 + $0x1c4] ss:$20 sps:$4 sm:$0xff]  }
 0xde2   : > { %20923 = vmatprep.subr.bf16.mxu0 %v24025_v32  ;;  %v24100_v32 = vld [vmem:[%s31188_s13 + $0x1ec] ss:$20 sps:$4 sm:$0xff]  }
 0xde4   : > { %16341 = vmatmul.mubr.bf16.vlgmr.msra.gmra.mrb[116].mxu0 %v15869_v58  ;;  %v24103_v58 = vld [vmem:[%s31188_s13 + $0x214] ss:$20 sps:$4 sm:$0xff]  }
 0xde5   : > { %20924 = vmatpush3.bf16.msra.mxu0 %v24026_v63  ;;  %v24098_v63 = vld [vmem:[%s31188_s13 + $0x1e8] ss:$20 sps:$4 sm:$0xff]  }
 0xde6   : > { %20925 = vmatprep.subr.bf16.mxu0 %v24030_v16  ;;  %v24101_v16 = vld [vmem:[%s31188_s13 + $0x210] ss:$20 sps:$4 sm:$0xff]  }
 0xde9   : > { %20926 = vmatpush3.bf16.msra.mxu0 %v24031_v18  ;;  %v24106_v18 = vld [vmem:[%s31188_s13 + $0x23c] ss:$20 sps:$4 sm:$0xff]  }
 0xdea   : > { %20927 = vmatprep.subr.bf16.mxu0 %v24035_v51  ;;  %v24104_v51 = vld [vmem:[%s31188_s13 + $0x238] ss:$20 sps:$4 sm:$0xff]  }
 0xded   : > { %20928 = vmatpush3.bf16.msra.mxu0 %v24036_v26  ;;  %v24109_v26 = vld [vmem:[%s31188_s13 + $0x264] ss:$20 sps:$4 sm:$0xff]  }
 0xdee   : > { %20929 = vmatprep.subr.bf16.mxu0 %v24040_v57  ;;  %v24107_v57 = vld [vmem:[%s31188_s13 + $0x260] ss:$20 sps:$4 sm:$0xff]  }
 0xdf1   : > { %20930 = vmatpush3.bf16.msra.mxu0 %v24041_v9  ;;  %v16449_v9 = vld [vmem:[%s31189_s14] sm:$0x1f] }
 0xdf2   : > { %20931 = vmatprep.subr.bf16.mxu0 %v24045_v10  ;;  %v16870_v10 = vrot.slane %v16449_v9, %v24581_v34  ;;  %v16878_v34 = vrot.slane %v16449_v9, %v24587_v36 }
 0xdf5   : > { %20932 = vmatpush3.bf16.msra.mxu0 %v24046_v38  ;;  %v16874_v38 = vrot.slane %v16449_v9, %v24584_v35 }
 0xdf6   : > { %20933 = vmatprep.subr.bf16.mxu0 %v24050_v43 }
 0xdf9   : > { %20934 = vmatpush3.bf16.msra.mxu0 %v24051_v4 }
 0xdfa   : > { %20935 = vmatprep.subr.bf16.mxu0 %v24055_v44 }
 0xdfd   : > { %20936 = vmatpush3.bf16.msra.mxu0 %v24056_v49 }
 0xdfe   : > { %20937 = vmatprep.subr.bf16.mxu0 %v24060_v19 }
 0xe01   : > { %20938 = vmatpush3.bf16.msra.mxu0 %v24061_v62 }
 0xeb7   : > { %v16342_v47 = vpop.f32.mrb[116].mxu0 }
 0xeb8   : > { %v21021_v7 = vadd.f32 %v16342_v47, %v16260_v8  ;;  %v16344_v33 = vpop.f32.mrb[117].mxu0  ;;  %v24127_v8 = vmov 1966171168   ;;  %v16885_v47 = vsub.s32 4, %v24575_v31 }
 0xeb9   : > { %v21022_v0 = vadd.f32 %v16344_v33, %v16264_v40  ;;  %v16346_v41 = vpop.f32.mrb[118].mxu0  ;;  %v17022_v40 = vunpack.c.l.s4 %v24127_v8  ;;  %v16882_v33 = vrot.slane %v16449_v9, %v24590_v37 }
 0xeba   : > { %v16349_v3 = vmax.f32 %v21021_v7, 0.0  ;;  %v16347_v2 = vpop.f32.mrb[119].mxu0  ;;  %v16886_v7 = vrot.slane %v16449_v9, %v16885_v47 }
 0xebb   : > { %v16350_v60 = vmax.f32 %v21022_v0, 0.0  ;;  %v17023_v35 = vunpack.c.0.s8 %v17022_v40 }
 0xebc   : > { %v31063_v30 = vpack.c.bf16 %v16349_v3, %v16349_v3 }
 0xebd   : > { %v16352_v54 = vpack.c.bf16 %v16350_v60, %v16350_v60  ;;  %v17026_v2 = vsub.s32 %v17023_v35, %v24575_v31 }
 0xebf   : > { %16924 = vmatprep.mubr.bf16.mxu1 %v16352_v54  ;;  %17006 = vmatprep.mubr.bf16.mxu0 %v16352_v54 }
 0xec0   : > { %16925 = vmatmul.mubr.bf16.vlgmr.msra.gmra.mrb[120].mxu1 %v31063_v30  ;;  %17007 = vmatmul.mubr.bf16.vlgmr.msra.gmra.mrb[120].mxu0 %v31063_v30 }
 0xec1   : > { %16934 = vmatpush1.bf16.msra.mxu1 %v24062_v53  ;;  %16965 = vmatprep.mubr.bf16.mxu1 %v16352_v54 }
 0xec2   : > { %16935 = vmatprep.subr.bf16.mxu1 %v24067_v22 }
 0xec5   : > { %16936 = vmatpush1.bf16.msra.mxu1 %v24065_v39 }
 0xec6   : > { %16937 = vmatprep.subr.bf16.mxu1 %v24070_v55 }
 0xec9   : > { %16938 = vmatpush1.bf16.msra.mxu1 %v24068_v28 }
 0xeca   : > { %16939 = vmatprep.subr.bf16.mxu1 %v24073_v6 }
 0xecd   : > { %16940 = vmatpush1.bf16.msra.mxu1 %v24071_v17 }
 0xece   : > { %16941 = vmatprep.subr.bf16.mxu1 %v24076_v46 }
 0xed1   : > { %16942 = vmatpush1.bf16.msra.mxu1 %v24074_v1 }
 0xed2   : > { %16943 = vmatprep.subr.bf16.mxu1 %v24079_v23 }
 0xed5   : > { %16944 = vmatpush1.bf16.msra.mxu1 %v24077_v61 }
 0xed6   : > { %16945 = vmatprep.subr.bf16.mxu1 %v24082_v21 }
 0xed9   : > { %16946 = vmatpush1.bf16.msra.mxu1 %v24080_v12 }
 0xeda   : > { %16947 = vmatprep.subr.bf16.mxu1 %v24085_v50 }
 0xedd   : > { %16948 = vmatpush1.bf16.msra.mxu1 %v24083_v24 }
 0xede   : > { %16949 = vmatprep.subr.bf16.mxu1 %v24088_v15 }
 0xee1   : > { %16950 = vmatpush1.bf16.msra.mxu1 %v24086_v20 }
 0xee2   : > { %16951 = vmatprep.subr.bf16.mxu1 %v24091_v5 }
 0xee5   : > { %16952 = vmatpush1.bf16.msra.mxu1 %v24089_v25 }
 0xee6   : > { %16953 = vmatprep.subr.bf16.mxu1 %v24094_v29 }
 0xee9   : > { %16954 = vmatpush1.bf16.msra.mxu1 %v24092_v59 }
 0xeea   : > { %16955 = vmatprep.subr.bf16.mxu1 %v24097_v48 }
 0xeed   : > { %16956 = vmatpush1.bf16.msra.mxu1 %v24095_v56 }
 0xeee   : > { %16957 = vmatprep.subr.bf16.mxu1 %v24100_v32 }
 0xef1   : > { %16958 = vmatpush1.bf16.msra.mxu1 %v24098_v63 }
 0xef2   : > { %16959 = vmatprep.subr.bf16.mxu1 %v24103_v58 }
 0xef5   : > { %16960 = vmatpush1.bf16.msra.mxu1 %v24101_v16 }
 0xef6   : > { %16961 = vmatprep.subr.bf16.mxu1 %v24106_v18 }
 0xef9   : > { %16962 = vmatpush1.bf16.msra.mxu1 %v24104_v51 }
 0xefa   : > { %16963 = vmatprep.subr.bf16.mxu1 %v24109_v26 }
 0xefd   : > { %16964 = vmatpush1.bf16.msra.mxu1 %v24107_v57 }
 0xf00   : > { %16966 = vmatmul.mubr.bf16.vlgmr.msra.gmra.mrb[124].mxu1 %v31063_v30 }
 0xf93   : > { %v16926_v43 = vpop.f32.mrb[120].mxu1  ;;  %v20939_v4 = vpop.f32.mrb[120].mxu0 }
 0xf94   : > { %v16927_v13 = vadd.f32 %v16926_v43, %v16870_v10  ;;  %v16928_v42 = vpop.f32.mrb[121].mxu1  ;;  %v20940_v44 = vpop.f32.mrb[121].mxu0 }
 0xf95   : > { %v16929_v49 = vadd.f32 %v16928_v42, %v16874_v38  ;;  %v20941_v11 = vadd.f32 %v20940_v44, %v20939_v4  ;;  %v16930_v45 = vpop.f32.mrb[122].mxu1  ;;  %v20942_v19 = vpop.f32.mrb[122].mxu0 }
 0xf96   : > { %v16931_v62 = vpop.f32.mrb[123].mxu1  ;;  %v20943_v52 = vpop.f32.mrb[123].mxu0 }
 0xf97   : > { %v17019_v14 = vcombine.low %v16927_v13, %v16929_v49  ;;  %v17009_v60 = vadd.f32 %v20941_v11, %v16886_v7 }
 0xf99   : > { %v17027_v39 = vrot.slane %v17019_v14, %v17026_v2  ;;  %v17041_v55 = vrot.slane %v17009_v60, %v17026_v2 }
 0xf9b   : > { %v17056_v6 = vrot.slane %v17041_v55, %v17026_v2 }
 0xfd3   : > { %v16967_v0 = vpop.f32.mrb[124].mxu1 }
 0xfd4   : > { %v16968_v41 = vadd.f32 %v16967_v0, %v16878_v34  ;;  %v16969_v3 = vpop.f32.mrb[125].mxu1 }
 0xfd5   : > { %v16970_v54 = vadd.f32 %v16969_v3, %v16882_v33  ;;  %v16971_v53 = vpop.f32.mrb[126].mxu1 }
 0xfd6   : > { %v16972_v30 = vpop.f32.mrb[127].mxu1 }
 0xfd7   : > { %v17020_v22 = vcombine.low %v16968_v41, %v16970_v54 }
 0xfd9   : > { %v17034_v28 = vrot.slane %v17020_v22, %v17026_v2 }
 0xfdb   : > { %v17042_v36 = vcombine.low %v17027_v39, %v17034_v28 }
 0xfdd   : > { %v17049_v17 = vrot.slane %v17042_v36, %v17026_v2 }
 0xfdf   : > { %v17057_v37 = vcombine.low %v17049_v17, %v17056_v6 }
 0xfe1   : > { %17063 = vst.msk [vmem:[%s492_s28] sm:$0x1f] %vm17061_vm0, %v17057_v37 }
 0xfe2 PF: > { %s25_s18 = sadd.s32 1, %s24118_s18  }
 0xfe3   : > { %p22_p4 = scmp.ge.s32.totalorder %s25_s18, 4  }
 0xfe5   :  { %24 = sbr.rel (!%p22_p4) target bundleno = 1 (0x1), region = 142 }

</bundles_post_ra>
